<compile_context>
chip_gen: v5e
topology: v5e:2x2
jax: 0.10.0
libtpu: 0.0.40
codegen_flags: <defaults>
</compile_context>

<pallas_src>
import functools

import jax
import jax.numpy as jnp
from jax.experimental import pallas as pl
from jax.experimental.pallas import tpu as pltpu


def _sigmoid(x):
    # exp issues to the EUP; the f32 divide's refinement rides the idle VPU slots.
    return 1.0 / (1.0 + jnp.exp(-x))


# ----------------------------------------------------------------------------
# Fused per-layer kernel: chunk input projection + bidirectional LSTM recurrence.
#   grid = (direction [parallel], time-chunk [arbitrary]); tc timesteps / chunk.
#   x is flat (T*B, Fin); rows [t*B, (t+1)*B) are timestep t.
#   Per chunk: gx = x_chunk @ W_ih + b  (one MXU GEMM, kept in VMEM scratch),
#   then an unrolled recurrence; running (h, c) live in the resident hn/cn
#   output blocks. Each direction writes its H-lane half of the (T*B, 2H) slab.
# ----------------------------------------------------------------------------
def _bilstm_layer_kernel(lens_ref, x_ref, wih_ref, b_ref, whh_ref,
                         h0_ref, c0_ref, y_ref, hn_ref, cn_ref, gx_ref, *, tc):
    d = pl.program_id(0)                 # 0 = forward, 1 = backward
    ci = pl.program_id(1)                # chunk index (sequential)
    nc = pl.num_programs(1)
    B = hn_ref.shape[1]
    H = hn_ref.shape[2]

    @pl.when(ci == 0)
    def _():
        hn_ref[...] = h0_ref[...]
        cn_ref[...] = c0_ref[...]

    wih = wih_ref[0]                     # (Fin, 4H) bf16, resident per direction
    whh = whh_ref[0]                     # (H, 4H)  bf16, resident per direction
    lens = lens_ref[...]                 # (B, 1)   int32, resident

    # whole-chunk input projection: one GEMM, result stays in VMEM scratch
    gx_ref[...] = (jnp.dot(x_ref[...].astype(wih.dtype), wih,
                           preferred_element_type=jnp.float32) + b_ref[0])

    # real-time index of the first timestep of this chunk (matches the index_map)
    tb = ci + d * (nc - 1 - 2 * ci)
    t0 = tb * tc

    def step(i, carry):
        h, c = carry
        li = i + d * (tc - 1 - 2 * i)    # forward: 0..tc-1 ; backward: tc-1..0
        t = t0 + li                      # real timestep
        row = pl.multiple_of(li * B, B)  # sublane-aligned row offset
        gates = gx_ref[pl.ds(row, B), :] + jnp.dot(
            h.astype(whh.dtype), whh, preferred_element_type=jnp.float32)
        i_g = _sigmoid(gates[:, 0 * H:1 * H])          # PyTorch gate order i,f,g,o
        f_g = _sigmoid(gates[:, 1 * H:2 * H])
        g_g = jnp.tanh(gates[:, 2 * H:3 * H])
        o_g = _sigmoid(gates[:, 3 * H:4 * H])
        c_new = f_g * c + i_g * g_g
        h_new = o_g * jnp.tanh(c_new)
        valid = t < lens                               # (B, 1) bool
        # packed-sequence semantics: padded steps keep state, emit zeros
        y_ref[pl.ds(row, B), :] = jnp.where(valid, h_new, 0.0)
        return jnp.where(valid, h_new, h), jnp.where(valid, c_new, c)

    h, c = jax.lax.fori_loop(0, tc, step, (hn_ref[0], cn_ref[0]), unroll=True)
    hn_ref[0] = h
    cn_ref[0] = c


def _run_bilstm_layer(x_flat, lens2d, wih, b, whh, h0, c0, *, tc):
    TB, Fin = x_flat.shape
    H = whh.shape[1]
    B = h0.shape[-2]
    T = TB // B
    nc = T // tc

    # time-chunk mapping: forward walks chunks 0..nc-1, backward nc-1..0;
    # the output's last block index selects the direction's 128-lane half.
    tx_map = lambda d, c: (c + d * (nc - 1 - 2 * c), 0)
    ty_map = lambda d, c: (c + d * (nc - 1 - 2 * c), d)
    d_map = lambda d, c: (d, 0, 0)
    fixed = lambda d, c: (0, 0)

    kernel = functools.partial(_bilstm_layer_kernel, tc=tc)
    return pl.pallas_call(
        kernel,
        grid=(2, nc),
        in_specs=[
            pl.BlockSpec((B, 1), fixed),                 # lens (resident)
            pl.BlockSpec((tc * B, Fin), tx_map),         # layer input rows
            pl.BlockSpec((1, Fin, 4 * H), d_map),        # W_ih^T  (per direction)
            pl.BlockSpec((1, 1, 4 * H), d_map),          # b_ih + b_hh
            pl.BlockSpec((1, H, 4 * H), d_map),          # W_hh^T  (per direction)
            pl.BlockSpec((1, B, H), d_map),              # h0
            pl.BlockSpec((1, B, H), d_map),              # c0
        ],
        out_specs=[
            pl.BlockSpec((tc * B, H), ty_map),           # y slab (lane-half / dir)
            pl.BlockSpec((1, B, H), d_map),              # final h (resident)
            pl.BlockSpec((1, B, H), d_map),              # final c (resident)
        ],
        out_shape=[
            jax.ShapeDtypeStruct((TB, 2 * H), jnp.float32),
            jax.ShapeDtypeStruct((2, B, H), jnp.float32),
            jax.ShapeDtypeStruct((2, B, H), jnp.float32),
        ],
        scratch_shapes=[pltpu.VMEM((tc * B, 4 * H), jnp.float32)],
        compiler_params=pltpu.CompilerParams(
            dimension_semantics=("parallel", "arbitrary")),
    )(lens2d, x_flat, wih, b, whh, h0, c0)


# ----------------------------------------------------------------------------
# Highway (gate_layer + gating + convert_layer), row-tiled:
#   g    = src @ Wg + bg
#   t    = sigmoid(g)
#   flow = lstm*t + g*(1-t) = g + t*(lstm - g)
#   out  = flow @ Wc + bc
# ----------------------------------------------------------------------------
def _highway_kernel(src_ref, lstm_ref, wg_ref, bg_ref, wc_ref, bc_ref, out_ref):
    src = src_ref[...].astype(wg_ref.dtype)
    g = (jnp.dot(src, wg_ref[...], preferred_element_type=jnp.float32)
         + bg_ref[...])
    t = _sigmoid(g)
    flow = g + t * (lstm_ref[...] - g)
    out_ref[...] = (jnp.dot(flow.astype(wc_ref.dtype), wc_ref[...],
                            preferred_element_type=jnp.float32)
                    + bc_ref[...])


def _highway(src_flat, lstm_flat, wg, bg, wc, bc, *, block_rows=256):
    N, F = src_flat.shape
    H2 = lstm_flat.shape[1]
    tn = min(block_rows, N)
    return pl.pallas_call(
        _highway_kernel,
        grid=(pl.cdiv(N, tn),),
        in_specs=[
            pl.BlockSpec((tn, F), lambda i: (i, 0)),
            pl.BlockSpec((tn, H2), lambda i: (i, 0)),
            pl.BlockSpec((F, H2), lambda i: (0, 0)),
            pl.BlockSpec((1, H2), lambda i: (0, 0)),
            pl.BlockSpec((H2, F), lambda i: (0, 0)),
            pl.BlockSpec((1, F), lambda i: (0, 0)),
        ],
        out_specs=pl.BlockSpec((tn, F), lambda i: (i, 0)),
        out_shape=jax.ShapeDtypeStruct((N, F), jnp.float32),
        compiler_params=pltpu.CompilerParams(dimension_semantics=("parallel",)),
    )(src_flat, lstm_flat, wg, bg, wc, bc)


# ----------------------------------------------------------------------------
# Full HBiLSTM_layer forward (time-major x: (T, B, F), like nn.LSTM default).
# ----------------------------------------------------------------------------
def hbilstm_layer_forward(x, hidden, lens, params, *, tc=8):
    T, B, F = x.shape
    h0, c0 = hidden
    H = h0.shape[-1]
    num_layers = h0.shape[0] // 2
    assert H % 128 == 0 and F % 128 == 0, "lane-aligned layout required"
    assert B % 8 == 0, "batch must be sublane-aligned"
    assert T % tc == 0, "seq_len must be a multiple of the time-chunk size"

    lens2d = lens.astype(jnp.int32).reshape(B, 1)
    src_flat = x.reshape(T * B, F)

    layer_in = src_flat                                   # (T*B, Fin), flat rows
    h_parts, c_parts = [], []
    for l in range(num_layers):
        y, hn, cn = _run_bilstm_layer(
            layer_in, lens2d, params["w_ih"][l], params["b"][l], params["w_hh"][l],
            h0[2 * l:2 * l + 2], c0[2 * l:2 * l + 2], tc=tc)
        h_parts.append(hn)
        c_parts.append(cn)
        layer_in = y                                      # (T*B, 2H), fwd|bwd packed
        # TODO(synk): inter-layer dropout (lstm_dropout) not applied (dropout=0 / eval).

    out_flat = _highway(src_flat, layer_in,
                        params["wg"], params["bg"], params["wc"], params["bc"])
    information_convert = out_flat.reshape(T, B, F)
    h_n = jnp.concatenate(h_parts, axis=0)                # (2*num_layers, B, H)
    c_n = jnp.concatenate(c_parts, axis=0)
    return information_convert, (h_n, c_n)


# ----------------------------------------------------------------------------
# Pure-JAX reference (lax.scan) with identical numerics, for validation.
# ----------------------------------------------------------------------------
def hbilstm_reference(x, hidden, lens, params):
    T, B, F = x.shape
    h0, c0 = hidden
    H = h0.shape[-1]
    L = h0.shape[0] // 2
    lens = lens.astype(jnp.int32)
    valid = jnp.arange(T)[:, None, None] < lens[None, :, None]   # (T, B, 1)

    def make_cell(whh):
        def cell(carry, inp):
            h, c = carry
            gx, v = inp
            gates = gx + jnp.dot(h.astype(whh.dtype), whh,
                                 preferred_element_type=jnp.float32)
            i_g = _sigmoid(gates[:, 0 * H:1 * H])
            f_g = _sigmoid(gates[:, 1 * H:2 * H])
            g_g = jnp.tanh(gates[:, 2 * H:3 * H])
            o_g = _sigmoid(gates[:, 3 * H:4 * H])
            c_new = f_g * c + i_g * g_g
            h_new = o_g * jnp.tanh(c_new)
            y = jnp.where(v, h_new, 0.0)
            return (jnp.where(v, h_new, h), jnp.where(v, c_new, c)), y
        return cell

    layer_in = x
    hs, cs = [], []
    for l in range(L):
        wih, b, whh = params["w_ih"][l], params["b"][l], params["w_hh"][l]
        Fin = layer_in.shape[-1]
        ys = []
        for d in range(2):
            gx = (jnp.dot(layer_in.reshape(T * B, Fin).astype(wih.dtype), wih[d],
                          preferred_element_type=jnp.float32)
                  .reshape(T, B, 4 * H) + b[d])
            gx_d = gx[::-1] if d else gx
            v_d = valid[::-1] if d else valid
            (hf, cf), y_d = jax.lax.scan(make_cell(whh[d]),
                                         (h0[2 * l + d], c0[2 * l + d]),
                                         (gx_d, v_d))
            ys.append(y_d[::-1] if d else y_d)
            hs.append(hf[None])
            cs.append(cf[None])
        layer_in = jnp.concatenate(ys, axis=-1)

    src = x.reshape(T * B, F)
    g = (jnp.dot(src.astype(params["wg"].dtype), params["wg"],
                 preferred_element_type=jnp.float32) + params["bg"])
    t = _sigmoid(g)
    flow = g + t * (layer_in.reshape(T * B, 2 * H) - g)
    out = (jnp.dot(flow.astype(params["wc"].dtype), params["wc"],
                   preferred_element_type=jnp.float32) + params["bc"])
    return out.reshape(T, B, F), (jnp.concatenate(hs, 0), jnp.concatenate(cs, 0))


if __name__ == "__main__":
    # small but lane/sublane-aligned shapes:
    # seq=16, batch=8, in_features=128, hidden=128, 2 BiLSTM layers, chunk=8.
    T, B, F, H, L, TC = 16, 8, 128, 128, 2, 8

    key = jax.random.PRNGKey(0)
    keys = jax.random.split(key, 24)
    kit = iter(list(keys[3:]))
    uni = lambda shape: jax.random.uniform(next(kit), shape, jnp.float32, -0.1, 0.1)

    x = jax.random.normal(keys[0], (T, B, F), jnp.float32)
    lens = jnp.array([T, T, 12, 9, T, 5, 7, 13], jnp.int32)   # max(lens) == T
    h0 = 0.1 * jax.random.normal(keys[1], (2 * L, B, H), jnp.float32)
    c0 = 0.1 * jax.random.normal(keys[2], (2 * L, B, H), jnp.float32)

    # deterministic synthetic parameters (shapes follow nn.LSTM / nn.Linear).
    # Per-direction LSTM weights are stored pre-transposed and stacked along a
    # leading direction axis: [i,f,g,o] gate order. bf16 = MXU operands only.
    params = {"w_ih": [], "w_hh": [], "b": []}
    for l in range(L):
        fin = F if l == 0 else 2 * H
        params["w_ih"].append(uni((2, fin, 4 * H)).astype(jnp.bfloat16))  # W_ih^T
        params["w_hh"].append(uni((2, H, 4 * H)).astype(jnp.bfloat16))    # W_hh^T
        params["b"].append(uni((2, 1, 4 * H)))                            # b_ih+b_hh

    # gate_layer: Linear(F -> 2H), bias=-1 ; convert_layer: Linear(2H -> F), bias=-1
    params["wg"] = uni((F, 2 * H)).astype(jnp.bfloat16)
    params["bg"] = jnp.full((1, 2 * H), -1.0, jnp.float32)
    params["wc"] = uni((2 * H, F)).astype(jnp.bfloat16)
    params["bc"] = jnp.full((1, F), -1.0, jnp.float32)
    # NOTE: fc1 from the torch __init__ is unused in forward, so it is omitted.

    fwd = jax.jit(functools.partial(hbilstm_layer_forward, tc=TC))
    out, (hn, cn) = fwd(x, (h0, c0), lens, params)
    jax.block_until_ready((out, hn, cn))

    ref_out, (ref_hn, ref_cn) = jax.jit(hbilstm_reference)(x, (h0, c0), lens, params)
    jax.block_until_ready((ref_out, ref_hn, ref_cn))

    assert out.shape == (T, B, F)
    assert hn.shape == (2 * L, B, H) and cn.shape == (2 * L, B, H)
    assert bool(jnp.max(jnp.abs(out - ref_out)) < 1e-2), "output mismatch vs reference"
    assert bool(jnp.max(jnp.abs(hn - ref_hn)) < 1e-2), "h_n mismatch vs reference"
    assert bool(jnp.max(jnp.abs(cn - ref_cn)) < 1e-2), "c_n mismatch vs reference"
    print("KERNEL_OK")
</pallas_src>

<mosaic_0001>
module attributes {stable_mosaic.version = 11 : i64} {
  func.func @_bilstm_layer_kernel(%arg0: i32, %arg1: i32, %arg2: memref<8x1xi32, #tpu.memory_space<vmem>>, %arg3: memref<64x128xf32, #tpu.memory_space<vmem>>, %arg4: memref<1x128x512xbf16, #tpu.memory_space<vmem>>, %arg5: memref<1x1x512xf32, #tpu.memory_space<vmem>>, %arg6: memref<1x128x512xbf16, #tpu.memory_space<vmem>>, %arg7: memref<1x8x128xf32, #tpu.memory_space<vmem>>, %arg8: memref<1x8x128xf32, #tpu.memory_space<vmem>>, %arg9: memref<64x128xf32, #tpu.memory_space<vmem>>, %arg10: memref<1x8x128xf32, #tpu.memory_space<vmem>>, %arg11: memref<1x8x128xf32, #tpu.memory_space<vmem>>, %arg12: memref<64x512xf32, #tpu.memory_space<vmem>>) attributes {dimension_semantics = [#tpu.dimension_semantics<parallel>, #tpu.dimension_semantics<arbitrary>], iteration_bounds = array<i64: 2, 2>, scalar_prefetch = 0 : i64, scratch_operands = 1 : i64, tpu.core_type = #tpu.core_type<tc>, window_params = [{pipeline_mode = #tpu.pipeline_mode<synchronous>, transform_indices = @transform_0, window_bounds = array<i64: 8, 1>}, {transform_indices = @transform_1, window_bounds = array<i64: 64, 128>}, {transform_indices = @transform_2, window_bounds = array<i64: 1, 128, 512>}, {transform_indices = @transform_3, window_bounds = array<i64: 1, 1, 512>}, {transform_indices = @transform_4, window_bounds = array<i64: 1, 128, 512>}, {transform_indices = @transform_5, window_bounds = array<i64: 1, 8, 128>}, {transform_indices = @transform_6, window_bounds = array<i64: 1, 8, 128>}, {transform_indices = @transform_7, window_bounds = array<i64: 64, 128>}, {transform_indices = @transform_8, window_bounds = array<i64: 1, 8, 128>}, {transform_indices = @transform_9, window_bounds = array<i64: 1, 8, 128>}]} {
    %c0_i32 = arith.constant 0 : i32
    %0 = arith.cmpi eq, %arg1, %c0_i32 : i32
    %1 = arith.extui %0 : i1 to i32
    %c0_i32_0 = arith.constant 0 : i32
    %2 = arith.cmpi ne, %1, %c0_i32_0 : i32
    scf.if %2 {
      %c0_159 = arith.constant 0 : index
      %c0_160 = arith.constant 0 : index
      %c0_161 = arith.constant 0 : index
      %487 = vector.load %arg7[%c0_159, %c0_160, %c0_161] : memref<1x8x128xf32, #tpu.memory_space<vmem>>, vector<1x8x128xf32>
      %c0_162 = arith.constant 0 : index
      %c0_163 = arith.constant 0 : index
      %c0_164 = arith.constant 0 : index
      %488 = vector.load %arg10[%c0_162, %c0_163, %c0_164] : memref<1x8x128xf32, #tpu.memory_space<vmem>>, vector<1x8x128xf32>
      tpu.vector_store %arg10[%c0_162, %c0_163, %c0_164], %487 {strides = array<i32>} : memref<1x8x128xf32, #tpu.memory_space<vmem>>, vector<1x8x128xf32>,
      %c0_165 = arith.constant 0 : index
      %c0_166 = arith.constant 0 : index
      %c0_167 = arith.constant 0 : index
      %489 = vector.load %arg8[%c0_165, %c0_166, %c0_167] : memref<1x8x128xf32, #tpu.memory_space<vmem>>, vector<1x8x128xf32>
      %c0_168 = arith.constant 0 : index
      %c0_169 = arith.constant 0 : index
      %c0_170 = arith.constant 0 : index
      %490 = vector.load %arg11[%c0_168, %c0_169, %c0_170] : memref<1x8x128xf32, #tpu.memory_space<vmem>>, vector<1x8x128xf32>
      tpu.vector_store %arg11[%c0_168, %c0_169, %c0_170], %489 {strides = array<i32>} : memref<1x8x128xf32, #tpu.memory_space<vmem>>, vector<1x8x128xf32>,
    } else {
    }
    %c0 = arith.constant 0 : index
    %c0_1 = arith.constant 0 : index
    %c0_2 = arith.constant 0 : index
    %3 = vector.load %arg4[%c0, %c0_1, %c0_2] : memref<1x128x512xbf16, #tpu.memory_space<vmem>>, vector<1x128x512xbf16>
    %4 = vector.shape_cast %3 : vector<1x128x512xbf16> to vector<128x512xbf16>
    %c0_3 = arith.constant 0 : index
    %c0_4 = arith.constant 0 : index
    %c0_5 = arith.constant 0 : index
    %5 = vector.load %arg6[%c0_3, %c0_4, %c0_5] : memref<1x128x512xbf16, #tpu.memory_space<vmem>>, vector<1x128x512xbf16>
    %6 = vector.shape_cast %5 : vector<1x128x512xbf16> to vector<128x512xbf16>
    %c0_6 = arith.constant 0 : index
    %c0_7 = arith.constant 0 : index
    %7 = vector.load %arg2[%c0_6, %c0_7] : memref<8x1xi32, #tpu.memory_space<vmem>>, vector<8x1xi32>
    %c0_8 = arith.constant 0 : index
    %c0_9 = arith.constant 0 : index
    %8 = vector.load %arg3[%c0_8, %c0_9] : memref<64x128xf32, #tpu.memory_space<vmem>>, vector<64x128xf32>
    %9 = arith.truncf %8 : vector<64x128xf32> to vector<64x128xbf16>
    %cst = arith.constant dense<0.000000e+00> : vector<64x512xf32>
    %10 = tpu.matmul %9, %4, %cst {dimension_numbers = #tpu.dot_dimension_numbers<[1], [0], [0], [1], [0, 0, 1, 1], [], []>} : vector<64x128xbf16>, vector<128x512xbf16>, vector<64x512xf32> -> vector<64x512xf32>
    %c0_10 = arith.constant 0 : index
    %c0_11 = arith.constant 0 : index
    %c0_12 = arith.constant 0 : index
    %11 = vector.load %arg5[%c0_10, %c0_11, %c0_12] : memref<1x1x512xf32, #tpu.memory_space<vmem>>, vector<1x1x512xf32>
    %12 = vector.shape_cast %11 : vector<1x1x512xf32> to vector<1x512xf32>
    %13 = vector.broadcast %12 : vector<1x512xf32> to vector<64x512xf32>
    %14 = arith.addf %10, %13 : vector<64x512xf32>
    %c0_13 = arith.constant 0 : index
    %c0_14 = arith.constant 0 : index
    %15 = vector.load %arg12[%c0_13, %c0_14] : memref<64x512xf32, #tpu.memory_space<vmem>>, vector<64x512xf32>
    tpu.vector_store %arg12[%c0_13, %c0_14], %14 {strides = array<i32>} : memref<64x512xf32, #tpu.memory_space<vmem>>, vector<64x512xf32>,
    %c2_i32 = arith.constant 2 : i32
    %16 = arith.muli %c2_i32, %arg1 : i32
    %c1_i32 = arith.constant 1 : i32
    %17 = arith.subi %c1_i32, %16 : i32
    %18 = arith.muli %arg0, %17 : i32
    %19 = arith.addi %arg1, %18 : i32
    %c8_i32 = arith.constant 8 : i32
    %20 = arith.muli %19, %c8_i32 : i32
    %c0_15 = arith.constant 0 : index
    %c0_16 = arith.constant 0 : index
    %c0_17 = arith.constant 0 : index
    %21 = vector.load %arg10[%c0_15, %c0_16, %c0_17] : memref<1x8x128xf32, #tpu.memory_space<vmem>>, vector<1x8x128xf32>
    %22 = vector.shape_cast %21 : vector<1x8x128xf32> to vector<8x128xf32>
    %c0_18 = arith.constant 0 : index
    %c0_19 = arith.constant 0 : index
    %c0_20 = arith.constant 0 : index
    %23 = vector.load %arg11[%c0_18, %c0_19, %c0_20] : memref<1x8x128xf32, #tpu.memory_space<vmem>>, vector<1x8x128xf32>
    %24 = vector.shape_cast %23 : vector<1x8x128xf32> to vector<8x128xf32>
    %c0_i32_21 = arith.constant 0 : i32
    %c2_i32_22 = arith.constant 2 : i32
    %25 = arith.muli %c2_i32_22, %c0_i32_21 : i32
    %c7_i32 = arith.constant 7 : i32
    %26 = arith.subi %c7_i32, %25 : i32
    %27 = arith.muli %arg0, %26 : i32
    %28 = arith.addi %c0_i32_21, %27 : i32
    %29 = arith.addi %20, %28 : i32
    %c8_i32_23 = arith.constant 8 : i32
    %30 = arith.muli %28, %c8_i32_23 : i32
    %31 = tpu.assume_multiple %30, 8 : i32
    %32 = arith.index_cast %31 : i32 to index
    %c0_24 = arith.constant 0 : index
    %33 = vector.load %arg12[%32, %c0_24] : memref<64x512xf32, #tpu.memory_space<vmem>>, vector<8x512xf32>
    %34 = arith.truncf %22 : vector<8x128xf32> to vector<8x128xbf16>
    %cst_25 = arith.constant dense<0.000000e+00> : vector<8x512xf32>
    %35 = tpu.matmul %34, %6, %cst_25 {dimension_numbers = #tpu.dot_dimension_numbers<[1], [0], [0], [1], [0, 0, 1, 1], [], []>} : vector<8x128xbf16>, vector<128x512xbf16>, vector<8x512xf32> -> vector<8x512xf32>
    %36 = arith.addf %33, %35 : vector<8x512xf32>
    %37 = vector.extract_strided_slice %36 {offsets = [0, 0], sizes = [8, 128], strides = [1, 1]} : vector<8x512xf32> to vector<8x128xf32>
    %cst_26 = arith.constant 0.000000e+00 : f32
    %38 = vector.broadcast %cst_26 : f32 to vector<8x128xf32>
    %39 = arith.subf %38, %37 : vector<8x128xf32>
    %40 = math.exp %39 : vector<8x128xf32>
    %cst_27 = arith.constant 1.000000e+00 : f32
    %41 = vector.broadcast %cst_27 : f32 to vector<8x128xf32>
    %42 = arith.addf %41, %40 : vector<8x128xf32>
    %cst_28 = arith.constant 1.000000e+00 : f32
    %43 = vector.broadcast %cst_28 : f32 to vector<8x128xf32>
    %44 = arith.divf %43, %42 : vector<8x128xf32>
    %45 = vector.extract_strided_slice %36 {offsets = [0, 128], sizes = [8, 128], strides = [1, 1]} : vector<8x512xf32> to vector<8x128xf32>
    %cst_29 = arith.constant 0.000000e+00 : f32
    %46 = vector.broadcast %cst_29 : f32 to vector<8x128xf32>
    %47 = arith.subf %46, %45 : vector<8x128xf32>
    %48 = math.exp %47 : vector<8x128xf32>
    %cst_30 = arith.constant 1.000000e+00 : f32
    %49 = vector.broadcast %cst_30 : f32 to vector<8x128xf32>
    %50 = arith.addf %49, %48 : vector<8x128xf32>
    %cst_31 = arith.constant 1.000000e+00 : f32
    %51 = vector.broadcast %cst_31 : f32 to vector<8x128xf32>
    %52 = arith.divf %51, %50 : vector<8x128xf32>
    %53 = vector.extract_strided_slice %36 {offsets = [0, 256], sizes = [8, 128], strides = [1, 1]} : vector<8x512xf32> to vector<8x128xf32>
    %54 = math.tanh %53 : vector<8x128xf32>
    %55 = vector.extract_strided_slice %36 {offsets = [0, 384], sizes = [8, 128], strides = [1, 1]} : vector<8x512xf32> to vector<8x128xf32>
    %cst_32 = arith.constant 0.000000e+00 : f32
    %56 = vector.broadcast %cst_32 : f32 to vector<8x128xf32>
    %57 = arith.subf %56, %55 : vector<8x128xf32>
    %58 = math.exp %57 : vector<8x128xf32>
    %cst_33 = arith.constant 1.000000e+00 : f32
    %59 = vector.broadcast %cst_33 : f32 to vector<8x128xf32>
    %60 = arith.addf %59, %58 : vector<8x128xf32>
    %cst_34 = arith.constant 1.000000e+00 : f32
    %61 = vector.broadcast %cst_34 : f32 to vector<8x128xf32>
    %62 = arith.divf %61, %60 : vector<8x128xf32>
    %63 = arith.mulf %52, %24 : vector<8x128xf32>
    %64 = arith.mulf %44, %54 : vector<8x128xf32>
    %65 = arith.addf %63, %64 : vector<8x128xf32>
    %66 = math.tanh %65 : vector<8x128xf32>
    %67 = arith.mulf %62, %66 : vector<8x128xf32>
    %68 = vector.broadcast %29 : i32 to vector<8x1xi32>
    %69 = arith.cmpi slt, %68, %7 : vector<8x1xi32>
    %cst_35 = arith.constant 0.000000e+00 : f32
    %70 = vector.shape_cast %69 : vector<8x1xi1> to vector<8x1xi1>
    %71 = vector.broadcast %70 : vector<8x1xi1> to vector<8x128xi1>
    %72 = vector.broadcast %cst_35 : f32 to vector<8x128xf32>
    %73 = arith.select %71, %67, %72 : vector<8x128xi1>, vector<8x128xf32>
    %74 = arith.index_cast %31 : i32 to index
    %c0_36 = arith.constant 0 : index
    %75 = vector.load %arg9[%74, %c0_36] : memref<64x128xf32, #tpu.memory_space<vmem>>, vector<8x128xf32>
    tpu.vector_store %arg9[%74, %c0_36], %73 {strides = array<i32>} : memref<64x128xf32, #tpu.memory_space<vmem>>, vector<8x128xf32>,
    %76 = vector.shape_cast %69 : vector<8x1xi1> to vector<8x1xi1>
    %77 = vector.broadcast %76 : vector<8x1xi1> to vector<8x128xi1>
    %78 = arith.select %77, %67, %22 : vector<8x128xi1>, vector<8x128xf32>
    %79 = vector.shape_cast %69 : vector<8x1xi1> to vector<8x1xi1>
    %80 = vector.broadcast %79 : vector<8x1xi1> to vector<8x128xi1>
    %81 = arith.select %80, %65, %24 : vector<8x128xi1>, vector<8x128xf32>
    %c1_i32_37 = arith.constant 1 : i32
    %c2_i32_38 = arith.constant 2 : i32
    %82 = arith.muli %c2_i32_38, %c1_i32_37 : i32
    %c7_i32_39 = arith.constant 7 : i32
    %83 = arith.subi %c7_i32_39, %82 : i32
    %84 = arith.muli %arg0, %83 : i32
    %85 = arith.addi %c1_i32_37, %84 : i32
    %86 = arith.addi %20, %85 : i32
    %c8_i32_40 = arith.constant 8 : i32
    %87 = arith.muli %85, %c8_i32_40 : i32
    %88 = tpu.assume_multiple %87, 8 : i32
    %89 = arith.index_cast %88 : i32 to index
    %c0_41 = arith.constant 0 : index
    %90 = vector.load %arg12[%89, %c0_41] : memref<64x512xf32, #tpu.memory_space<vmem>>, vector<8x512xf32>
    %91 = arith.truncf %78 : vector<8x128xf32> to vector<8x128xbf16>
    %cst_42 = arith.constant dense<0.000000e+00> : vector<8x512xf32>
    %92 = tpu.matmul %91, %6, %cst_42 {dimension_numbers = #tpu.dot_dimension_numbers<[1], [0], [0], [1], [0, 0, 1, 1], [], []>} : vector<8x128xbf16>, vector<128x512xbf16>, vector<8x512xf32> -> vector<8x512xf32>
    %93 = arith.addf %90, %92 : vector<8x512xf32>
    %94 = vector.extract_strided_slice %93 {offsets = [0, 0], sizes = [8, 128], strides = [1, 1]} : vector<8x512xf32> to vector<8x128xf32>
    %cst_43 = arith.constant 0.000000e+00 : f32
    %95 = vector.broadcast %cst_43 : f32 to vector<8x128xf32>
    %96 = arith.subf %95, %94 : vector<8x128xf32>
    %97 = math.exp %96 : vector<8x128xf32>
    %cst_44 = arith.constant 1.000000e+00 : f32
    %98 = vector.broadcast %cst_44 : f32 to vector<8x128xf32>
    %99 = arith.addf %98, %97 : vector<8x128xf32>
    %cst_45 = arith.constant 1.000000e+00 : f32
    %100 = vector.broadcast %cst_45 : f32 to vector<8x128xf32>
    %101 = arith.divf %100, %99 : vector<8x128xf32>
    %102 = vector.extract_strided_slice %93 {offsets = [0, 128], sizes = [8, 128], strides = [1, 1]} : vector<8x512xf32> to vector<8x128xf32>
    %cst_46 = arith.constant 0.000000e+00 : f32
    %103 = vector.broadcast %cst_46 : f32 to vector<8x128xf32>
    %104 = arith.subf %103, %102 : vector<8x128xf32>
    %105 = math.exp %104 : vector<8x128xf32>
    %cst_47 = arith.constant 1.000000e+00 : f32
    %106 = vector.broadcast %cst_47 : f32 to vector<8x128xf32>
    %107 = arith.addf %106, %105 : vector<8x128xf32>
    %cst_48 = arith.constant 1.000000e+00 : f32
    %108 = vector.broadcast %cst_48 : f32 to vector<8x128xf32>
    %109 = arith.divf %108, %107 : vector<8x128xf32>
    %110 = vector.extract_strided_slice %93 {offsets = [0, 256], sizes = [8, 128], strides = [1, 1]} : vector<8x512xf32> to vector<8x128xf32>
    %111 = math.tanh %110 : vector<8x128xf32>
    %112 = vector.extract_strided_slice %93 {offsets = [0, 384], sizes = [8, 128], strides = [1, 1]} : vector<8x512xf32> to vector<8x128xf32>
    %cst_49 = arith.constant 0.000000e+00 : f32
    %113 = vector.broadcast %cst_49 : f32 to vector<8x128xf32>
    %114 = arith.subf %113, %112 : vector<8x128xf32>
    %115 = math.exp %114 : vector<8x128xf32>
    %cst_50 = arith.constant 1.000000e+00 : f32
    %116 = vector.broadcast %cst_50 : f32 to vector<8x128xf32>
    %117 = arith.addf %116, %115 : vector<8x128xf32>
    %cst_51 = arith.constant 1.000000e+00 : f32
    %118 = vector.broadcast %cst_51 : f32 to vector<8x128xf32>
    %119 = arith.divf %118, %117 : vector<8x128xf32>
    %120 = arith.mulf %109, %81 : vector<8x128xf32>
    %121 = arith.mulf %101, %111 : vector<8x128xf32>
    %122 = arith.addf %120, %121 : vector<8x128xf32>
    %123 = math.tanh %122 : vector<8x128xf32>
    %124 = arith.mulf %119, %123 : vector<8x128xf32>
    %125 = vector.broadcast %86 : i32 to vector<8x1xi32>
    %126 = arith.cmpi slt, %125, %7 : vector<8x1xi32>
    %cst_52 = arith.constant 0.000000e+00 : f32
    %127 = vector.shape_cast %126 : vector<8x1xi1> to vector<8x1xi1>
    %128 = vector.broadcast %127 : vector<8x1xi1> to vector<8x128xi1>
    %129 = vector.broadcast %cst_52 : f32 to vector<8x128xf32>
    %130 = arith.select %128, %124, %129 : vector<8x128xi1>, vector<8x128xf32>
    %131 = arith.index_cast %88 : i32 to index
    %c0_53 = arith.constant 0 : index
    %132 = vector.load %arg9[%131, %c0_53] : memref<64x128xf32, #tpu.memory_space<vmem>>, vector<8x128xf32>
    tpu.vector_store %arg9[%131, %c0_53], %130 {strides = array<i32>} : memref<64x128xf32, #tpu.memory_space<vmem>>, vector<8x128xf32>,
    %133 = vector.shape_cast %126 : vector<8x1xi1> to vector<8x1xi1>
    %134 = vector.broadcast %133 : vector<8x1xi1> to vector<8x128xi1>
    %135 = arith.select %134, %124, %78 : vector<8x128xi1>, vector<8x128xf32>
    %136 = vector.shape_cast %126 : vector<8x1xi1> to vector<8x1xi1>
    %137 = vector.broadcast %136 : vector<8x1xi1> to vector<8x128xi1>
    %138 = arith.select %137, %122, %81 : vector<8x128xi1>, vector<8x128xf32>
    %c2_i32_54 = arith.constant 2 : i32
    %c2_i32_55 = arith.constant 2 : i32
    %139 = arith.muli %c2_i32_55, %c2_i32_54 : i32
    %c7_i32_56 = arith.constant 7 : i32
    %140 = arith.subi %c7_i32_56, %139 : i32
    %141 = arith.muli %arg0, %140 : i32
    %142 = arith.addi %c2_i32_54, %141 : i32
    %143 = arith.addi %20, %142 : i32
    %c8_i32_57 = arith.constant 8 : i32
    %144 = arith.muli %142, %c8_i32_57 : i32
    %145 = tpu.assume_multiple %144, 8 : i32
    %146 = arith.index_cast %145 : i32 to index
    %c0_58 = arith.constant 0 : index
    %147 = vector.load %arg12[%146, %c0_58] : memref<64x512xf32, #tpu.memory_space<vmem>>, vector<8x512xf32>
    %148 = arith.truncf %135 : vector<8x128xf32> to vector<8x128xbf16>
    %cst_59 = arith.constant dense<0.000000e+00> : vector<8x512xf32>
    %149 = tpu.matmul %148, %6, %cst_59 {dimension_numbers = #tpu.dot_dimension_numbers<[1], [0], [0], [1], [0, 0, 1, 1], [], []>} : vector<8x128xbf16>, vector<128x512xbf16>, vector<8x512xf32> -> vector<8x512xf32>
    %150 = arith.addf %147, %149 : vector<8x512xf32>
    %151 = vector.extract_strided_slice %150 {offsets = [0, 0], sizes = [8, 128], strides = [1, 1]} : vector<8x512xf32> to vector<8x128xf32>
    %cst_60 = arith.constant 0.000000e+00 : f32
    %152 = vector.broadcast %cst_60 : f32 to vector<8x128xf32>
    %153 = arith.subf %152, %151 : vector<8x128xf32>
    %154 = math.exp %153 : vector<8x128xf32>
    %cst_61 = arith.constant 1.000000e+00 : f32
    %155 = vector.broadcast %cst_61 : f32 to vector<8x128xf32>
    %156 = arith.addf %155, %154 : vector<8x128xf32>
    %cst_62 = arith.constant 1.000000e+00 : f32
    %157 = vector.broadcast %cst_62 : f32 to vector<8x128xf32>
    %158 = arith.divf %157, %156 : vector<8x128xf32>
    %159 = vector.extract_strided_slice %150 {offsets = [0, 128], sizes = [8, 128], strides = [1, 1]} : vector<8x512xf32> to vector<8x128xf32>
    %cst_63 = arith.constant 0.000000e+00 : f32
    %160 = vector.broadcast %cst_63 : f32 to vector<8x128xf32>
    %161 = arith.subf %160, %159 : vector<8x128xf32>
    %162 = math.exp %161 : vector<8x128xf32>
    %cst_64 = arith.constant 1.000000e+00 : f32
    %163 = vector.broadcast %cst_64 : f32 to vector<8x128xf32>
    %164 = arith.addf %163, %162 : vector<8x128xf32>
    %cst_65 = arith.constant 1.000000e+00 : f32
    %165 = vector.broadcast %cst_65 : f32 to vector<8x128xf32>
    %166 = arith.divf %165, %164 : vector<8x128xf32>
    %167 = vector.extract_strided_slice %150 {offsets = [0, 256], sizes = [8, 128], strides = [1, 1]} : vector<8x512xf32> to vector<8x128xf32>
    %168 = math.tanh %167 : vector<8x128xf32>
    %169 = vector.extract_strided_slice %150 {offsets = [0, 384], sizes = [8, 128], strides = [1, 1]} : vector<8x512xf32> to vector<8x128xf32>
    %cst_66 = arith.constant 0.000000e+00 : f32
    %170 = vector.broadcast %cst_66 : f32 to vector<8x128xf32>
    %171 = arith.subf %170, %169 : vector<8x128xf32>
    %172 = math.exp %171 : vector<8x128xf32>
    %cst_67 = arith.constant 1.000000e+00 : f32
    %173 = vector.broadcast %cst_67 : f32 to vector<8x128xf32>
    %174 = arith.addf %173, %172 : vector<8x128xf32>
    %cst_68 = arith.constant 1.000000e+00 : f32
    %175 = vector.broadcast %cst_68 : f32 to vector<8x128xf32>
    %176 = arith.divf %175, %174 : vector<8x128xf32>
    %177 = arith.mulf %166, %138 : vector<8x128xf32>
    %178 = arith.mulf %158, %168 : vector<8x128xf32>
    %179 = arith.addf %177, %178 : vector<8x128xf32>
    %180 = math.tanh %179 : vector<8x128xf32>
    %181 = arith.mulf %176, %180 : vector<8x128xf32>
    %182 = vector.broadcast %143 : i32 to vector<8x1xi32>
    %183 = arith.cmpi slt, %182, %7 : vector<8x1xi32>
    %cst_69 = arith.constant 0.000000e+00 : f32
    %184 = vector.shape_cast %183 : vector<8x1xi1> to vector<8x1xi1>
    %185 = vector.broadcast %184 : vector<8x1xi1> to vector<8x128xi1>
    %186 = vector.broadcast %cst_69 : f32 to vector<8x128xf32>
    %187 = arith.select %185, %181, %186 : vector<8x128xi1>, vector<8x128xf32>
    %188 = arith.index_cast %145 : i32 to index
    %c0_70 = arith.constant 0 : index
    %189 = vector.load %arg9[%188, %c0_70] : memref<64x128xf32, #tpu.memory_space<vmem>>, vector<8x128xf32>
    tpu.vector_store %arg9[%188, %c0_70], %187 {strides = array<i32>} : memref<64x128xf32, #tpu.memory_space<vmem>>, vector<8x128xf32>,
    %190 = vector.shape_cast %183 : vector<8x1xi1> to vector<8x1xi1>
    %191 = vector.broadcast %190 : vector<8x1xi1> to vector<8x128xi1>
    %192 = arith.select %191, %181, %135 : vector<8x128xi1>, vector<8x128xf32>
    %193 = vector.shape_cast %183 : vector<8x1xi1> to vector<8x1xi1>
    %194 = vector.broadcast %193 : vector<8x1xi1> to vector<8x128xi1>
    %195 = arith.select %194, %179, %138 : vector<8x128xi1>, vector<8x128xf32>
    %c3_i32 = arith.constant 3 : i32
    %c2_i32_71 = arith.constant 2 : i32
    %196 = arith.muli %c2_i32_71, %c3_i32 : i32
    %c7_i32_72 = arith.constant 7 : i32
    %197 = arith.subi %c7_i32_72, %196 : i32
    %198 = arith.muli %arg0, %197 : i32
    %199 = arith.addi %c3_i32, %198 : i32
    %200 = arith.addi %20, %199 : i32
    %c8_i32_73 = arith.constant 8 : i32
    %201 = arith.muli %199, %c8_i32_73 : i32
    %202 = tpu.assume_multiple %201, 8 : i32
    %203 = arith.index_cast %202 : i32 to index
    %c0_74 = arith.constant 0 : index
    %204 = vector.load %arg12[%203, %c0_74] : memref<64x512xf32, #tpu.memory_space<vmem>>, vector<8x512xf32>
    %205 = arith.truncf %192 : vector<8x128xf32> to vector<8x128xbf16>
    %cst_75 = arith.constant dense<0.000000e+00> : vector<8x512xf32>
    %206 = tpu.matmul %205, %6, %cst_75 {dimension_numbers = #tpu.dot_dimension_numbers<[1], [0], [0], [1], [0, 0, 1, 1], [], []>} : vector<8x128xbf16>, vector<128x512xbf16>, vector<8x512xf32> -> vector<8x512xf32>
    %207 = arith.addf %204, %206 : vector<8x512xf32>
    %208 = vector.extract_strided_slice %207 {offsets = [0, 0], sizes = [8, 128], strides = [1, 1]} : vector<8x512xf32> to vector<8x128xf32>
    %cst_76 = arith.constant 0.000000e+00 : f32
    %209 = vector.broadcast %cst_76 : f32 to vector<8x128xf32>
    %210 = arith.subf %209, %208 : vector<8x128xf32>
    %211 = math.exp %210 : vector<8x128xf32>
    %cst_77 = arith.constant 1.000000e+00 : f32
    %212 = vector.broadcast %cst_77 : f32 to vector<8x128xf32>
    %213 = arith.addf %212, %211 : vector<8x128xf32>
    %cst_78 = arith.constant 1.000000e+00 : f32
    %214 = vector.broadcast %cst_78 : f32 to vector<8x128xf32>
    %215 = arith.divf %214, %213 : vector<8x128xf32>
    %216 = vector.extract_strided_slice %207 {offsets = [0, 128], sizes = [8, 128], strides = [1, 1]} : vector<8x512xf32> to vector<8x128xf32>
    %cst_79 = arith.constant 0.000000e+00 : f32
    %217 = vector.broadcast %cst_79 : f32 to vector<8x128xf32>
    %218 = arith.subf %217, %216 : vector<8x128xf32>
    %219 = math.exp %218 : vector<8x128xf32>
    %cst_80 = arith.constant 1.000000e+00 : f32
    %220 = vector.broadcast %cst_80 : f32 to vector<8x128xf32>
    %221 = arith.addf %220, %219 : vector<8x128xf32>
    %cst_81 = arith.constant 1.000000e+00 : f32
    %222 = vector.broadcast %cst_81 : f32 to vector<8x128xf32>
    %223 = arith.divf %222, %221 : vector<8x128xf32>
    %224 = vector.extract_strided_slice %207 {offsets = [0, 256], sizes = [8, 128], strides = [1, 1]} : vector<8x512xf32> to vector<8x128xf32>
    %225 = math.tanh %224 : vector<8x128xf32>
    %226 = vector.extract_strided_slice %207 {offsets = [0, 384], sizes = [8, 128], strides = [1, 1]} : vector<8x512xf32> to vector<8x128xf32>
    %cst_82 = arith.constant 0.000000e+00 : f32
    %227 = vector.broadcast %cst_82 : f32 to vector<8x128xf32>
    %228 = arith.subf %227, %226 : vector<8x128xf32>
    %229 = math.exp %228 : vector<8x128xf32>
    %cst_83 = arith.constant 1.000000e+00 : f32
    %230 = vector.broadcast %cst_83 : f32 to vector<8x128xf32>
    %231 = arith.addf %230, %229 : vector<8x128xf32>
    %cst_84 = arith.constant 1.000000e+00 : f32
    %232 = vector.broadcast %cst_84 : f32 to vector<8x128xf32>
    %233 = arith.divf %232, %231 : vector<8x128xf32>
    %234 = arith.mulf %223, %195 : vector<8x128xf32>
    %235 = arith.mulf %215, %225 : vector<8x128xf32>
    %236 = arith.addf %234, %235 : vector<8x128xf32>
    %237 = math.tanh %236 : vector<8x128xf32>
    %238 = arith.mulf %233, %237 : vector<8x128xf32>
    %239 = vector.broadcast %200 : i32 to vector<8x1xi32>
    %240 = arith.cmpi slt, %239, %7 : vector<8x1xi32>
    %cst_85 = arith.constant 0.000000e+00 : f32
    %241 = vector.shape_cast %240 : vector<8x1xi1> to vector<8x1xi1>
    %242 = vector.broadcast %241 : vector<8x1xi1> to vector<8x128xi1>
    %243 = vector.broadcast %cst_85 : f32 to vector<8x128xf32>
    %244 = arith.select %242, %238, %243 : vector<8x128xi1>, vector<8x128xf32>
    %245 = arith.index_cast %202 : i32 to index
    %c0_86 = arith.constant 0 : index
    %246 = vector.load %arg9[%245, %c0_86] : memref<64x128xf32, #tpu.memory_space<vmem>>, vector<8x128xf32>
    tpu.vector_store %arg9[%245, %c0_86], %244 {strides = array<i32>} : memref<64x128xf32, #tpu.memory_space<vmem>>, vector<8x128xf32>,
    %247 = vector.shape_cast %240 : vector<8x1xi1> to vector<8x1xi1>
    %248 = vector.broadcast %247 : vector<8x1xi1> to vector<8x128xi1>
    %249 = arith.select %248, %238, %192 : vector<8x128xi1>, vector<8x128xf32>
    %250 = vector.shape_cast %240 : vector<8x1xi1> to vector<8x1xi1>
    %251 = vector.broadcast %250 : vector<8x1xi1> to vector<8x128xi1>
    %252 = arith.select %251, %236, %195 : vector<8x128xi1>, vector<8x128xf32>
    %c4_i32 = arith.constant 4 : i32
    %c2_i32_87 = arith.constant 2 : i32
    %253 = arith.muli %c2_i32_87, %c4_i32 : i32
    %c7_i32_88 = arith.constant 7 : i32
    %254 = arith.subi %c7_i32_88, %253 : i32
    %255 = arith.muli %arg0, %254 : i32
    %256 = arith.addi %c4_i32, %255 : i32
    %257 = arith.addi %20, %256 : i32
    %c8_i32_89 = arith.constant 8 : i32
    %258 = arith.muli %256, %c8_i32_89 : i32
    %259 = tpu.assume_multiple %258, 8 : i32
    %260 = arith.index_cast %259 : i32 to index
    %c0_90 = arith.constant 0 : index
    %261 = vector.load %arg12[%260, %c0_90] : memref<64x512xf32, #tpu.memory_space<vmem>>, vector<8x512xf32>
    %262 = arith.truncf %249 : vector<8x128xf32> to vector<8x128xbf16>
    %cst_91 = arith.constant dense<0.000000e+00> : vector<8x512xf32>
    %263 = tpu.matmul %262, %6, %cst_91 {dimension_numbers = #tpu.dot_dimension_numbers<[1], [0], [0], [1], [0, 0, 1, 1], [], []>} : vector<8x128xbf16>, vector<128x512xbf16>, vector<8x512xf32> -> vector<8x512xf32>
    %264 = arith.addf %261, %263 : vector<8x512xf32>
    %265 = vector.extract_strided_slice %264 {offsets = [0, 0], sizes = [8, 128], strides = [1, 1]} : vector<8x512xf32> to vector<8x128xf32>
    %cst_92 = arith.constant 0.000000e+00 : f32
    %266 = vector.broadcast %cst_92 : f32 to vector<8x128xf32>
    %267 = arith.subf %266, %265 : vector<8x128xf32>
    %268 = math.exp %267 : vector<8x128xf32>
    %cst_93 = arith.constant 1.000000e+00 : f32
    %269 = vector.broadcast %cst_93 : f32 to vector<8x128xf32>
    %270 = arith.addf %269, %268 : vector<8x128xf32>
    %cst_94 = arith.constant 1.000000e+00 : f32
    %271 = vector.broadcast %cst_94 : f32 to vector<8x128xf32>
    %272 = arith.divf %271, %270 : vector<8x128xf32>
    %273 = vector.extract_strided_slice %264 {offsets = [0, 128], sizes = [8, 128], strides = [1, 1]} : vector<8x512xf32> to vector<8x128xf32>
    %cst_95 = arith.constant 0.000000e+00 : f32
    %274 = vector.broadcast %cst_95 : f32 to vector<8x128xf32>
    %275 = arith.subf %274, %273 : vector<8x128xf32>
    %276 = math.exp %275 : vector<8x128xf32>
    %cst_96 = arith.constant 1.000000e+00 : f32
    %277 = vector.broadcast %cst_96 : f32 to vector<8x128xf32>
    %278 = arith.addf %277, %276 : vector<8x128xf32>
    %cst_97 = arith.constant 1.000000e+00 : f32
    %279 = vector.broadcast %cst_97 : f32 to vector<8x128xf32>
    %280 = arith.divf %279, %278 : vector<8x128xf32>
    %281 = vector.extract_strided_slice %264 {offsets = [0, 256], sizes = [8, 128], strides = [1, 1]} : vector<8x512xf32> to vector<8x128xf32>
    %282 = math.tanh %281 : vector<8x128xf32>
    %283 = vector.extract_strided_slice %264 {offsets = [0, 384], sizes = [8, 128], strides = [1, 1]} : vector<8x512xf32> to vector<8x128xf32>
    %cst_98 = arith.constant 0.000000e+00 : f32
    %284 = vector.broadcast %cst_98 : f32 to vector<8x128xf32>
    %285 = arith.subf %284, %283 : vector<8x128xf32>
    %286 = math.exp %285 : vector<8x128xf32>
    %cst_99 = arith.constant 1.000000e+00 : f32
    %287 = vector.broadcast %cst_99 : f32 to vector<8x128xf32>
    %288 = arith.addf %287, %286 : vector<8x128xf32>
    %cst_100 = arith.constant 1.000000e+00 : f32
    %289 = vector.broadcast %cst_100 : f32 to vector<8x128xf32>
    %290 = arith.divf %289, %288 : vector<8x128xf32>
    %291 = arith.mulf %280, %252 : vector<8x128xf32>
    %292 = arith.mulf %272, %282 : vector<8x128xf32>
    %293 = arith.addf %291, %292 : vector<8x128xf32>
    %294 = math.tanh %293 : vector<8x128xf32>
    %295 = arith.mulf %290, %294 : vector<8x128xf32>
    %296 = vector.broadcast %257 : i32 to vector<8x1xi32>
    %297 = arith.cmpi slt, %296, %7 : vector<8x1xi32>
    %cst_101 = arith.constant 0.000000e+00 : f32
    %298 = vector.shape_cast %297 : vector<8x1xi1> to vector<8x1xi1>
    %299 = vector.broadcast %298 : vector<8x1xi1> to vector<8x128xi1>
    %300 = vector.broadcast %cst_101 : f32 to vector<8x128xf32>
    %301 = arith.select %299, %295, %300 : vector<8x128xi1>, vector<8x128xf32>
    %302 = arith.index_cast %259 : i32 to index
    %c0_102 = arith.constant 0 : index
    %303 = vector.load %arg9[%302, %c0_102] : memref<64x128xf32, #tpu.memory_space<vmem>>, vector<8x128xf32>
    tpu.vector_store %arg9[%302, %c0_102], %301 {strides = array<i32>} : memref<64x128xf32, #tpu.memory_space<vmem>>, vector<8x128xf32>,
    %304 = vector.shape_cast %297 : vector<8x1xi1> to vector<8x1xi1>
    %305 = vector.broadcast %304 : vector<8x1xi1> to vector<8x128xi1>
    %306 = arith.select %305, %295, %249 : vector<8x128xi1>, vector<8x128xf32>
    %307 = vector.shape_cast %297 : vector<8x1xi1> to vector<8x1xi1>
    %308 = vector.broadcast %307 : vector<8x1xi1> to vector<8x128xi1>
    %309 = arith.select %308, %293, %252 : vector<8x128xi1>, vector<8x128xf32>
    %c5_i32 = arith.constant 5 : i32
    %c2_i32_103 = arith.constant 2 : i32
    %310 = arith.muli %c2_i32_103, %c5_i32 : i32
    %c7_i32_104 = arith.constant 7 : i32
    %311 = arith.subi %c7_i32_104, %310 : i32
    %312 = arith.muli %arg0, %311 : i32
    %313 = arith.addi %c5_i32, %312 : i32
    %314 = arith.addi %20, %313 : i32
    %c8_i32_105 = arith.constant 8 : i32
    %315 = arith.muli %313, %c8_i32_105 : i32
    %316 = tpu.assume_multiple %315, 8 : i32
    %317 = arith.index_cast %316 : i32 to index
    %c0_106 = arith.constant 0 : index
    %318 = vector.load %arg12[%317, %c0_106] : memref<64x512xf32, #tpu.memory_space<vmem>>, vector<8x512xf32>
    %319 = arith.truncf %306 : vector<8x128xf32> to vector<8x128xbf16>
    %cst_107 = arith.constant dense<0.000000e+00> : vector<8x512xf32>
    %320 = tpu.matmul %319, %6, %cst_107 {dimension_numbers = #tpu.dot_dimension_numbers<[1], [0], [0], [1], [0, 0, 1, 1], [], []>} : vector<8x128xbf16>, vector<128x512xbf16>, vector<8x512xf32> -> vector<8x512xf32>
    %321 = arith.addf %318, %320 : vector<8x512xf32>
    %322 = vector.extract_strided_slice %321 {offsets = [0, 0], sizes = [8, 128], strides = [1, 1]} : vector<8x512xf32> to vector<8x128xf32>
    %cst_108 = arith.constant 0.000000e+00 : f32
    %323 = vector.broadcast %cst_108 : f32 to vector<8x128xf32>
    %324 = arith.subf %323, %322 : vector<8x128xf32>
    %325 = math.exp %324 : vector<8x128xf32>
    %cst_109 = arith.constant 1.000000e+00 : f32
    %326 = vector.broadcast %cst_109 : f32 to vector<8x128xf32>
    %327 = arith.addf %326, %325 : vector<8x128xf32>
    %cst_110 = arith.constant 1.000000e+00 : f32
    %328 = vector.broadcast %cst_110 : f32 to vector<8x128xf32>
    %329 = arith.divf %328, %327 : vector<8x128xf32>
    %330 = vector.extract_strided_slice %321 {offsets = [0, 128], sizes = [8, 128], strides = [1, 1]} : vector<8x512xf32> to vector<8x128xf32>
    %cst_111 = arith.constant 0.000000e+00 : f32
    %331 = vector.broadcast %cst_111 : f32 to vector<8x128xf32>
    %332 = arith.subf %331, %330 : vector<8x128xf32>
    %333 = math.exp %332 : vector<8x128xf32>
    %cst_112 = arith.constant 1.000000e+00 : f32
    %334 = vector.broadcast %cst_112 : f32 to vector<8x128xf32>
    %335 = arith.addf %334, %333 : vector<8x128xf32>
    %cst_113 = arith.constant 1.000000e+00 : f32
    %336 = vector.broadcast %cst_113 : f32 to vector<8x128xf32>
    %337 = arith.divf %336, %335 : vector<8x128xf32>
    %338 = vector.extract_strided_slice %321 {offsets = [0, 256], sizes = [8, 128], strides = [1, 1]} : vector<8x512xf32> to vector<8x128xf32>
    %339 = math.tanh %338 : vector<8x128xf32>
    %340 = vector.extract_strided_slice %321 {offsets = [0, 384], sizes = [8, 128], strides = [1, 1]} : vector<8x512xf32> to vector<8x128xf32>
    %cst_114 = arith.constant 0.000000e+00 : f32
    %341 = vector.broadcast %cst_114 : f32 to vector<8x128xf32>
    %342 = arith.subf %341, %340 : vector<8x128xf32>
    %343 = math.exp %342 : vector<8x128xf32>
    %cst_115 = arith.constant 1.000000e+00 : f32
    %344 = vector.broadcast %cst_115 : f32 to vector<8x128xf32>
    %345 = arith.addf %344, %343 : vector<8x128xf32>
    %cst_116 = arith.constant 1.000000e+00 : f32
    %346 = vector.broadcast %cst_116 : f32 to vector<8x128xf32>
    %347 = arith.divf %346, %345 : vector<8x128xf32>
    %348 = arith.mulf %337, %309 : vector<8x128xf32>
    %349 = arith.mulf %329, %339 : vector<8x128xf32>
    %350 = arith.addf %348, %349 : vector<8x128xf32>
    %351 = math.tanh %350 : vector<8x128xf32>
    %352 = arith.mulf %347, %351 : vector<8x128xf32>
    %353 = vector.broadcast %314 : i32 to vector<8x1xi32>
    %354 = arith.cmpi slt, %353, %7 : vector<8x1xi32>
    %cst_117 = arith.constant 0.000000e+00 : f32
    %355 = vector.shape_cast %354 : vector<8x1xi1> to vector<8x1xi1>
    %356 = vector.broadcast %355 : vector<8x1xi1> to vector<8x128xi1>
    %357 = vector.broadcast %cst_117 : f32 to vector<8x128xf32>
    %358 = arith.select %356, %352, %357 : vector<8x128xi1>, vector<8x128xf32>
    %359 = arith.index_cast %316 : i32 to index
    %c0_118 = arith.constant 0 : index
    %360 = vector.load %arg9[%359, %c0_118] : memref<64x128xf32, #tpu.memory_space<vmem>>, vector<8x128xf32>
    tpu.vector_store %arg9[%359, %c0_118], %358 {strides = array<i32>} : memref<64x128xf32, #tpu.memory_space<vmem>>, vector<8x128xf32>,
    %361 = vector.shape_cast %354 : vector<8x1xi1> to vector<8x1xi1>
    %362 = vector.broadcast %361 : vector<8x1xi1> to vector<8x128xi1>
    %363 = arith.select %362, %352, %306 : vector<8x128xi1>, vector<8x128xf32>
    %364 = vector.shape_cast %354 : vector<8x1xi1> to vector<8x1xi1>
    %365 = vector.broadcast %364 : vector<8x1xi1> to vector<8x128xi1>
    %366 = arith.select %365, %350, %309 : vector<8x128xi1>, vector<8x128xf32>
    %c6_i32 = arith.constant 6 : i32
    %c2_i32_119 = arith.constant 2 : i32
    %367 = arith.muli %c2_i32_119, %c6_i32 : i32
    %c7_i32_120 = arith.constant 7 : i32
    %368 = arith.subi %c7_i32_120, %367 : i32
    %369 = arith.muli %arg0, %368 : i32
    %370 = arith.addi %c6_i32, %369 : i32
    %371 = arith.addi %20, %370 : i32
    %c8_i32_121 = arith.constant 8 : i32
    %372 = arith.muli %370, %c8_i32_121 : i32
    %373 = tpu.assume_multiple %372, 8 : i32
    %374 = arith.index_cast %373 : i32 to index
    %c0_122 = arith.constant 0 : index
    %375 = vector.load %arg12[%374, %c0_122] : memref<64x512xf32, #tpu.memory_space<vmem>>, vector<8x512xf32>
    %376 = arith.truncf %363 : vector<8x128xf32> to vector<8x128xbf16>
    %cst_123 = arith.constant dense<0.000000e+00> : vector<8x512xf32>
    %377 = tpu.matmul %376, %6, %cst_123 {dimension_numbers = #tpu.dot_dimension_numbers<[1], [0], [0], [1], [0, 0, 1, 1], [], []>} : vector<8x128xbf16>, vector<128x512xbf16>, vector<8x512xf32> -> vector<8x512xf32>
    %378 = arith.addf %375, %377 : vector<8x512xf32>
    %379 = vector.extract_strided_slice %378 {offsets = [0, 0], sizes = [8, 128], strides = [1, 1]} : vector<8x512xf32> to vector<8x128xf32>
    %cst_124 = arith.constant 0.000000e+00 : f32
    %380 = vector.broadcast %cst_124 : f32 to vector<8x128xf32>
    %381 = arith.subf %380, %379 : vector<8x128xf32>
    %382 = math.exp %381 : vector<8x128xf32>
    %cst_125 = arith.constant 1.000000e+00 : f32
    %383 = vector.broadcast %cst_125 : f32 to vector<8x128xf32>
    %384 = arith.addf %383, %382 : vector<8x128xf32>
    %cst_126 = arith.constant 1.000000e+00 : f32
    %385 = vector.broadcast %cst_126 : f32 to vector<8x128xf32>
    %386 = arith.divf %385, %384 : vector<8x128xf32>
    %387 = vector.extract_strided_slice %378 {offsets = [0, 128], sizes = [8, 128], strides = [1, 1]} : vector<8x512xf32> to vector<8x128xf32>
    %cst_127 = arith.constant 0.000000e+00 : f32
    %388 = vector.broadcast %cst_127 : f32 to vector<8x128xf32>
    %389 = arith.subf %388, %387 : vector<8x128xf32>
    %390 = math.exp %389 : vector<8x128xf32>
    %cst_128 = arith.constant 1.000000e+00 : f32
    %391 = vector.broadcast %cst_128 : f32 to vector<8x128xf32>
    %392 = arith.addf %391, %390 : vector<8x128xf32>
    %cst_129 = arith.constant 1.000000e+00 : f32
    %393 = vector.broadcast %cst_129 : f32 to vector<8x128xf32>
    %394 = arith.divf %393, %392 : vector<8x128xf32>
    %395 = vector.extract_strided_slice %378 {offsets = [0, 256], sizes = [8, 128], strides = [1, 1]} : vector<8x512xf32> to vector<8x128xf32>
    %396 = math.tanh %395 : vector<8x128xf32>
    %397 = vector.extract_strided_slice %378 {offsets = [0, 384], sizes = [8, 128], strides = [1, 1]} : vector<8x512xf32> to vector<8x128xf32>
    %cst_130 = arith.constant 0.000000e+00 : f32
    %398 = vector.broadcast %cst_130 : f32 to vector<8x128xf32>
    %399 = arith.subf %398, %397 : vector<8x128xf32>
    %400 = math.exp %399 : vector<8x128xf32>
    %cst_131 = arith.constant 1.000000e+00 : f32
    %401 = vector.broadcast %cst_131 : f32 to vector<8x128xf32>
    %402 = arith.addf %401, %400 : vector<8x128xf32>
    %cst_132 = arith.constant 1.000000e+00 : f32
    %403 = vector.broadcast %cst_132 : f32 to vector<8x128xf32>
    %404 = arith.divf %403, %402 : vector<8x128xf32>
    %405 = arith.mulf %394, %366 : vector<8x128xf32>
    %406 = arith.mulf %386, %396 : vector<8x128xf32>
    %407 = arith.addf %405, %406 : vector<8x128xf32>
    %408 = math.tanh %407 : vector<8x128xf32>
    %409 = arith.mulf %404, %408 : vector<8x128xf32>
    %410 = vector.broadcast %371 : i32 to vector<8x1xi32>
    %411 = arith.cmpi slt, %410, %7 : vector<8x1xi32>
    %cst_133 = arith.constant 0.000000e+00 : f32
    %412 = vector.shape_cast %411 : vector<8x1xi1> to vector<8x1xi1>
    %413 = vector.broadcast %412 : vector<8x1xi1> to vector<8x128xi1>
    %414 = vector.broadcast %cst_133 : f32 to vector<8x128xf32>
    %415 = arith.select %413, %409, %414 : vector<8x128xi1>, vector<8x128xf32>
    %416 = arith.index_cast %373 : i32 to index
    %c0_134 = arith.constant 0 : index
    %417 = vector.load %arg9[%416, %c0_134] : memref<64x128xf32, #tpu.memory_space<vmem>>, vector<8x128xf32>
    tpu.vector_store %arg9[%416, %c0_134], %415 {strides = array<i32>} : memref<64x128xf32, #tpu.memory_space<vmem>>, vector<8x128xf32>,
    %418 = vector.shape_cast %411 : vector<8x1xi1> to vector<8x1xi1>
    %419 = vector.broadcast %418 : vector<8x1xi1> to vector<8x128xi1>
    %420 = arith.select %419, %409, %363 : vector<8x128xi1>, vector<8x128xf32>
    %421 = vector.shape_cast %411 : vector<8x1xi1> to vector<8x1xi1>
    %422 = vector.broadcast %421 : vector<8x1xi1> to vector<8x128xi1>
    %423 = arith.select %422, %407, %366 : vector<8x128xi1>, vector<8x128xf32>
    %c7_i32_135 = arith.constant 7 : i32
    %c2_i32_136 = arith.constant 2 : i32
    %424 = arith.muli %c2_i32_136, %c7_i32_135 : i32
    %c7_i32_137 = arith.constant 7 : i32
    %425 = arith.subi %c7_i32_137, %424 : i32
    %426 = arith.muli %arg0, %425 : i32
    %427 = arith.addi %c7_i32_135, %426 : i32
    %428 = arith.addi %20, %427 : i32
    %c8_i32_138 = arith.constant 8 : i32
    %429 = arith.muli %427, %c8_i32_138 : i32
    %430 = tpu.assume_multiple %429, 8 : i32
    %431 = arith.index_cast %430 : i32 to index
    %c0_139 = arith.constant 0 : index
    %432 = vector.load %arg12[%431, %c0_139] : memref<64x512xf32, #tpu.memory_space<vmem>>, vector<8x512xf32>
    %433 = arith.truncf %420 : vector<8x128xf32> to vector<8x128xbf16>
    %cst_140 = arith.constant dense<0.000000e+00> : vector<8x512xf32>
    %434 = tpu.matmul %433, %6, %cst_140 {dimension_numbers = #tpu.dot_dimension_numbers<[1], [0], [0], [1], [0, 0, 1, 1], [], []>} : vector<8x128xbf16>, vector<128x512xbf16>, vector<8x512xf32> -> vector<8x512xf32>
    %435 = arith.addf %432, %434 : vector<8x512xf32>
    %436 = vector.extract_strided_slice %435 {offsets = [0, 0], sizes = [8, 128], strides = [1, 1]} : vector<8x512xf32> to vector<8x128xf32>
    %cst_141 = arith.constant 0.000000e+00 : f32
    %437 = vector.broadcast %cst_141 : f32 to vector<8x128xf32>
    %438 = arith.subf %437, %436 : vector<8x128xf32>
    %439 = math.exp %438 : vector<8x128xf32>
    %cst_142 = arith.constant 1.000000e+00 : f32
    %440 = vector.broadcast %cst_142 : f32 to vector<8x128xf32>
    %441 = arith.addf %440, %439 : vector<8x128xf32>
    %cst_143 = arith.constant 1.000000e+00 : f32
    %442 = vector.broadcast %cst_143 : f32 to vector<8x128xf32>
    %443 = arith.divf %442, %441 : vector<8x128xf32>
    %444 = vector.extract_strided_slice %435 {offsets = [0, 128], sizes = [8, 128], strides = [1, 1]} : vector<8x512xf32> to vector<8x128xf32>
    %cst_144 = arith.constant 0.000000e+00 : f32
    %445 = vector.broadcast %cst_144 : f32 to vector<8x128xf32>
    %446 = arith.subf %445, %444 : vector<8x128xf32>
    %447 = math.exp %446 : vector<8x128xf32>
    %cst_145 = arith.constant 1.000000e+00 : f32
    %448 = vector.broadcast %cst_145 : f32 to vector<8x128xf32>
    %449 = arith.addf %448, %447 : vector<8x128xf32>
    %cst_146 = arith.constant 1.000000e+00 : f32
    %450 = vector.broadcast %cst_146 : f32 to vector<8x128xf32>
    %451 = arith.divf %450, %449 : vector<8x128xf32>
    %452 = vector.extract_strided_slice %435 {offsets = [0, 256], sizes = [8, 128], strides = [1, 1]} : vector<8x512xf32> to vector<8x128xf32>
    %453 = math.tanh %452 : vector<8x128xf32>
    %454 = vector.extract_strided_slice %435 {offsets = [0, 384], sizes = [8, 128], strides = [1, 1]} : vector<8x512xf32> to vector<8x128xf32>
    %cst_147 = arith.constant 0.000000e+00 : f32
    %455 = vector.broadcast %cst_147 : f32 to vector<8x128xf32>
    %456 = arith.subf %455, %454 : vector<8x128xf32>
    %457 = math.exp %456 : vector<8x128xf32>
    %cst_148 = arith.constant 1.000000e+00 : f32
    %458 = vector.broadcast %cst_148 : f32 to vector<8x128xf32>
    %459 = arith.addf %458, %457 : vector<8x128xf32>
    %cst_149 = arith.constant 1.000000e+00 : f32
    %460 = vector.broadcast %cst_149 : f32 to vector<8x128xf32>
    %461 = arith.divf %460, %459 : vector<8x128xf32>
    %462 = arith.mulf %451, %423 : vector<8x128xf32>
    %463 = arith.mulf %443, %453 : vector<8x128xf32>
    %464 = arith.addf %462, %463 : vector<8x128xf32>
    %465 = math.tanh %464 : vector<8x128xf32>
    %466 = arith.mulf %461, %465 : vector<8x128xf32>
    %467 = vector.broadcast %428 : i32 to vector<8x1xi32>
    %468 = arith.cmpi slt, %467, %7 : vector<8x1xi32>
    %cst_150 = arith.constant 0.000000e+00 : f32
    %469 = vector.shape_cast %468 : vector<8x1xi1> to vector<8x1xi1>
    %470 = vector.broadcast %469 : vector<8x1xi1> to vector<8x128xi1>
    %471 = vector.broadcast %cst_150 : f32 to vector<8x128xf32>
    %472 = arith.select %470, %466, %471 : vector<8x128xi1>, vector<8x128xf32>
    %473 = arith.index_cast %430 : i32 to index
    %c0_151 = arith.constant 0 : index
    %474 = vector.load %arg9[%473, %c0_151] : memref<64x128xf32, #tpu.memory_space<vmem>>, vector<8x128xf32>
    tpu.vector_store %arg9[%473, %c0_151], %472 {strides = array<i32>} : memref<64x128xf32, #tpu.memory_space<vmem>>, vector<8x128xf32>,
    %475 = vector.shape_cast %468 : vector<8x1xi1> to vector<8x1xi1>
    %476 = vector.broadcast %475 : vector<8x1xi1> to vector<8x128xi1>
    %477 = arith.select %476, %466, %420 : vector<8x128xi1>, vector<8x128xf32>
    %478 = vector.shape_cast %468 : vector<8x1xi1> to vector<8x1xi1>
    %479 = vector.broadcast %478 : vector<8x1xi1> to vector<8x128xi1>
    %480 = arith.select %479, %464, %423 : vector<8x128xi1>, vector<8x128xf32>
    %c8_i32_152 = arith.constant 8 : i32
    %c0_153 = arith.constant 0 : index
    %c0_154 = arith.constant 0 : index
    %c0_155 = arith.constant 0 : index
    %481 = vector.load %arg10[%c0_153, %c0_154, %c0_155] : memref<1x8x128xf32, #tpu.memory_space<vmem>>, vector<1x8x128xf32>
    %482 = vector.shape_cast %481 : vector<1x8x128xf32> to vector<8x128xf32>
    %483 = vector.shape_cast %477 : vector<8x128xf32> to vector<1x8x128xf32>
    tpu.vector_store %arg10[%c0_153, %c0_154, %c0_155], %483 {strides = array<i32>} : memref<1x8x128xf32, #tpu.memory_space<vmem>>, vector<1x8x128xf32>,
    %c0_156 = arith.constant 0 : index
    %c0_157 = arith.constant 0 : index
    %c0_158 = arith.constant 0 : index
    %484 = vector.load %arg11[%c0_156, %c0_157, %c0_158] : memref<1x8x128xf32, #tpu.memory_space<vmem>>, vector<1x8x128xf32>
    %485 = vector.shape_cast %484 : vector<1x8x128xf32> to vector<8x128xf32>
    %486 = vector.shape_cast %480 : vector<8x128xf32> to vector<1x8x128xf32>
    tpu.vector_store %arg11[%c0_156, %c0_157, %c0_158], %486 {strides = array<i32>} : memref<1x8x128xf32, #tpu.memory_space<vmem>>, vector<1x8x128xf32>,
    return
  }
  func.func @transform_0(%arg0: i32, %arg1: i32) -> (i32, i32) {
    %c0_i32 = arith.constant 0 : i32
    %c0_i32_0 = arith.constant 0 : i32
    %c0_i32_1 = arith.constant 0 : i32
    return %c0_i32, %c0_i32_0 : i32, i32
  }
  func.func @transform_1(%arg0: i32, %arg1: i32) -> (i32, i32) {
    %c2_i32 = arith.constant 2 : i32
    %0 = arith.muli %c2_i32, %arg1 : i32
    %c1_i32 = arith.constant 1 : i32
    %1 = arith.subi %c1_i32, %0 : i32
    %2 = arith.muli %arg0, %1 : i32
    %3 = arith.addi %arg1, %2 : i32
    %c0_i32 = arith.constant 0 : i32
    %c0_i32_0 = arith.constant 0 : i32
    return %3, %c0_i32 : i32, i32
  }
  func.func @transform_2(%arg0: i32, %arg1: i32) -> (i32, i32, i32) {
    %c0_i32 = arith.constant 0 : i32
    %c0_i32_0 = arith.constant 0 : i32
    %c0_i32_1 = arith.constant 0 : i32
    return %arg0, %c0_i32, %c0_i32_0 : i32, i32, i32
  }
  func.func @transform_3(%arg0: i32, %arg1: i32) -> (i32, i32, i32) {
    %c0_i32 = arith.constant 0 : i32
    %c0_i32_0 = arith.constant 0 : i32
    %c0_i32_1 = arith.constant 0 : i32
    return %arg0, %c0_i32, %c0_i32_0 : i32, i32, i32
  }
  func.func @transform_4(%arg0: i32, %arg1: i32) -> (i32, i32, i32) {
    %c0_i32 = arith.constant 0 : i32
    %c0_i32_0 = arith.constant 0 : i32
    %c0_i32_1 = arith.constant 0 : i32
    return %arg0, %c0_i32, %c0_i32_0 : i32, i32, i32
  }
  func.func @transform_5(%arg0: i32, %arg1: i32) -> (i32, i32, i32) {
    %c0_i32 = arith.constant 0 : i32
    %c0_i32_0 = arith.constant 0 : i32
    %c0_i32_1 = arith.constant 0 : i32
    return %arg0, %c0_i32, %c0_i32_0 : i32, i32, i32
  }
  func.func @transform_6(%arg0: i32, %arg1: i32) -> (i32, i32, i32) {
    %c0_i32 = arith.constant 0 : i32
    %c0_i32_0 = arith.constant 0 : i32
    %c0_i32_1 = arith.constant 0 : i32
    return %arg0, %c0_i32, %c0_i32_0 : i32, i32, i32
  }
  func.func @transform_7(%arg0: i32, %arg1: i32) -> (i32, i32) {
    %c2_i32 = arith.constant 2 : i32
    %0 = arith.muli %c2_i32, %arg1 : i32
    %c1_i32 = arith.constant 1 : i32
    %1 = arith.subi %c1_i32, %0 : i32
    %2 = arith.muli %arg0, %1 : i32
    %3 = arith.addi %arg1, %2 : i32
    %c0_i32 = arith.constant 0 : i32
    return %3, %arg0 : i32, i32
  }
  func.func @transform_8(%arg0: i32, %arg1: i32) -> (i32, i32, i32) {
    %c0_i32 = arith.constant 0 : i32
    %c0_i32_0 = arith.constant 0 : i32
    %c0_i32_1 = arith.constant 0 : i32
    return %arg0, %c0_i32, %c0_i32_0 : i32, i32, i32
  }
  func.func @transform_9(%arg0: i32, %arg1: i32) -> (i32, i32, i32) {
    %c0_i32 = arith.constant 0 : i32
    %c0_i32_0 = arith.constant 0 : i32
    %c0_i32_1 = arith.constant 0 : i32
    return %arg0, %c0_i32, %c0_i32_0 : i32, i32, i32
  }
}

module attributes {stable_mosaic.version = 11 : i64} {
  func.func @_highway_kernel(%arg0: i32, %arg1: memref<128x128xf32, #tpu.memory_space<vmem>>, %arg2: memref<128x256xf32, #tpu.memory_space<vmem>>, %arg3: memref<128x256xbf16, #tpu.memory_space<vmem>>, %arg4: memref<1x256xf32, #tpu.memory_space<vmem>>, %arg5: memref<256x128xbf16, #tpu.memory_space<vmem>>, %arg6: memref<1x128xf32, #tpu.memory_space<vmem>>, %arg7: memref<128x128xf32, #tpu.memory_space<vmem>>) attributes {dimension_semantics = [#tpu.dimension_semantics<parallel>], iteration_bounds = array<i64: 1>, scalar_prefetch = 0 : i64, scratch_operands = 0 : i64, tpu.core_type = #tpu.core_type<tc>, window_params = [{transform_indices = @transform_0, window_bounds = array<i64: 128, 128>}, {transform_indices = @transform_1, window_bounds = array<i64: 128, 256>}, {pipeline_mode = #tpu.pipeline_mode<synchronous>, transform_indices = @transform_2, window_bounds = array<i64: 128, 256>}, {pipeline_mode = #tpu.pipeline_mode<synchronous>, transform_indices = @transform_3, window_bounds = array<i64: 1, 256>}, {pipeline_mode = #tpu.pipeline_mode<synchronous>, transform_indices = @transform_4, window_bounds = array<i64: 256, 128>}, {pipeline_mode = #tpu.pipeline_mode<synchronous>, transform_indices = @transform_5, window_bounds = array<i64: 1, 128>}, {transform_indices = @transform_6, window_bounds = array<i64: 128, 128>}]} {
    %c0 = arith.constant 0 : index
    %c0_0 = arith.constant 0 : index
    %0 = vector.load %arg1[%c0, %c0_0] : memref<128x128xf32, #tpu.memory_space<vmem>>, vector<128x128xf32>
    %1 = arith.truncf %0 : vector<128x128xf32> to vector<128x128xbf16>
    %c0_1 = arith.constant 0 : index
    %c0_2 = arith.constant 0 : index
    %2 = vector.load %arg3[%c0_1, %c0_2] : memref<128x256xbf16, #tpu.memory_space<vmem>>, vector<128x256xbf16>
    %cst = arith.constant dense<0.000000e+00> : vector<128x256xf32>
    %3 = tpu.matmul %1, %2, %cst {dimension_numbers = #tpu.dot_dimension_numbers<[1], [0], [0], [1], [0, 0, 1, 1], [], []>} : vector<128x128xbf16>, vector<128x256xbf16>, vector<128x256xf32> -> vector<128x256xf32>
    %c0_3 = arith.constant 0 : index
    %c0_4 = arith.constant 0 : index
    %4 = vector.load %arg4[%c0_3, %c0_4] : memref<1x256xf32, #tpu.memory_space<vmem>>, vector<1x256xf32>
    %5 = vector.broadcast %4 : vector<1x256xf32> to vector<128x256xf32>
    %6 = arith.addf %3, %5 : vector<128x256xf32>
    %cst_5 = arith.constant 0.000000e+00 : f32
    %7 = vector.broadcast %cst_5 : f32 to vector<128x256xf32>
    %8 = arith.subf %7, %6 : vector<128x256xf32>
    %9 = math.exp %8 : vector<128x256xf32>
    %cst_6 = arith.constant 1.000000e+00 : f32
    %10 = vector.broadcast %cst_6 : f32 to vector<128x256xf32>
    %11 = arith.addf %10, %9 : vector<128x256xf32>
    %cst_7 = arith.constant 1.000000e+00 : f32
    %12 = vector.broadcast %cst_7 : f32 to vector<128x256xf32>
    %13 = arith.divf %12, %11 : vector<128x256xf32>
    %c0_8 = arith.constant 0 : index
    %c0_9 = arith.constant 0 : index
    %14 = vector.load %arg2[%c0_8, %c0_9] : memref<128x256xf32, #tpu.memory_space<vmem>>, vector<128x256xf32>
    %15 = arith.subf %14, %6 : vector<128x256xf32>
    %16 = arith.mulf %13, %15 : vector<128x256xf32>
    %17 = arith.addf %6, %16 : vector<128x256xf32>
    %18 = arith.truncf %17 : vector<128x256xf32> to vector<128x256xbf16>
    %c0_10 = arith.constant 0 : index
    %c0_11 = arith.constant 0 : index
    %19 = vector.load %arg5[%c0_10, %c0_11] : memref<256x128xbf16, #tpu.memory_space<vmem>>, vector<256x128xbf16>
    %cst_12 = arith.constant dense<0.000000e+00> : vector<128x128xf32>
    %20 = tpu.matmul %18, %19, %cst_12 {dimension_numbers = #tpu.dot_dimension_numbers<[1], [0], [0], [1], [0, 0, 1, 1], [], []>} : vector<128x256xbf16>, vector<256x128xbf16>, vector<128x128xf32> -> vector<128x128xf32>
    %c0_13 = arith.constant 0 : index
    %c0_14 = arith.constant 0 : index
    %21 = vector.load %arg6[%c0_13, %c0_14] : memref<1x128xf32, #tpu.memory_space<vmem>>, vector<1x128xf32>
    %22 = vector.broadcast %21 : vector<1x128xf32> to vector<128x128xf32>
    %23 = arith.addf %20, %22 : vector<128x128xf32>
    %c0_15 = arith.constant 0 : index
    %c0_16 = arith.constant 0 : index
    %24 = vector.load %arg7[%c0_15, %c0_16] : memref<128x128xf32, #tpu.memory_space<vmem>>, vector<128x128xf32>
    tpu.vector_store %arg7[%c0_15, %c0_16], %23 {strides = array<i32>} : memref<128x128xf32, #tpu.memory_space<vmem>>, vector<128x128xf32>,
    return
  }
  func.func @transform_0(%arg0: i32) -> (i32, i32) {
    %c0_i32 = arith.constant 0 : i32
    %c0_i32_0 = arith.constant 0 : i32
    return %arg0, %c0_i32 : i32, i32
  }
  func.func @transform_1(%arg0: i32) -> (i32, i32) {
    %c0_i32 = arith.constant 0 : i32
    %c0_i32_0 = arith.constant 0 : i32
    return %arg0, %c0_i32 : i32, i32
  }
  func.func @transform_2(%arg0: i32) -> (i32, i32) {
    %c0_i32 = arith.constant 0 : i32
    %c0_i32_0 = arith.constant 0 : i32
    %c0_i32_1 = arith.constant 0 : i32
    return %c0_i32, %c0_i32_0 : i32, i32
  }
  func.func @transform_3(%arg0: i32) -> (i32, i32) {
    %c0_i32 = arith.constant 0 : i32
    %c0_i32_0 = arith.constant 0 : i32
    %c0_i32_1 = arith.constant 0 : i32
    return %c0_i32, %c0_i32_0 : i32, i32
  }
  func.func @transform_4(%arg0: i32) -> (i32, i32) {
    %c0_i32 = arith.constant 0 : i32
    %c0_i32_0 = arith.constant 0 : i32
    %c0_i32_1 = arith.constant 0 : i32
    return %c0_i32, %c0_i32_0 : i32, i32
  }
  func.func @transform_5(%arg0: i32) -> (i32, i32) {
    %c0_i32 = arith.constant 0 : i32
    %c0_i32_0 = arith.constant 0 : i32
    %c0_i32_1 = arith.constant 0 : i32
    return %c0_i32, %c0_i32_0 : i32, i32
  }
  func.func @transform_6(%arg0: i32) -> (i32, i32) {
    %c0_i32 = arith.constant 0 : i32
    %c0_i32_0 = arith.constant 0 : i32
    return %arg0, %c0_i32 : i32, i32
  }
}

module attributes {stable_mosaic.version = 11 : i64} {
  func.func @_bilstm_layer_kernel(%arg0: i32, %arg1: i32, %arg2: memref<8x1xi32, #tpu.memory_space<vmem>>, %arg3: memref<64x256xf32, #tpu.memory_space<vmem>>, %arg4: memref<1x256x512xbf16, #tpu.memory_space<vmem>>, %arg5: memref<1x1x512xf32, #tpu.memory_space<vmem>>, %arg6: memref<1x128x512xbf16, #tpu.memory_space<vmem>>, %arg7: memref<1x8x128xf32, #tpu.memory_space<vmem>>, %arg8: memref<1x8x128xf32, #tpu.memory_space<vmem>>, %arg9: memref<64x128xf32, #tpu.memory_space<vmem>>, %arg10: memref<1x8x128xf32, #tpu.memory_space<vmem>>, %arg11: memref<1x8x128xf32, #tpu.memory_space<vmem>>, %arg12: memref<64x512xf32, #tpu.memory_space<vmem>>) attributes {dimension_semantics = [#tpu.dimension_semantics<parallel>, #tpu.dimension_semantics<arbitrary>], iteration_bounds = array<i64: 2, 2>, scalar_prefetch = 0 : i64, scratch_operands = 1 : i64, tpu.core_type = #tpu.core_type<tc>, window_params = [{pipeline_mode = #tpu.pipeline_mode<synchronous>, transform_indices = @transform_0, window_bounds = array<i64: 8, 1>}, {transform_indices = @transform_1, window_bounds = array<i64: 64, 256>}, {transform_indices = @transform_2, window_bounds = array<i64: 1, 256, 512>}, {transform_indices = @transform_3, window_bounds = array<i64: 1, 1, 512>}, {transform_indices = @transform_4, window_bounds = array<i64: 1, 128, 512>}, {transform_indices = @transform_5, window_bounds = array<i64: 1, 8, 128>}, {transform_indices = @transform_6, window_bounds = array<i64: 1, 8, 128>}, {transform_indices = @transform_7, window_bounds = array<i64: 64, 128>}, {transform_indices = @transform_8, window_bounds = array<i64: 1, 8, 128>}, {transform_indices = @transform_9, window_bounds = array<i64: 1, 8, 128>}]} {
    %c0_i32 = arith.constant 0 : i32
    %0 = arith.cmpi eq, %arg1, %c0_i32 : i32
    %1 = arith.extui %0 : i1 to i32
    %c0_i32_0 = arith.constant 0 : i32
    %2 = arith.cmpi ne, %1, %c0_i32_0 : i32
    scf.if %2 {
      %c0_159 = arith.constant 0 : index
      %c0_160 = arith.constant 0 : index
      %c0_161 = arith.constant 0 : index
      %487 = vector.load %arg7[%c0_159, %c0_160, %c0_161] : memref<1x8x128xf32, #tpu.memory_space<vmem>>, vector<1x8x128xf32>
      %c0_162 = arith.constant 0 : index
      %c0_163 = arith.constant 0 : index
      %c0_164 = arith.constant 0 : index
      %488 = vector.load %arg10[%c0_162, %c0_163, %c0_164] : memref<1x8x128xf32, #tpu.memory_space<vmem>>, vector<1x8x128xf32>
      tpu.vector_store %arg10[%c0_162, %c0_163, %c0_164], %487 {strides = array<i32>} : memref<1x8x128xf32, #tpu.memory_space<vmem>>, vector<1x8x128xf32>,
      %c0_165 = arith.constant 0 : index
      %c0_166 = arith.constant 0 : index
      %c0_167 = arith.constant 0 : index
      %489 = vector.load %arg8[%c0_165, %c0_166, %c0_167] : memref<1x8x128xf32, #tpu.memory_space<vmem>>, vector<1x8x128xf32>
      %c0_168 = arith.constant 0 : index
      %c0_169 = arith.constant 0 : index
      %c0_170 = arith.constant 0 : index
      %490 = vector.load %arg11[%c0_168, %c0_169, %c0_170] : memref<1x8x128xf32, #tpu.memory_space<vmem>>, vector<1x8x128xf32>
      tpu.vector_store %arg11[%c0_168, %c0_169, %c0_170], %489 {strides = array<i32>} : memref<1x8x128xf32, #tpu.memory_space<vmem>>, vector<1x8x128xf32>,
    } else {
    }
    %c0 = arith.constant 0 : index
    %c0_1 = arith.constant 0 : index
    %c0_2 = arith.constant 0 : index
    %3 = vector.load %arg4[%c0, %c0_1, %c0_2] : memref<1x256x512xbf16, #tpu.memory_space<vmem>>, vector<1x256x512xbf16>
    %4 = vector.shape_cast %3 : vector<1x256x512xbf16> to vector<256x512xbf16>
    %c0_3 = arith.constant 0 : index
    %c0_4 = arith.constant 0 : index
    %c0_5 = arith.constant 0 : index
    %5 = vector.load %arg6[%c0_3, %c0_4, %c0_5] : memref<1x128x512xbf16, #tpu.memory_space<vmem>>, vector<1x128x512xbf16>
    %6 = vector.shape_cast %5 : vector<1x128x512xbf16> to vector<128x512xbf16>
    %c0_6 = arith.constant 0 : index
    %c0_7 = arith.constant 0 : index
    %7 = vector.load %arg2[%c0_6, %c0_7] : memref<8x1xi32, #tpu.memory_space<vmem>>, vector<8x1xi32>
    %c0_8 = arith.constant 0 : index
    %c0_9 = arith.constant 0 : index
    %8 = vector.load %arg3[%c0_8, %c0_9] : memref<64x256xf32, #tpu.memory_space<vmem>>, vector<64x256xf32>
    %9 = arith.truncf %8 : vector<64x256xf32> to vector<64x256xbf16>
    %cst = arith.constant dense<0.000000e+00> : vector<64x512xf32>
    %10 = tpu.matmul %9, %4, %cst {dimension_numbers = #tpu.dot_dimension_numbers<[1], [0], [0], [1], [0, 0, 1, 1], [], []>} : vector<64x256xbf16>, vector<256x512xbf16>, vector<64x512xf32> -> vector<64x512xf32>
    %c0_10 = arith.constant 0 : index
    %c0_11 = arith.constant 0 : index
    %c0_12 = arith.constant 0 : index
    %11 = vector.load %arg5[%c0_10, %c0_11, %c0_12] : memref<1x1x512xf32, #tpu.memory_space<vmem>>, vector<1x1x512xf32>
    %12 = vector.shape_cast %11 : vector<1x1x512xf32> to vector<1x512xf32>
    %13 = vector.broadcast %12 : vector<1x512xf32> to vector<64x512xf32>
    %14 = arith.addf %10, %13 : vector<64x512xf32>
    %c0_13 = arith.constant 0 : index
    %c0_14 = arith.constant 0 : index
    %15 = vector.load %arg12[%c0_13, %c0_14] : memref<64x512xf32, #tpu.memory_space<vmem>>, vector<64x512xf32>
    tpu.vector_store %arg12[%c0_13, %c0_14], %14 {strides = array<i32>} : memref<64x512xf32, #tpu.memory_space<vmem>>, vector<64x512xf32>,
    %c2_i32 = arith.constant 2 : i32
    %16 = arith.muli %c2_i32, %arg1 : i32
    %c1_i32 = arith.constant 1 : i32
    %17 = arith.subi %c1_i32, %16 : i32
    %18 = arith.muli %arg0, %17 : i32
    %19 = arith.addi %arg1, %18 : i32
    %c8_i32 = arith.constant 8 : i32
    %20 = arith.muli %19, %c8_i32 : i32
    %c0_15 = arith.constant 0 : index
    %c0_16 = arith.constant 0 : index
    %c0_17 = arith.constant 0 : index
    %21 = vector.load %arg10[%c0_15, %c0_16, %c0_17] : memref<1x8x128xf32, #tpu.memory_space<vmem>>, vector<1x8x128xf32>
    %22 = vector.shape_cast %21 : vector<1x8x128xf32> to vector<8x128xf32>
    %c0_18 = arith.constant 0 : index
    %c0_19 = arith.constant 0 : index
    %c0_20 = arith.constant 0 : index
    %23 = vector.load %arg11[%c0_18, %c0_19, %c0_20] : memref<1x8x128xf32, #tpu.memory_space<vmem>>, vector<1x8x128xf32>
    %24 = vector.shape_cast %23 : vector<1x8x128xf32> to vector<8x128xf32>
    %c0_i32_21 = arith.constant 0 : i32
    %c2_i32_22 = arith.constant 2 : i32
    %25 = arith.muli %c2_i32_22, %c0_i32_21 : i32
    %c7_i32 = arith.constant 7 : i32
    %26 = arith.subi %c7_i32, %25 : i32
    %27 = arith.muli %arg0, %26 : i32
    %28 = arith.addi %c0_i32_21, %27 : i32
    %29 = arith.addi %20, %28 : i32
    %c8_i32_23 = arith.constant 8 : i32
    %30 = arith.muli %28, %c8_i32_23 : i32
    %31 = tpu.assume_multiple %30, 8 : i32
    %32 = arith.index_cast %31 : i32 to index
    %c0_24 = arith.constant 0 : index
    %33 = vector.load %arg12[%32, %c0_24] : memref<64x512xf32, #tpu.memory_space<vmem>>, vector<8x512xf32>
    %34 = arith.truncf %22 : vector<8x128xf32> to vector<8x128xbf16>
    %cst_25 = arith.constant dense<0.000000e+00> : vector<8x512xf32>
    %35 = tpu.matmul %34, %6, %cst_25 {dimension_numbers = #tpu.dot_dimension_numbers<[1], [0], [0], [1], [0, 0, 1, 1], [], []>} : vector<8x128xbf16>, vector<128x512xbf16>, vector<8x512xf32> -> vector<8x512xf32>
    %36 = arith.addf %33, %35 : vector<8x512xf32>
    %37 = vector.extract_strided_slice %36 {offsets = [0, 0], sizes = [8, 128], strides = [1, 1]} : vector<8x512xf32> to vector<8x128xf32>
    %cst_26 = arith.constant 0.000000e+00 : f32
    %38 = vector.broadcast %cst_26 : f32 to vector<8x128xf32>
    %39 = arith.subf %38, %37 : vector<8x128xf32>
    %40 = math.exp %39 : vector<8x128xf32>
    %cst_27 = arith.constant 1.000000e+00 : f32
    %41 = vector.broadcast %cst_27 : f32 to vector<8x128xf32>
    %42 = arith.addf %41, %40 : vector<8x128xf32>
    %cst_28 = arith.constant 1.000000e+00 : f32
    %43 = vector.broadcast %cst_28 : f32 to vector<8x128xf32>
    %44 = arith.divf %43, %42 : vector<8x128xf32>
    %45 = vector.extract_strided_slice %36 {offsets = [0, 128], sizes = [8, 128], strides = [1, 1]} : vector<8x512xf32> to vector<8x128xf32>
    %cst_29 = arith.constant 0.000000e+00 : f32
    %46 = vector.broadcast %cst_29 : f32 to vector<8x128xf32>
    %47 = arith.subf %46, %45 : vector<8x128xf32>
    %48 = math.exp %47 : vector<8x128xf32>
    %cst_30 = arith.constant 1.000000e+00 : f32
    %49 = vector.broadcast %cst_30 : f32 to vector<8x128xf32>
    %50 = arith.addf %49, %48 : vector<8x128xf32>
    %cst_31 = arith.constant 1.000000e+00 : f32
    %51 = vector.broadcast %cst_31 : f32 to vector<8x128xf32>
    %52 = arith.divf %51, %50 : vector<8x128xf32>
    %53 = vector.extract_strided_slice %36 {offsets = [0, 256], sizes = [8, 128], strides = [1, 1]} : vector<8x512xf32> to vector<8x128xf32>
    %54 = math.tanh %53 : vector<8x128xf32>
    %55 = vector.extract_strided_slice %36 {offsets = [0, 384], sizes = [8, 128], strides = [1, 1]} : vector<8x512xf32> to vector<8x128xf32>
    %cst_32 = arith.constant 0.000000e+00 : f32
    %56 = vector.broadcast %cst_32 : f32 to vector<8x128xf32>
    %57 = arith.subf %56, %55 : vector<8x128xf32>
    %58 = math.exp %57 : vector<8x128xf32>
    %cst_33 = arith.constant 1.000000e+00 : f32
    %59 = vector.broadcast %cst_33 : f32 to vector<8x128xf32>
    %60 = arith.addf %59, %58 : vector<8x128xf32>
    %cst_34 = arith.constant 1.000000e+00 : f32
    %61 = vector.broadcast %cst_34 : f32 to vector<8x128xf32>
    %62 = arith.divf %61, %60 : vector<8x128xf32>
    %63 = arith.mulf %52, %24 : vector<8x128xf32>
    %64 = arith.mulf %44, %54 : vector<8x128xf32>
    %65 = arith.addf %63, %64 : vector<8x128xf32>
    %66 = math.tanh %65 : vector<8x128xf32>
    %67 = arith.mulf %62, %66 : vector<8x128xf32>
    %68 = vector.broadcast %29 : i32 to vector<8x1xi32>
    %69 = arith.cmpi slt, %68, %7 : vector<8x1xi32>
    %cst_35 = arith.constant 0.000000e+00 : f32
    %70 = vector.shape_cast %69 : vector<8x1xi1> to vector<8x1xi1>
    %71 = vector.broadcast %70 : vector<8x1xi1> to vector<8x128xi1>
    %72 = vector.broadcast %cst_35 : f32 to vector<8x128xf32>
    %73 = arith.select %71, %67, %72 : vector<8x128xi1>, vector<8x128xf32>
    %74 = arith.index_cast %31 : i32 to index
    %c0_36 = arith.constant 0 : index
    %75 = vector.load %arg9[%74, %c0_36] : memref<64x128xf32, #tpu.memory_space<vmem>>, vector<8x128xf32>
    tpu.vector_store %arg9[%74, %c0_36], %73 {strides = array<i32>} : memref<64x128xf32, #tpu.memory_space<vmem>>, vector<8x128xf32>,
    %76 = vector.shape_cast %69 : vector<8x1xi1> to vector<8x1xi1>
    %77 = vector.broadcast %76 : vector<8x1xi1> to vector<8x128xi1>
    %78 = arith.select %77, %67, %22 : vector<8x128xi1>, vector<8x128xf32>
    %79 = vector.shape_cast %69 : vector<8x1xi1> to vector<8x1xi1>
    %80 = vector.broadcast %79 : vector<8x1xi1> to vector<8x128xi1>
    %81 = arith.select %80, %65, %24 : vector<8x128xi1>, vector<8x128xf32>
    %c1_i32_37 = arith.constant 1 : i32
    %c2_i32_38 = arith.constant 2 : i32
    %82 = arith.muli %c2_i32_38, %c1_i32_37 : i32
    %c7_i32_39 = arith.constant 7 : i32
    %83 = arith.subi %c7_i32_39, %82 : i32
    %84 = arith.muli %arg0, %83 : i32
    %85 = arith.addi %c1_i32_37, %84 : i32
    %86 = arith.addi %20, %85 : i32
    %c8_i32_40 = arith.constant 8 : i32
    %87 = arith.muli %85, %c8_i32_40 : i32
    %88 = tpu.assume_multiple %87, 8 : i32
    %89 = arith.index_cast %88 : i32 to index
    %c0_41 = arith.constant 0 : index
    %90 = vector.load %arg12[%89, %c0_41] : memref<64x512xf32, #tpu.memory_space<vmem>>, vector<8x512xf32>
    %91 = arith.truncf %78 : vector<8x128xf32> to vector<8x128xbf16>
    %cst_42 = arith.constant dense<0.000000e+00> : vector<8x512xf32>
    %92 = tpu.matmul %91, %6, %cst_42 {dimension_numbers = #tpu.dot_dimension_numbers<[1], [0], [0], [1], [0, 0, 1, 1], [], []>} : vector<8x128xbf16>, vector<128x512xbf16>, vector<8x512xf32> -> vector<8x512xf32>
    %93 = arith.addf %90, %92 : vector<8x512xf32>
    %94 = vector.extract_strided_slice %93 {offsets = [0, 0], sizes = [8, 128], strides = [1, 1]} : vector<8x512xf32> to vector<8x128xf32>
    %cst_43 = arith.constant 0.000000e+00 : f32
    %95 = vector.broadcast %cst_43 : f32 to vector<8x128xf32>
    %96 = arith.subf %95, %94 : vector<8x128xf32>
    %97 = math.exp %96 : vector<8x128xf32>
    %cst_44 = arith.constant 1.000000e+00 : f32
    %98 = vector.broadcast %cst_44 : f32 to vector<8x128xf32>
    %99 = arith.addf %98, %97 : vector<8x128xf32>
    %cst_45 = arith.constant 1.000000e+00 : f32
    %100 = vector.broadcast %cst_45 : f32 to vector<8x128xf32>
    %101 = arith.divf %100, %99 : vector<8x128xf32>
    %102 = vector.extract_strided_slice %93 {offsets = [0, 128], sizes = [8, 128], strides = [1, 1]} : vector<8x512xf32> to vector<8x128xf32>
    %cst_46 = arith.constant 0.000000e+00 : f32
    %103 = vector.broadcast %cst_46 : f32 to vector<8x128xf32>
    %104 = arith.subf %103, %102 : vector<8x128xf32>
    %105 = math.exp %104 : vector<8x128xf32>
    %cst_47 = arith.constant 1.000000e+00 : f32
    %106 = vector.broadcast %cst_47 : f32 to vector<8x128xf32>
    %107 = arith.addf %106, %105 : vector<8x128xf32>
    %cst_48 = arith.constant 1.000000e+00 : f32
    %108 = vector.broadcast %cst_48 : f32 to vector<8x128xf32>
    %109 = arith.divf %108, %107 : vector<8x128xf32>
    %110 = vector.extract_strided_slice %93 {offsets = [0, 256], sizes = [8, 128], strides = [1, 1]} : vector<8x512xf32> to vector<8x128xf32>
    %111 = math.tanh %110 : vector<8x128xf32>
    %112 = vector.extract_strided_slice %93 {offsets = [0, 384], sizes = [8, 128], strides = [1, 1]} : vector<8x512xf32> to vector<8x128xf32>
    %cst_49 = arith.constant 0.000000e+00 : f32
    %113 = vector.broadcast %cst_49 : f32 to vector<8x128xf32>
    %114 = arith.subf %113, %112 : vector<8x128xf32>
    %115 = math.exp %114 : vector<8x128xf32>
    %cst_50 = arith.constant 1.000000e+00 : f32
    %116 = vector.broadcast %cst_50 : f32 to vector<8x128xf32>
    %117 = arith.addf %116, %115 : vector<8x128xf32>
    %cst_51 = arith.constant 1.000000e+00 : f32
    %118 = vector.broadcast %cst_51 : f32 to vector<8x128xf32>
    %119 = arith.divf %118, %117 : vector<8x128xf32>
    %120 = arith.mulf %109, %81 : vector<8x128xf32>
    %121 = arith.mulf %101, %111 : vector<8x128xf32>
    %122 = arith.addf %120, %121 : vector<8x128xf32>
    %123 = math.tanh %122 : vector<8x128xf32>
    %124 = arith.mulf %119, %123 : vector<8x128xf32>
    %125 = vector.broadcast %86 : i32 to vector<8x1xi32>
    %126 = arith.cmpi slt, %125, %7 : vector<8x1xi32>
    %cst_52 = arith.constant 0.000000e+00 : f32
    %127 = vector.shape_cast %126 : vector<8x1xi1> to vector<8x1xi1>
    %128 = vector.broadcast %127 : vector<8x1xi1> to vector<8x128xi1>
    %129 = vector.broadcast %cst_52 : f32 to vector<8x128xf32>
    %130 = arith.select %128, %124, %129 : vector<8x128xi1>, vector<8x128xf32>
    %131 = arith.index_cast %88 : i32 to index
    %c0_53 = arith.constant 0 : index
    %132 = vector.load %arg9[%131, %c0_53] : memref<64x128xf32, #tpu.memory_space<vmem>>, vector<8x128xf32>
    tpu.vector_store %arg9[%131, %c0_53], %130 {strides = array<i32>} : memref<64x128xf32, #tpu.memory_space<vmem>>, vector<8x128xf32>,
    %133 = vector.shape_cast %126 : vector<8x1xi1> to vector<8x1xi1>
    %134 = vector.broadcast %133 : vector<8x1xi1> to vector<8x128xi1>
    %135 = arith.select %134, %124, %78 : vector<8x128xi1>, vector<8x128xf32>
    %136 = vector.shape_cast %126 : vector<8x1xi1> to vector<8x1xi1>
    %137 = vector.broadcast %136 : vector<8x1xi1> to vector<8x128xi1>
    %138 = arith.select %137, %122, %81 : vector<8x128xi1>, vector<8x128xf32>
    %c2_i32_54 = arith.constant 2 : i32
    %c2_i32_55 = arith.constant 2 : i32
    %139 = arith.muli %c2_i32_55, %c2_i32_54 : i32
    %c7_i32_56 = arith.constant 7 : i32
    %140 = arith.subi %c7_i32_56, %139 : i32
    %141 = arith.muli %arg0, %140 : i32
    %142 = arith.addi %c2_i32_54, %141 : i32
    %143 = arith.addi %20, %142 : i32
    %c8_i32_57 = arith.constant 8 : i32
    %144 = arith.muli %142, %c8_i32_57 : i32
    %145 = tpu.assume_multiple %144, 8 : i32
    %146 = arith.index_cast %145 : i32 to index
    %c0_58 = arith.constant 0 : index
    %147 = vector.load %arg12[%146, %c0_58] : memref<64x512xf32, #tpu.memory_space<vmem>>, vector<8x512xf32>
    %148 = arith.truncf %135 : vector<8x128xf32> to vector<8x128xbf16>
    %cst_59 = arith.constant dense<0.000000e+00> : vector<8x512xf32>
    %149 = tpu.matmul %148, %6, %cst_59 {dimension_numbers = #tpu.dot_dimension_numbers<[1], [0], [0], [1], [0, 0, 1, 1], [], []>} : vector<8x128xbf16>, vector<128x512xbf16>, vector<8x512xf32> -> vector<8x512xf32>
    %150 = arith.addf %147, %149 : vector<8x512xf32>
    %151 = vector.extract_strided_slice %150 {offsets = [0, 0], sizes = [8, 128], strides = [1, 1]} : vector<8x512xf32> to vector<8x128xf32>
    %cst_60 = arith.constant 0.000000e+00 : f32
    %152 = vector.broadcast %cst_60 : f32 to vector<8x128xf32>
    %153 = arith.subf %152, %151 : vector<8x128xf32>
    %154 = math.exp %153 : vector<8x128xf32>
    %cst_61 = arith.constant 1.000000e+00 : f32
    %155 = vector.broadcast %cst_61 : f32 to vector<8x128xf32>
    %156 = arith.addf %155, %154 : vector<8x128xf32>
    %cst_62 = arith.constant 1.000000e+00 : f32
    %157 = vector.broadcast %cst_62 : f32 to vector<8x128xf32>
    %158 = arith.divf %157, %156 : vector<8x128xf32>
    %159 = vector.extract_strided_slice %150 {offsets = [0, 128], sizes = [8, 128], strides = [1, 1]} : vector<8x512xf32> to vector<8x128xf32>
    %cst_63 = arith.constant 0.000000e+00 : f32
    %160 = vector.broadcast %cst_63 : f32 to vector<8x128xf32>
    %161 = arith.subf %160, %159 : vector<8x128xf32>
    %162 = math.exp %161 : vector<8x128xf32>
    %cst_64 = arith.constant 1.000000e+00 : f32
    %163 = vector.broadcast %cst_64 : f32 to vector<8x128xf32>
    %164 = arith.addf %163, %162 : vector<8x128xf32>
    %cst_65 = arith.constant 1.000000e+00 : f32
    %165 = vector.broadcast %cst_65 : f32 to vector<8x128xf32>
    %166 = arith.divf %165, %164 : vector<8x128xf32>
    %167 = vector.extract_strided_slice %150 {offsets = [0, 256], sizes = [8, 128], strides = [1, 1]} : vector<8x512xf32> to vector<8x128xf32>
    %168 = math.tanh %167 : vector<8x128xf32>
    %169 = vector.extract_strided_slice %150 {offsets = [0, 384], sizes = [8, 128], strides = [1, 1]} : vector<8x512xf32> to vector<8x128xf32>
    %cst_66 = arith.constant 0.000000e+00 : f32
    %170 = vector.broadcast %cst_66 : f32 to vector<8x128xf32>
    %171 = arith.subf %170, %169 : vector<8x128xf32>
    %172 = math.exp %171 : vector<8x128xf32>
    %cst_67 = arith.constant 1.000000e+00 : f32
    %173 = vector.broadcast %cst_67 : f32 to vector<8x128xf32>
    %174 = arith.addf %173, %172 : vector<8x128xf32>
    %cst_68 = arith.constant 1.000000e+00 : f32
    %175 = vector.broadcast %cst_68 : f32 to vector<8x128xf32>
    %176 = arith.divf %175, %174 : vector<8x128xf32>
    %177 = arith.mulf %166, %138 : vector<8x128xf32>
    %178 = arith.mulf %158, %168 : vector<8x128xf32>
    %179 = arith.addf %177, %178 : vector<8x128xf32>
    %180 = math.tanh %179 : vector<8x128xf32>
    %181 = arith.mulf %176, %180 : vector<8x128xf32>
    %182 = vector.broadcast %143 : i32 to vector<8x1xi32>
    %183 = arith.cmpi slt, %182, %7 : vector<8x1xi32>
    %cst_69 = arith.constant 0.000000e+00 : f32
    %184 = vector.shape_cast %183 : vector<8x1xi1> to vector<8x1xi1>
    %185 = vector.broadcast %184 : vector<8x1xi1> to vector<8x128xi1>
    %186 = vector.broadcast %cst_69 : f32 to vector<8x128xf32>
    %187 = arith.select %185, %181, %186 : vector<8x128xi1>, vector<8x128xf32>
    %188 = arith.index_cast %145 : i32 to index
    %c0_70 = arith.constant 0 : index
    %189 = vector.load %arg9[%188, %c0_70] : memref<64x128xf32, #tpu.memory_space<vmem>>, vector<8x128xf32>
    tpu.vector_store %arg9[%188, %c0_70], %187 {strides = array<i32>} : memref<64x128xf32, #tpu.memory_space<vmem>>, vector<8x128xf32>,
    %190 = vector.shape_cast %183 : vector<8x1xi1> to vector<8x1xi1>
    %191 = vector.broadcast %190 : vector<8x1xi1> to vector<8x128xi1>
    %192 = arith.select %191, %181, %135 : vector<8x128xi1>, vector<8x128xf32>
    %193 = vector.shape_cast %183 : vector<8x1xi1> to vector<8x1xi1>
    %194 = vector.broadcast %193 : vector<8x1xi1> to vector<8x128xi1>
    %195 = arith.select %194, %179, %138 : vector<8x128xi1>, vector<8x128xf32>
    %c3_i32 = arith.constant 3 : i32
    %c2_i32_71 = arith.constant 2 : i32
    %196 = arith.muli %c2_i32_71, %c3_i32 : i32
    %c7_i32_72 = arith.constant 7 : i32
    %197 = arith.subi %c7_i32_72, %196 : i32
    %198 = arith.muli %arg0, %197 : i32
    %199 = arith.addi %c3_i32, %198 : i32
    %200 = arith.addi %20, %199 : i32
    %c8_i32_73 = arith.constant 8 : i32
    %201 = arith.muli %199, %c8_i32_73 : i32
    %202 = tpu.assume_multiple %201, 8 : i32
    %203 = arith.index_cast %202 : i32 to index
    %c0_74 = arith.constant 0 : index
    %204 = vector.load %arg12[%203, %c0_74] : memref<64x512xf32, #tpu.memory_space<vmem>>, vector<8x512xf32>
    %205 = arith.truncf %192 : vector<8x128xf32> to vector<8x128xbf16>
    %cst_75 = arith.constant dense<0.000000e+00> : vector<8x512xf32>
    %206 = tpu.matmul %205, %6, %cst_75 {dimension_numbers = #tpu.dot_dimension_numbers<[1], [0], [0], [1], [0, 0, 1, 1], [], []>} : vector<8x128xbf16>, vector<128x512xbf16>, vector<8x512xf32> -> vector<8x512xf32>
    %207 = arith.addf %204, %206 : vector<8x512xf32>
    %208 = vector.extract_strided_slice %207 {offsets = [0, 0], sizes = [8, 128], strides = [1, 1]} : vector<8x512xf32> to vector<8x128xf32>
    %cst_76 = arith.constant 0.000000e+00 : f32
    %209 = vector.broadcast %cst_76 : f32 to vector<8x128xf32>
    %210 = arith.subf %209, %208 : vector<8x128xf32>
    %211 = math.exp %210 : vector<8x128xf32>
    %cst_77 = arith.constant 1.000000e+00 : f32
    %212 = vector.broadcast %cst_77 : f32 to vector<8x128xf32>
    %213 = arith.addf %212, %211 : vector<8x128xf32>
    %cst_78 = arith.constant 1.000000e+00 : f32
    %214 = vector.broadcast %cst_78 : f32 to vector<8x128xf32>
    %215 = arith.divf %214, %213 : vector<8x128xf32>
    %216 = vector.extract_strided_slice %207 {offsets = [0, 128], sizes = [8, 128], strides = [1, 1]} : vector<8x512xf32> to vector<8x128xf32>
    %cst_79 = arith.constant 0.000000e+00 : f32
    %217 = vector.broadcast %cst_79 : f32 to vector<8x128xf32>
    %218 = arith.subf %217, %216 : vector<8x128xf32>
    %219 = math.exp %218 : vector<8x128xf32>
    %cst_80 = arith.constant 1.000000e+00 : f32
    %220 = vector.broadcast %cst_80 : f32 to vector<8x128xf32>
    %221 = arith.addf %220, %219 : vector<8x128xf32>
    %cst_81 = arith.constant 1.000000e+00 : f32
    %222 = vector.broadcast %cst_81 : f32 to vector<8x128xf32>
    %223 = arith.divf %222, %221 : vector<8x128xf32>
    %224 = vector.extract_strided_slice %207 {offsets = [0, 256], sizes = [8, 128], strides = [1, 1]} : vector<8x512xf32> to vector<8x128xf32>
    %225 = math.tanh %224 : vector<8x128xf32>
    %226 = vector.extract_strided_slice %207 {offsets = [0, 384], sizes = [8, 128], strides = [1, 1]} : vector<8x512xf32> to vector<8x128xf32>
    %cst_82 = arith.constant 0.000000e+00 : f32
    %227 = vector.broadcast %cst_82 : f32 to vector<8x128xf32>
    %228 = arith.subf %227, %226 : vector<8x128xf32>
    %229 = math.exp %228 : vector<8x128xf32>
    %cst_83 = arith.constant 1.000000e+00 : f32
    %230 = vector.broadcast %cst_83 : f32 to vector<8x128xf32>
    %231 = arith.addf %230, %229 : vector<8x128xf32>
    %cst_84 = arith.constant 1.000000e+00 : f32
    %232 = vector.broadcast %cst_84 : f32 to vector<8x128xf32>
    %233 = arith.divf %232, %231 : vector<8x128xf32>
    %234 = arith.mulf %223, %195 : vector<8x128xf32>
    %235 = arith.mulf %215, %225 : vector<8x128xf32>
    %236 = arith.addf %234, %235 : vector<8x128xf32>
    %237 = math.tanh %236 : vector<8x128xf32>
    %238 = arith.mulf %233, %237 : vector<8x128xf32>
    %239 = vector.broadcast %200 : i32 to vector<8x1xi32>
    %240 = arith.cmpi slt, %239, %7 : vector<8x1xi32>
    %cst_85 = arith.constant 0.000000e+00 : f32
    %241 = vector.shape_cast %240 : vector<8x1xi1> to vector<8x1xi1>
    %242 = vector.broadcast %241 : vector<8x1xi1> to vector<8x128xi1>
    %243 = vector.broadcast %cst_85 : f32 to vector<8x128xf32>
    %244 = arith.select %242, %238, %243 : vector<8x128xi1>, vector<8x128xf32>
    %245 = arith.index_cast %202 : i32 to index
    %c0_86 = arith.constant 0 : index
    %246 = vector.load %arg9[%245, %c0_86] : memref<64x128xf32, #tpu.memory_space<vmem>>, vector<8x128xf32>
    tpu.vector_store %arg9[%245, %c0_86], %244 {strides = array<i32>} : memref<64x128xf32, #tpu.memory_space<vmem>>, vector<8x128xf32>,
    %247 = vector.shape_cast %240 : vector<8x1xi1> to vector<8x1xi1>
    %248 = vector.broadcast %247 : vector<8x1xi1> to vector<8x128xi1>
    %249 = arith.select %248, %238, %192 : vector<8x128xi1>, vector<8x128xf32>
    %250 = vector.shape_cast %240 : vector<8x1xi1> to vector<8x1xi1>
    %251 = vector.broadcast %250 : vector<8x1xi1> to vector<8x128xi1>
    %252 = arith.select %251, %236, %195 : vector<8x128xi1>, vector<8x128xf32>
    %c4_i32 = arith.constant 4 : i32
    %c2_i32_87 = arith.constant 2 : i32
    %253 = arith.muli %c2_i32_87, %c4_i32 : i32
    %c7_i32_88 = arith.constant 7 : i32
    %254 = arith.subi %c7_i32_88, %253 : i32
    %255 = arith.muli %arg0, %254 : i32
    %256 = arith.addi %c4_i32, %255 : i32
    %257 = arith.addi %20, %256 : i32
    %c8_i32_89 = arith.constant 8 : i32
    %258 = arith.muli %256, %c8_i32_89 : i32
    %259 = tpu.assume_multiple %258, 8 : i32
    %260 = arith.index_cast %259 : i32 to index
    %c0_90 = arith.constant 0 : index
    %261 = vector.load %arg12[%260, %c0_90] : memref<64x512xf32, #tpu.memory_space<vmem>>, vector<8x512xf32>
    %262 = arith.truncf %249 : vector<8x128xf32> to vector<8x128xbf16>
    %cst_91 = arith.constant dense<0.000000e+00> : vector<8x512xf32>
    %263 = tpu.matmul %262, %6, %cst_91 {dimension_numbers = #tpu.dot_dimension_numbers<[1], [0], [0], [1], [0, 0, 1, 1], [], []>} : vector<8x128xbf16>, vector<128x512xbf16>, vector<8x512xf32> -> vector<8x512xf32>
    %264 = arith.addf %261, %263 : vector<8x512xf32>
    %265 = vector.extract_strided_slice %264 {offsets = [0, 0], sizes = [8, 128], strides = [1, 1]} : vector<8x512xf32> to vector<8x128xf32>
    %cst_92 = arith.constant 0.000000e+00 : f32
    %266 = vector.broadcast %cst_92 : f32 to vector<8x128xf32>
    %267 = arith.subf %266, %265 : vector<8x128xf32>
    %268 = math.exp %267 : vector<8x128xf32>
    %cst_93 = arith.constant 1.000000e+00 : f32
    %269 = vector.broadcast %cst_93 : f32 to vector<8x128xf32>
    %270 = arith.addf %269, %268 : vector<8x128xf32>
    %cst_94 = arith.constant 1.000000e+00 : f32
    %271 = vector.broadcast %cst_94 : f32 to vector<8x128xf32>
    %272 = arith.divf %271, %270 : vector<8x128xf32>
    %273 = vector.extract_strided_slice %264 {offsets = [0, 128], sizes = [8, 128], strides = [1, 1]} : vector<8x512xf32> to vector<8x128xf32>
    %cst_95 = arith.constant 0.000000e+00 : f32
    %274 = vector.broadcast %cst_95 : f32 to vector<8x128xf32>
    %275 = arith.subf %274, %273 : vector<8x128xf32>
    %276 = math.exp %275 : vector<8x128xf32>
    %cst_96 = arith.constant 1.000000e+00 : f32
    %277 = vector.broadcast %cst_96 : f32 to vector<8x128xf32>
    %278 = arith.addf %277, %276 : vector<8x128xf32>
    %cst_97 = arith.constant 1.000000e+00 : f32
    %279 = vector.broadcast %cst_97 : f32 to vector<8x128xf32>
    %280 = arith.divf %279, %278 : vector<8x128xf32>
    %281 = vector.extract_strided_slice %264 {offsets = [0, 256], sizes = [8, 128], strides = [1, 1]} : vector<8x512xf32> to vector<8x128xf32>
    %282 = math.tanh %281 : vector<8x128xf32>
    %283 = vector.extract_strided_slice %264 {offsets = [0, 384], sizes = [8, 128], strides = [1, 1]} : vector<8x512xf32> to vector<8x128xf32>
    %cst_98 = arith.constant 0.000000e+00 : f32
    %284 = vector.broadcast %cst_98 : f32 to vector<8x128xf32>
    %285 = arith.subf %284, %283 : vector<8x128xf32>
    %286 = math.exp %285 : vector<8x128xf32>
    %cst_99 = arith.constant 1.000000e+00 : f32
    %287 = vector.broadcast %cst_99 : f32 to vector<8x128xf32>
    %288 = arith.addf %287, %286 : vector<8x128xf32>
    %cst_100 = arith.constant 1.000000e+00 : f32
    %289 = vector.broadcast %cst_100 : f32 to vector<8x128xf32>
    %290 = arith.divf %289, %288 : vector<8x128xf32>
    %291 = arith.mulf %280, %252 : vector<8x128xf32>
    %292 = arith.mulf %272, %282 : vector<8x128xf32>
    %293 = arith.addf %291, %292 : vector<8x128xf32>
    %294 = math.tanh %293 : vector<8x128xf32>
    %295 = arith.mulf %290, %294 : vector<8x128xf32>
    %296 = vector.broadcast %257 : i32 to vector<8x1xi32>
    %297 = arith.cmpi slt, %296, %7 : vector<8x1xi32>
    %cst_101 = arith.constant 0.000000e+00 : f32
    %298 = vector.shape_cast %297 : vector<8x1xi1> to vector<8x1xi1>
    %299 = vector.broadcast %298 : vector<8x1xi1> to vector<8x128xi1>
    %300 = vector.broadcast %cst_101 : f32 to vector<8x128xf32>
    %301 = arith.select %299, %295, %300 : vector<8x128xi1>, vector<8x128xf32>
    %302 = arith.index_cast %259 : i32 to index
    %c0_102 = arith.constant 0 : index
    %303 = vector.load %arg9[%302, %c0_102] : memref<64x128xf32, #tpu.memory_space<vmem>>, vector<8x128xf32>
    tpu.vector_store %arg9[%302, %c0_102], %301 {strides = array<i32>} : memref<64x128xf32, #tpu.memory_space<vmem>>, vector<8x128xf32>,
    %304 = vector.shape_cast %297 : vector<8x1xi1> to vector<8x1xi1>
    %305 = vector.broadcast %304 : vector<8x1xi1> to vector<8x128xi1>
    %306 = arith.select %305, %295, %249 : vector<8x128xi1>, vector<8x128xf32>
    %307 = vector.shape_cast %297 : vector<8x1xi1> to vector<8x1xi1>
    %308 = vector.broadcast %307 : vector<8x1xi1> to vector<8x128xi1>
    %309 = arith.select %308, %293, %252 : vector<8x128xi1>, vector<8x128xf32>
    %c5_i32 = arith.constant 5 : i32
    %c2_i32_103 = arith.constant 2 : i32
    %310 = arith.muli %c2_i32_103, %c5_i32 : i32
    %c7_i32_104 = arith.constant 7 : i32
    %311 = arith.subi %c7_i32_104, %310 : i32
    %312 = arith.muli %arg0, %311 : i32
    %313 = arith.addi %c5_i32, %312 : i32
    %314 = arith.addi %20, %313 : i32
    %c8_i32_105 = arith.constant 8 : i32
    %315 = arith.muli %313, %c8_i32_105 : i32
    %316 = tpu.assume_multiple %315, 8 : i32
    %317 = arith.index_cast %316 : i32 to index
    %c0_106 = arith.constant 0 : index
    %318 = vector.load %arg12[%317, %c0_106] : memref<64x512xf32, #tpu.memory_space<vmem>>, vector<8x512xf32>
    %319 = arith.truncf %306 : vector<8x128xf32> to vector<8x128xbf16>
    %cst_107 = arith.constant dense<0.000000e+00> : vector<8x512xf32>
    %320 = tpu.matmul %319, %6, %cst_107 {dimension_numbers = #tpu.dot_dimension_numbers<[1], [0], [0], [1], [0, 0, 1, 1], [], []>} : vector<8x128xbf16>, vector<128x512xbf16>, vector<8x512xf32> -> vector<8x512xf32>
    %321 = arith.addf %318, %320 : vector<8x512xf32>
    %322 = vector.extract_strided_slice %321 {offsets = [0, 0], sizes = [8, 128], strides = [1, 1]} : vector<8x512xf32> to vector<8x128xf32>
    %cst_108 = arith.constant 0.000000e+00 : f32
    %323 = vector.broadcast %cst_108 : f32 to vector<8x128xf32>
    %324 = arith.subf %323, %322 : vector<8x128xf32>
    %325 = math.exp %324 : vector<8x128xf32>
    %cst_109 = arith.constant 1.000000e+00 : f32
    %326 = vector.broadcast %cst_109 : f32 to vector<8x128xf32>
    %327 = arith.addf %326, %325 : vector<8x128xf32>
    %cst_110 = arith.constant 1.000000e+00 : f32
    %328 = vector.broadcast %cst_110 : f32 to vector<8x128xf32>
    %329 = arith.divf %328, %327 : vector<8x128xf32>
    %330 = vector.extract_strided_slice %321 {offsets = [0, 128], sizes = [8, 128], strides = [1, 1]} : vector<8x512xf32> to vector<8x128xf32>
    %cst_111 = arith.constant 0.000000e+00 : f32
    %331 = vector.broadcast %cst_111 : f32 to vector<8x128xf32>
    %332 = arith.subf %331, %330 : vector<8x128xf32>
    %333 = math.exp %332 : vector<8x128xf32>
    %cst_112 = arith.constant 1.000000e+00 : f32
    %334 = vector.broadcast %cst_112 : f32 to vector<8x128xf32>
    %335 = arith.addf %334, %333 : vector<8x128xf32>
    %cst_113 = arith.constant 1.000000e+00 : f32
    %336 = vector.broadcast %cst_113 : f32 to vector<8x128xf32>
    %337 = arith.divf %336, %335 : vector<8x128xf32>
    %338 = vector.extract_strided_slice %321 {offsets = [0, 256], sizes = [8, 128], strides = [1, 1]} : vector<8x512xf32> to vector<8x128xf32>
    %339 = math.tanh %338 : vector<8x128xf32>
    %340 = vector.extract_strided_slice %321 {offsets = [0, 384], sizes = [8, 128], strides = [1, 1]} : vector<8x512xf32> to vector<8x128xf32>
    %cst_114 = arith.constant 0.000000e+00 : f32
    %341 = vector.broadcast %cst_114 : f32 to vector<8x128xf32>
    %342 = arith.subf %341, %340 : vector<8x128xf32>
    %343 = math.exp %342 : vector<8x128xf32>
    %cst_115 = arith.constant 1.000000e+00 : f32
    %344 = vector.broadcast %cst_115 : f32 to vector<8x128xf32>
    %345 = arith.addf %344, %343 : vector<8x128xf32>
    %cst_116 = arith.constant 1.000000e+00 : f32
    %346 = vector.broadcast %cst_116 : f32 to vector<8x128xf32>
    %347 = arith.divf %346, %345 : vector<8x128xf32>
    %348 = arith.mulf %337, %309 : vector<8x128xf32>
    %349 = arith.mulf %329, %339 : vector<8x128xf32>
    %350 = arith.addf %348, %349 : vector<8x128xf32>
    %351 = math.tanh %350 : vector<8x128xf32>
    %352 = arith.mulf %347, %351 : vector<8x128xf32>
    %353 = vector.broadcast %314 : i32 to vector<8x1xi32>
    %354 = arith.cmpi slt, %353, %7 : vector<8x1xi32>
    %cst_117 = arith.constant 0.000000e+00 : f32
    %355 = vector.shape_cast %354 : vector<8x1xi1> to vector<8x1xi1>
    %356 = vector.broadcast %355 : vector<8x1xi1> to vector<8x128xi1>
    %357 = vector.broadcast %cst_117 : f32 to vector<8x128xf32>
    %358 = arith.select %356, %352, %357 : vector<8x128xi1>, vector<8x128xf32>
    %359 = arith.index_cast %316 : i32 to index
    %c0_118 = arith.constant 0 : index
    %360 = vector.load %arg9[%359, %c0_118] : memref<64x128xf32, #tpu.memory_space<vmem>>, vector<8x128xf32>
    tpu.vector_store %arg9[%359, %c0_118], %358 {strides = array<i32>} : memref<64x128xf32, #tpu.memory_space<vmem>>, vector<8x128xf32>,
    %361 = vector.shape_cast %354 : vector<8x1xi1> to vector<8x1xi1>
    %362 = vector.broadcast %361 : vector<8x1xi1> to vector<8x128xi1>
    %363 = arith.select %362, %352, %306 : vector<8x128xi1>, vector<8x128xf32>
    %364 = vector.shape_cast %354 : vector<8x1xi1> to vector<8x1xi1>
    %365 = vector.broadcast %364 : vector<8x1xi1> to vector<8x128xi1>
    %366 = arith.select %365, %350, %309 : vector<8x128xi1>, vector<8x128xf32>
    %c6_i32 = arith.constant 6 : i32
    %c2_i32_119 = arith.constant 2 : i32
    %367 = arith.muli %c2_i32_119, %c6_i32 : i32
    %c7_i32_120 = arith.constant 7 : i32
    %368 = arith.subi %c7_i32_120, %367 : i32
    %369 = arith.muli %arg0, %368 : i32
    %370 = arith.addi %c6_i32, %369 : i32
    %371 = arith.addi %20, %370 : i32
    %c8_i32_121 = arith.constant 8 : i32
    %372 = arith.muli %370, %c8_i32_121 : i32
    %373 = tpu.assume_multiple %372, 8 : i32
    %374 = arith.index_cast %373 : i32 to index
    %c0_122 = arith.constant 0 : index
    %375 = vector.load %arg12[%374, %c0_122] : memref<64x512xf32, #tpu.memory_space<vmem>>, vector<8x512xf32>
    %376 = arith.truncf %363 : vector<8x128xf32> to vector<8x128xbf16>
    %cst_123 = arith.constant dense<0.000000e+00> : vector<8x512xf32>
    %377 = tpu.matmul %376, %6, %cst_123 {dimension_numbers = #tpu.dot_dimension_numbers<[1], [0], [0], [1], [0, 0, 1, 1], [], []>} : vector<8x128xbf16>, vector<128x512xbf16>, vector<8x512xf32> -> vector<8x512xf32>
    %378 = arith.addf %375, %377 : vector<8x512xf32>
    %379 = vector.extract_strided_slice %378 {offsets = [0, 0], sizes = [8, 128], strides = [1, 1]} : vector<8x512xf32> to vector<8x128xf32>
    %cst_124 = arith.constant 0.000000e+00 : f32
    %380 = vector.broadcast %cst_124 : f32 to vector<8x128xf32>
    %381 = arith.subf %380, %379 : vector<8x128xf32>
    %382 = math.exp %381 : vector<8x128xf32>
    %cst_125 = arith.constant 1.000000e+00 : f32
    %383 = vector.broadcast %cst_125 : f32 to vector<8x128xf32>
    %384 = arith.addf %383, %382 : vector<8x128xf32>
    %cst_126 = arith.constant 1.000000e+00 : f32
    %385 = vector.broadcast %cst_126 : f32 to vector<8x128xf32>
    %386 = arith.divf %385, %384 : vector<8x128xf32>
    %387 = vector.extract_strided_slice %378 {offsets = [0, 128], sizes = [8, 128], strides = [1, 1]} : vector<8x512xf32> to vector<8x128xf32>
    %cst_127 = arith.constant 0.000000e+00 : f32
    %388 = vector.broadcast %cst_127 : f32 to vector<8x128xf32>
    %389 = arith.subf %388, %387 : vector<8x128xf32>
    %390 = math.exp %389 : vector<8x128xf32>
    %cst_128 = arith.constant 1.000000e+00 : f32
    %391 = vector.broadcast %cst_128 : f32 to vector<8x128xf32>
    %392 = arith.addf %391, %390 : vector<8x128xf32>
    %cst_129 = arith.constant 1.000000e+00 : f32
    %393 = vector.broadcast %cst_129 : f32 to vector<8x128xf32>
    %394 = arith.divf %393, %392 : vector<8x128xf32>
    %395 = vector.extract_strided_slice %378 {offsets = [0, 256], sizes = [8, 128], strides = [1, 1]} : vector<8x512xf32> to vector<8x128xf32>
    %396 = math.tanh %395 : vector<8x128xf32>
    %397 = vector.extract_strided_slice %378 {offsets = [0, 384], sizes = [8, 128], strides = [1, 1]} : vector<8x512xf32> to vector<8x128xf32>
    %cst_130 = arith.constant 0.000000e+00 : f32
    %398 = vector.broadcast %cst_130 : f32 to vector<8x128xf32>
    %399 = arith.subf %398, %397 : vector<8x128xf32>
    %400 = math.exp %399 : vector<8x128xf32>
    %cst_131 = arith.constant 1.000000e+00 : f32
    %401 = vector.broadcast %cst_131 : f32 to vector<8x128xf32>
    %402 = arith.addf %401, %400 : vector<8x128xf32>
    %cst_132 = arith.constant 1.000000e+00 : f32
    %403 = vector.broadcast %cst_132 : f32 to vector<8x128xf32>
    %404 = arith.divf %403, %402 : vector<8x128xf32>
    %405 = arith.mulf %394, %366 : vector<8x128xf32>
    %406 = arith.mulf %386, %396 : vector<8x128xf32>
    %407 = arith.addf %405, %406 : vector<8x128xf32>
    %408 = math.tanh %407 : vector<8x128xf32>
    %409 = arith.mulf %404, %408 : vector<8x128xf32>
    %410 = vector.broadcast %371 : i32 to vector<8x1xi32>
    %411 = arith.cmpi slt, %410, %7 : vector<8x1xi32>
    %cst_133 = arith.constant 0.000000e+00 : f32
    %412 = vector.shape_cast %411 : vector<8x1xi1> to vector<8x1xi1>
    %413 = vector.broadcast %412 : vector<8x1xi1> to vector<8x128xi1>
    %414 = vector.broadcast %cst_133 : f32 to vector<8x128xf32>
    %415 = arith.select %413, %409, %414 : vector<8x128xi1>, vector<8x128xf32>
    %416 = arith.index_cast %373 : i32 to index
    %c0_134 = arith.constant 0 : index
    %417 = vector.load %arg9[%416, %c0_134] : memref<64x128xf32, #tpu.memory_space<vmem>>, vector<8x128xf32>
    tpu.vector_store %arg9[%416, %c0_134], %415 {strides = array<i32>} : memref<64x128xf32, #tpu.memory_space<vmem>>, vector<8x128xf32>,
    %418 = vector.shape_cast %411 : vector<8x1xi1> to vector<8x1xi1>
    %419 = vector.broadcast %418 : vector<8x1xi1> to vector<8x128xi1>
    %420 = arith.select %419, %409, %363 : vector<8x128xi1>, vector<8x128xf32>
    %421 = vector.shape_cast %411 : vector<8x1xi1> to vector<8x1xi1>
    %422 = vector.broadcast %421 : vector<8x1xi1> to vector<8x128xi1>
    %423 = arith.select %422, %407, %366 : vector<8x128xi1>, vector<8x128xf32>
    %c7_i32_135 = arith.constant 7 : i32
    %c2_i32_136 = arith.constant 2 : i32
    %424 = arith.muli %c2_i32_136, %c7_i32_135 : i32
    %c7_i32_137 = arith.constant 7 : i32
    %425 = arith.subi %c7_i32_137, %424 : i32
    %426 = arith.muli %arg0, %425 : i32
    %427 = arith.addi %c7_i32_135, %426 : i32
    %428 = arith.addi %20, %427 : i32
    %c8_i32_138 = arith.constant 8 : i32
    %429 = arith.muli %427, %c8_i32_138 : i32
    %430 = tpu.assume_multiple %429, 8 : i32
    %431 = arith.index_cast %430 : i32 to index
    %c0_139 = arith.constant 0 : index
    %432 = vector.load %arg12[%431, %c0_139] : memref<64x512xf32, #tpu.memory_space<vmem>>, vector<8x512xf32>
    %433 = arith.truncf %420 : vector<8x128xf32> to vector<8x128xbf16>
    %cst_140 = arith.constant dense<0.000000e+00> : vector<8x512xf32>
    %434 = tpu.matmul %433, %6, %cst_140 {dimension_numbers = #tpu.dot_dimension_numbers<[1], [0], [0], [1], [0, 0, 1, 1], [], []>} : vector<8x128xbf16>, vector<128x512xbf16>, vector<8x512xf32> -> vector<8x512xf32>
    %435 = arith.addf %432, %434 : vector<8x512xf32>
    %436 = vector.extract_strided_slice %435 {offsets = [0, 0], sizes = [8, 128], strides = [1, 1]} : vector<8x512xf32> to vector<8x128xf32>
    %cst_141 = arith.constant 0.000000e+00 : f32
    %437 = vector.broadcast %cst_141 : f32 to vector<8x128xf32>
    %438 = arith.subf %437, %436 : vector<8x128xf32>
    %439 = math.exp %438 : vector<8x128xf32>
    %cst_142 = arith.constant 1.000000e+00 : f32
    %440 = vector.broadcast %cst_142 : f32 to vector<8x128xf32>
    %441 = arith.addf %440, %439 : vector<8x128xf32>
    %cst_143 = arith.constant 1.000000e+00 : f32
    %442 = vector.broadcast %cst_143 : f32 to vector<8x128xf32>
    %443 = arith.divf %442, %441 : vector<8x128xf32>
    %444 = vector.extract_strided_slice %435 {offsets = [0, 128], sizes = [8, 128], strides = [1, 1]} : vector<8x512xf32> to vector<8x128xf32>
    %cst_144 = arith.constant 0.000000e+00 : f32
    %445 = vector.broadcast %cst_144 : f32 to vector<8x128xf32>
    %446 = arith.subf %445, %444 : vector<8x128xf32>
    %447 = math.exp %446 : vector<8x128xf32>
    %cst_145 = arith.constant 1.000000e+00 : f32
    %448 = vector.broadcast %cst_145 : f32 to vector<8x128xf32>
    %449 = arith.addf %448, %447 : vector<8x128xf32>
    %cst_146 = arith.constant 1.000000e+00 : f32
    %450 = vector.broadcast %cst_146 : f32 to vector<8x128xf32>
    %451 = arith.divf %450, %449 : vector<8x128xf32>
    %452 = vector.extract_strided_slice %435 {offsets = [0, 256], sizes = [8, 128], strides = [1, 1]} : vector<8x512xf32> to vector<8x128xf32>
    %453 = math.tanh %452 : vector<8x128xf32>
    %454 = vector.extract_strided_slice %435 {offsets = [0, 384], sizes = [8, 128], strides = [1, 1]} : vector<8x512xf32> to vector<8x128xf32>
    %cst_147 = arith.constant 0.000000e+00 : f32
    %455 = vector.broadcast %cst_147 : f32 to vector<8x128xf32>
    %456 = arith.subf %455, %454 : vector<8x128xf32>
    %457 = math.exp %456 : vector<8x128xf32>
    %cst_148 = arith.constant 1.000000e+00 : f32
    %458 = vector.broadcast %cst_148 : f32 to vector<8x128xf32>
    %459 = arith.addf %458, %457 : vector<8x128xf32>
    %cst_149 = arith.constant 1.000000e+00 : f32
    %460 = vector.broadcast %cst_149 : f32 to vector<8x128xf32>
    %461 = arith.divf %460, %459 : vector<8x128xf32>
    %462 = arith.mulf %451, %423 : vector<8x128xf32>
    %463 = arith.mulf %443, %453 : vector<8x128xf32>
    %464 = arith.addf %462, %463 : vector<8x128xf32>
    %465 = math.tanh %464 : vector<8x128xf32>
    %466 = arith.mulf %461, %465 : vector<8x128xf32>
    %467 = vector.broadcast %428 : i32 to vector<8x1xi32>
    %468 = arith.cmpi slt, %467, %7 : vector<8x1xi32>
    %cst_150 = arith.constant 0.000000e+00 : f32
    %469 = vector.shape_cast %468 : vector<8x1xi1> to vector<8x1xi1>
    %470 = vector.broadcast %469 : vector<8x1xi1> to vector<8x128xi1>
    %471 = vector.broadcast %cst_150 : f32 to vector<8x128xf32>
    %472 = arith.select %470, %466, %471 : vector<8x128xi1>, vector<8x128xf32>
    %473 = arith.index_cast %430 : i32 to index
    %c0_151 = arith.constant 0 : index
    %474 = vector.load %arg9[%473, %c0_151] : memref<64x128xf32, #tpu.memory_space<vmem>>, vector<8x128xf32>
    tpu.vector_store %arg9[%473, %c0_151], %472 {strides = array<i32>} : memref<64x128xf32, #tpu.memory_space<vmem>>, vector<8x128xf32>,
    %475 = vector.shape_cast %468 : vector<8x1xi1> to vector<8x1xi1>
    %476 = vector.broadcast %475 : vector<8x1xi1> to vector<8x128xi1>
    %477 = arith.select %476, %466, %420 : vector<8x128xi1>, vector<8x128xf32>
    %478 = vector.shape_cast %468 : vector<8x1xi1> to vector<8x1xi1>
    %479 = vector.broadcast %478 : vector<8x1xi1> to vector<8x128xi1>
    %480 = arith.select %479, %464, %423 : vector<8x128xi1>, vector<8x128xf32>
    %c8_i32_152 = arith.constant 8 : i32
    %c0_153 = arith.constant 0 : index
    %c0_154 = arith.constant 0 : index
    %c0_155 = arith.constant 0 : index
    %481 = vector.load %arg10[%c0_153, %c0_154, %c0_155] : memref<1x8x128xf32, #tpu.memory_space<vmem>>, vector<1x8x128xf32>
    %482 = vector.shape_cast %481 : vector<1x8x128xf32> to vector<8x128xf32>
    %483 = vector.shape_cast %477 : vector<8x128xf32> to vector<1x8x128xf32>
    tpu.vector_store %arg10[%c0_153, %c0_154, %c0_155], %483 {strides = array<i32>} : memref<1x8x128xf32, #tpu.memory_space<vmem>>, vector<1x8x128xf32>,
    %c0_156 = arith.constant 0 : index
    %c0_157 = arith.constant 0 : index
    %c0_158 = arith.constant 0 : index
    %484 = vector.load %arg11[%c0_156, %c0_157, %c0_158] : memref<1x8x128xf32, #tpu.memory_space<vmem>>, vector<1x8x128xf32>
    %485 = vector.shape_cast %484 : vector<1x8x128xf32> to vector<8x128xf32>
    %486 = vector.shape_cast %480 : vector<8x128xf32> to vector<1x8x128xf32>
    tpu.vector_store %arg11[%c0_156, %c0_157, %c0_158], %486 {strides = array<i32>} : memref<1x8x128xf32, #tpu.memory_space<vmem>>, vector<1x8x128xf32>,
    return
  }
  func.func @transform_0(%arg0: i32, %arg1: i32) -> (i32, i32) {
    %c0_i32 = arith.constant 0 : i32
    %c0_i32_0 = arith.constant 0 : i32
    %c0_i32_1 = arith.constant 0 : i32
    return %c0_i32, %c0_i32_0 : i32, i32
  }
  func.func @transform_1(%arg0: i32, %arg1: i32) -> (i32, i32) {
    %c2_i32 = arith.constant 2 : i32
    %0 = arith.muli %c2_i32, %arg1 : i32
    %c1_i32 = arith.constant 1 : i32
    %1 = arith.subi %c1_i32, %0 : i32
    %2 = arith.muli %arg0, %1 : i32
    %3 = arith.addi %arg1, %2 : i32
    %c0_i32 = arith.constant 0 : i32
    %c0_i32_0 = arith.constant 0 : i32
    return %3, %c0_i32 : i32, i32
  }
  func.func @transform_2(%arg0: i32, %arg1: i32) -> (i32, i32, i32) {
    %c0_i32 = arith.constant 0 : i32
    %c0_i32_0 = arith.constant 0 : i32
    %c0_i32_1 = arith.constant 0 : i32
    return %arg0, %c0_i32, %c0_i32_0 : i32, i32, i32
  }
  func.func @transform_3(%arg0: i32, %arg1: i32) -> (i32, i32, i32) {
    %c0_i32 = arith.constant 0 : i32
    %c0_i32_0 = arith.constant 0 : i32
    %c0_i32_1 = arith.constant 0 : i32
    return %arg0, %c0_i32, %c0_i32_0 : i32, i32, i32
  }
  func.func @transform_4(%arg0: i32, %arg1: i32) -> (i32, i32, i32) {
    %c0_i32 = arith.constant 0 : i32
    %c0_i32_0 = arith.constant 0 : i32
    %c0_i32_1 = arith.constant 0 : i32
    return %arg0, %c0_i32, %c0_i32_0 : i32, i32, i32
  }
  func.func @transform_5(%arg0: i32, %arg1: i32) -> (i32, i32, i32) {
    %c0_i32 = arith.constant 0 : i32
    %c0_i32_0 = arith.constant 0 : i32
    %c0_i32_1 = arith.constant 0 : i32
    return %arg0, %c0_i32, %c0_i32_0 : i32, i32, i32
  }
  func.func @transform_6(%arg0: i32, %arg1: i32) -> (i32, i32, i32) {
    %c0_i32 = arith.constant 0 : i32
    %c0_i32_0 = arith.constant 0 : i32
    %c0_i32_1 = arith.constant 0 : i32
    return %arg0, %c0_i32, %c0_i32_0 : i32, i32, i32
  }
  func.func @transform_7(%arg0: i32, %arg1: i32) -> (i32, i32) {
    %c2_i32 = arith.constant 2 : i32
    %0 = arith.muli %c2_i32, %arg1 : i32
    %c1_i32 = arith.constant 1 : i32
    %1 = arith.subi %c1_i32, %0 : i32
    %2 = arith.muli %arg0, %1 : i32
    %3 = arith.addi %arg1, %2 : i32
    %c0_i32 = arith.constant 0 : i32
    return %3, %arg0 : i32, i32
  }
  func.func @transform_8(%arg0: i32, %arg1: i32) -> (i32, i32, i32) {
    %c0_i32 = arith.constant 0 : i32
    %c0_i32_0 = arith.constant 0 : i32
    %c0_i32_1 = arith.constant 0 : i32
    return %arg0, %c0_i32, %c0_i32_0 : i32, i32, i32
  }
  func.func @transform_9(%arg0: i32, %arg1: i32) -> (i32, i32, i32) {
    %c0_i32 = arith.constant 0 : i32
    %c0_i32_0 = arith.constant 0 : i32
    %c0_i32_1 = arith.constant 0 : i32
    return %arg0, %c0_i32, %c0_i32_0 : i32, i32, i32
  }
}

</mosaic_0001>

<bundles_post_ra>
// kernel: hbilstm_layer_forward.5
= control target key start
LH: loop header
LB: loop body
LE: loop exit
PB: predicated region body
PF: predicated region fallthrough
CT: control target
= control target key end

     0   :  { %11 = vsyncpa [#allocation3], 0  ;;  %s2840_s0 = inlined_call_operand.hbm [shape: f32[128,128], index: 0, kind: input, shape index: {}]   ;;  %s2841_s1 = inlined_call_operand.vmem [shape: f32[128,256], index: 1, kind: input, shape index: {}]   ;;  %s2842_s2 = inlined_call_operand.hbm [shape: bf16[128,256], index: 2, kind: input, shape index: {}]   ;;  %s2843_s3 = inlined_call_operand.vmem [shape: f32[1,256], index: 3, kind: input, shape index: {}]   ;;  %s2844_s4 = inlined_call_operand.hbm [shape: bf16[256,128], index: 4, kind: input, shape index: {}]   ;;  %s2845_s5 = inlined_call_operand.vmem [shape: f32[1,128], index: 5, kind: input, shape index: {}]   ;;  %s2846_s6 = inlined_call_operand.hbm [shape: f32[128,128], index: 6, kind: output, shape index: {}]  }
   0x1   :  { %12 = vsyncpa [#allocation6], 0 }
   0x2   :  { %13 = vsyncpa [#allocation4], 0  ;;  %s33_s23 = sshll.u32 %s2842_s2, 4  ;;  %s1712_s24 = smov [#allocation5]   ;;  %s34_s23 = int_to_ptr.hbm [resolvable:$true] %s33_s23 }
   0x3   :  { %s35_s25 = sshll.u32 %s1712_s24, 4  ;;  %s18_s28 = sshll.u32 %s2840_s0, 4  ;;  %s36_s25 = int_to_ptr.vmem [resolvable:$true] %s35_s25  ;;  %s19_s28 = int_to_ptr.hbm [resolvable:$true] %s18_s28 }
   0x4   :  { %s1713_s29 = smov 128   ;;  %s1714_s30 = smov 8  }
   0x5   :  { %41 = dma.hbm_to_vmem [thread:$0]  %s34_s23, 2048, %s36_s25, [#allocation6], %s1713_s29, %s1713_s29, %s1714_s30  }
   0x6   :  { %s1715_s7 = smov [#allocation2]   ;;  %s48_s2 = sshll.u32 %s2844_s4, 4  ;;  %s49_s2 = int_to_ptr.hbm [resolvable:$true] %s48_s2 }
   0x7   :  { %s20_s8 = sshll.u32 %s1715_s7, 4  ;;  %s1716_s0 = smov [#allocation7]   ;;  %s21_s8 = int_to_ptr.vmem [resolvable:$true] %s20_s8 }
   0x8   :  { %26 = dma.hbm_to_vmem [thread:$0]  %s19_s28, 2048, %s21_s8, [#allocation3], %s1713_s29, %s1713_s29, %s1714_s30  }
   0x9   :  { %s50_s11 = sshll.u32 %s1716_s0, 4  ;;  %s1717_s12 = smov 64   ;;  %s51_s11 = int_to_ptr.vmem [resolvable:$true] %s50_s11 }
   0xa   :  { %s1718_s13 = smov 4  }
   0xb   :  { %56 = dma.hbm_to_vmem [thread:$0]  %s49_s2, 2048, %s51_s11, [#allocation6], %s1717_s12, %s1717_s12, %s1718_s13  }
   0xc   :  { %1706 = dma.done.wait [#allocation3], 2048  }
   0xd   :  { %1707 = vsyncadd [#allocation3], 4294965248 }
   0xe   :  { %1708 = dma.done.wait [#allocation6], 4096  }
   0xf   :  { %1709 = vsyncadd [#allocation6], 4294963200  ;;  %v1371_v0 = vld [vmem:[#allocation5 + $0x70] sm:$0xf]  ;;  %v1456_v1 = vld [vmem:[#allocation5 + $0x74] sm:$0xf0] }
  0x10   :  { %v1455_v2 = vld [vmem:[#allocation5 + $0x74] sm:$0xf]  ;;  %v1372_v3 = vor.u32 %v1456_v1, %v1371_v0  ;;  %v1373_v4 = vld [vmem:[#allocation5 + $0x78] sm:$0xf0]  ;;  %v1363_v5 = vld [vmem:[#allocation5 + $0x60] sm:$0xf] }
  0x11   :  { %v1454_v6 = vld [vmem:[#allocation5 + $0x64] sm:$0xf0]  ;;  %v1376_v7 = vor.u32 %v1455_v2, %v1373_v4  ;;  %v1453_v8 = vld [vmem:[#allocation5 + $0x64] sm:$0xf]  ;;  %v1365_v9 = vld [vmem:[#allocation5 + $0x68] sm:$0xf0] }
  0x12   :  { %197 = vmatpush.bf16.msra.mxu0 %v1372_v3  ;;  %v1364_v10 = vor.u32 %v1454_v6, %v1363_v5  ;;  %v1368_v11 = vor.u32 %v1453_v8, %v1365_v9  ;;  %v1355_v12 = vld [vmem:[#allocation5 + $0x50] sm:$0xf]  ;;  %v1452_v13 = vld [vmem:[#allocation5 + $0x54] sm:$0xf0]  ;;  %v1451_v14 = vld [vmem:[#allocation5 + $0x54] sm:$0xf] }
  0x13   :  { %246 = vmatpush.bf16.msra.mxu1 %v1376_v7  ;;  %v1357_v15 = vld [vmem:[#allocation5 + $0x58] sm:$0xf0]  ;;  %v1356_v16 = vor.u32 %v1452_v13, %v1355_v12  ;;  %v1347_v18 = vld [vmem:[#allocation5 + $0x40] sm:$0xf]  ;;  %v1450_v19 = vld [vmem:[#allocation5 + $0x44] sm:$0xf0] }
  0x14   :  { %v1360_v17 = vor.u32 %v1451_v14, %v1357_v15  ;;  %v1449_v20 = vld [vmem:[#allocation5 + $0x44] sm:$0xf]  ;;  %v1349_v21 = vld [vmem:[#allocation5 + $0x48] sm:$0xf0]  ;;  %v1348_v22 = vor.u32 %v1450_v19, %v1347_v18  ;;  %v1339_v24 = vld [vmem:[#allocation5 + $0x30] sm:$0xf] }
  0x15   :  { %v1352_v23 = vor.u32 %v1449_v20, %v1349_v21  ;;  %v1448_v25 = vld [vmem:[#allocation5 + $0x34] sm:$0xf0]  ;;  %v1447_v26 = vld [vmem:[#allocation5 + $0x34] sm:$0xf]  ;;  %v1341_v27 = vld [vmem:[#allocation5 + $0x38] sm:$0xf0] }
  0x16   :  { %198 = vmatpush.bf16.msra.mxu0 %v1364_v10  ;;  %v1340_v28 = vor.u32 %v1448_v25, %v1339_v24  ;;  %v1344_v29 = vor.u32 %v1447_v26, %v1341_v27  ;;  %v1331_v30 = vld [vmem:[#allocation5 + $0x20] sm:$0xf]  ;;  %v1446_v31 = vld [vmem:[#allocation5 + $0x24] sm:$0xf0]  ;;  %v1445_v32 = vld [vmem:[#allocation5 + $0x24] sm:$0xf] }
  0x17   :  { %247 = vmatpush.bf16.msra.mxu1 %v1368_v11  ;;  %v1333_v33 = vld [vmem:[#allocation5 + $0x28] sm:$0xf0]  ;;  %v1332_v34 = vor.u32 %v1446_v31, %v1331_v30  ;;  %v1323_v36 = vld [vmem:[#allocation5 + $0x10] sm:$0xf]  ;;  %v1444_v37 = vld [vmem:[#allocation5 + $0x14] sm:$0xf0] }
  0x18   :  { %v1336_v35 = vor.u32 %v1445_v32, %v1333_v33  ;;  %v1443_v38 = vld [vmem:[#allocation5 + $0x14] sm:$0xf]  ;;  %v1325_v39 = vld [vmem:[#allocation5 + $0x18] sm:$0xf0]  ;;  %v1324_v40 = vor.u32 %v1444_v37, %v1323_v36  ;;  %v1315_v42 = vld [vmem:[#allocation5] sm:$0xf] }
  0x19   :  { %v1328_v41 = vor.u32 %v1443_v38, %v1325_v39  ;;  %v1442_v43 = vld [vmem:[#allocation5 + $0x4] sm:$0xf0]  ;;  %v1441_v44 = vld [vmem:[#allocation5 + $0x4] sm:$0xf]  ;;  %v1317_v45 = vld [vmem:[#allocation5 + $0x8] sm:$0xf0] }
  0x1a   :  { %199 = vmatpush.bf16.msra.mxu0 %v1356_v16  ;;  %v1316_v46 = vor.u32 %v1442_v43, %v1315_v42  ;;  %v71_v47 = vld [vmem:[#allocation2] sm:$0xff]  ;;  %v72_v48 = vld [vmem:[#allocation2 + $0x8] sm:$0xff]  ;;  %v1320_v49 = vor.u32 %v1441_v44, %v1317_v45  ;;  %v73_v51 = vld [vmem:[#allocation2 + $0x10] sm:$0xff]  ;;  %s1299_s8 = sshll.u32 %s2846_s6, 4  ;;  %s1300_s8 = int_to_ptr.hbm [resolvable:$true] %s1299_s8 }
  0x1b   :  { %248 = vmatpush.bf16.msra.mxu1 %v1360_v17  ;;  %v87_v50 = vpack.c.bf16 %v72_v48, %v71_v47  ;;  %v74_v52 = vld [vmem:[#allocation2 + $0x18] sm:$0xff]  ;;  %v75_v54 = vld [vmem:[#allocation2 + $0x20] sm:$0xff]  ;;  %v76_v55 = vld [vmem:[#allocation2 + $0x28] sm:$0xff] }
  0x1c   :  { %v88_v53 = vpack.c.bf16 %v74_v52, %v73_v51  ;;  %v89_v56 = vpack.c.bf16 %v76_v55, %v75_v54  ;;  %v77_v57 = vld [vmem:[#allocation2 + $0x30] sm:$0xff]  ;;  %v78_v58 = vld [vmem:[#allocation2 + $0x38] sm:$0xff]  ;;  %v79_v60 = vld [vmem:[#allocation2 + $0x40] sm:$0xff] }
  0x1d   :  { %v90_v59 = vpack.c.bf16 %v78_v58, %v77_v57  ;;  %v80_v61 = vld [vmem:[#allocation2 + $0x48] sm:$0xff]  ;;  %v81_v63 = vld [vmem:[#allocation2 + $0x50] sm:$0xff]  ;;  %v82_v0 = vld [vmem:[#allocation2 + $0x58] sm:$0xff] }
  0x1e   :  { %200 = vmatpush.bf16.msra.mxu0 %v1348_v22  ;;  %v91_v62 = vpack.c.bf16 %v80_v61, %v79_v60  ;;  %v92_v1 = vpack.c.bf16 %v82_v0, %v81_v63  ;;  %v83_v2 = vld [vmem:[#allocation2 + $0x60] sm:$0xff]  ;;  %v84_v3 = vld [vmem:[#allocation2 + $0x68] sm:$0xff]  ;;  %v85_v5 = vld [vmem:[#allocation2 + $0x70] sm:$0xff] }
  0x1f   :  { %249 = vmatpush.bf16.msra.mxu1 %v1352_v23  ;;  %v93_v4 = vpack.c.bf16 %v84_v3, %v83_v2  ;;  %v86_v6 = vld [vmem:[#allocation2 + $0x78] sm:$0xff]  ;;  %v1463_v10 = vld [vmem:[#allocation7 + $0x30] sm:$0xff]  ;;  %v1462_v12 = vld [vmem:[#allocation7 + $0x28] sm:$0xff] }
  0x20   :  { %v94_v7 = vpack.c.bf16 %v86_v6, %v85_v5  ;;  %v1464_v8 = vld [vmem:[#allocation7 + $0x38] sm:$0xff]  ;;  %v1471_v11 = vld [vmem:[#allocation7 + $0x70] sm:$0xff]  ;;  %v1470_v13 = vld [vmem:[#allocation7 + $0x68] sm:$0xff] }
  0x21   :  { %v1472_v9 = vld [vmem:[#allocation7 + $0x78] sm:$0xff]  ;;  %1179 = vmatpush.bf16.msra.mxu2 %v1464_v8  ;;  %v111_v14 = vld [vmem:[%s2843_s3] sm:$0x3]  ;;  %v1810_v51 = vld [vmem:[%s2841_s1 + $0x8] sm:$0xff] }
  0x22   :  { %201 = vmatpush.bf16.msra.mxu0 %v1340_v28  ;;  %1228 = vmatpush.bf16.msra.mxu3 %v1472_v9  ;;  %v1773_v15 = vperm.slane %v111_v14, 0  ;;  %v1461_v16 = vld [vmem:[#allocation7 + $0x20] sm:$0xff]  ;;  %v1775_v17 = vperm.slane %v111_v14, 1  ;;  %v1460_v22 = vld [vmem:[#allocation7 + $0x18] sm:$0xff]  ;;  %v1459_v28 = vld [vmem:[#allocation7 + $0x10] sm:$0xff] }
  0x23   :  { %250 = vmatpush.bf16.msra.mxu1 %v1344_v29  ;;  %v1469_v18 = vld [vmem:[#allocation7 + $0x60] sm:$0xff]  ;;  %v1468_v23 = vld [vmem:[#allocation7 + $0x58] sm:$0xff]  ;;  %v1467_v29 = vld [vmem:[#allocation7 + $0x50] sm:$0xff] }
  0x24   :  { %v1465_v45 = vld [vmem:[#allocation7 + $0x40] sm:$0xff]  ;;  %v1823_v54 = vld [vmem:[%s2841_s1 + $0x18] sm:$0xff]  ;;  %v1862_v14 = vld [vmem:[%s2841_s1 + $0x28] sm:$0xff] }
  0x25   :  { %1180 = vmatpush.bf16.msra.mxu2 %v1463_v10 }
  0x26   :  { %202 = vmatpush.bf16.msra.mxu0 %v1332_v34  ;;  %1229 = vmatpush.bf16.msra.mxu3 %v1471_v11  ;;  %v1458_v34 = vld [vmem:[#allocation7 + $0x8] sm:$0xff] }
  0x27   :  { %251 = vmatpush.bf16.msra.mxu1 %v1336_v35  ;;  %v1466_v35 = vld [vmem:[#allocation7 + $0x48] sm:$0xff] }
  0x29   :  { %1181 = vmatpush.bf16.msra.mxu2 %v1462_v12 }
  0x2a   :  { %203 = vmatpush.bf16.msra.mxu0 %v1324_v40  ;;  %1230 = vmatpush.bf16.msra.mxu3 %v1470_v13 }
  0x2b   :  { %252 = vmatpush.bf16.msra.mxu1 %v1328_v41  ;;  %v1457_v41 = vld [vmem:[#allocation7] sm:$0xff] }
  0x2d   :  { %1182 = vmatpush.bf16.msra.mxu2 %v1461_v16 }
  0x2e   :  { %204 = vmatpush.bf16.msra.mxu0 %v1316_v46  ;;  %1231 = vmatpush.bf16.msra.mxu3 %v1469_v18 }
  0x2f   :  { %253 = vmatpush.bf16.msra.mxu1 %v1320_v49 }
  0x31   :  { %205 = vmatmul.bf16.vlgmr.msra.gmra.mxu0 %v87_v50  ;;  %1183 = vmatpush.bf16.msra.mxu2 %v1460_v22 }
  0x32   :  { %254 = vmatmul.bf16.vlgmr.msra.gmra.mxu1 %v87_v50  ;;  %1232 = vmatpush.bf16.msra.mxu3 %v1468_v23  ;;  %v1805_v50 = vld [vmem:[%s2841_s1] sm:$0xff] }
  0x35   :  { %1184 = vmatpush.bf16.msra.mxu2 %v1459_v28 }
  0x36   :  { %1233 = vmatpush.bf16.msra.mxu3 %v1467_v29 }
  0x39   :  { %1185 = vmatpush.bf16.msra.mxu2 %v1458_v34 }
  0x3a   :  { %1234 = vmatpush.bf16.msra.mxu3 %v1466_v35 }
  0x3d   :  { %1186 = vmatpush.bf16.msra.mxu2 %v1457_v41 }
  0x3e   :  { %1235 = vmatpush.bf16.msra.mxu3 %v1465_v45 }
  0x41   :  { %210 = vmatmul.bf16.gmra.mxu0 %v88_v53 }
  0x42   :  { %259 = vmatmul.bf16.gmra.mxu1 %v88_v53  ;;  %v1818_v53 = vld [vmem:[%s2841_s1 + $0x10] sm:$0xff] }
  0x51   :  { %215 = vmatmul.bf16.gmra.mxu0 %v89_v56 }
  0x52   :  { %264 = vmatmul.bf16.gmra.mxu1 %v89_v56 }
  0x61   :  { %220 = vmatmul.bf16.gmra.mxu0 %v90_v59 }
  0x62   :  { %269 = vmatmul.bf16.gmra.mxu1 %v90_v59 }
  0x71   :  { %225 = vmatmul.bf16.gmra.mxu0 %v91_v62 }
  0x72   :  { %274 = vmatmul.bf16.gmra.mxu1 %v91_v62  ;;  %v1835_v62 = vld [vmem:[%s2841_s1 + $0x20] sm:$0xff] }
  0x81   :  { %230 = vmatmul.bf16.gmra.mxu0 %v92_v1 }
  0x82   :  { %279 = vmatmul.bf16.gmra.mxu1 %v92_v1 }
  0x91   :  { %235 = vmatmul.bf16.gmra.mxu0 %v93_v4 }
  0x92   :  { %284 = vmatmul.bf16.gmra.mxu1 %v93_v4 }
  0xa1   :  { %240 = vmatmul.bf16.gmra.mxu0 %v94_v7 }
  0xa2   :  { %289 = vmatmul.bf16.gmra.mxu1 %v94_v7 }
  0xae   :  { %v206_v19 = vpop.f32.mrf.mxu0 }
  0xaf   :  { %v1778_v20 = vadd.f32 %v206_v19, %v1773_v15  ;;  %v255_v21 = vpop.f32.mrf.mxu1 }
  0xb0   :  { %v1781_v24 = vadd.f32 %v255_v21, %v1775_v17 }
  0xb1   :  { %v295_v25 = vsub.f32 0.0, %v1778_v20  ;;  %v935_v59 = vsub.f32 %v1805_v50, %v1778_v20 }
  0xb2   :  { %v296_v26 = vsub.f32 0.0, %v1781_v24  ;;  %v936_v60 = vsub.f32 %v1810_v51, %v1781_v24 }
  0xb3   :  { %v327_v27 = vmul.f32 1.442695, %v295_v25 }
  0xb4   :  { %v329_v30 = vmul.f32 1.442695, %v296_v26 }
  0xb5   :  { %1482 = vpow2.f32 %v327_v27 }
  0xb6   :  { %1484 = vpow2.f32 %v329_v30  ;;  %v208_v31 = vpop.f32.mrf.mxu0 }
  0xb7   :  { %v1786_v32 = vadd.f32 %v208_v31, %v1773_v15  ;;  %v257_v33 = vpop.f32.mrf.mxu1 }
  0xb8   :  { %v1789_v36 = vadd.f32 %v257_v33, %v1775_v17 }
  0xb9   :  { %v297_v37 = vsub.f32 0.0, %v1786_v32  ;;  %v937_v2 = vsub.f32 %v1818_v53, %v1786_v32 }
  0xba   :  { %v298_v38 = vsub.f32 0.0, %v1789_v36  ;;  %v938_v3 = vsub.f32 %v1823_v54, %v1789_v36  ;;  %v2017_v54 = vld [vmem:[%s2841_s1 + $0x48] sm:$0xff] }
  0xbb   :  { %v1483_v39 = vpop.eup %1482  ;;  %v331_v40 = vmul.f32 1.442695, %v297_v37  ;;  %v1892_v37 = vld [vmem:[%s2841_s1 + $0x30] sm:$0xff] }
  0xbc   :  { %v1485_v42 = vpop.eup %1484  ;;  %v1793_v43 = vadd.f32 1.0, %v1483_v39  ;;  %v333_v44 = vmul.f32 1.442695, %v298_v38  ;;  %v1897_v38 = vld [vmem:[%s2841_s1 + $0x38] sm:$0xff] }
  0xbd   :  { %v1795_v46 = vadd.f32 1.0, %v1485_v42  ;;  %1486 = vpow2.f32 %v331_v40 }
  0xbe   :  { %1488 = vrcp.f32 %v1793_v43  ;;  %v211_v47 = vpop.f32.mrf.mxu0  ;;  %v434_v57 = vand.u32 2147483648, %v1793_v43  ;;  %v432_v63 = vand.u32 2147483647, %v1793_v43  ;;  %vm428_vm0 = vweird.f32 %v1793_v43 }
  0xbf   :  { %1490 = vrcp.f32 %v1795_v46  ;;  %v1800_v48 = vadd.f32 %v211_v47, %v1773_v15  ;;  %v260_v49 = vpop.f32.mrf.mxu1  ;;  %v447_v7 = vand.u32 2147483647, %v1795_v46  ;;  %vm443_vm1 = vweird.f32 %v1795_v46 }
  0xc0   :  { %1492 = vpow2.f32 %v333_v44  ;;  %v1813_v52 = vadd.f32 %v260_v49, %v1775_v17  ;;  %v435_v11 = vor.u32 1.1754944e-38, %v434_v57  ;;  %v449_v12 = vand.u32 2147483648, %v1795_v46 }
  0xc1   :  { %v299_v55 = vsub.f32 0.0, %v1800_v48  ;;  %v939_v9 = vsub.f32 %v1835_v62, %v1800_v48  ;;  %vm1868_vm3 = vcmp.eq.f32.partialorder %v432_v63, 8.507059e+37  ;;  %vm1885_vm4 = vcmp.eq.f32.partialorder %v447_v7, 8.507059e+37  ;;  %v2091_v62 = vld [vmem:[%s2841_s1 + $0x60] sm:$0xff] }
  0xc2   :  { %v300_v56 = vsub.f32 0.0, %v1813_v52  ;;  %v940_v29 = vsub.f32 %v1862_v14, %v1813_v52  ;;  %v450_v40 = vor.u32 1.1754944e-38, %v449_v12 }
  0xc3   :  { %v1487_v58 = vpop.eup %1486  ;;  %v335_v61 = vmul.f32 1.442695, %v299_v55 }
  0xc4   :  { %v1838_v0 = vpop.eup %1488  ;;  %v1840_v1 = vadd.f32 1.0, %v1487_v58  ;;  %v337_v4 = vmul.f32 1.442695, %v300_v56 }
  0xc5   :  { %v1846_v5 = vpop.eup %1490  ;;  %1494 = vpow2.f32 %v335_v61  ;;  %v424_v6 = vmul.f32 %v1838_v0, %v1793_v43  ;;  %vm429_vm2 = vweird.f32 %v1838_v0 }
  0xc6   :  { %v1493_v8 = vpop.eup %1492  ;;  %1496 = vrcp.f32 %v1840_v1  ;;  %v213_v10 = vpop.f32.mrf.mxu0  ;;  %v464_v23 = vand.u32 2147483648, %v1840_v1  ;;  %v439_v25 = vmul.f32 %v1846_v5, %v1795_v46  ;;  %v462_v28 = vand.u32 2147483647, %v1840_v1  ;;  %vm1907_vm6 = vmor %vm428_vm0, %vm429_vm2 }
  0xc7   :  { %v1857_v13 = vadd.f32 1.0, %v1493_v8  ;;  %v1865_v16 = vadd.f32 %v213_v10, %v1773_v15  ;;  %v262_v18 = vpop.f32.mrf.mxu1  ;;  %v425_v19 = vsub.f32 1.0, %v424_v6  ;;  %1498 = vpow2.f32 %v337_v4 }
  0xc8   :  { %v1873_v22 = vadd.f32 %v262_v18, %v1775_v17  ;;  %v440_v31 = vsub.f32 1.0, %v439_v25  ;;  %vm458_vm5 = vweird.f32 %v1840_v1  ;;  %v465_v45 = vor.u32 1.1754944e-38, %v464_v23 }
  0xc9   :  { %1500 = vrcp.f32 %v1857_v13  ;;  %v301_v26 = vsub.f32 0.0, %v1865_v16  ;;  %v426_v27 = vmul.f32 %v1838_v0, %v425_v19  ;;  %vm444_vm7 = vweird.f32 %v1846_v5 }
  0xca   :  { %v302_v30 = vsub.f32 0.0, %v1873_v22  ;;  %v441_v47 = vmul.f32 %v1846_v5, %v440_v31  ;;  %vm1917_vm8 = vcmp.eq.f32.partialorder %v462_v28, 8.507059e+37  ;;  %v941_v58 = vsub.f32 %v1892_v37, %v1865_v16  ;;  %vm1934_vm10 = vmor %vm443_vm1, %vm444_vm7 }
  0xcb   :  { %v1495_v34 = vpop.eup %1494  ;;  %v339_v35 = vmul.f32 1.442695, %v301_v26  ;;  %v427_v39 = vadd.f32 %v1838_v0, %v426_v27  ;;  %v942_v61 = vsub.f32 %v1897_v38, %v1873_v22  ;;  %v477_v12 = vand.u32 2147483647, %v1857_v13 }
  0xcc   :  { %v1497_v41 = vpop.eup %1496  ;;  %v1901_v42 = vadd.f32 1.0, %v1495_v34  ;;  %v341_v49 = vmul.f32 1.442695, %v302_v30  ;;  %v442_v4 = vadd.f32 %v1846_v5, %v441_v47  ;;  %vm473_vm11 = vweird.f32 %v1857_v13 }
  0xcd   :  { %1502 = vpow2.f32 %v339_v35  ;;  %v431_v55 = vsel %vm1907_vm6, %v1838_v0, %v427_v39  ;;  %v454_v56 = vmul.f32 %v1497_v41, %v1840_v1  ;;  %v1499_v43 = vpop.eup %1498  ;;  %vm459_vm9 = vweird.f32 %v1497_v41 }
  0xce   :  { %1504 = vrcp.f32 %v1901_v42  ;;  %v216_v63 = vpop.f32.mrf.mxu0  ;;  %v436_v19 = vsel %vm1868_vm3, %v435_v11, %v431_v55  ;;  %v446_v23 = vsel %vm1934_vm10, %v1846_v5, %v442_v4  ;;  %v1948_v26 = vadd.f32 1.0, %v1499_v43  ;;  %vm460_vm12 = vmor %vm458_vm5, %vm459_vm9 }
  0xcf   :  { %v1501_v6 = vpop.eup %1500  ;;  %v1928_v0 = vadd.f32 %v216_v63, %v1773_v15  ;;  %v265_v7 = vpop.f32.mrf.mxu1  ;;  %v455_v8 = vsub.f32 1.0, %v454_v56  ;;  %1506 = vpow2.f32 %v341_v49  ;;  %v479_v21 = vand.u32 2147483648, %v1857_v13 }
  0xd0   :  { %v1940_v18 = vadd.f32 %v265_v7, %v1775_v17  ;;  %v469_v25 = vmul.f32 %v1501_v6, %v1857_v13  ;;  %v967_v5 = vmul.f32 %v935_v59, %v436_v19  ;;  %v451_v35 = vsel %vm1885_vm4, %v450_v40, %v446_v23 }
  0xd1   :  { %v303_v46 = vsub.f32 0.0, %v1928_v0  ;;  %v456_v27 = vmul.f32 %v1497_v41, %v455_v8  ;;  %vm474_vm13 = vweird.f32 %v1501_v6  ;;  %1508 = vrcp.f32 %v1948_v26 }
  0xd2   :  { %v304_v28 = vsub.f32 0.0, %v1940_v18  ;;  %v470_v30 = vsub.f32 1.0, %v469_v25  ;;  %vm1967_vm14 = vcmp.eq.f32.partialorder %v477_v12, 8.507059e+37  ;;  %v480_v56 = vor.u32 1.1754944e-38, %v479_v21  ;;  %vm475_vm15 = vmor %vm473_vm11, %vm474_vm13 }
  0xd3   :  { %v1503_v11 = vpop.eup %1502  ;;  %v343_v31 = vmul.f32 1.442695, %v303_v46  ;;  %v457_v34 = vadd.f32 %v1497_v41, %v456_v27  ;;  %v999_v12 = vadd.f32 %v967_v5, %v1778_v20  ;;  %v2008_v20 = vld [vmem:[%s2841_s1 + $0x40] sm:$0xff]  ;;  %vm488_vm1 = vweird.f32 %v1901_v42  ;;  %v2036_v5 = vld [vmem:[%s2841_s1 + $0x50] sm:$0xff] }
  0xd4   :  { %v1959_v39 = vpop.eup %1504  ;;  %v1961_v44 = vadd.f32 1.0, %v1503_v11  ;;  %v345_v47 = vmul.f32 1.442695, %v304_v28  ;;  %v471_v49 = vmul.f32 %v1501_v6, %v470_v30  ;;  %v492_v21 = vand.u32 2147483647, %v1901_v42 }
  0xd5   :  { %v461_v55 = vsel %vm460_vm12, %v1497_v41, %v457_v34  ;;  %v484_v59 = vmul.f32 %v1959_v39, %v1901_v42  ;;  %v1507_v43 = vpop.eup %1506  ;;  %vm489_vm0 = vweird.f32 %v1959_v39  ;;  %v494_v11 = vand.u32 2147483648, %v1901_v42 }
  0xd6   :  { %1510 = vrcp.f32 %v1961_v44  ;;  %v218_v33 = vpop.f32.mrf.mxu0  ;;  %v466_v40 = vsel %vm1917_vm8, %v465_v45, %v461_v55  ;;  %v472_v1 = vadd.f32 %v1501_v6, %v471_v49  ;;  %v968_v45 = vmul.f32 %v936_v60, %v451_v35  ;;  %vm2022_vm2 = vmor %vm488_vm1, %vm489_vm0 }
  0xd7   :  { %1512 = vpow2.f32 %v343_v31  ;;  %v1977_v63 = vadd.f32 %v218_v33, %v1773_v15  ;;  %v267_v41 = vpop.f32.mrf.mxu1  ;;  %v969_v4 = vmul.f32 %v937_v2, %v466_v40  ;;  %v485_v8 = vsub.f32 1.0, %v484_v59  ;;  %v2003_v19 = vpop.eup %1508  ;;  %v2051_v40 = vld [vmem:[%s2841_s1 + $0x58] sm:$0xff] }
  0xd8   :  { %1514 = vpow2.f32 %v345_v47  ;;  %v1989_v57 = vadd.f32 %v267_v41, %v1775_v17  ;;  %v476_v7 = vsel %vm475_vm15, %v1501_v6, %v472_v1  ;;  %v1996_v13 = vadd.f32 1.0, %v1507_v43 }
  0xd9   :  { %v305_v10 = vsub.f32 0.0, %v1977_v63  ;;  %v1001_v53 = vadd.f32 %v969_v4, %v1786_v32  ;;  %v481_v2 = vsel %vm1967_vm14, %v480_v56, %v476_v7  ;;  %v486_v6 = vmul.f32 %v1959_v39, %v485_v8 }
  0xda   :  { %v306_v51 = vsub.f32 0.0, %v1989_v57  ;;  %v970_v60 = vmul.f32 %v938_v3, %v481_v2  ;;  %v1000_v25 = vadd.f32 %v968_v45, %v1781_v24  ;;  %v944_v49 = vsub.f32 %v2017_v54, %v1940_v18 }
  0xdb   :  { %v347_v32 = vmul.f32 1.442695, %v305_v10  ;;  %v1031_v23 = vpack.c.bf16 %v1001_v53, %v999_v12  ;;  %v487_v28 = vadd.f32 %v1959_v39, %v486_v6  ;;  %v495_v59 = vor.u32 1.1754944e-38, %v494_v11 }
  0xdc   :  { %v2012_v46 = vpop.eup %1510  ;;  %v349_v3 = vmul.f32 1.442695, %v306_v51  ;;  %v1002_v27 = vadd.f32 %v970_v60, %v1789_v36  ;;  %v943_v36 = vsub.f32 %v2008_v20, %v1928_v0  ;;  %vm493_vm3 = vcmp.eq.f32.partialorder %v492_v21, 8.507059e+37 }
  0xdd   :  { %v1513_v30 = vpop.eup %1512  ;;  %1516 = vpow2.f32 %v347_v32  ;;  %1187 = vmatmul.bf16.vlgmr.msra.gmra.mxu2 %v1031_v23  ;;  %v514_v31 = vmul.f32 %v2012_v46, %v1961_v44  ;;  %v491_v42 = vsel %vm2022_vm2, %v1959_v39, %v487_v28  ;;  %v945_v43 = vsub.f32 %v2036_v5, %v1977_v63 }
  0xde   :  { %v1515_v34 = vpop.eup %1514  ;;  %1518 = vrcp.f32 %v1996_v13  ;;  %v1032_v35 = vpack.c.bf16 %v1002_v27, %v1000_v25  ;;  %v221_v47 = vpop.f32.mrf.mxu0  ;;  %v2046_v33 = vadd.f32 1.0, %v1513_v30  ;;  %v496_v4 = vsel %vm493_vm3, %v495_v59, %v491_v42 }
  0xdf   :  { %1520 = vpow2.f32 %v349_v3  ;;  %v2044_v55 = vadd.f32 %v221_v47, %v1773_v15  ;;  %v270_v50 = vpop.f32.mrf.mxu1  ;;  %v515_v39 = vsub.f32 1.0, %v514_v31  ;;  %v2056_v56 = vadd.f32 1.0, %v1515_v34 }
  0xe0   :  { %1236 = vmatmul.bf16.vlgmr.msra.gmra.mxu3 %v1032_v35  ;;  %v2054_v1 = vadd.f32 %v270_v50, %v1775_v17  ;;  %vm519_vm4 = vweird.f32 %v2012_v46  ;;  %v522_v8 = vand.u32 2147483647, %v1961_v44  ;;  %v946_v12 = vsub.f32 %v2051_v40, %v1989_v57  ;;  %v2103_v35 = vld [vmem:[%s2841_s1 + $0x68] sm:$0xff] }
  0xe1   :  { %v307_v41 = vsub.f32 0.0, %v2044_v55  ;;  %v516_v7 = vmul.f32 %v2012_v46, %v515_v39  ;;  %v524_v2 = vand.u32 2147483648, %v1961_v44  ;;  %v499_v51 = vmul.f32 %v2003_v19, %v1948_v26 }
  0xe2   :  { %v308_v45 = vsub.f32 0.0, %v2054_v1  ;;  %1522 = vrcp.f32 %v2046_v33  ;;  %vm518_vm5 = vweird.f32 %v1961_v44  ;;  %v971_v3 = vmul.f32 %v939_v9, %v496_v4 }
  0xe3   :  { %v1517_v10 = vpop.eup %1516  ;;  %v351_v53 = vmul.f32 1.442695, %v307_v41  ;;  %v517_v32 = vadd.f32 %v2012_v46, %v516_v7  ;;  %vm520_vm6 = vmor %vm518_vm5, %vm519_vm4  ;;  %v525_v25 = vor.u32 1.1754944e-38, %v524_v2  ;;  %v500_v27 = vsub.f32 1.0, %v499_v51  ;;  %v2121_v7 = vld [vmem:[%s2841_s1 + $0x70] sm:$0xff] }
  0xe4   :  { %v2070_v60 = vpop.eup %1518  ;;  %v353_v6 = vmul.f32 1.442695, %v308_v45  ;;  %v2079_v28 = vadd.f32 1.0, %v1517_v10  ;;  %vm523_vm7 = vcmp.eq.f32.partialorder %v522_v8, 8.507059e+37  ;;  %vm504_vm8 = vweird.f32 %v2003_v19 }
  0xe5   :  { %v1521_v23 = vpop.eup %1520  ;;  %1524 = vpow2.f32 %v351_v53  ;;  %v521_v24 = vsel %vm520_vm6, %v2012_v46, %v517_v32  ;;  %v501_v31 = vmul.f32 %v2003_v19, %v500_v27  ;;  %v1003_v42 = vadd.f32 %v971_v3, %v1800_v48  ;;  %v2142_v32 = vld [vmem:[%s2841_s1 + $0x78] sm:$0xff] }
  0xe6   :  { %1526 = vrcp.f32 %v2056_v56  ;;  %v223_v30 = vpop.f32.mrf.mxu0  ;;  %v526_v11 = vsel %vm523_vm7, %v525_v25, %v521_v24  ;;  %v2086_v34 = vadd.f32 1.0, %v1521_v23  ;;  %vm503_vm9 = vweird.f32 %v1948_v26 }
  0xe7   :  { %1528 = vpow2.f32 %v353_v6  ;;  %v2083_v44 = vadd.f32 %v223_v30, %v1773_v15  ;;  %v272_v21 = vpop.f32.mrf.mxu1  ;;  %v973_v46 = vmul.f32 %v941_v58, %v526_v11  ;;  %v502_v50 = vadd.f32 %v2003_v19, %v501_v31  ;;  %vm2125_vm10 = vmor %vm503_vm9, %vm504_vm8 }
  0xe8   :  { %v2094_v9 = vadd.f32 %v272_v21, %v1775_v17  ;;  %v2109_v59 = vpop.eup %1522  ;;  %v507_v39 = vand.u32 2147483647, %v1948_v26  ;;  %v509_v41 = vand.u32 2147483648, %v1948_v26  ;;  %1530 = vrcp.f32 %v2079_v28 }
  0xe9   :  { %v309_v47 = vsub.f32 0.0, %v2083_v44  ;;  %v1005_v58 = vadd.f32 %v973_v46, %v1865_v16  ;;  %v947_v48 = vsub.f32 %v2091_v62, %v2044_v55  ;;  %v529_v26 = vmul.f32 %v2070_v60, %v1996_v13 }
  0xea   :  { %v310_v37 = vsub.f32 0.0, %v2094_v9  ;;  %1532 = vrcp.f32 %v2086_v34  ;;  %v948_v10 = vsub.f32 %v2103_v35, %v2054_v1  ;;  %v506_v2 = vsel %vm2125_vm10, %v2003_v19, %v502_v50 }
  0xeb   :  { %v1525_v4 = vpop.eup %1524  ;;  %v355_v45 = vmul.f32 1.442695, %v309_v47  ;;  %v1033_v53 = vpack.c.bf16 %v1005_v58, %v1003_v42  ;;  %v510_v23 = vor.u32 1.1754944e-38, %v509_v41  ;;  %v530_v25 = vsub.f32 1.0, %v529_v26 }
  0xec   :  { %v2131_v8 = vpop.eup %1526  ;;  %v357_v6 = vmul.f32 1.442695, %v310_v37  ;;  %v2144_v3 = vadd.f32 1.0, %v1525_v4  ;;  %v949_v27 = vsub.f32 %v2121_v7, %v2083_v44  ;;  %vm508_vm11 = vcmp.eq.f32.partialorder %v507_v39, 8.507059e+37 }
  0xed   :  { %v1529_v51 = vpop.eup %1528  ;;  %1534 = vpow2.f32 %v355_v45  ;;  %1192 = vmatmul.bf16.gmra.mxu2 %v1033_v53  ;;  %vm534_vm12 = vweird.f32 %v2070_v60  ;;  %v511_v30 = vsel %vm508_vm11, %v510_v23, %v506_v2  ;;  %v531_v24 = vmul.f32 %v2070_v60, %v530_v25 }
  0xee   :  { %v226_v19 = vpop.f32.mrf.mxu0  ;;  %v537_v21 = vand.u32 2147483647, %v1996_v13  ;;  %v539_v11 = vand.u32 2147483648, %v1996_v13  ;;  %v2152_v46 = vadd.f32 1.0, %v1529_v51  ;;  %v950_v47 = vsub.f32 %v2142_v32, %v2094_v9  ;;  %v2162_v37 = vpop.eup %1530 }
  0xef   :  { %v275_v31 = vpop.f32.mrf.mxu1  ;;  %v2157_v42 = vadd.f32 %v226_v19, %v1773_v15  ;;  %1536 = vpow2.f32 %v357_v6  ;;  %v532_v58 = vadd.f32 %v2070_v60, %v531_v24  ;;  %vm533_vm13 = vweird.f32 %v1996_v13 }
  0xf0   :  { %v2160_v50 = vadd.f32 %v275_v31, %v1775_v17  ;;  %v544_v39 = vmul.f32 %v2109_v59, %v2046_v33  ;;  %v2168_v41 = vpop.eup %1532  ;;  %vm535_vm14 = vmor %vm533_vm13, %vm534_vm12  ;;  %v540_v4 = vor.u32 1.1754944e-38, %v539_v11  ;;  %v972_v45 = vmul.f32 %v940_v29, %v511_v30  ;;  %v2188_v29 = vld [vmem:[%s2841_s1 + $0x80] sm:$0xff] }
  0xf1   :  { %v311_v16 = vsub.f32 0.0, %v2157_v42  ;;  %1538 = vrcp.f32 %v2144_v3  ;;  %v536_v13 = vsel %vm535_vm14, %v2070_v60, %v532_v58  ;;  %vm538_vm15 = vcmp.eq.f32.partialorder %v537_v21, 8.507059e+37 }
  0xf2   :  { %v312_v26 = vsub.f32 0.0, %v2160_v50  ;;  %v545_v2 = vsub.f32 1.0, %v544_v39  ;;  %1540 = vrcp.f32 %v2152_v46  ;;  %v541_v6 = vsel %vm538_vm15, %v540_v4, %v536_v13  ;;  %v2219_v13 = vld [vmem:[%s2841_s1 + $0x88] sm:$0xff] }
  0xf3   :  { %v1535_v53 = vpop.eup %1534  ;;  %v359_v23 = vmul.f32 1.442695, %v311_v16  ;;  %v974_v14 = vmul.f32 %v942_v61, %v541_v6  ;;  %v554_v19 = vand.u32 2147483648, %v2046_v33  ;;  %v1004_v30 = vadd.f32 %v972_v45, %v1813_v52 }
  0xf4   :  { %v2180_v51 = vadd.f32 1.0, %v1535_v53  ;;  %v361_v25 = vmul.f32 1.442695, %v312_v26  ;;  %v546_v60 = vmul.f32 %v2109_v59, %v545_v2  ;;  %vm549_vm0 = vweird.f32 %v2109_v59 }
  0xf5   :  { %v552_v21 = vand.u32 2147483647, %v2046_v33  ;;  %v574_v38 = vmul.f32 %v2162_v37, %v2079_v28  ;;  %v1537_v61 = vpop.eup %1536  ;;  %v1006_v11 = vadd.f32 %v974_v14, %v1873_v22  ;;  %1542 = vpow2.f32 %v359_v23 }
  0xf6   :  { %v228_v24 = vpop.f32.mrf.mxu0  ;;  %v547_v39 = vadd.f32 %v2109_v59, %v546_v60  ;;  %1544 = vrcp.f32 %v2180_v51  ;;  %v951_v52 = vsub.f32 %v2188_v29, %v2157_v42  ;;  %vm548_vm1 = vweird.f32 %v2046_v33 }
  0xf7   :  { %v2199_v31 = vadd.f32 %v228_v24, %v1773_v15  ;;  %v277_v58 = vpop.f32.mrf.mxu1  ;;  %v2209_v45 = vpop.eup %1538  ;;  %v1034_v22 = vpack.c.bf16 %v1006_v11, %v1004_v30  ;;  %1546 = vpow2.f32 %v361_v25  ;;  %vm550_vm2 = vmor %vm548_vm1, %vm549_vm0  ;;  %v555_v26 = vor.u32 1.1754944e-38, %v554_v19 }
  0xf8   :  { %v2206_v4 = vadd.f32 %v277_v58, %v1775_v17  ;;  %v2214_v53 = vpop.eup %1540  ;;  %v551_v33 = vsel %vm550_vm2, %v2109_v59, %v547_v39  ;;  %vm553_vm3 = vcmp.eq.f32.partialorder %v552_v21, 8.507059e+37  ;;  %v575_v6 = vsub.f32 1.0, %v574_v38 }
  0xf9   :  { %v313_v16 = vsub.f32 0.0, %v2199_v31  ;;  %v2223_v23 = vadd.f32 1.0, %v1537_v61  ;;  %1241 = vmatmul.bf16.gmra.mxu3 %v1034_v22  ;;  %v556_v25 = vsel %vm553_vm3, %v555_v26, %v551_v33  ;;  %vm579_vm4 = vweird.f32 %v2162_v37 }
  0xfa   :  { %v314_v2 = vsub.f32 0.0, %v2206_v4  ;;  %v576_v19 = vmul.f32 %v2162_v37, %v575_v6  ;;  %v582_v30 = vand.u32 2147483647, %v2079_v28  ;;  %v584_v24 = vand.u32 2147483648, %v2079_v28 }
  0xfb   :  { %v363_v14 = vmul.f32 1.442695, %v313_v16  ;;  %v1543_v11 = vpop.eup %1542  ;;  %vm578_vm5 = vweird.f32 %v2079_v28  ;;  %v559_v21 = vmul.f32 %v2131_v8, %v2056_v56  ;;  %v975_v39 = vmul.f32 %v943_v36, %v556_v25 }
  0xfc   :  { %v365_v60 = vmul.f32 1.442695, %v314_v2  ;;  %v2234_v38 = vpop.eup %1544  ;;  %v2236_v61 = vadd.f32 1.0, %v1543_v11  ;;  %v577_v58 = vadd.f32 %v2162_v37, %v576_v19  ;;  %vm580_vm6 = vmor %vm578_vm5, %vm579_vm4  ;;  %v585_v28 = vor.u32 1.1754944e-38, %v584_v24 }
  0xfd   :  { %1548 = vpow2.f32 %v363_v14  ;;  %v1547_v16 = vpop.eup %1546  ;;  %v560_v26 = vsub.f32 1.0, %v559_v21  ;;  %v567_v2 = vand.u32 2147483647, %v2056_v56  ;;  %vm583_vm7 = vcmp.eq.f32.partialorder %v582_v30, 8.507059e+37 }
  0xfe   :  { %1550 = vpow2.f32 %v365_v60  ;;  %v231_v22 = vpop.f32.mrf.mxu0  ;;  %v581_v6 = vsel %vm580_vm6, %v2162_v37, %v577_v58  ;;  %vm564_vm8 = vweird.f32 %v2131_v8  ;;  %v569_v20 = vand.u32 2147483648, %v2056_v56 }
  0xff   :  { %1552 = vrcp.f32 %v2223_v23  ;;  %v280_v33 = vpop.f32.mrf.mxu1  ;;  %v2249_v36 = vadd.f32 1.0, %v1547_v16  ;;  %v586_v14 = vsel %vm583_vm7, %v585_v28, %v581_v6  ;;  %v561_v25 = vmul.f32 %v2131_v8, %v560_v26 }
 0x100   :  { %v589_v60 = vmul.f32 %v2168_v41, %v2086_v34  ;;  %1554 = vrcp.f32 %v2236_v61  ;;  %v977_v19 = vmul.f32 %v945_v43, %v586_v14  ;;  %v1007_v37 = vadd.f32 %v975_v39, %v1928_v0 }
 0x101   :  { %vm563_vm9 = vweird.f32 %v2056_v56  ;;  %v562_v24 = vadd.f32 %v2131_v8, %v561_v25  ;;  %vm2261_vm10 = vcmp.eq.f32.partialorder %v567_v2, 8.507059e+37  ;;  %v597_v58 = vand.u32 2147483647, %v2086_v34 }
 0x102   :  { %v590_v21 = vsub.f32 1.0, %v589_v60  ;;  %v1009_v28 = vadd.f32 %v977_v19, %v1977_v63  ;;  %vm565_vm11 = vmor %vm563_vm9, %vm564_vm8  ;;  %v570_v5 = vor.u32 1.1754944e-38, %v569_v20  ;;  %v599_v0 = vand.u32 2147483648, %v2086_v34 }
 0x103   :  { %v1549_v30 = vpop.eup %1548  ;;  %v2271_v56 = vadd.f32 %v231_v22, %v1773_v15  ;;  %1556 = vrcp.f32 %v2249_v36  ;;  %v566_v39 = vsel %vm565_vm11, %v2131_v8, %v562_v24  ;;  %vm594_vm12 = vweird.f32 %v2168_v41 }
 0x104   :  { %v1551_v16 = vpop.eup %1550  ;;  %v591_v26 = vmul.f32 %v2168_v41, %v590_v21  ;;  %v2279_v63 = vadd.f32 1.0, %v1549_v30  ;;  %v1035_v2 = vpack.c.bf16 %v1009_v28, %v1007_v37  ;;  %v571_v6 = vsel %vm2261_vm10, %v570_v5, %v566_v39  ;;  %v2297_v37 = vld [vmem:[%s2841_s1 + $0x90] sm:$0xff] }
 0x105   :  { %v2273_v43 = vpop.eup %1552  ;;  %vm593_vm13 = vweird.f32 %v2086_v34  ;;  %v2284_v20 = vadd.f32 1.0, %v1551_v16  ;;  %vm2287_vm14 = vcmp.eq.f32.partialorder %v597_v58, 8.507059e+37  ;;  %v315_v8 = vsub.f32 0.0, %v2271_v56  ;;  %v2302_v34 = vld [vmem:[%s2841_s1 + $0x98] sm:$0xff] }
 0x106   :  { %v233_v22 = vpop.f32.mrf.mxu0  ;;  %v592_v14 = vadd.f32 %v2168_v41, %v591_v26  ;;  %v2292_v19 = vpop.eup %1554  ;;  %1197 = vmatmul.bf16.gmra.mxu2 %v1035_v2  ;;  %vm595_vm15 = vmor %vm593_vm13, %vm594_vm12  ;;  %v600_v30 = vor.u32 1.1754944e-38, %v599_v0  ;;  %v2307_v24 = vadd.f32 %v280_v33, %v1775_v17  ;;  %v976_v16 = vmul.f32 %v944_v49, %v571_v6  ;;  %v2327_v0 = vld [vmem:[%s2841_s1 + $0xa0] sm:$0xff] }
 0x107   :  { %v282_v60 = vpop.f32.mrf.mxu1  ;;  %v2310_v11 = vadd.f32 %v233_v22, %v1773_v15  ;;  %v367_v28 = vmul.f32 1.442695, %v315_v8  ;;  %v604_v5 = vmul.f32 %v2209_v45, %v2144_v3  ;;  %1558 = vrcp.f32 %v2279_v63  ;;  %v2344_v22 = vld [vmem:[%s2841_s1 + $0xa8] sm:$0xff] }
 0x108   :  { %v2313_v21 = vadd.f32 %v282_v60, %v1775_v17  ;;  %v596_v58 = vsel %vm595_vm15, %v2168_v41, %v592_v14  ;;  %v316_v41 = vsub.f32 0.0, %v2307_v24  ;;  %v953_v49 = vsub.f32 %v2297_v37, %v2199_v31 }
 0x109   :  { %v601_v33 = vsel %vm2287_vm14, %v600_v30, %v596_v58  ;;  %v317_v39 = vsub.f32 0.0, %v2310_v11  ;;  %v2331_v54 = vpop.eup %1556  ;;  %1560 = vpow2.f32 %v367_v28  ;;  %v605_v25 = vsub.f32 1.0, %v604_v5  ;;  %v2354_v30 = vld [vmem:[%s2841_s1 + $0xb0] sm:$0xff] }
 0x10a   :  { %v978_v2 = vmul.f32 %v946_v12, %v601_v33  ;;  %1562 = vrcp.f32 %v2284_v20  ;;  %v369_v6 = vmul.f32 1.442695, %v316_v41  ;;  %v318_v14 = vsub.f32 0.0, %v2313_v21 }
 0x10b   :  { %v1008_v8 = vadd.f32 %v976_v16, %v1940_v18  ;;  %v371_v12 = vmul.f32 1.442695, %v317_v39  ;;  %v606_v58 = vmul.f32 %v2209_v45, %v605_v25  ;;  %vm609_vm0 = vweird.f32 %v2209_v45 }
 0x10c   :  { %v1010_v60 = vadd.f32 %v978_v2, %v1989_v57  ;;  %v612_v28 = vand.u32 2147483647, %v2144_v3  ;;  %v614_v5 = vand.u32 2147483648, %v2144_v3  ;;  %1564 = vpow2.f32 %v369_v6  ;;  %v2373_v6 = vld [vmem:[%s2841_s1 + $0xb8] sm:$0xff] }
 0x10d   :  { %v634_v16 = vmul.f32 %v2234_v38, %v2180_v51  ;;  %v2364_v33 = vpop.eup %1558  ;;  %v373_v39 = vmul.f32 1.442695, %v318_v14  ;;  %v607_v2 = vadd.f32 %v2209_v45, %v606_v58  ;;  %vm608_vm1 = vweird.f32 %v2144_v3 }
 0x10e   :  { %v1036_v18 = vpack.c.bf16 %v1010_v60, %v1008_v8  ;;  %1566 = vpow2.f32 %v371_v12  ;;  %vm610_vm2 = vmor %vm608_vm1, %vm609_vm0  ;;  %vm613_vm3 = vcmp.eq.f32.partialorder %v612_v28, 8.507059e+37  ;;  %v615_v8 = vor.u32 1.1754944e-38, %v614_v5  ;;  %v236_v57 = vpop.f32.mrf.mxu0 }
 0x10f   :  { %v1561_v25 = vpop.eup %1560  ;;  %v635_v60 = vsub.f32 1.0, %v634_v16  ;;  %v611_v58 = vsel %vm610_vm2, %v2209_v45, %v607_v2  ;;  %vm639_vm4 = vweird.f32 %v2234_v38  ;;  %v644_v3 = vand.u32 2147483648, %v2180_v51 }
 0x110   :  { %1246 = vmatmul.bf16.gmra.mxu3 %v1036_v18  ;;  %v2377_v14 = vpop.eup %1562  ;;  %v619_v12 = vmul.f32 %v2214_v53, %v2152_v46  ;;  %v285_v18 = vpop.f32.mrf.mxu1  ;;  %v2384_v41 = vadd.f32 1.0, %v1561_v25  ;;  %v616_v40 = vsel %vm613_vm3, %v615_v8, %v611_v58  ;;  %v642_v5 = vand.u32 2147483647, %v2180_v51 }
 0x111   :  { %v636_v28 = vmul.f32 %v2234_v38, %v635_v60  ;;  %vm638_vm5 = vweird.f32 %v2180_v51  ;;  %v979_v45 = vmul.f32 %v947_v48, %v616_v40  ;;  %1568 = vpow2.f32 %v373_v39 }
 0x112   :  { %v620_v2 = vsub.f32 1.0, %v619_v12  ;;  %v1565_v26 = vpop.eup %1564  ;;  %v627_v8 = vand.u32 2147483647, %v2152_v46  ;;  %v629_v60 = vand.u32 2147483648, %v2152_v46  ;;  %vm640_vm6 = vmor %vm638_vm5, %vm639_vm4  ;;  %v645_v58 = vor.u32 1.1754944e-38, %v644_v3 }
 0x113   :  { %v637_v25 = vadd.f32 %v2234_v38, %v636_v28  ;;  %vm624_vm7 = vweird.f32 %v2214_v53  ;;  %v649_v62 = vmul.f32 %v2273_v43, %v2223_v23  ;;  %1570 = vrcp.f32 %v2384_v41 }
 0x114   :  { %v621_v16 = vmul.f32 %v2214_v53, %v620_v2  ;;  %v1567_v48 = vpop.eup %1566  ;;  %vm643_vm8 = vcmp.eq.f32.partialorder %v642_v5, 8.507059e+37  ;;  %vm623_vm9 = vweird.f32 %v2152_v46  ;;  %v2406_v40 = vadd.f32 1.0, %v1565_v26 }
 0x115   :  { %v641_v51 = vsel %vm640_vm6, %v2234_v38, %v637_v25  ;;  %v1011_v3 = vadd.f32 %v979_v45, %v2044_v55  ;;  %vm625_vm10 = vmor %vm623_vm9, %vm624_vm7  ;;  %vm628_vm11 = vcmp.eq.f32.partialorder %v627_v8, 8.507059e+37  ;;  %v630_v2 = vor.u32 1.1754944e-38, %v629_v60 }
 0x116   :  { %v646_v39 = vsel %vm643_vm8, %v645_v58, %v641_v51  ;;  %v622_v12 = vadd.f32 %v2214_v53, %v621_v16  ;;  %v650_v59 = vsub.f32 1.0, %v649_v62  ;;  %vm654_vm12 = vweird.f32 %v2273_v43 }
 0x117   :  { %v981_v28 = vmul.f32 %v949_v27, %v646_v39  ;;  %v657_v46 = vand.u32 2147483647, %v2223_v23  ;;  %v659_v26 = vand.u32 2147483648, %v2223_v23  ;;  %v1569_v5 = vpop.eup %1568  ;;  %v2420_v7 = vadd.f32 %v236_v57, %v1773_v15  ;;  %v238_v27 = vpop.f32.mrf.mxu0 }
 0x118   :  { %v626_v38 = vsel %vm625_vm10, %v2214_v53, %v622_v12  ;;  %v651_v45 = vmul.f32 %v2273_v43, %v650_v59  ;;  %1572 = vrcp.f32 %v2406_v40  ;;  %v2423_v25 = vadd.f32 1.0, %v1567_v48  ;;  %v287_v8 = vpop.f32.mrf.mxu1 }
 0x119   :  { %v1013_v55 = vadd.f32 %v981_v28, %v2083_v44  ;;  %v631_v16 = vsel %vm628_vm11, %v630_v2, %v626_v38  ;;  %vm653_vm13 = vweird.f32 %v2223_v23  ;;  %v2427_v53 = vadd.f32 %v285_v18, %v1775_v17  ;;  %v2429_v60 = vpop.eup %1570 }
 0x11a   :  { %v652_v58 = vadd.f32 %v2273_v43, %v651_v45  ;;  %vm658_vm14 = vcmp.eq.f32.partialorder %v657_v46, 8.507059e+37  ;;  %v319_v59 = vsub.f32 0.0, %v2420_v7  ;;  %vm655_vm15 = vmor %vm653_vm13, %vm654_vm12  ;;  %v660_v57 = vor.u32 1.1754944e-38, %v659_v26  ;;  %v2462_v26 = vld [vmem:[%s2841_s1 + $0xc0] sm:$0xff] }
 0x11b   :  { %v1037_v44 = vpack.c.bf16 %v1013_v55, %v1011_v3  ;;  %v980_v23 = vmul.f32 %v948_v10, %v631_v16  ;;  %v320_v18 = vsub.f32 0.0, %v2427_v53  ;;  %v2440_v62 = vadd.f32 %v238_v27, %v1773_v15 }
 0x11c   :  { %v656_v48 = vsel %vm655_vm15, %v2273_v43, %v652_v58  ;;  %v375_v51 = vmul.f32 1.442695, %v319_v59  ;;  %v2444_v39 = vadd.f32 %v287_v8, %v1775_v17  ;;  %v664_v3 = vmul.f32 %v2292_v19, %v2236_v61 }
 0x11d   :  { %1202 = vmatmul.bf16.gmra.mxu2 %v1037_v44  ;;  %1574 = vrcp.f32 %v2423_v25  ;;  %v661_v12 = vsel %vm658_vm14, %v660_v57, %v656_v48  ;;  %v377_v35 = vmul.f32 1.442695, %v320_v18  ;;  %v321_v10 = vsub.f32 0.0, %v2440_v62  ;;  %v2486_v57 = vld [vmem:[%s2841_s1 + $0xd0] sm:$0xff] }
 0x11e   :  { %v2450_v28 = vadd.f32 1.0, %v1569_v5  ;;  %v982_v2 = vmul.f32 %v950_v47, %v661_v12  ;;  %1576 = vpow2.f32 %v375_v51  ;;  %v322_v43 = vsub.f32 0.0, %v2444_v39  ;;  %v2456_v38 = vpop.eup %1572  ;;  %v2467_v5 = vld [vmem:[%s2841_s1 + $0xc8] sm:$0xff] }
 0x11f   :  { %v1012_v46 = vadd.f32 %v980_v23, %v2054_v1  ;;  %1578 = vpow2.f32 %v377_v35  ;;  %v379_v32 = vmul.f32 1.442695, %v321_v10  ;;  %v665_v47 = vsub.f32 1.0, %v664_v3  ;;  %v2491_v23 = vld [vmem:[%s2841_s1 + $0xd8] sm:$0xff]  ;;  %v241_v51 = vpop.f32.mrf.mxu0 }
 0x120   :  { %v1014_v55 = vadd.f32 %v982_v2, %v2094_v9  ;;  %v381_v16 = vmul.f32 1.442695, %v322_v43  ;;  %vm669_vm0 = vweird.f32 %v2292_v19  ;;  %v672_v1 = vand.u32 2147483647, %v2236_v61  ;;  %v290_v2 = vpop.f32.mrf.mxu1 }
 0x121   :  { %1580 = vpow2.f32 %v379_v32  ;;  %v666_v45 = vmul.f32 %v2292_v19, %v665_v47  ;;  %v674_v27 = vand.u32 2147483648, %v2236_v61  ;;  %v694_v8 = vmul.f32 %v2364_v33, %v2279_v63 }
 0x122   :  { %1582 = vrcp.f32 %v2450_v28  ;;  %v1038_v44 = vpack.c.bf16 %v1014_v55, %v1012_v46  ;;  %v959_v58 = vsub.f32 %v2462_v26, %v2420_v7  ;;  %v960_v9 = vsub.f32 %v2467_v5, %v2427_v53  ;;  %v931_v5 = vld [vmem:[%s2841_s1 + $0xe0] sm:$0xff] }
 0x123   :  { %v2481_v59 = vpop.eup %1574  ;;  %1584 = vpow2.f32 %v381_v16  ;;  %v667_v18 = vadd.f32 %v2292_v19, %v666_v45  ;;  %vm668_vm1 = vweird.f32 %v2236_v61  ;;  %v695_v48 = vsub.f32 1.0, %v694_v8 }
 0x124   :  { %v1577_v3 = vpop.eup %1576  ;;  %1251 = vmatmul.bf16.gmra.mxu3 %v1038_v44  ;;  %vm670_vm2 = vmor %vm668_vm1, %vm669_vm0  ;;  %vm673_vm3 = vcmp.eq.f32.partialorder %v672_v1, 8.507059e+37  ;;  %v675_v12 = vor.u32 1.1754944e-38, %v674_v27  ;;  %v704_v35 = vand.u32 2147483648, %v2279_v63  ;;  %v679_v10 = vmul.f32 %v2331_v54, %v2249_v36 }
 0x125   :  { %v1579_v43 = vpop.eup %1578  ;;  %v671_v46 = vsel %vm670_vm2, %v2292_v19, %v667_v18  ;;  %v696_v61 = vmul.f32 %v2364_v33, %v695_v48  ;;  %vm699_vm4 = vweird.f32 %v2364_v33  ;;  %v702_v32 = vand.u32 2147483647, %v2279_v63 }
 0x126   :  { %v2504_v47 = vadd.f32 1.0, %v1577_v3  ;;  %v961_v55 = vsub.f32 %v2486_v57, %v2440_v62  ;;  %v962_v16 = vsub.f32 %v2491_v23, %v2444_v39  ;;  %v676_v1 = vsel %vm673_vm3, %v675_v12, %v671_v46 }
 0x127   :  { %v1581_v45 = vpop.eup %1580  ;;  %v2510_v27 = vadd.f32 1.0, %v1579_v43  ;;  %v697_v19 = vadd.f32 %v2364_v33, %v696_v61  ;;  %vm698_vm5 = vweird.f32 %v2279_v63  ;;  %v680_v8 = vsub.f32 1.0, %v679_v10 }
 0x128   :  { %v2514_v44 = vpop.eup %1582  ;;  %v2516_v18 = vadd.f32 1.0, %v1581_v45  ;;  %vm700_vm6 = vmor %vm698_vm5, %vm699_vm4  ;;  %v705_v48 = vor.u32 1.1754944e-38, %v704_v35  ;;  %v983_v3 = vmul.f32 %v951_v52, %v676_v1  ;;  %vm683_vm7 = vweird.f32 %v2249_v36 }
 0x129   :  { %v1585_v12 = vpop.eup %1584  ;;  %v701_v43 = vsel %vm700_vm6, %v2364_v33, %v697_v19  ;;  %vm703_vm8 = vcmp.eq.f32.partialorder %v702_v32, 8.507059e+37  ;;  %v681_v46 = vmul.f32 %v2331_v54, %v680_v8  ;;  %vm684_vm9 = vweird.f32 %v2331_v54 }
 0x12a   :  { %1586 = vrcp.f32 %v2504_v47  ;;  %v706_v63 = vsel %vm703_vm8, %v705_v48, %v701_v43  ;;  %v687_v10 = vand.u32 2147483647, %v2249_v36  ;;  %v689_v35 = vand.u32 2147483648, %v2249_v36  ;;  %vm2541_vm10 = vmor %vm683_vm7, %vm684_vm9  ;;  %v243_v48 = vpop.f32.mrf.mxu0 }
 0x12b   :  { %1588 = vrcp.f32 %v2510_v27  ;;  %v985_v29 = vmul.f32 %v953_v49, %v706_v63  ;;  %v682_v52 = vadd.f32 %v2331_v54, %v681_v46  ;;  %v709_v33 = vmul.f32 %v2377_v14, %v2284_v20 }
 0x12c   :  { %1590 = vrcp.f32 %v2516_v18  ;;  %v2536_v61 = vadd.f32 1.0, %v1585_v12  ;;  %v1015_v32 = vadd.f32 %v983_v3, %v2157_v42  ;;  %v717_v37 = vand.u32 2147483647, %v2284_v20  ;;  %v292_v12 = vpop.f32.mrf.mxu1 }
 0x12d   :  { %v1017_v49 = vadd.f32 %v985_v29, %v2199_v31  ;;  %v686_v45 = vsel %vm2541_vm10, %v2331_v54, %v682_v52  ;;  %v710_v19 = vsub.f32 1.0, %v709_v33  ;;  %v2551_v8 = vadd.f32 %v241_v51, %v1773_v15 }
 0x12e   :  { %vm688_vm11 = vcmp.eq.f32.partialorder %v687_v10, 8.507059e+37  ;;  %v690_v42 = vor.u32 1.1754944e-38, %v689_v35  ;;  %v719_v36 = vand.u32 2147483648, %v2284_v20  ;;  %v2555_v3 = vadd.f32 %v290_v2, %v1775_v17 }
 0x12f   :  { %v1039_v43 = vpack.c.bf16 %v1017_v49, %v1015_v32  ;;  %v711_v31 = vmul.f32 %v2377_v14, %v710_v19  ;;  %vm714_vm12 = vweird.f32 %v2377_v14  ;;  %v323_v54 = vsub.f32 0.0, %v2551_v8 }
 0x130   :  { %v2560_v46 = vpop.eup %1586  ;;  %v691_v51 = vsel %vm688_vm11, %v690_v42, %v686_v45  ;;  %vm713_vm13 = vweird.f32 %v2284_v20  ;;  %v324_v63 = vsub.f32 0.0, %v2555_v3  ;;  %v2565_v10 = vadd.f32 %v243_v48, %v1773_v15 }
 0x131   :  { %v2567_v2 = vpop.eup %1588  ;;  %1207 = vmatmul.bf16.gmra.mxu2 %v1039_v43  ;;  %v712_v35 = vadd.f32 %v2377_v14, %v711_v31  ;;  %vm718_vm14 = vcmp.eq.f32.partialorder %v717_v37, 8.507059e+37  ;;  %v383_v29 = vmul.f32 1.442695, %v323_v54  ;;  %v2571_v52 = vadd.f32 %v292_v12, %v1775_v17  ;;  %vm715_vm15 = vmor %vm713_vm13, %vm714_vm12 }
 0x132   :  { %v2573_v33 = vpop.eup %1590  ;;  %v720_v32 = vor.u32 1.1754944e-38, %v719_v36  ;;  %v385_v20 = vmul.f32 1.442695, %v324_v63  ;;  %v325_v1 = vsub.f32 0.0, %v2565_v10  ;;  %v724_v15 = vmul.f32 %v2429_v60, %v2384_v41 }
 0x133   :  { %v716_v49 = vsel %vm715_vm15, %v2377_v14, %v712_v35  ;;  %v2869_v45 = vsub.f32 %v2219_v13, %v2160_v50  ;;  %1592 = vpow2.f32 %v383_v29  ;;  %v326_v17 = vsub.f32 0.0, %v2571_v52 }
 0x134   :  { %v721_v19 = vsel %vm718_vm14, %v720_v32, %v716_v49  ;;  %1594 = vpow2.f32 %v385_v20  ;;  %v387_v48 = vmul.f32 1.442695, %v325_v1  ;;  %v725_v42 = vsub.f32 1.0, %v724_v15 }
 0x135   :  { %v984_v37 = vmul.f32 %v2869_v45, %v691_v51  ;;  %1596 = vrcp.f32 %v2536_v61  ;;  %v2870_v36 = vsub.f32 %v2302_v34, %v2206_v4  ;;  %v389_v43 = vmul.f32 1.442695, %v326_v17 }
 0x136   :  { %vm729_vm0 = vweird.f32 %v2429_v60  ;;  %1598 = vpow2.f32 %v387_v48  ;;  %v726_v13 = vmul.f32 %v2429_v60, %v725_v42  ;;  %v732_v14 = vand.u32 2147483647, %v2384_v41 }
 0x137   :  { %v986_v12 = vmul.f32 %v2870_v36, %v721_v19  ;;  %v734_v31 = vand.u32 2147483648, %v2384_v41  ;;  %v1016_v54 = vadd.f32 %v984_v37, %v2160_v50  ;;  %1600 = vpow2.f32 %v389_v43 }
 0x138   :  { %v754_v63 = vmul.f32 %v2481_v59, %v2423_v25  ;;  %v727_v34 = vadd.f32 %v2429_v60, %v726_v13  ;;  %vm728_vm1 = vweird.f32 %v2384_v41  ;;  %vm758_vm2 = vweird.f32 %v2423_v25 }
 0x139   :  { %v1018_v51 = vadd.f32 %v986_v12, %v2206_v4  ;;  %v735_v35 = vor.u32 1.1754944e-38, %v734_v31  ;;  %v1593_v29 = vpop.eup %1592  ;;  %vm730_vm3 = vmor %vm728_vm1, %vm729_vm0  ;;  %v762_v50 = vand.u32 2147483647, %v2423_v25  ;;  %v764_v4 = vand.u32 2147483648, %v2423_v25 }
 0x13a   :  { %v755_v20 = vsub.f32 1.0, %v754_v63  ;;  %v1595_v1 = vpop.eup %1594  ;;  %v2602_v15 = vadd.f32 1.0, %v1593_v29  ;;  %v731_v49 = vsel %vm730_vm3, %v2429_v60, %v727_v34  ;;  %vm733_vm4 = vcmp.eq.f32.partialorder %v732_v14, 8.507059e+37 }
 0x13b   :  { %v1040_v32 = vpack.c.bf16 %v1018_v51, %v1016_v54  ;;  %v739_v41 = vmul.f32 %v2456_v38, %v2406_v40  ;;  %v2607_v45 = vpop.eup %1596  ;;  %v2609_v37 = vadd.f32 1.0, %v1595_v1  ;;  %v736_v17 = vsel %vm733_vm4, %v735_v35, %v731_v49 }
 0x13c   :  { %v756_v19 = vmul.f32 %v2481_v59, %v755_v20  ;;  %vm759_vm5 = vweird.f32 %v2481_v59  ;;  %v1599_v48 = vpop.eup %1598  ;;  %vm2613_vm6 = vcmp.eq.f32.partialorder %v762_v50, 8.507059e+37  ;;  %v2873_v60 = vsub.f32 %v2327_v0, %v2271_v56 }
 0x13d   :  { %1256 = vmatmul.bf16.gmra.mxu3 %v1040_v32  ;;  %v740_v12 = vsub.f32 1.0, %v739_v41  ;;  %vm743_vm7 = vweird.f32 %v2406_v40  ;;  %v1601_v43 = vpop.eup %1600  ;;  %1602 = vrcp.f32 %v2602_v15  ;;  %v2622_v13 = vadd.f32 1.0, %v1599_v48  ;;  %vm760_vm8 = vmor %vm758_vm2, %vm759_vm5 }
 0x13e   :  { %v987_v36 = vmul.f32 %v2873_v60, %v736_v17  ;;  %v757_v14 = vadd.f32 %v2481_v59, %v756_v19  ;;  %v765_v31 = vor.u32 1.1754944e-38, %v764_v4  ;;  %1604 = vrcp.f32 %v2609_v37 }
 0x13f   :  { %v741_v54 = vmul.f32 %v2456_v38, %v740_v12  ;;  %vm744_vm9 = vweird.f32 %v2456_v38  ;;  %v747_v0 = vand.u32 2147483647, %v2406_v40  ;;  %v2631_v51 = vadd.f32 1.0, %v1601_v43 }
 0x140   :  { %v761_v63 = vsel %vm760_vm8, %v2481_v59, %v757_v14  ;;  %v749_v34 = vand.u32 2147483648, %v2406_v40  ;;  %v769_v35 = vmul.f32 %v2514_v44, %v2450_v28  ;;  %1606 = vrcp.f32 %v2622_v13  ;;  %vm745_vm10 = vmor %vm743_vm7, %vm744_vm9 }
 0x141   :  { %v766_v25 = vsel %vm2613_vm6, %v765_v31, %v761_v63  ;;  %v1019_v29 = vadd.f32 %v987_v36, %v2271_v56  ;;  %v742_v32 = vadd.f32 %v2456_v38, %v741_v54  ;;  %v2874_v20 = vsub.f32 %v2354_v30, %v2310_v11 }
 0x142   :  { %vm748_vm11 = vcmp.eq.f32.partialorder %v747_v0, 8.507059e+37  ;;  %v750_v59 = vor.u32 1.1754944e-38, %v749_v34  ;;  %v770_v4 = vsub.f32 1.0, %v769_v35  ;;  %vm774_vm12 = vweird.f32 %v2514_v44 }
 0x143   :  { %v989_v50 = vmul.f32 %v2874_v20, %v766_v25  ;;  %v746_v1 = vsel %vm745_vm10, %v2456_v38, %v742_v32  ;;  %v777_v49 = vand.u32 2147483647, %v2450_v28  ;;  %v779_v56 = vand.u32 2147483648, %v2450_v28  ;;  %v2651_v41 = vpop.eup %1602 }
 0x144   :  { %v751_v30 = vsel %vm748_vm11, %v750_v59, %v746_v1  ;;  %v771_v19 = vmul.f32 %v2514_v44, %v770_v4  ;;  %v784_v40 = vmul.f32 %v2560_v46, %v2504_v47  ;;  %v2657_v48 = vpop.eup %1604  ;;  %1608 = vrcp.f32 %v2631_v51 }
 0x145   :  { %v1021_v17 = vadd.f32 %v989_v50, %v2310_v11  ;;  %vm773_vm13 = vweird.f32 %v2450_v28  ;;  %vm2661_vm14 = vcmp.eq.f32.partialorder %v777_v49, 8.507059e+37  ;;  %v2877_v42 = vsub.f32 %v2344_v22, %v2307_v24 }
 0x146   :  { %v772_v36 = vadd.f32 %v2514_v44, %v771_v19  ;;  %v780_v12 = vor.u32 1.1754944e-38, %v779_v56  ;;  %v785_v43 = vsub.f32 1.0, %v784_v40  ;;  %v2669_v14 = vpop.eup %1606  ;;  %vm775_vm15 = vmor %vm773_vm13, %vm774_vm12  ;;  %vm788_vm0 = vweird.f32 %v2504_v47 }
 0x147   :  { %v988_v11 = vmul.f32 %v2877_v42, %v751_v30  ;;  %v1041_v60 = vpack.c.bf16 %v1021_v17, %v1019_v29  ;;  %v792_v28 = vand.u32 2147483647, %v2504_v47  ;;  %v794_v31 = vand.u32 2147483648, %v2504_v47 }
 0x148   :  { %v814_v22 = vmul.f32 %v2573_v33, %v2516_v18  ;;  %v776_v54 = vsel %vm775_vm15, %v2514_v44, %v772_v36  ;;  %v786_v63 = vmul.f32 %v2560_v46, %v785_v43  ;;  %vm789_vm1 = vweird.f32 %v2560_v46 }
 0x149   :  { %1212 = vmatmul.bf16.gmra.mxu2 %v1041_v60  ;;  %v1020_v0 = vadd.f32 %v988_v11, %v2307_v24  ;;  %v781_v34 = vsel %vm2661_vm14, %v780_v12, %v776_v54  ;;  %vm818_vm2 = vweird.f32 %v2516_v18  ;;  %vm819_vm3 = vweird.f32 %v2573_v33  ;;  %vm790_vm5 = vmor %vm788_vm0, %vm789_vm1 }
 0x14a   :  { %v815_v35 = vsub.f32 1.0, %v814_v22  ;;  %v2878_v25 = vsub.f32 %v2373_v6, %v2313_v21  ;;  %v787_v44 = vadd.f32 %v2560_v46, %v786_v63  ;;  %vm793_vm4 = vcmp.eq.f32.partialorder %v792_v28, 8.507059e+37  ;;  %v2691_v32 = vpop.eup %1608  ;;  %vm820_vm8 = vmor %vm818_vm2, %vm819_vm3 }
 0x14b   :  { %v824_v24 = vand.u32 2147483648, %v2516_v18  ;;  %v795_v20 = vor.u32 1.1754944e-38, %v794_v31  ;;  %v822_v59 = vand.u32 2147483647, %v2516_v18  ;;  %v799_v4 = vmul.f32 %v2567_v2, %v2510_v27 }
 0x14c   :  { %v990_v29 = vmul.f32 %v2878_v25, %v781_v34  ;;  %v816_v50 = vmul.f32 %v2573_v33, %v815_v35  ;;  %v791_v1 = vsel %vm790_vm5, %v2560_v46, %v787_v44  ;;  %vm803_vm6 = vweird.f32 %v2510_v27 }
 0x14d   :  { %vm804_vm7 = vweird.f32 %v2567_v2  ;;  %v796_v49 = vsel %vm793_vm4, %v795_v20, %v791_v1  ;;  %v800_v56 = vsub.f32 1.0, %v799_v4  ;;  %v807_v17 = vand.u32 2147483647, %v2510_v27 }
 0x14e   :  { %v1022_v6 = vadd.f32 %v990_v29, %v2313_v21  ;;  %v817_v47 = vadd.f32 %v2573_v33, %v816_v50  ;;  %v825_v19 = vor.u32 1.1754944e-38, %v824_v24  ;;  %v809_v21 = vand.u32 2147483648, %v2510_v27  ;;  %vm805_vm12 = vmor %vm803_vm6, %vm804_vm7 }
 0x14f   :  { %v829_v46 = vmul.f32 %v2607_v45, %v2536_v61  ;;  %vm823_vm9 = vcmp.eq.f32.partialorder %v822_v59, 8.507059e+37  ;;  %v991_v38 = vmul.f32 %v959_v58, %v796_v49  ;;  %v801_v42 = vmul.f32 %v2567_v2, %v800_v56 }
 0x150   :  { %v1042_v30 = vpack.c.bf16 %v1022_v6, %v1020_v0  ;;  %v821_v40 = vsel %vm820_vm8, %v2573_v33, %v817_v47  ;;  %vm2717_vm10 = vcmp.eq.f32.partialorder %v807_v17, 8.507059e+37  ;;  %vm833_vm11 = vweird.f32 %v2536_v61 }
 0x151   :  { %v826_v11 = vsel %vm823_vm9, %v825_v19, %v821_v40  ;;  %v830_v60 = vsub.f32 1.0, %v829_v46  ;;  %v802_v36 = vadd.f32 %v2567_v2, %v801_v42  ;;  %v810_v12 = vor.u32 1.1754944e-38, %v809_v21 }
 0x152   :  { %1261 = vmatmul.bf16.gmra.mxu3 %v1042_v30  ;;  %v993_v33 = vmul.f32 %v961_v55, %v826_v11  ;;  %v837_v26 = vand.u32 2147483647, %v2536_v61  ;;  %vm834_vm13 = vweird.f32 %v2607_v45  ;;  %v839_v43 = vand.u32 2147483648, %v2536_v61 }
 0x153   :  { %v831_v58 = vmul.f32 %v2607_v45, %v830_v60  ;;  %v844_v57 = vmul.f32 %v2651_v41, %v2602_v15  ;;  %v1023_v55 = vadd.f32 %v991_v38, %v2420_v7  ;;  %v806_v31 = vsel %vm805_vm12, %v2567_v2, %v802_v36  ;;  %vm835_vm15 = vmor %vm833_vm11, %vm834_vm13 }
 0x154   :  { %v1025_v28 = vadd.f32 %v993_v33, %v2440_v62  ;;  %vm838_vm14 = vcmp.eq.f32.partialorder %v837_v26, 8.507059e+37  ;;  %v811_v27 = vsel %vm2717_vm10, %v810_v12, %v806_v31  ;;  %v840_v54 = vor.u32 1.1754944e-38, %v839_v43  ;;  %v932_v33 = vld [vmem:[%s2841_s1 + $0xe8] sm:$0xff]  ;;  %v934_v43 = vld [vmem:[%s2841_s1 + $0xf8] sm:$0xff] }
 0x155   :  { %v832_v22 = vadd.f32 %v2607_v45, %v831_v58  ;;  %v845_v0 = vsub.f32 1.0, %v844_v57  ;;  %v992_v7 = vmul.f32 %v960_v9, %v811_v27  ;;  %v852_v62 = vand.u32 2147483647, %v2602_v15  ;;  %v933_v9 = vld [vmem:[%s2841_s1 + $0xf0] sm:$0xff]  ;;  %s1719_s1 = smov [#allocation8]  }
 0x156   :  { %v1043_v63 = vpack.c.bf16 %v1025_v28, %v1023_v55  ;;  %v854_v2 = vand.u32 2147483648, %v2602_v15  ;;  %vm849_vm0 = vweird.f32 %v2651_v41  ;;  %v874_v25 = vmul.f32 %v2669_v14, %v2622_v13  ;;  %s1297_s27 = sshll.u32 %s1719_s1, 4  ;;  %s1298_s27 = int_to_ptr.vmem [resolvable:$true] %s1297_s27 }
 0x157   :  { %v836_v34 = vsel %vm835_vm15, %v2607_v45, %v832_v22  ;;  %v846_v35 = vmul.f32 %v2651_v41, %v845_v0  ;;  %v1024_v61 = vadd.f32 %v992_v7, %v2427_v53  ;;  %vm848_vm1 = vweird.f32 %v2602_v15 }
 0x158   :  { %v841_v29 = vsel %vm838_vm14, %v840_v54, %v836_v34  ;;  %vm853_vm2 = vcmp.eq.f32.partialorder %v852_v62, 8.507059e+37  ;;  %v875_v24 = vsub.f32 1.0, %v874_v25  ;;  %vm850_vm3 = vmor %vm848_vm1, %vm849_vm0  ;;  %v855_v53 = vor.u32 1.1754944e-38, %v854_v2 }
 0x159   :  { %1217 = vmatmul.bf16.gmra.mxu2 %v1043_v63  ;;  %v994_v45 = vmul.f32 %v962_v16, %v841_v29  ;;  %v847_v44 = vadd.f32 %v2651_v41, %v846_v35  ;;  %vm879_vm4 = vweird.f32 %v2669_v14  ;;  %v884_v15 = vand.u32 2147483648, %v2622_v13 }
 0x15a   :  { %v859_v20 = vmul.f32 %v2657_v48, %v2609_v37  ;;  %v876_v23 = vmul.f32 %v2669_v14, %v875_v24  ;;  %v882_v16 = vand.u32 2147483647, %v2622_v13  ;;  %v963_v4 = vsub.f32 %v931_v5, %v2551_v8 }
 0x15b   :  { %v1026_v50 = vadd.f32 %v994_v45, %v2444_v39  ;;  %v851_v59 = vsel %vm850_vm3, %v2651_v41, %v847_v44  ;;  %v965_v6 = vsub.f32 %v933_v9, %v2565_v10  ;;  %vm878_vm5 = vweird.f32 %v2622_v13  ;;  %v2782_v39 = vld [vmem:[%s2845_s5] ss:$0 sm:$0xff] }
 0x15c   :  { %v856_v1 = vsel %vm853_vm2, %v855_v53, %v851_v59  ;;  %v860_v49 = vsub.f32 1.0, %v859_v20  ;;  %v877_v56 = vadd.f32 %v2669_v14, %v876_v23  ;;  %vm864_vm6 = vweird.f32 %v2657_v48  ;;  %vm880_vm7 = vmor %vm878_vm5, %vm879_vm4 }
 0x15d   :  { %v1044_v47 = vpack.c.bf16 %v1026_v50, %v1024_v61  ;;  %v885_v41 = vor.u32 1.1754944e-38, %v884_v15  ;;  %v869_v30 = vand.u32 2147483648, %v2609_v37  ;;  %v889_v19 = vmul.f32 %v2691_v32, %v2631_v51 }
 0x15e   :  { %v861_v17 = vmul.f32 %v2657_v48, %v860_v49  ;;  %v881_v13 = vsel %vm880_vm7, %v2669_v14, %v877_v56  ;;  %vm883_vm8 = vcmp.eq.f32.partialorder %v882_v16, 8.507059e+37  ;;  %v995_v21 = vmul.f32 %v963_v4, %v856_v1 }
 0x15f   :  { %v867_v46 = vand.u32 2147483647, %v2609_v37  ;;  %v886_v38 = vsel %vm883_vm8, %v885_v41, %v881_v13  ;;  %vm863_vm9 = vweird.f32 %v2609_v37  ;;  %v890_v11 = vsub.f32 1.0, %v889_v19 }
 0x160   :  { %v1188_v40 = vpop.f32.mrf.mxu2  ;;  %v862_v42 = vadd.f32 %v2657_v48, %v861_v17  ;;  %v997_v18 = vmul.f32 %v965_v6, %v886_v38  ;;  %vm865_vm10 = vmor %vm863_vm9, %vm864_vm6  ;;  %vm894_vm11 = vweird.f32 %v2691_v32  ;;  %v899_v14 = vand.u32 2147483648, %v2631_v51 }
 0x161   :  { %v1189_v60 = vadd.f32 %v2782_v39, %v1188_v40  ;;  %v870_v12 = vor.u32 1.1754944e-38, %v869_v30  ;;  %v891_v37 = vmul.f32 %v2691_v32, %v890_v11  ;;  %v897_v26 = vand.u32 2147483647, %v2631_v51 }
 0x162   :  { %1266 = vmatmul.bf16.gmra.mxu3 %v1044_v47  ;;  %v866_v36 = vsel %vm865_vm10, %v2657_v48, %v862_v42  ;;  %v1027_v57 = vadd.f32 %v995_v21, %v2551_v8  ;;  %v1029_v55 = vadd.f32 %v997_v18, %v2565_v10  ;;  %vm868_vm12 = vcmp.eq.f32.partialorder %v867_v46, 8.507059e+37 }
 0x163   :  { %v1237_v58 = vpop.f32.mrf.mxu3  ;;  %v871_v28 = vsel %vm868_vm12, %v870_v12, %v866_v36  ;;  %v892_v31 = vadd.f32 %v2691_v32, %v891_v37  ;;  %vm893_vm13 = vweird.f32 %v2631_v51  ;;  %v964_v27 = vsub.f32 %v932_v33, %v2555_v3 }
 0x164   :  { %v1238_v48 = vadd.f32 %v1237_v58, %v1189_v60  ;;  %v1045_v22 = vpack.c.bf16 %v1029_v55, %v1027_v57  ;;  %vm895_vm14 = vmor %vm893_vm13, %vm894_vm11  ;;  %v900_v54 = vor.u32 1.1754944e-38, %v899_v14  ;;  %v966_v0 = vsub.f32 %v934_v43, %v2571_v52 }
 0x165   :  { %v896_v8 = vsel %vm895_vm14, %v2691_v32, %v892_v31  ;;  %vm898_vm15 = vcmp.eq.f32.partialorder %v897_v26, 8.507059e+37  ;;  %v996_v63 = vmul.f32 %v964_v27, %v871_v28 }
 0x166   :  { %1277 = vst [vmem:[#allocation8] sm:$0xff] %v1238_v48  ;;  %v901_v10 = vsel %vm898_vm15, %v900_v54, %v896_v8 }
 0x167   :  { %v998_v62 = vmul.f32 %v966_v0, %v901_v10  ;;  %v1028_v35 = vadd.f32 %v996_v63, %v2555_v3 }
 0x168   :  { %v1190_v7 = vpop.f32.mrf.mxu2 }
 0x169   :  { %v1191_v51 = vadd.f32 %v2782_v39, %v1190_v7  ;;  %1222 = vmatmul.bf16.gmra.mxu2 %v1045_v22  ;;  %v1030_v2 = vadd.f32 %v998_v62, %v2571_v52 }
 0x16b   :  { %v1239_v34 = vpop.f32.mrf.mxu3  ;;  %v1046_v29 = vpack.c.bf16 %v1030_v2, %v1028_v35 }
 0x16c   :  { %v1240_v25 = vadd.f32 %v1239_v34, %v1191_v51 }
 0x16e   :  { %1278 = vst [vmem:[#allocation8 + $0x8] sm:$0xff] %v1240_v25 }
 0x170   :  { %v1193_v61 = vpop.f32.mrf.mxu2 }
 0x171   :  { %v1194_v32 = vadd.f32 %v2782_v39, %v1193_v61 }
 0x172   :  { %1271 = vmatmul.bf16.gmra.mxu3 %v1046_v29 }
 0x178   :  { %v1195_v45 = vpop.f32.mrf.mxu2 }
 0x179   :  { %v1196_v44 = vadd.f32 %v2782_v39, %v1195_v45 }
 0x17c   :  { %v1242_v5 = vpop.f32.mrf.mxu3 }
 0x17d   :  { %v1243_v9 = vadd.f32 %v1242_v5, %v1194_v32 }
 0x17f   :  { %1279 = vst [vmem:[#allocation8 + $0x10] sm:$0xff] %v1243_v9 }
 0x184   :  { %v1244_v24 = vpop.f32.mrf.mxu3 }
 0x185   :  { %v1245_v53 = vadd.f32 %v1244_v24, %v1196_v44 }
 0x187   :  { %1280 = vst [vmem:[#allocation8 + $0x18] sm:$0xff] %v1245_v53 }
 0x189   :  { %v1198_v52 = vpop.f32.mrf.mxu2 }
 0x18a   :  { %v1199_v15 = vadd.f32 %v2782_v39, %v1198_v52 }
 0x191   :  { %v1200_v50 = vpop.f32.mrf.mxu2 }
 0x192   :  { %v1201_v59 = vadd.f32 %v2782_v39, %v1200_v50 }
 0x193   :  { %v1247_v3 = vpop.f32.mrf.mxu3 }
 0x194   :  { %v1248_v20 = vadd.f32 %v1247_v3, %v1199_v15 }
 0x196   :  { %1281 = vst [vmem:[#allocation8 + $0x20] sm:$0xff] %v1248_v20 }
 0x19b   :  { %v1249_v23 = vpop.f32.mrf.mxu3 }
 0x19c   :  { %v1250_v16 = vadd.f32 %v1249_v23, %v1201_v59 }
 0x19e   :  { %1282 = vst [vmem:[#allocation8 + $0x28] sm:$0xff] %v1250_v16 }
 0x1a0   :  { %v1203_v4 = vpop.f32.mrf.mxu2 }
 0x1a1   :  { %v1204_v6 = vadd.f32 %v2782_v39, %v1203_v4 }
 0x1a7   :  { %v1252_v1 = vpop.f32.mrf.mxu3 }
 0x1a8   :  { %v1253_v49 = vadd.f32 %v1252_v1, %v1204_v6  ;;  %v1205_v47 = vpop.f32.mrf.mxu2 }
 0x1a9   :  { %v1206_v56 = vadd.f32 %v2782_v39, %v1205_v47 }
 0x1aa   :  { %1283 = vst [vmem:[#allocation8 + $0x30] sm:$0xff] %v1253_v49 }
 0x1af   :  { %v1254_v41 = vpop.f32.mrf.mxu3 }
 0x1b0   :  { %v1255_v17 = vadd.f32 %v1254_v41, %v1206_v56 }
 0x1b2   :  { %1284 = vst [vmem:[#allocation8 + $0x38] sm:$0xff] %v1255_v17 }
 0x1b4   :  { %v1208_v30 = vpop.f32.mrf.mxu2 }
 0x1b5   :  { %v1209_v19 = vadd.f32 %v2782_v39, %v1208_v30 }
 0x1bc   :  { %v1210_v46 = vpop.f32.mrf.mxu2 }
 0x1bd   :  { %v1211_v40 = vadd.f32 %v2782_v39, %v1210_v46 }
 0x1c0   :  { %v1257_v13 = vpop.f32.mrf.mxu3 }
 0x1c1   :  { %v1258_v21 = vadd.f32 %v1257_v13, %v1209_v19 }
 0x1c3   :  { %1285 = vst [vmem:[#allocation8 + $0x40] sm:$0xff] %v1258_v21 }
 0x1c8   :  { %v1259_v38 = vpop.f32.mrf.mxu3 }
 0x1c9   :  { %v1260_v42 = vadd.f32 %v1259_v38, %v1211_v40 }
 0x1cb   :  { %1286 = vst [vmem:[#allocation8 + $0x48] sm:$0xff] %v1260_v42 }
 0x1cc   :  { %v1213_v11 = vpop.f32.mrf.mxu2 }
 0x1cd   :  { %v1214_v18 = vadd.f32 %v2782_v39, %v1213_v11 }
 0x1d4   :  { %v1215_v60 = vpop.f32.mrf.mxu2 }
 0x1d5   :  { %v1262_v14 = vpop.f32.mrf.mxu3  ;;  %v1216_v36 = vadd.f32 %v2782_v39, %v1215_v60 }
 0x1d6   :  { %v1263_v33 = vadd.f32 %v1262_v14, %v1214_v18 }
 0x1d8   :  { %1287 = vst [vmem:[#allocation8 + $0x50] sm:$0xff] %v1263_v33 }
 0x1dc   :  { %v1218_v37 = vpop.f32.mrf.mxu2 }
 0x1dd   :  { %v1264_v12 = vpop.f32.mrf.mxu3  ;;  %v1219_v58 = vadd.f32 %v2782_v39, %v1218_v37 }
 0x1de   :  { %v1265_v26 = vadd.f32 %v1264_v12, %v1216_v36 }
 0x1e0   :  { %1288 = vst [vmem:[#allocation8 + $0x58] sm:$0xff] %v1265_v26 }
 0x1e4   :  { %v1220_v57 = vpop.f32.mrf.mxu2 }
 0x1e5   :  { %v1267_v43 = vpop.f32.mrf.mxu3  ;;  %v1221_v28 = vadd.f32 %v2782_v39, %v1220_v57 }
 0x1e6   :  { %v1268_v55 = vadd.f32 %v1267_v43, %v1219_v58 }
 0x1e8   :  { %1289 = vst [vmem:[#allocation8 + $0x60] sm:$0xff] %v1268_v55 }
 0x1ec   :  { %v1223_v48 = vpop.f32.mrf.mxu2 }
 0x1ed   :  { %v1269_v31 = vpop.f32.mrf.mxu3  ;;  %v1224_v22 = vadd.f32 %v2782_v39, %v1223_v48 }
 0x1ee   :  { %v1270_v27 = vadd.f32 %v1269_v31, %v1221_v28 }
 0x1f0   :  { %1290 = vst [vmem:[#allocation8 + $0x68] sm:$0xff] %v1270_v27 }
 0x1f4   :  { %v1225_v8 = vpop.f32.mrf.mxu2 }
 0x1f5   :  { %v1272_v54 = vpop.f32.mrf.mxu3  ;;  %v1226_v10 = vadd.f32 %v2782_v39, %v1225_v8 }
 0x1f6   :  { %v1273_v0 = vadd.f32 %v1272_v54, %v1224_v22 }
 0x1f8   :  { %1291 = vst [vmem:[#allocation8 + $0x70] sm:$0xff] %v1273_v0 }
 0x1fd   :  { %v1274_v63 = vpop.f32.mrf.mxu3 }
 0x1fe   :  { %v1275_v7 = vadd.f32 %v1274_v63, %v1226_v10 }
 0x200   :  { %1292 = vst [vmem:[#allocation8 + $0x78] sm:$0xff] %v1275_v7 }
 0x201   :  { %1305 = dma.vmem_to_hbm [thread:$0]  %s1298_s27, 2048, %s1300_s8, [#allocation4], %s1713_s29, %s1713_s29, %s1714_s30  }
 0x202   :  { %1710 = dma.done.wait [#allocation4], 2048  }
 0x203   :  { %1711 = vsyncadd [#allocation4], 4294965248 }
 0x204   :  { %1310 = vsyncpa [#allocation3], 1 }
 0x205   :  { %1311 = vsyncpa [#allocation6], 1 }
 0x206   :  { %1312 = vsyncpa [#allocation4], 1 }

// kernel: hbilstm_layer_forward.3
= control target key start
LH: loop header
LB: loop body
LE: loop exit
PB: predicated region body
PF: predicated region fallthrough
CT: control target
= control target key end

     0   :  { %s4600_s0 = inlined_call_operand.vmem [shape: s32[8,1], index: 0, kind: input, shape index: {}]   ;;  %s4601_s1 = inlined_call_operand.hbm [shape: f32[128,128], index: 1, kind: input, shape index: {}]   ;;  %s4602_s2 = inlined_call_operand.hbm [shape: bf16[2,128,512], index: 2, kind: input, shape index: {}]   ;;  %s4603_s3 = inlined_call_operand.vmem [shape: f32[2,1,512], index: 3, kind: input, shape index: {}]   ;;  %s4604_s4 = inlined_call_operand.hbm [shape: bf16[2,128,512], index: 4, kind: input, shape index: {}]   ;;  %s4605_s5 = inlined_call_operand.vmem [shape: f32[2,8,128], index: 5, kind: input, shape index: {}]   ;;  %s4606_s6 = inlined_call_operand.vmem [shape: f32[2,8,128], index: 6, kind: input, shape index: {}]   ;;  %s4607_s7 = inlined_call_operand.vmem [shape: f32[128,256], index: 7, kind: output, shape index: {0}]   ;;  %s4608_s8 = inlined_call_operand.vmem [shape: f32[2,8,128], index: 8, kind: output, shape index: {1}]   ;;  %s4609_s9 = inlined_call_operand.vmem [shape: f32[2,8,128], index: 9, kind: output, shape index: {2}]  }
   0x1   :  { %4625 = sst [smem:[#allocation24_spill]] %s4600_s0 }
   0x2   :  { %4626 = sst [smem:[#allocation25_spill]] %s4601_s1 }
   0x3   :  { %4627 = sst [smem:[#allocation26_spill]] %s4602_s2 }
   0x4   :  { %4628 = sst [smem:[#allocation27_spill]] %s4603_s3 }
   0x5   :  { %4629 = sst [smem:[#allocation28_spill]] %s4604_s4 }
   0x6   :  { %4630 = sst [smem:[#allocation29_spill]] %s4605_s5 }
   0x7   :  { %4631 = sst [smem:[#allocation30_spill]] %s4606_s6 }
   0x8   :  { %4632 = sst [smem:[#allocation31_spill]] %s4607_s7 }
   0x9   :  { %4633 = sst [smem:[#allocation32_spill]] %s4608_s8 }
   0xa   :  { %4634 = sst [smem:[#allocation33_spill]] %s4609_s9 }
   0xb   :  { %15 = vsyncpa [#allocation4], 0 }
   0xc   :  { %17 = vsyncpa [#allocation4 + $0x1], 0 }
   0xd   :  { %18 = vsyncpa [#allocation6], 0 }
   0xe   :  { %20 = vsyncpa [#allocation6 + $0x1], 0  ;;  %s3550_s30 = smov 0   ;;  %s3552_s10 = smov 0  }
   0xf   :  { %s3554_s11 = smov 0   ;;  %s3556_s12 = smov 0  }
  0x10   :  { %s3558_s13 = smov 0   ;;  %s3560_s14 = smov 0  }
  0x11   :  { %s3562_s15 = smov 0   ;;  %s3564_s16 = smov 0  }
  0x12   :  { %s3566_s17 = smov 0   ;;  %s3568_s18 = smov 0  }
  0x13   :  { %s3570_s19 = smov 0   ;;  %s3572_s20 = smov 0  }
  0x14   :  { %s3574_s21 = smov 0  }
  0x15 LB: > { %4635 = sst [smem:[#allocation11_spill]] %s3445_s30  ;;  %s3614_s22 = sadd.s32 4294967295, %s3493_s21   ;;  %s3493_s21 = sphi %s3574_s21, %s26_s21   ;;  %s3489_s20 = sphi %s3572_s20, %s4694_s20   ;;  %s3485_s19 = sphi %s3570_s19, %s4693_s19   ;;  %s3481_s18 = sphi %s3568_s18, %s4684_s18   ;;  %s3477_s17 = sphi %s3566_s17, %s4683_s17   ;;  %s3473_s16 = sphi %s3564_s16, %s4692_s16   ;;  %s3469_s15 = sphi %s3562_s15, %s4681_s15   ;;  %s3465_s14 = sphi %s3560_s14, %s4680_s14   ;;  %s3461_s13 = sphi %s3558_s13, %s4679_s13   ;;  %s3457_s12 = sphi %s3556_s12, %s4691_s12   ;;  %s3453_s11 = sphi %s3554_s11, %s4690_s11   ;;  %s3449_s10 = sphi %s3552_s10, %s4689_s10   ;;  %s3445_s30 = sphi %s3550_s30, %s4688_s30  }
  0x16   : > { %4636 = sst [smem:[#allocation12_spill]] %s3461_s13  ;;  %p82_p0 = scmp.eq.s32.totalorder %s3493_s21, 0 }
  0x17   : > { %4637 = sst [smem:[#allocation13_spill]] %s3469_s15  ;;  %p88_p1 = scmp.eq.s32.totalorder %s3614_s22, 0 }
  0x18   : > { %4638 = sst [smem:[#allocation14_spill]] %s3473_s16  ;;  %p107_p2 = scmp.ne.s32.totalorder %s3461_s13, %s3457_s12 }
  0x19   : > { %4639 = sst [smem:[#allocation15_spill]] %s3477_s17  ;;  %p113_p3 = scmp.ne.s32.totalorder %s3457_s12, %s3453_s11 }
  0x1a   : > { %4640 = sst [smem:[#allocation16_spill]] %s3481_s18  ;;  %p3051_p4 = scmp.lt.s32.totalorder %s3493_s21, 4 }
  0x1b   : > { %4641 = sst [smem:[#allocation17_spill]] %s3485_s19  ;;  %p109_p5 = por %p107_p2, %p82_p0 }
  0x1c   : > { %4642 = sst [smem:[#allocation18_spill]] %s3489_s20  ;;  %p3627_p6 = por %p113_p3, %p88_p1 }
  0x1d   : > { %s358_s25 = sand.u32 1, %s3493_s21   ;;  %s360_s26 = sand.u32 1, %s3461_s13  }
  0x1e   : > { %s2625_s27 = sshll.u32 %s360_s26, 8  ;;  %s2943_s28 = sshll.u32 %s3489_s20, 8 }
  0x1f   : > { %s4644_s2 = sld [smem:[#allocation26_spill]]  ;;  %s362_s23 = scalar_lea.vmem [#allocation5], %s2625_s27 }
  0x20   : > { %s370_s17 = sshll.u32 %s362_s23, 4  ;;  %p3639_p7 = pnand %p3051_p4, %p109_p5  ;;  %s371_s17 = int_to_ptr.vmem [resolvable:$true] %s370_s17 }
  0x21   : > { %s3643_s26 = scalar_lea.sflag [#allocation6], %s358_s25  ;;  %s4612_s7 = smov 256  }
  0x22   : > { %s4613_s29 = smov 16   ;;  %s4646_s4 = sld [smem:[#allocation28_spill]] }
  0x23   : > { %s391_s8 = scalar_lea.vmem [#allocation7], %s2625_s27  ;;  %p2631_p8 = scmp.ge.s32.totalorder %s3493_s21, 1 }
  0x24   : > { %s3654_s6 = sshll.u32 %s391_s8, 4  ;;  %p421_p9 = scmp.lt.s32.totalorder %s3493_s21, 5 }
  0x25   : > { %s367_s0 = scalar_lea.hbm %s4644_s2, %s2943_s28  ;;  %4647 = sst [smem:[#allocation19_spill]] %s3654_s6 }
  0x26   : > { %s368_s11 = sshll.u32 %s367_s0, 4  ;;  %p3661_p10 = pnand %p2631_p8, %p421_p9  ;;  %s369_s11 = int_to_ptr.hbm [resolvable:$true] %s368_s11 }
  0x27   : > { %3047 = dma.hbm_to_vmem [thread:$0]  (!%p3639_p7), %s369_s11, 4096, %s371_s17, %s3643_s26, %s4612_s7, %s4612_s7, %s4613_s29  }
  0x28   : > { %s396_s2 = scalar_lea.hbm %s4646_s4, %s2943_s28  ;;  %s35_s28 = sadd.s32 1, %s3485_s19 }
  0x29   : > { %s397_s25 = sshll.u32 %s396_s2, 4  ;;  %s38_s8 = sadd.s32 1, %s3489_s20  ;;  %s3657_s25 = int_to_ptr.hbm [resolvable:$true] %s397_s25 }
  0x2a   : > { %p36_p11 = scmp.ge.s32.totalorder %s35_s28, 2  ;;  %s2615_s2 = sshll.u32 %s3485_s19, 1 }
  0x2b   : > { %s64_s27 = ssub.s32 1, %s2615_s2  ;;  %s74_s11 = sadd.s32 1, %s3473_s16 }
  0x2c   : > { %s4696_s28 = smov (%p36_p11, %s35_s28), 0  ;;  %s4698_s8 = smov (!%p36_p11, %s38_s8), %s3489_s20 }
  0x2d   : > { %4649 = sst [smem:[#allocation20_spill]] %s4696_s28  ;;  %s65_s0 = smul.u32 %s3489_s20, %s64_s27 }
  0x2e   : > { %s2616_s23 = sshll.u32 %s4696_s28, 1  ;;  %p40_p12 = scmp.ge.s32.totalorder %s4698_s8, 2 }
  0x2f   : > { %s68_s7 = ssub.s32 1, %s2616_s23  ;;  %s66_s29 = sadd.s32 %s3485_s19, %s65_s0 }
  0x30   : > { %p81_p13 = scmp.ne.s32.totalorder %s3473_s16, %s3469_s15  ;;  %s4700_s8 = smov (%p40_p12, %s4698_s8), 0 }
  0x31   : > { %4650 = sst [smem:[#allocation21_spill]] %s4700_s8  ;;  %p87_p3 = scmp.ne.s32.totalorder %s3469_s15, %s3465_s14 }
  0x32   : > { %p3681_p2 = por %p82_p0, %p81_p13  ;;  %s69_s27 = smul.u32 %s68_s7, %s4700_s8 }
  0x33   : > { %s97_s23 = ssub.s32 %s3489_s20, %s4700_s8  ;;  %p3692_p5 = por %p88_p1, %p87_p3 }
  0x34   : > { %p98_p8 = scmp.eq.s32.totalorder %s97_s23, 0  ;;  %s70_s6 = sadd.s32 %s69_s27, %s4696_s28 }
  0x35   : > { %s240_s4 = sadd.s32 1, %s3449_s10  ;;  %s71_s19 = ssub.s32 %s66_s29, %s70_s6 }
  0x36   : > { %p250_p9 = scmp.ne.s32.totalorder %s3449_s10, %s3445_s30  ;;  %p72_p11 = scmp.eq.s32.totalorder %s71_s19, 0 }
  0x37   : > { %s237_s5 = sor.u32 %s97_s23, %s71_s19  ;;  %s4653_s3 = sadd.s32 1, %s3461_s13 }
  0x38   : > { %s3703_s18 = scalar_select %p98_p8, %s3461_s13, %s4653_s3  }
  0x39   : > { %s3706_s14 = scalar_select %p72_p11, %s3473_s16, %s74_s11  }
  0x3a   : > { %4654 = sst [smem:[#allocation22_spill]] %s3703_s18  ;;  %p238_p0 = scmp.eq.s32.totalorder %s237_s5, 0 }
  0x3b   : > { %4655 = sst [smem:[#allocation23_spill]] %s3706_s14  ;;  %p251_p12 = scmp.eq.s32.totalorder %s3614_s22, 3 }
  0x3c   : > { %s332_s7 = sand.u32 1, %s3473_s16   ;;  %s2942_s8 = sshll.u32 %s66_s29, 6 }
  0x3d   : > { %s3711_s20 = scalar_select %p238_p0, %s3449_s10, %s240_s4  }
  0x3e   : > { %p3713_p1 = por %p251_p12, %p250_p9  ;;  %s2621_s6 = sshll.u32 %s332_s7, 6 }
  0x3f   : > { %s4657_s1 = sld [smem:[#allocation25_spill]]  ;;  %s336_s3 = scalar_lea.vmem [#allocation3], %s2621_s6 }
  0x40   : > { %s348_s11 = sshll.u32 %s336_s3, 4  ;;  %p3724_p13 = pnand %p3051_p4, %p3681_p2  ;;  %s349_s11 = int_to_ptr.vmem [resolvable:$true] %s348_s11 }
  0x41   : > { %s333_s4 = scalar_lea.sflag [#allocation4], %s332_s7 }
  0x42   : > { %p3327_p8 = pneg %p3724_p13 }
  0x45   : > { %s345_s23 = scalar_lea.hbm %s4657_s1, %s2942_s8  ;;  %s3330_s6 = scalar_lea.hbm %s4657_s1, 128 }
  0x46   : > { %s346_s30 = sshll.u32 %s345_s23, 4  ;;  %s347_s30 = int_to_ptr.hbm [resolvable:$true] %s346_s30 }
  0x47   : > { %s3323_s29 = sshra.s32 %s347_s30, 4  ;;  %s3324_s29 = int_to_ptr.hbm [resolvable:$true] %s3323_s29 }
  0x48   : > { %s3325_s14 = scalar_lea.hbm %s3324_s29, 64  ;;  %p3331_p4 = scmp.lt.s32.totalorder %s3324_s29, %s4657_s1 }
  0x49   : > { %p3326_p3 = scmp.ne.s32.totalorder %s3324_s29, %s3325_s14  ;;  %p3332_p2 = scmp.lt.s32.totalorder %s3330_s6, %s3325_s14 }
  0x4b   : > { %p3328_p9 = pnand %p3327_p8, %p3326_p3  ;;  %p3333_p0 = por %p3332_p2, %p3331_p4 }
  0x4d   : > { %p3329_p11 = pneg %p3328_p9 }
  0x4f   : > { %p3334_p12 = pnand %p3333_p0, %p3329_p11 }
  0x51   : > { %3337 = shalt.err (!%p3334_p12)
}
  0x52   : > { %s3497_s7 = smov 128   ;;  %s4659_s23 = sld [smem:[#allocation19_spill]] }
  0x53   : > { %s3498_s3 = smov 8   ;;  %s4660_s28 = smov 16  }
  0x54   : > { %3044 = dma.hbm_to_vmem [thread:$0]  (!%p3724_p13), %s347_s30, 1024, %s349_s11, %s333_s4, %s3497_s7, %s3497_s7, %s3498_s3  }
  0x55   : > { %s4661_s8 = smov 256   ;;  %425 = sbr.rel (%p3661_p10) target bundleno = 1641 (0x669), region = 48 }
  0x56   : > { %s427_s14 = sand.u32 (!%p3661_p10), 1, %s3469_s15  }
  0x57   : > { %s2632_s29 = sshll.u32 (!%p3661_p10), %s427_s14, 6  ;;  %s428_s6 = scalar_lea.sflag (!%p3661_p10), [#allocation4], %s427_s14 }
  0x58   : > { %s4662_s16 = int_to_ptr.vmem [resolvable:$true] %s4659_s23  ;;  %s3750_s2 = scalar_lea.vmem (!%p3661_p10), [#allocation3], %s2632_s29 }
  0x59   : > { %3050 = dma.hbm_to_vmem [thread:$0]  (!%p3639_p7), %s3657_s25, 4096, %s4662_s16, %s3643_s26, %s4661_s8, %s4661_s8, %s4660_s28  }
  0x5a   : > { %3436 = dma.done.wait (%p3692_p5), %s428_s6, 1024  }
  0x5b   : > { %3438 = vsyncadd (%p3692_p5), %s428_s6, 4294966272  ;;  %s437_s9 = sand.u32 1, %s3614_s22   ;;  %s439_s30 = sand.u32 1, %s3457_s12  }
  0x5c   : > { %s2633_s16 = sshll.u32 %s439_s30, 8  ;;  %s438_s26 = scalar_lea.sflag [#allocation6], %s437_s9 }
  0x5d   : > { %s3758_s25 = scalar_lea.vmem [#allocation5], %s2633_s16 }
  0x5e   : > { %3440 = dma.done.wait (%p3627_p6), %s438_s26, 8192  }
  0x5f   : > { %3442 = vsyncadd (%p3627_p6), %s438_s26, 4294959104  ;;  %s4663_s17 = sld [smem:[#allocation11_spill]] }
  0x60   : > { %s4664_s11 = sld [smem:[#allocation16_spill]] }
  0x61   : > { %s4665_s23 = sld [smem:[#allocation27_spill]] }
  0x62   : > { %s4666_s14 = sld [smem:[#allocation29_spill]] }
  0x63   : > { %s4667_s9 = sld [smem:[#allocation30_spill]] }
  0x64   : > { %s4669_s18 = sld [smem:[#allocation33_spill]] }
  0x65   : > { %s501_s5 = sand.u32 1, %s4663_s17   ;;  %s4670_s7 = sld [smem:[#allocation15_spill]] }
  0x66   : > { %s2635_s0 = sshll.u32 %s501_s5, 6  ;;  %p521_p7 = scmp.lt.s32.totalorder %s4664_s11, 1 }
  0x67   : > { %s4668_s5 = sld [smem:[#allocation32_spill]]  ;;  %s3790_s22 = scalar_lea.vmem [#allocation8], %s2635_s0 }
  0x68   : > { %s4702_s11 = smov (!%p521_p7, %s4664_s11), 1 }
  0x69   : > { %s2636_s4 = sshll.u32 %s4702_s11, 2  ;;  %s2637_s19 = sshll.u32 %s4702_s11, 3 }
  0x6a   : > { %s3770_s3 = scalar_lea.vmem %s4665_s23, %s2636_s4  ;;  %s528_s29 = scalar_lea.vmem %s4666_s14, %s2637_s19 }
  0x6b   : > { %s532_s30 = scalar_lea.vmem %s4667_s9, %s2637_s19  ;;  %s3786_s13 = scalar_lea.vmem %s4669_s18, %s2637_s19 }
  0x6c   : > { %s3788_s4 = scalar_lea.vmem [#allocation7], %s2633_s16  ;;  %p2641_p6 = scmp.ne.s32.totalorder %s4670_s7, 0 }
  0x6d   : > { %s3781_s1 = scalar_lea.vmem %s4668_s5, %s2637_s19 }
  0x6e   : > { %549 = sbr.rel (%p2641_p6) target bundleno = 118 (0x76), region = 64 }
  0x73   : > { %v550_v0 = vld [vmem:[%s528_s29] sm:$0xff] }
  0x74   : > { %v552_v1 = vld [vmem:[%s532_s30] sm:$0xff]  ;;  %551 = vst [vmem:[%s3781_s1] sm:$0xff] %v550_v0 }
  0x75   : > { %553 = vst [vmem:[%s3786_s13] sm:$0xff] %v552_v1 }
  0x76 PF: > { %v2756_v2 = vld [vmem:[%s3758_s25 + $0xe0] sm:$0xf]  ;;  %v2975_v3 = vld [vmem:[%s3758_s25 + $0xec] sm:$0xf0]  ;;  %v2973_v4 = vld [vmem:[%s3758_s25 + $0xe4] sm:$0xf] }
  0x77   : > { %v2757_v5 = vor.u32 %v2975_v3, %v2756_v2  ;;  %v2758_v6 = vld [vmem:[%s3758_s25 + $0xf0] sm:$0xf0]  ;;  %v2764_v7 = vld [vmem:[%s3758_s25 + $0xe8] sm:$0xf]  ;;  %v2976_v8 = vld [vmem:[%s3758_s25 + $0xf4] sm:$0xf0] }
  0x78   : > { %v2761_v9 = vor.u32 %v2973_v4, %v2758_v6  ;;  %v2765_v10 = vor.u32 %v2976_v8, %v2764_v7  ;;  %v2974_v11 = vld [vmem:[%s3758_s25 + $0xec] sm:$0xf]  ;;  %v2766_v12 = vld [vmem:[%s3758_s25 + $0xf8] sm:$0xf0]  ;;  %v2740_v13 = vld [vmem:[%s3758_s25 + $0xc0] sm:$0xf] }
  0x79   : > { %801 = vmatpush.bf16.msra.mxu0 %v2757_v5  ;;  %v2769_v14 = vor.u32 %v2974_v11, %v2766_v12  ;;  %v2971_v15 = vld [vmem:[%s3758_s25 + $0xcc] sm:$0xf0]  ;;  %v2969_v16 = vld [vmem:[%s3758_s25 + $0xc4] sm:$0xf]  ;;  %v2742_v17 = vld [vmem:[%s3758_s25 + $0xd0] sm:$0xf0] }
  0x7a   : > { %830 = vmatpush.bf16.msra.mxu1 %v2761_v9  ;;  %859 = vmatpush.bf16.msra.mxu2 %v2765_v10  ;;  %v2741_v18 = vor.u32 %v2971_v15, %v2740_v13  ;;  %v2745_v19 = vor.u32 %v2969_v16, %v2742_v17  ;;  %v2748_v20 = vld [vmem:[%s3758_s25 + $0xc8] sm:$0xf]  ;;  %v2972_v21 = vld [vmem:[%s3758_s25 + $0xd4] sm:$0xf0]  ;;  %v2970_v22 = vld [vmem:[%s3758_s25 + $0xcc] sm:$0xf] }
  0x7b   : > { %888 = vmatpush.bf16.msra.mxu3 %v2769_v14  ;;  %v2749_v23 = vor.u32 %v2972_v21, %v2748_v20  ;;  %v2750_v24 = vld [vmem:[%s3758_s25 + $0xd8] sm:$0xf0]  ;;  %v2724_v25 = vld [vmem:[%s3758_s25 + $0xa0] sm:$0xf]  ;;  %v2967_v26 = vld [vmem:[%s3758_s25 + $0xac] sm:$0xf0] }
  0x7c   : > { %v2753_v27 = vor.u32 %v2970_v22, %v2750_v24  ;;  %v2965_v28 = vld [vmem:[%s3758_s25 + $0xa4] sm:$0xf]  ;;  %v2726_v29 = vld [vmem:[%s3758_s25 + $0xb0] sm:$0xf0]  ;;  %v2732_v30 = vld [vmem:[%s3758_s25 + $0xa8] sm:$0xf]  ;;  %v2725_v31 = vor.u32 %v2967_v26, %v2724_v25 }
  0x7d   : > { %802 = vmatpush.bf16.msra.mxu0 %v2741_v18  ;;  %v2968_v32 = vld [vmem:[%s3758_s25 + $0xb4] sm:$0xf0]  ;;  %v2966_v33 = vld [vmem:[%s3758_s25 + $0xac] sm:$0xf]  ;;  %v2734_v34 = vld [vmem:[%s3758_s25 + $0xb8] sm:$0xf0]  ;;  %v2729_v35 = vor.u32 %v2965_v28, %v2726_v29 }
  0x7e   : > { %831 = vmatpush.bf16.msra.mxu1 %v2745_v19  ;;  %860 = vmatpush.bf16.msra.mxu2 %v2749_v23  ;;  %v2733_v36 = vor.u32 %v2968_v32, %v2732_v30  ;;  %v2708_v37 = vld [vmem:[%s3758_s25 + $0x80] sm:$0xf]  ;;  %v2963_v38 = vld [vmem:[%s3758_s25 + $0x8c] sm:$0xf0]  ;;  %v2961_v39 = vld [vmem:[%s3758_s25 + $0x84] sm:$0xf]  ;;  %v2737_v40 = vor.u32 %v2966_v33, %v2734_v34 }
  0x7f   : > { %889 = vmatpush.bf16.msra.mxu3 %v2753_v27  ;;  %v2710_v41 = vld [vmem:[%s3758_s25 + $0x90] sm:$0xf0]  ;;  %v2716_v42 = vld [vmem:[%s3758_s25 + $0x88] sm:$0xf]  ;;  %v2964_v43 = vld [vmem:[%s3758_s25 + $0x94] sm:$0xf0]  ;;  %v2709_v46 = vor.u32 %v2963_v38, %v2708_v37 }
  0x80   : > { %v2962_v44 = vld [vmem:[%s3758_s25 + $0x8c] sm:$0xf]  ;;  %v2718_v45 = vld [vmem:[%s3758_s25 + $0x98] sm:$0xf0]  ;;  %v2713_v47 = vor.u32 %v2961_v39, %v2710_v41  ;;  %v2717_v48 = vor.u32 %v2964_v43, %v2716_v42  ;;  %v2692_v49 = vld [vmem:[%s3758_s25 + $0x60] sm:$0xf] }
  0x81   : > { %803 = vmatpush.bf16.msra.mxu0 %v2725_v31  ;;  %v2959_v50 = vld [vmem:[%s3758_s25 + $0x6c] sm:$0xf0]  ;;  %v2957_v51 = vld [vmem:[%s3758_s25 + $0x64] sm:$0xf]  ;;  %v2721_v52 = vor.u32 %v2962_v44, %v2718_v45  ;;  %v2694_v53 = vld [vmem:[%s3758_s25 + $0x70] sm:$0xf0] }
  0x82   : > { %832 = vmatpush.bf16.msra.mxu1 %v2729_v35  ;;  %861 = vmatpush.bf16.msra.mxu2 %v2733_v36  ;;  %v2700_v54 = vld [vmem:[%s3758_s25 + $0x68] sm:$0xf]  ;;  %v2960_v55 = vld [vmem:[%s3758_s25 + $0x74] sm:$0xf0]  ;;  %v2958_v56 = vld [vmem:[%s3758_s25 + $0x6c] sm:$0xf]  ;;  %v2693_v58 = vor.u32 %v2959_v50, %v2692_v49  ;;  %v2697_v59 = vor.u32 %v2957_v51, %v2694_v53 }
  0x83   : > { %890 = vmatpush.bf16.msra.mxu3 %v2737_v40  ;;  %v2702_v57 = vld [vmem:[%s3758_s25 + $0x78] sm:$0xf0]  ;;  %v2701_v60 = vor.u32 %v2960_v55, %v2700_v54  ;;  %v2676_v61 = vld [vmem:[%s3758_s25 + $0x40] sm:$0xf]  ;;  %v2955_v62 = vld [vmem:[%s3758_s25 + $0x4c] sm:$0xf0] }
  0x84   : > { %v2953_v63 = vld [vmem:[%s3758_s25 + $0x44] sm:$0xf]  ;;  %v2705_v0 = vor.u32 %v2958_v56, %v2702_v57  ;;  %v2678_v1 = vld [vmem:[%s3758_s25 + $0x50] sm:$0xf0]  ;;  %v2684_v2 = vld [vmem:[%s3758_s25 + $0x48] sm:$0xf]  ;;  %v2677_v6 = vor.u32 %v2955_v62, %v2676_v61 }
  0x85   : > { %804 = vmatpush.bf16.msra.mxu0 %v2709_v46  ;;  %v2956_v3 = vld [vmem:[%s3758_s25 + $0x54] sm:$0xf0]  ;;  %v2954_v4 = vld [vmem:[%s3758_s25 + $0x4c] sm:$0xf]  ;;  %v2686_v5 = vld [vmem:[%s3758_s25 + $0x58] sm:$0xf0]  ;;  %v2681_v7 = vor.u32 %v2953_v63, %v2678_v1 }
  0x86   : > { %833 = vmatpush.bf16.msra.mxu1 %v2713_v47  ;;  %862 = vmatpush.bf16.msra.mxu2 %v2717_v48  ;;  %v2685_v8 = vor.u32 %v2956_v3, %v2684_v2  ;;  %v2660_v9 = vld [vmem:[%s3758_s25 + $0x20] sm:$0xf]  ;;  %v2951_v10 = vld [vmem:[%s3758_s25 + $0x2c] sm:$0xf0]  ;;  %v2949_v11 = vld [vmem:[%s3758_s25 + $0x24] sm:$0xf]  ;;  %v2689_v12 = vor.u32 %v2954_v4, %v2686_v5 }
  0x87   : > { %891 = vmatpush.bf16.msra.mxu3 %v2721_v52  ;;  %v2662_v13 = vld [vmem:[%s3758_s25 + $0x30] sm:$0xf0]  ;;  %v2668_v14 = vld [vmem:[%s3758_s25 + $0x28] sm:$0xf]  ;;  %v2952_v15 = vld [vmem:[%s3758_s25 + $0x34] sm:$0xf0]  ;;  %v2661_v18 = vor.u32 %v2951_v10, %v2660_v9 }
  0x88   : > { %v2950_v16 = vld [vmem:[%s3758_s25 + $0x2c] sm:$0xf]  ;;  %v2670_v17 = vld [vmem:[%s3758_s25 + $0x38] sm:$0xf0]  ;;  %v2644_v19 = vld [vmem:[%s3758_s25] sm:$0xf]  ;;  %v2665_v21 = vor.u32 %v2949_v11, %v2662_v13  ;;  %v2669_v22 = vor.u32 %v2952_v15, %v2668_v14 }
  0x89   : > { %805 = vmatpush.bf16.msra.mxu0 %v2693_v58  ;;  %v2947_v20 = vld [vmem:[%s3758_s25 + $0xc] sm:$0xf0]  ;;  %v2945_v23 = vld [vmem:[%s3758_s25 + $0x4] sm:$0xf]  ;;  %v2646_v24 = vld [vmem:[%s3758_s25 + $0x10] sm:$0xf0]  ;;  %v2673_v26 = vor.u32 %v2950_v16, %v2670_v17 }
  0x8a   : > { %834 = vmatpush.bf16.msra.mxu1 %v2697_v59  ;;  %863 = vmatpush.bf16.msra.mxu2 %v2701_v60  ;;  %v2652_v25 = vld [vmem:[%s3758_s25 + $0x8] sm:$0xf]  ;;  %v2948_v27 = vld [vmem:[%s3758_s25 + $0x14] sm:$0xf0]  ;;  %v2946_v28 = vld [vmem:[%s3758_s25 + $0xc] sm:$0xf]  ;;  %v2645_v33 = vor.u32 %v2947_v20, %v2644_v19  ;;  %v2649_v37 = vor.u32 %v2945_v23, %v2646_v24 }
  0x8b   : > { %892 = vmatpush.bf16.msra.mxu3 %v2705_v0  ;;  %v2654_v29 = vld [vmem:[%s3758_s25 + $0x18] sm:$0xf0]  ;;  %v619_v30 = vld [vmem:[%s3750_s2] sm:$0xff]  ;;  %v3007_v32 = vld [vmem:[%s3788_s4 + $0xec] sm:$0xf0]  ;;  %v2653_v38 = vor.u32 %v2948_v27, %v2652_v25  ;;  %s4671_s15 = sld [smem:[#allocation15_spill]] }
  0x8c   : > { %v2888_v31 = vld [vmem:[%s3788_s4 + $0xe0] sm:$0xf]  ;;  %v620_v34 = vld [vmem:[%s3750_s2 + $0x8] sm:$0xff]  ;;  %v3005_v35 = vld [vmem:[%s3788_s4 + $0xe4] sm:$0xf]  ;;  %v2657_v39 = vor.u32 %v2946_v28, %v2654_v29  ;;  %s4672_s25 = sld [smem:[#allocation16_spill]] }
  0x8d   : > { %806 = vmatpush.bf16.msra.mxu0 %v2677_v6  ;;  %v2890_v36 = vld [vmem:[%s3788_s4 + $0xf0] sm:$0xf0]  ;;  %v3865_v40 = vor.u32 %v3007_v32, %v2888_v31  ;;  %v3006_v41 = vld [vmem:[%s3788_s4 + $0xec] sm:$0xf]  ;;  %v2896_v42 = vld [vmem:[%s3788_s4 + $0xe8] sm:$0xf]  ;;  %v627_v44 = vpack.c.bf16 %v620_v34, %v619_v30 }
  0x8e   : > { %835 = vmatpush.bf16.msra.mxu1 %v2681_v7  ;;  %864 = vmatpush.bf16.msra.mxu2 %v2685_v8  ;;  %v3008_v43 = vld [vmem:[%s3788_s4 + $0xf4] sm:$0xf0]  ;;  %v3870_v45 = vor.u32 %v3005_v35, %v2890_v36  ;;  %v2898_v46 = vld [vmem:[%s3788_s4 + $0xf8] sm:$0xf0]  ;;  %v2872_v47 = vld [vmem:[%s3788_s4 + $0xc0] sm:$0xf] }
  0x8f   : > { %893 = vmatpush.bf16.msra.mxu3 %v2689_v12  ;;  %v3003_v48 = vld [vmem:[%s3788_s4 + $0xcc] sm:$0xf0]  ;;  %v3001_v49 = vld [vmem:[%s3788_s4 + $0xc4] sm:$0xf]  ;;  %v2874_v50 = vld [vmem:[%s3788_s4 + $0xd0] sm:$0xf0]  ;;  %v3877_v51 = vor.u32 %v3008_v43, %v2896_v42  ;;  %v3880_v52 = vor.u32 %v3006_v41, %v2898_v46 }
  0x90   : > { %v3882_v53 = vor.u32 %v3003_v48, %v2872_v47  ;;  %v3002_v54 = vld [vmem:[%s3788_s4 + $0xcc] sm:$0xf]  ;;  %v3886_v55 = vor.u32 %v3001_v49, %v2874_v50  ;;  %v2882_v56 = vld [vmem:[%s3788_s4 + $0xd8] sm:$0xf0]  ;;  %v2856_v57 = vld [vmem:[%s3788_s4 + $0xa0] sm:$0xf] }
  0x91   : > { %807 = vmatpush.bf16.msra.mxu0 %v2661_v18  ;;  %v2999_v58 = vld [vmem:[%s3788_s4 + $0xac] sm:$0xf0]  ;;  %v2997_v59 = vld [vmem:[%s3788_s4 + $0xa4] sm:$0xf]  ;;  %v2858_v60 = vld [vmem:[%s3788_s4 + $0xb0] sm:$0xf0]  ;;  %v3896_v61 = vor.u32 %v3002_v54, %v2882_v56 }
  0x92   : > { %836 = vmatpush.bf16.msra.mxu1 %v2665_v21  ;;  %865 = vmatpush.bf16.msra.mxu2 %v2669_v22  ;;  %v3898_v62 = vor.u32 %v2999_v58, %v2856_v57  ;;  %v2998_v63 = vld [vmem:[%s3788_s4 + $0xac] sm:$0xf]  ;;  %v2880_v0 = vld [vmem:[%s3788_s4 + $0xc8] sm:$0xf]  ;;  %v3004_v1 = vld [vmem:[%s3788_s4 + $0xd4] sm:$0xf0]  ;;  %v3904_v2 = vor.u32 %v2997_v59, %v2858_v60 }
  0x93   : > { %894 = vmatpush.bf16.msra.mxu3 %v2673_v26  ;;  %v2866_v3 = vld [vmem:[%s3788_s4 + $0xb8] sm:$0xf0]  ;;  %v2840_v4 = vld [vmem:[%s3788_s4 + $0x80] sm:$0xf]  ;;  %v2995_v5 = vld [vmem:[%s3788_s4 + $0x8c] sm:$0xf0]  ;;  %v3909_v6 = vor.u32 %v3004_v1, %v2880_v0 }
  0x94   : > { %v2993_v7 = vld [vmem:[%s3788_s4 + $0x84] sm:$0xf]  ;;  %v2842_v8 = vld [vmem:[%s3788_s4 + $0x90] sm:$0xf0]  ;;  %v2864_v9 = vld [vmem:[%s3788_s4 + $0xa8] sm:$0xf]  ;;  %v3919_v12 = vor.u32 %v2998_v63, %v2866_v3  ;;  %v3921_v13 = vor.u32 %v2995_v5, %v2840_v4 }
  0x95   : > { %808 = vmatpush.bf16.msra.mxu0 %v2645_v33  ;;  %v3000_v10 = vld [vmem:[%s3788_s4 + $0xb4] sm:$0xf0]  ;;  %v621_v11 = vld [vmem:[%s3750_s2 + $0x10] sm:$0xff]  ;;  %v2994_v14 = vld [vmem:[%s3788_s4 + $0x8c] sm:$0xf]  ;;  %v3929_v18 = vor.u32 %v2993_v7, %v2842_v8  ;;  %s2770_s18 = sshll.u32 %s4671_s15, 1 }
  0x96   : > { %837 = vmatpush.bf16.msra.mxu1 %v2649_v37  ;;  %866 = vmatpush.bf16.msra.mxu2 %v2653_v38  ;;  %v3924_v15 = vor.u32 %v3000_v10, %v2864_v9  ;;  %v2848_v16 = vld [vmem:[%s3788_s4 + $0x88] sm:$0xf]  ;;  %v2996_v17 = vld [vmem:[%s3788_s4 + $0x94] sm:$0xf0]  ;;  %v2850_v19 = vld [vmem:[%s3788_s4 + $0x98] sm:$0xf0] }
  0x97   : > { %895 = vmatpush.bf16.msra.mxu3 %v2657_v39  ;;  %v2824_v20 = vld [vmem:[%s3788_s4 + $0x60] sm:$0xf]  ;;  %v2991_v21 = vld [vmem:[%s3788_s4 + $0x6c] sm:$0xf0]  ;;  %v622_v22 = vld [vmem:[%s3750_s2 + $0x18] sm:$0xff]  ;;  %v3938_v25 = vor.u32 %v2996_v17, %v2848_v16  ;;  %v3942_v26 = vor.u32 %v2994_v14, %v2850_v19  ;;  %s3958_s16 = ssub.s32 1, %s2770_s18 }
  0x98   : > { %809 = vmatmul.bf16.vlgmr.msra.gmra.mxu0 %v627_v44  ;;  %v2989_v23 = vld [vmem:[%s3788_s4 + $0x64] sm:$0xf]  ;;  %v2826_v24 = vld [vmem:[%s3788_s4 + $0x70] sm:$0xf0]  ;;  %v3944_v27 = vor.u32 %v2991_v21, %v2824_v20  ;;  %v628_v28 = vpack.c.bf16 %v622_v22, %v621_v11  ;;  %v2990_v30 = vld [vmem:[%s3788_s4 + $0x6c] sm:$0xf]  ;;  %s951_s0 = smul.u32 %s4672_s25, %s3958_s16 }
  0x99   : > { %1129 = vmatpush.bf16.msrb.mxu0 %v3865_v40  ;;  %838 = vmatmul.bf16.vlgmr.msra.gmra.mxu1 %v627_v44  ;;  %v3947_v29 = vor.u32 %v2989_v23, %v2826_v24  ;;  %v2834_v31 = vld [vmem:[%s3788_s4 + $0x78] sm:$0xf0]  ;;  %v2808_v33 = vld [vmem:[%s3788_s4 + $0x40] sm:$0xf]  ;;  %v2987_v34 = vld [vmem:[%s3788_s4 + $0x4c] sm:$0xf0] }
  0x9a   : > { %1142 = vmatpush.bf16.msrb.mxu1 %v3870_v45  ;;  %867 = vmatmul.bf16.vlgmr.msra.gmra.mxu2 %v627_v44  ;;  %v3955_v32 = vor.u32 %v2990_v30, %v2834_v31  ;;  %v2985_v35 = vld [vmem:[%s3788_s4 + $0x44] sm:$0xf]  ;;  %v3964_v36 = vor.u32 %v2987_v34, %v2808_v33  ;;  %v2810_v37 = vld [vmem:[%s3788_s4 + $0x50] sm:$0xf0]  ;;  %v2832_v38 = vld [vmem:[%s3788_s4 + $0x68] sm:$0xf]  ;;  %s4011_s19 = sadd.s32 %s4671_s15, %s951_s0 }
  0x9b   : > { %896 = vmatmul.bf16.vlgmr.msra.gmra.mxu3 %v627_v44  ;;  %1155 = vmatpush.bf16.msrb.mxu2 %v3877_v51  ;;  %v2992_v39 = vld [vmem:[%s3788_s4 + $0x74] sm:$0xf0]  ;;  %v3969_v41 = vor.u32 %v2985_v35, %v2810_v37  ;;  %v2986_v43 = vld [vmem:[%s3788_s4 + $0x4c] sm:$0xf]  ;;  %v2818_v44 = vld [vmem:[%s3788_s4 + $0x58] sm:$0xf0] }
  0x9c   : > { %1168 = vmatpush.bf16.msrb.mxu3 %v3880_v52  ;;  %v3971_v42 = vor.u32 %v2992_v39, %v2832_v38  ;;  %v2816_v46 = vld [vmem:[%s3788_s4 + $0x48] sm:$0xf]  ;;  %v3977_v47 = vor.u32 %v2986_v43, %v2818_v44  ;;  %v2988_v48 = vld [vmem:[%s3788_s4 + $0x54] sm:$0xf0]  ;;  %v2792_v49 = vld [vmem:[%s3788_s4 + $0x20] sm:$0xf] }
  0x9d   : > { %1130 = vmatpush.bf16.msrb.mxu0 %v3882_v53  ;;  %v2983_v50 = vld [vmem:[%s3788_s4 + $0x2c] sm:$0xf0]  ;;  %v3986_v54 = vor.u32 %v2988_v48, %v2816_v46  ;;  %v2981_v57 = vld [vmem:[%s3788_s4 + $0x24] sm:$0xf]  ;;  %v2794_v58 = vld [vmem:[%s3788_s4 + $0x30] sm:$0xf0] }
  0x9e   : > { %1143 = vmatpush.bf16.msrb.mxu1 %v3886_v55  ;;  %v3988_v56 = vor.u32 %v2983_v50, %v2792_v49  ;;  %v2800_v59 = vld [vmem:[%s3788_s4 + $0x28] sm:$0xf]  ;;  %v3994_v60 = vor.u32 %v2981_v57, %v2794_v58  ;;  %v2984_v63 = vld [vmem:[%s3788_s4 + $0x34] sm:$0xf0]  ;;  %v2982_v0 = vld [vmem:[%s3788_s4 + $0x2c] sm:$0xf] }
  0x9f   : > { %1156 = vmatpush.bf16.msrb.mxu2 %v3909_v6  ;;  %v2802_v1 = vld [vmem:[%s3788_s4 + $0x38] sm:$0xf0]  ;;  %v2776_v4 = vld [vmem:[%s3788_s4] sm:$0xf]  ;;  %v2979_v5 = vld [vmem:[%s3788_s4 + $0xc] sm:$0xf0]  ;;  %v4015_v14 = vor.u32 %v2984_v63, %v2800_v59 }
  0xa0   : > { %1169 = vmatpush.bf16.msrb.mxu3 %v3896_v61  ;;  %v3999_v3 = vor.u32 %v2982_v0, %v2802_v1  ;;  %v2977_v7 = vld [vmem:[%s3788_s4 + $0x4] sm:$0xf]  ;;  %v624_v9 = vld [vmem:[%s3750_s2 + $0x28] sm:$0xff]  ;;  %v4007_v10 = vor.u32 %v2979_v5, %v2776_v4  ;;  %v2778_v11 = vld [vmem:[%s3788_s4 + $0x10] sm:$0xf0]  ;;  %s1260_s23 = smul.u32 5, %s4672_s25 }
  0xa1   : > { %1131 = vmatpush.bf16.msrb.mxu0 %v3898_v62  ;;  %v623_v8 = vld [vmem:[%s3750_s2 + $0x20] sm:$0xff]  ;;  %v4017_v16 = vor.u32 %v2977_v7, %v2778_v11  ;;  %v2978_v17 = vld [vmem:[%s3788_s4 + $0xc] sm:$0xf]  ;;  %v2786_v19 = vld [vmem:[%s3788_s4 + $0x18] sm:$0xf0]  ;;  %s956_s28 = smul.u32 7, %s4672_s25 }
  0xa2   : > { %1144 = vmatpush.bf16.msrb.mxu1 %v3904_v2  ;;  %v2784_v20 = vld [vmem:[%s3788_s4 + $0x8] sm:$0xf]  ;;  %v2980_v21 = vld [vmem:[%s3788_s4 + $0x14] sm:$0xf0]  ;;  %v4025_v22 = vor.u32 %v2978_v17, %v2786_v19  ;;  %v629_v23 = vpack.c.bf16 %v624_v9, %v623_v8  ;;  %s4029_s8 = sshll.u32 %s4011_s19, 3  ;;  %s1261_s14 = sadd.s32 1, %s1260_s23 }
  0xa3   : > { %1157 = vmatpush.bf16.msrb.mxu2 %v3924_v15  ;;  %v4034_v24 = vor.u32 %v2980_v21, %v2784_v20  ;;  %s957_s29 = sadd.s32 %s4029_s8, %s956_s28  ;;  %s1262_s24 = sadd.s32 %s4029_s8, %s1261_s14  ;;  %v3499_v31 = vmov 0   ;;  %v625_v35 = vld [vmem:[%s3750_s2 + $0x30] sm:$0xff]  ;;  %v626_v37 = vld [vmem:[%s3750_s2 + $0x38] sm:$0xff]  ;;  %v4079_v43 = vld [vmem:[%s3781_s1] sm:$0xff] }
  0xa4   : > { %1170 = vmatpush.bf16.msrb.mxu3 %v3919_v12  ;;  %s4673_s30 = sld [smem:[#allocation24_spill]]  ;;  %v1248_v30 = vstv %s957_s29  ;;  %3161 = vset.pattern.permute.xlu0 %v3499_v31  ;;  %v1393_v34 = vstv %s1262_s24  ;;  %v630_v39 = vpack.c.bf16 %v626_v37, %v625_v35  ;;  %v968_v44 = vpack.c.bf16 %v4079_v43, %v4079_v43  ;;  %s1983_s2 = smul.u32 4294967291, %s4672_s25  ;;  %v631_v49 = vld [vmem:[%s3770_s3] sm:$0xf] }
  0xa5   : > { %1132 = vmatpush.bf16.msrb.mxu0 %v3921_v13  ;;  %3162 = vset.pattern.permute.xlu1 %v3499_v31  ;;  %v4128_v50 = vperm.slane %v631_v49, 0  ;;  %v4130_v57 = vperm.slane %v631_v49, 1  ;;  %v4134_v1 = vperm.slane %v631_v49, 2  ;;  %v4136_v4 = vperm.slane %v631_v49, 3  ;;  %s958_s3 = smul.u32 56, %s4672_s25  ;;  %s1550_s24 = sadd.s32 3, %s4672_s25 }
  0xa6   : > { %1145 = vmatpush.bf16.msrb.mxu1 %v3929_v18  ;;  %3163 = vset.pattern.permute.xlu2 %v3499_v31  ;;  %s1984_s17 = sadd.s32 6, %s1983_s2  ;;  %s3030_s18 = smul.u32 40, %s4672_s25 }
  0xa7   : > { %1158 = vmatpush.bf16.msrb.mxu2 %v3938_v25  ;;  %s1985_s5 = sadd.s32 %s4029_s8, %s1984_s17  ;;  %s959_s11 = sshra.s32 %s958_s3, 3 }
  0xa8   : > { %1171 = vmatpush.bf16.msrb.mxu3 %v3942_v26  ;;  %814 = vmatmul.bf16.gmra.mxu0 %v628_v28  ;;  %v2116_v46 = vstv %s1985_s5  ;;  %s3009_s4 = sshll.u32 %s959_s11, 5  ;;  %s1256_s15 = scalar_lea.vmem %s3790_s22, %s958_s3 [#allocation8] }
  0xa9   : > { %1133 = vmatpush.bf16.msrb.mxu0 %v3944_v27  ;;  %843 = vmatmul.bf16.gmra.mxu1 %v628_v28  ;;  %s963_s7 = scalar_lea.vmem [#allocation2], %s3009_s4  ;;  %s3011_s16 = sadd.s32 8, %s3030_s18 }
  0xaa   : > { %1146 = vmatpush.bf16.msrb.mxu1 %v3947_v29  ;;  %872 = vmatmul.bf16.gmra.mxu2 %v628_v28  ;;  %s4674_s26 = smov %s4673_s30  ;;  %s1264_s0 = sshra.s32 %s3011_s16, 3 }
  0xab   : > { %901 = vmatmul.bf16.gmra.mxu3 %v628_v28  ;;  %1159 = vmatpush.bf16.msrb.mxu2 %v3971_v42  ;;  %v4045_v28 = vld [vmem:[%s4673_s30] sm:$0xff]  ;;  %s3012_s23 = sshll.u32 %s1264_s0, 5  ;;  %s1405_s14 = smul.u32 3, %s4672_s25 }
  0xac   : > { %1172 = vmatpush.bf16.msrb.mxu3 %v3955_v32  ;;  %vm1249_vm0 = vcmp.lt.s32.totalorder %v1248_v30, %v4045_v28  ;;  %vm1394_vm1 = vcmp.lt.s32.totalorder %v1393_v34, %v4045_v28  ;;  %vm2117_vm2 = vcmp.lt.s32.totalorder %v2116_v46, %v4045_v28  ;;  %s4220_s28 = scalar_lea.vmem [#allocation2], %s3012_s23  ;;  %s1551_s9 = sadd.s32 %s4029_s8, %s1550_s24 }
  0xad   : > { %1134 = vmatpush.bf16.msrb.mxu0 %v3964_v36  ;;  %v1250_v33 = vsel %vm1249_vm0, 1, %v3499_v31  ;;  %v1395_v38 = vsel %vm1394_vm1, 1, %v3499_v31  ;;  %v2118_v48 = vsel %vm2117_vm2, 1, %v3499_v31  ;;  %s1406_s29 = sadd.s32 2, %s1405_s14  ;;  %s2128_s30 = smul.u32 4294967289, %s4672_s25 }
  0xae   : > { %1147 = vmatpush.bf16.msrb.mxu1 %v3969_v41  ;;  %1252 = vperm.xlu0 %3161, %v1250_v33   ;;  %s1407_s6 = sadd.s32 %s4029_s8, %s1406_s29  ;;  %s2468_s5 = scalar_lea.vmem %s3790_s22, %s3030_s18 [#allocation8] }
  0xaf   : > { %1160 = vmatpush.bf16.msrb.mxu2 %v3986_v54  ;;  %s2129_s2 = sadd.s32 7, %s2128_s30  ;;  %s3031_s3 = smul.u32 24, %s4672_s25 }
  0xb0   : > { %1173 = vmatpush.bf16.msrb.mxu3 %v3977_v47  ;;  %s2130_s17 = sadd.s32 %s4029_s8, %s2129_s2  ;;  %s3016_s16 = sshll.u32 %s4672_s25, 3 }
  0xb1   : > { %1135 = vmatpush.bf16.msrb.mxu0 %v3988_v56  ;;  %s3014_s11 = sadd.s32 16, %s3031_s3  ;;  %s2474_s18 = scalar_lea.vmem %s3790_s22, %s3031_s3 [#allocation8] }
  0xb2   : > { %1148 = vmatpush.bf16.msrb.mxu1 %v3994_v60  ;;  %s1409_s4 = sshra.s32 %s3014_s11, 3  ;;  %s3017_s0 = sadd.s32 24, %s3016_s16 }
  0xb3   : > { %1161 = vmatpush.bf16.msrb.mxu2 %v4015_v14  ;;  %s1553_s23 = sshra.s32 %s3017_s0, 3  ;;  %s1838_s29 = smul.u32 4294967293, %s4672_s25 }
  0xb4   : > { %1174 = vmatpush.bf16.msrb.mxu3 %v3999_v3  ;;  %s1694_s24 = ssub.s32 4, %s4672_s25  ;;  %s3034_s2 = smul.u32 4294967240, %s4672_s25 }
  0xb5   : > { %1136 = vmatpush.bf16.msrb.mxu0 %v4007_v10 }
  0xb6   : > { %1149 = vmatpush.bf16.msrb.mxu1 %v4017_v16  ;;  %1397 = vperm.xlu0 %3161, %v1395_v38  }
  0xb7   : > { %1162 = vmatpush.bf16.msrb.mxu2 %v4034_v24 }
  0xb8   : > { %1175 = vmatpush.bf16.msrb.mxu3 %v4025_v22  ;;  %819 = vmatmul.bf16.gmra.mxu0 %v629_v23 }
  0xb9   : > { %1274 = vmatpush.bf16.msra.mxu0 %v3865_v40  ;;  %848 = vmatmul.bf16.gmra.mxu1 %v629_v23 }
  0xba   : > { %1287 = vmatpush.bf16.msra.mxu1 %v3870_v45  ;;  %877 = vmatmul.bf16.gmra.mxu2 %v629_v23 }
  0xbb   : > { %906 = vmatmul.bf16.gmra.mxu3 %v629_v23  ;;  %1300 = vmatpush.bf16.msra.mxu2 %v3877_v51 }
  0xbc   : > { %1313 = vmatpush.bf16.msra.mxu3 %v3880_v52 }
  0xbd   : > { %1275 = vmatpush.bf16.msra.mxu0 %v3882_v53 }
  0xbe   : > { %1288 = vmatpush.bf16.msra.mxu1 %v3886_v55  ;;  %2120 = vperm.xlu0 %3161, %v2118_v48  }
  0xbf   : > { %1301 = vmatpush.bf16.msra.mxu2 %v3909_v6 }
  0xc0   : > { %1314 = vmatpush.bf16.msra.mxu3 %v3896_v61 }
  0xc1   : > { %1276 = vmatpush.bf16.msra.mxu0 %v3898_v62 }
  0xc2   : > { %1289 = vmatpush.bf16.msra.mxu1 %v3904_v2 }
  0xc3   : > { %1302 = vmatpush.bf16.msra.mxu2 %v3924_v15 }
  0xc4   : > { %1315 = vmatpush.bf16.msra.mxu3 %v3919_v12 }
  0xc5   : > { %1277 = vmatpush.bf16.msra.mxu0 %v3921_v13 }
  0xc6   : > { %1290 = vmatpush.bf16.msra.mxu1 %v3929_v18 }
  0xc7   : > { %1303 = vmatpush.bf16.msra.mxu2 %v3938_v25 }
  0xc8   : > { %824 = vmatmul.bf16.gmra.mxu0 %v630_v39  ;;  %1316 = vmatpush.bf16.msra.mxu3 %v3942_v26 }
  0xc9   : > { %853 = vmatmul.bf16.gmra.mxu1 %v630_v39  ;;  %1278 = vmatpush.bf16.msra.mxu0 %v3944_v27 }
  0xca   : > { %882 = vmatmul.bf16.gmra.mxu2 %v630_v39  ;;  %1291 = vmatpush.bf16.msra.mxu1 %v3947_v29 }
  0xcb   : > { %911 = vmatmul.bf16.gmra.mxu3 %v630_v39  ;;  %1304 = vmatpush.bf16.msra.mxu2 %v3971_v42 }
  0xcc   : > { %1317 = vmatpush.bf16.msra.mxu3 %v3955_v32 }
  0xcd   : > { %1279 = vmatpush.bf16.msra.mxu0 %v3964_v36 }
  0xce   : > { %1292 = vmatpush.bf16.msra.mxu1 %v3969_v41 }
  0xcf   : > { %1305 = vmatpush.bf16.msra.mxu2 %v3986_v54 }
  0xd0   : > { %1318 = vmatpush.bf16.msra.mxu3 %v3977_v47 }
  0xd1   : > { %1280 = vmatpush.bf16.msra.mxu0 %v3988_v56 }
  0xd2   : > { %1293 = vmatpush.bf16.msra.mxu1 %v3994_v60 }
  0xd3   : > { %1306 = vmatpush.bf16.msra.mxu2 %v4015_v14 }
  0xd4   : > { %1319 = vmatpush.bf16.msra.mxu3 %v3999_v3 }
  0xd5   : > { %1281 = vmatpush.bf16.msra.mxu0 %v4007_v10 }
  0xd6   : > { %1294 = vmatpush.bf16.msra.mxu1 %v4017_v16 }
  0xd7   : > { %1307 = vmatpush.bf16.msra.mxu2 %v4034_v24 }
  0xd8   : > { %1137 = vmatmul.bf16.vlgmr.msrb.gmra.mxu0 %v968_v44  ;;  %1320 = vmatpush.bf16.msra.mxu3 %v4025_v22 }
  0xd9   : > { %1150 = vmatmul.bf16.vlgmr.msrb.gmra.mxu1 %v968_v44  ;;  %1419 = vmatpush.bf16.msrb.mxu0 %v3865_v40 }
  0xda   : > { %1163 = vmatmul.bf16.vlgmr.msrb.gmra.mxu2 %v968_v44  ;;  %1432 = vmatpush.bf16.msrb.mxu1 %v3870_v45 }
  0xdb   : > { %1176 = vmatmul.bf16.vlgmr.msrb.gmra.mxu3 %v968_v44  ;;  %1445 = vmatpush.bf16.msrb.mxu2 %v3877_v51 }
  0xdc   : > { %1458 = vmatpush.bf16.msrb.mxu3 %v3880_v52 }
  0xdd   : > { %1420 = vmatpush.bf16.msrb.mxu0 %v3882_v53 }
  0xde   : > { %1433 = vmatpush.bf16.msrb.mxu1 %v3886_v55 }
  0xdf   : > { %1446 = vmatpush.bf16.msrb.mxu2 %v3909_v6 }
  0xe0   : > { %1459 = vmatpush.bf16.msrb.mxu3 %v3896_v61 }
  0xe1   : > { %1421 = vmatpush.bf16.msrb.mxu0 %v3898_v62 }
  0xe2   : > { %1434 = vmatpush.bf16.msrb.mxu1 %v3904_v2 }
  0xe3   : > { %1447 = vmatpush.bf16.msrb.mxu2 %v3924_v15 }
  0xe4   : > { %1460 = vmatpush.bf16.msrb.mxu3 %v3919_v12 }
  0xe5   : > { %1422 = vmatpush.bf16.msrb.mxu0 %v3921_v13 }
  0xe6   : > { %1435 = vmatpush.bf16.msrb.mxu1 %v3929_v18 }
  0xe7   : > { %1448 = vmatpush.bf16.msrb.mxu2 %v3938_v25 }
  0xe8   : > { %1461 = vmatpush.bf16.msrb.mxu3 %v3942_v26 }
  0xe9   : > { %1423 = vmatpush.bf16.msrb.mxu0 %v3944_v27 }
  0xea   : > { %1436 = vmatpush.bf16.msrb.mxu1 %v3947_v29 }
  0xeb   : > { %1449 = vmatpush.bf16.msrb.mxu2 %v3971_v42 }
  0xec   : > { %1462 = vmatpush.bf16.msrb.mxu3 %v3955_v32 }
  0xed   : > { %1424 = vmatpush.bf16.msrb.mxu0 %v3964_v36 }
  0xee   : > { %1437 = vmatpush.bf16.msrb.mxu1 %v3969_v41 }
  0xef   : > { %1450 = vmatpush.bf16.msrb.mxu2 %v3986_v54 }
  0xf0   : > { %1463 = vmatpush.bf16.msrb.mxu3 %v3977_v47 }
  0xf1   : > { %1425 = vmatpush.bf16.msrb.mxu0 %v3988_v56 }
  0xf2   : > { %1438 = vmatpush.bf16.msrb.mxu1 %v3994_v60 }
  0xf3   : > { %1451 = vmatpush.bf16.msrb.mxu2 %v4015_v14 }
  0xf4   : > { %1464 = vmatpush.bf16.msrb.mxu3 %v3999_v3 }
  0xf5   : > { %1426 = vmatpush.bf16.msrb.mxu0 %v4007_v10 }
  0xf6   : > { %1439 = vmatpush.bf16.msrb.mxu1 %v4017_v16 }
  0xf7   : > { %1452 = vmatpush.bf16.msrb.mxu2 %v4034_v24 }
  0xf8   : > { %1465 = vmatpush.bf16.msrb.mxu3 %v4025_v22 }
 0x115   : > { %v810_v58 = vpop.f32.mrf.mxu0 }
 0x116   : > { %v811_v59 = vadd.f32 %v810_v58, %v4128_v50  ;;  %v839_v63 = vpop.f32.mrf.mxu1 }
 0x117   : > { %v840_v0 = vadd.f32 %v839_v63, %v4130_v57 }
 0x118   : > { %917 = vst [vmem:[#allocation2] sm:$0xff] %v811_v59 }
 0x119   : > { %918 = vst [vmem:[#allocation2 + $0x8] sm:$0xff] %v840_v0 }
 0x11d   : > { %v868_v5 = vpop.f32.mrf.mxu2  ;;  %v812_v9 = vpop.f32.mrf.mxu0 }
 0x11e   : > { %v869_v7 = vadd.f32 %v868_v5, %v4134_v1  ;;  %v897_v8 = vpop.f32.mrf.mxu3  ;;  %v813_v17 = vadd.f32 %v812_v9, %v4128_v50  ;;  %v841_v19 = vpop.f32.mrf.mxu1 }
 0x11f   : > { %v898_v11 = vadd.f32 %v897_v8, %v4136_v4  ;;  %v842_v20 = vadd.f32 %v841_v19, %v4130_v57 }
 0x120   : > { %919 = vst [vmem:[#allocation2 + $0x10] sm:$0xff] %v869_v7 }
 0x121   : > { %920 = vst [vmem:[#allocation2 + $0x18] sm:$0xff] %v898_v11 }
 0x122   : > { %921 = vst [vmem:[#allocation2 + $0x20] sm:$0xff] %v813_v17 }
 0x123   : > { %922 = vst [vmem:[#allocation2 + $0x28] sm:$0xff] %v842_v20 }
 0x125   : > { %v870_v21 = vpop.f32.mrf.mxu2  ;;  %v815_v33 = vpop.f32.mrf.mxu0 }
 0x126   : > { %v871_v23 = vadd.f32 %v870_v21, %v4134_v1  ;;  %v899_v30 = vpop.f32.mrf.mxu3  ;;  %v816_v35 = vadd.f32 %v815_v33, %v4128_v50  ;;  %v844_v37 = vpop.f32.mrf.mxu1 }
 0x127   : > { %v900_v34 = vadd.f32 %v899_v30, %v4136_v4  ;;  %v845_v38 = vadd.f32 %v844_v37, %v4130_v57 }
 0x128   : > { %923 = vst [vmem:[#allocation2 + $0x30] sm:$0xff] %v871_v23 }
 0x129   : > { %924 = vst [vmem:[#allocation2 + $0x38] sm:$0xff] %v900_v34 }
 0x12a   : > { %925 = vst [vmem:[#allocation2 + $0x40] sm:$0xff] %v816_v35 }
 0x12b   : > { %926 = vst [vmem:[#allocation2 + $0x48] sm:$0xff] %v845_v38 }
 0x12d   : > { %v873_v39 = vpop.f32.mrf.mxu2  ;;  %v817_v48 = vpop.f32.mrf.mxu0 }
 0x12e   : > { %v874_v44 = vadd.f32 %v873_v39, %v4134_v1  ;;  %v902_v46 = vpop.f32.mrf.mxu3  ;;  %v818_v58 = vadd.f32 %v817_v48, %v4128_v50  ;;  %v846_v59 = vpop.f32.mrf.mxu1 }
 0x12f   : > { %v903_v49 = vadd.f32 %v902_v46, %v4136_v4  ;;  %v847_v63 = vadd.f32 %v846_v59, %v4130_v57 }
 0x130   : > { %927 = vst [vmem:[#allocation2 + $0x50] sm:$0xff] %v874_v44 }
 0x131   : > { %928 = vst [vmem:[#allocation2 + $0x58] sm:$0xff] %v903_v49 }
 0x132   : > { %929 = vst [vmem:[#allocation2 + $0x60] sm:$0xff] %v818_v58 }
 0x133   : > { %930 = vst [vmem:[#allocation2 + $0x68] sm:$0xff] %v847_v63 }
 0x135   : > { %v875_v0 = vpop.f32.mrf.mxu2  ;;  %v820_v8 = vpop.f32.mrf.mxu0 }
 0x136   : > { %v876_v5 = vadd.f32 %v875_v0, %v4134_v1  ;;  %v904_v7 = vpop.f32.mrf.mxu3  ;;  %v821_v11 = vadd.f32 %v820_v8, %v4128_v50  ;;  %v849_v17 = vpop.f32.mrf.mxu1 }
 0x137   : > { %v905_v9 = vadd.f32 %v904_v7, %v4136_v4  ;;  %v850_v19 = vadd.f32 %v849_v17, %v4130_v57 }
 0x138   : > { %931 = vst [vmem:[#allocation2 + $0x70] sm:$0xff] %v876_v5 }
 0x139   : > { %932 = vst [vmem:[#allocation2 + $0x78] sm:$0xff] %v905_v9 }
 0x13a   : > { %933 = vst [vmem:[#allocation2 + $0x80] sm:$0xff] %v821_v11 }
 0x13b   : > { %934 = vst [vmem:[#allocation2 + $0x88] sm:$0xff] %v850_v19 }
 0x13d   : > { %v878_v20 = vpop.f32.mrf.mxu2  ;;  %v822_v30 = vpop.f32.mrf.mxu0 }
 0x13e   : > { %v879_v21 = vadd.f32 %v878_v20, %v4134_v1  ;;  %v907_v23 = vpop.f32.mrf.mxu3  ;;  %v823_v34 = vadd.f32 %v822_v30, %v4128_v50  ;;  %v851_v35 = vpop.f32.mrf.mxu1 }
 0x13f   : > { %v908_v33 = vadd.f32 %v907_v23, %v4136_v4  ;;  %v852_v37 = vadd.f32 %v851_v35, %v4130_v57 }
 0x140   : > { %935 = vst [vmem:[#allocation2 + $0x90] sm:$0xff] %v879_v21 }
 0x141   : > { %936 = vst [vmem:[#allocation2 + $0x98] sm:$0xff] %v908_v33 }
 0x142   : > { %937 = vst [vmem:[#allocation2 + $0xa0] sm:$0xff] %v823_v34 }
 0x143   : > { %938 = vst [vmem:[#allocation2 + $0xa8] sm:$0xff] %v852_v37 }
 0x145   : > { %v880_v38 = vpop.f32.mrf.mxu2  ;;  %v825_v46 = vpop.f32.mrf.mxu0 }
 0x146   : > { %v881_v39 = vadd.f32 %v880_v38, %v4134_v1  ;;  %v909_v44 = vpop.f32.mrf.mxu3  ;;  %v826_v49 = vadd.f32 %v825_v46, %v4128_v50  ;;  %v854_v58 = vpop.f32.mrf.mxu1 }
 0x147   : > { %v910_v48 = vadd.f32 %v909_v44, %v4136_v4  ;;  %v855_v59 = vadd.f32 %v854_v58, %v4130_v57 }
 0x148   : > { %939 = vst [vmem:[#allocation2 + $0xb0] sm:$0xff] %v881_v39 }
 0x149   : > { %940 = vst [vmem:[#allocation2 + $0xb8] sm:$0xff] %v910_v48 }
 0x14a   : > { %941 = vst [vmem:[#allocation2 + $0xc0] sm:$0xff] %v826_v49 }
 0x14b   : > { %942 = vst [vmem:[#allocation2 + $0xc8] sm:$0xff] %v855_v59 }
 0x14d   : > { %v883_v63 = vpop.f32.mrf.mxu2  ;;  %v827_v7 = vpop.f32.mrf.mxu0 }
 0x14e   : > { %v884_v0 = vadd.f32 %v883_v63, %v4134_v1  ;;  %v912_v5 = vpop.f32.mrf.mxu3  ;;  %v828_v9 = vadd.f32 %v827_v7, %v4128_v50  ;;  %v856_v11 = vpop.f32.mrf.mxu1 }
 0x14f   : > { %v913_v8 = vadd.f32 %v912_v5, %v4136_v4  ;;  %v857_v17 = vadd.f32 %v856_v11, %v4130_v57 }
 0x150   : > { %943 = vst [vmem:[#allocation2 + $0xd0] sm:$0xff] %v884_v0 }
 0x151   : > { %944 = vst [vmem:[#allocation2 + $0xd8] sm:$0xff] %v913_v8 }
 0x152   : > { %945 = vst [vmem:[#allocation2 + $0xe0] sm:$0xff] %v828_v9 }
 0x153   : > { %946 = vst [vmem:[#allocation2 + $0xe8] sm:$0xff] %v857_v17 }
 0x155   : > { %v885_v19 = vpop.f32.mrf.mxu2  ;;  %v1138_v23 = vpop.f32.mrf.mxu0 }
 0x156   : > { %v886_v20 = vadd.f32 %v885_v19, %v4134_v1  ;;  %v914_v21 = vpop.f32.mrf.mxu3  ;;  %v1151_v33 = vpop.f32.mrf.mxu1 }
 0x157   : > { %v915_v30 = vadd.f32 %v914_v21, %v4136_v4 }
 0x158   : > { %947 = vst [vmem:[#allocation2 + $0xf0] sm:$0xff] %v886_v20 }
 0x159   : > { %948 = vst [vmem:[#allocation2 + $0xf8] sm:$0xff] %v915_v30 }
 0x15d   : > { %v1164_v50 = vpop.f32.mrf.mxu2  ;;  %v1140_v34 = vpop.f32.mrf.mxu0 }
 0x15e   : > { %v1177_v57 = vpop.f32.mrf.mxu3  ;;  %v1153_v35 = vpop.f32.mrf.mxu1 }
 0x160   : > { %v964_v37 = vld [vmem:[%s963_s7] sm:$0xff]  ;;  %v965_v38 = vld [vmem:[%s963_s7 + $0x8] sm:$0xff]  ;;  %v967_v1 = vld [vmem:[%s963_s7 + $0x18] sm:$0xff] }
 0x161   : > { %v1181_v39 = vadd.f32 %v1138_v23, %v964_v37  ;;  %v1182_v44 = vadd.f32 %v1151_v33, %v965_v38  ;;  %v1184_v46 = vadd.f32 %v1177_v57, %v967_v1  ;;  %v966_v20 = vld [vmem:[%s963_s7 + $0x10] sm:$0xff]  ;;  %s3015_s7 = sshll.u32 %s1409_s4, 5 }
 0x162   : > { %v1183_v23 = vadd.f32 %v1164_v50, %v966_v20 }
 0x163   : > { %v1185_v48 = vsub.f32 0.0, %v1181_v39  ;;  %v1204_v49 = vsub.f32 0.0, %v1182_v44  ;;  %v1224_v4 = vsub.f32 0.0, %v1184_v46 }
 0x165   : > { %v1186_v58 = vmul.f32 1.442695, %v1185_v48  ;;  %v1205_v59 = vmul.f32 1.442695, %v1204_v49  ;;  %v1166_v63 = vpop.f32.mrf.mxu2  ;;  %v1225_v0 = vmul.f32 1.442695, %v1224_v4 }
 0x166   : > { %v1179_v5 = vpop.f32.mrf.mxu3 }
 0x167   : > { %3164 = vpow2.f32 %v1186_v58 }
 0x168   : > { %3166 = vpow2.f32 %v1205_v59 }
 0x169   : > { %3168 = vpow2.f32 %v1225_v0  ;;  %v955_v0 = vld [vmem:[%s3786_s13] sm:$0xff] }
 0x16d   : > { %v3165_v7 = vpop.eup %3164 }
 0x16e   : > { %v3167_v8 = vpop.eup %3166  ;;  %v1188_v9 = vadd.f32 1.0, %v3165_v7 }
 0x16f   : > { %v3169_v11 = vpop.eup %3168  ;;  %v1207_v17 = vadd.f32 1.0, %v3167_v8 }
 0x170   : > { %3170 = vrcp.f32 %v1188_v9  ;;  %v1227_v19 = vadd.f32 1.0, %v3169_v11  ;;  %v1200_v38 = vand.u32 2147483648, %v1188_v9  ;;  %v1198_v1 = vand.u32 2147483647, %v1188_v9 }
 0x171   : > { %3172 = vrcp.f32 %v1207_v17  ;;  %v1219_v46 = vand.u32 2147483648, %v1207_v17  ;;  %v1217_v49 = vand.u32 2147483647, %v1207_v17  ;;  %vm1194_vm5 = vweird.f32 %v1188_v9 }
 0x172   : > { %3174 = vrcp.f32 %v1227_v19  ;;  %v1201_v58 = vor.u32 1.1754944e-38, %v1200_v38  ;;  %vm1213_vm7 = vweird.f32 %v1207_v17  ;;  %vm1199_vm8 = vcmp.eq.f32.partialorder %v1198_v1, 8.507059e+37 }
 0x173   : > { %3176 = vtanh.f32 %v1183_v23  ;;  %v1220_v5 = vor.u32 1.1754944e-38, %v1219_v46  ;;  %vm1218_vm10 = vcmp.eq.f32.partialorder %v1217_v49, 8.507059e+37  ;;  %vm1233_vm13 = vweird.f32 %v1227_v19 }
 0x174   : > { %v1237_v38 = vand.u32 2147483647, %v1227_v19 }
 0x176   : > { %v3171_v21 = vpop.eup %3170  ;;  %vm1238_vm15 = vcmp.eq.f32.partialorder %v1237_v38, 8.507059e+37 }
 0x177   : > { %v3173_v30 = vpop.eup %3172  ;;  %v1190_v33 = vmul.f32 %v3171_v21, %v1188_v9  ;;  %vm1195_vm3 = vweird.f32 %v3171_v21 }
 0x178   : > { %v1209_v34 = vmul.f32 %v3173_v30, %v1207_v17  ;;  %v3175_v57 = vpop.eup %3174  ;;  %vm1214_vm4 = vweird.f32 %v3173_v30  ;;  %vm1196_vm6 = vmor %vm1194_vm5, %vm1195_vm3  ;;  %v1239_v17 = vand.u32 2147483648, %v1227_v19 }
 0x179   : > { %v1191_v35 = vsub.f32 1.0, %v1190_v33  ;;  %v1229_v39 = vmul.f32 %v3175_v57, %v1227_v19  ;;  %vm1215_vm9 = vmor %vm1213_vm7, %vm1214_vm4  ;;  %v3177_v7 = vpop.eup %3176  ;;  %vm1234_vm12 = vweird.f32 %v3175_v57 }
 0x17a   : > { %v1210_v37 = vsub.f32 1.0, %v1209_v34  ;;  %v1253_v34 = vpop.permute.xlu0 %1252  ;;  %vm1235_vm14 = vmor %vm1233_vm13, %vm1234_vm12 }
 0x17b   : > { %v1192_v44 = vmul.f32 %v3171_v21, %v1191_v35  ;;  %v1230_v50 = vsub.f32 1.0, %v1229_v39  ;;  %vm1254_vm11 = vcmp.eq.s32.totalorder %v1253_v34, 1  ;;  %v1240_v39 = vor.u32 1.1754944e-38, %v1239_v17 }
 0x17c   : > { %v1211_v48 = vmul.f32 %v3173_v30, %v1210_v37 }
 0x17d   : > { %v1193_v4 = vadd.f32 %v3171_v21, %v1192_v44  ;;  %v1231_v33 = vmul.f32 %v3175_v57, %v1230_v50 }
 0x17e   : > { %v1212_v59 = vadd.f32 %v3173_v30, %v1211_v48 }
 0x17f   : > { %v1197_v63 = vsel %vm1196_vm6, %v3171_v21, %v1193_v4  ;;  %v1232_v37 = vadd.f32 %v3175_v57, %v1231_v33 }
 0x180   : > { %v1202_v8 = vsel %vm1199_vm8, %v1201_v58, %v1197_v63  ;;  %v1216_v11 = vsel %vm1215_vm9, %v3173_v30, %v1212_v59 }
 0x181   : > { %v1244_v20 = vmul.f32 %v3177_v7, %v1202_v8  ;;  %v1221_v23 = vsel %vm1218_vm10, %v1220_v5, %v1216_v11  ;;  %v1236_v30 = vsel %vm1235_vm14, %v3175_v57, %v1232_v37  ;;  %v1270_v57 = vld [vmem:[%s4220_s28 + $0x8] sm:$0xff]  ;;  %v1272_v11 = vld [vmem:[%s4220_s28 + $0x18] sm:$0xff] }
 0x182   : > { %v1243_v35 = vmul.f32 %v1221_v23, %v955_v0  ;;  %v1241_v1 = vsel %vm1238_vm15, %v1240_v39, %v1236_v30 }
 0x184   : > { %v1245_v9 = vadd.f32 %v1244_v20, %v1243_v35 }
 0x186   : > { %3178 = vtanh.f32 %v1245_v9  ;;  %v4173_v21 = vsel %vm1254_vm11, %v1245_v9, %v955_v0 }
 0x18c   : > { %v3179_v44 = vpop.eup %3178 }
 0x18d   : > { %v1247_v46 = vmul.f32 %v3179_v44, %v1241_v1  ;;  %v1538_v1 = vstv %s1407_s6  ;;  %s1839_s6 = sadd.s32 5, %s1838_s29 }
 0x18e   : > { %vm1539_vm0 = vcmp.lt.s32.totalorder %v1538_v1, %v4045_v28  ;;  %s1840_s30 = sadd.s32 %s4029_s8, %s1839_s6 }
 0x18f   : > { %v1255_v48 = vsel %vm1254_vm11, %v1247_v46, 0.0  ;;  %v4181_v49 = vsel %vm1254_vm11, %v1247_v46, %v4079_v43  ;;  %v1269_v43 = vld [vmem:[%s4220_s28] sm:$0xff] }
 0x190   : > { %1257 = vst [vmem:[%s1256_s15] sm:$0xff] %v1255_v48  ;;  %v1273_v4 = vpack.c.bf16 %v4181_v49, %v4181_v49  ;;  %v1271_v48 = vld [vmem:[%s4220_s28 + $0x10] sm:$0xff]  ;;  %s4295_s15 = scalar_lea.vmem [#allocation2], %s3015_s7  ;;  %s3018_s28 = sshll.u32 %s1553_s23, 5 }
 0x191   : > { %s4351_s14 = scalar_lea.vmem [#allocation2], %s3018_s28 }
 0x192   : > { %1282 = vmatmul.bf16.vlgmr.msra.gmra.mxu0 %v1273_v4  ;;  %1295 = vmatmul.bf16.vlgmr.msra.gmra.mxu1 %v1273_v4 }
 0x193   : > { %1308 = vmatmul.bf16.vlgmr.msra.gmra.mxu2 %v1273_v4  ;;  %1321 = vmatmul.bf16.vlgmr.msra.gmra.mxu3 %v1273_v4 }
 0x194   : > { %1563 = vmatpush.bf16.msra.mxu0 %v3865_v40  ;;  %1576 = vmatpush.bf16.msra.mxu1 %v3870_v45 }
 0x195   : > { %1589 = vmatpush.bf16.msra.mxu2 %v3877_v51  ;;  %1602 = vmatpush.bf16.msra.mxu3 %v3880_v52 }
 0x198   : > { %1564 = vmatpush.bf16.msra.mxu0 %v3882_v53  ;;  %1577 = vmatpush.bf16.msra.mxu1 %v3886_v55 }
 0x199   : > { %1590 = vmatpush.bf16.msra.mxu2 %v3909_v6  ;;  %1603 = vmatpush.bf16.msra.mxu3 %v3896_v61 }
 0x19c   : > { %1565 = vmatpush.bf16.msra.mxu0 %v3898_v62  ;;  %1578 = vmatpush.bf16.msra.mxu1 %v3904_v2 }
 0x19d   : > { %1591 = vmatpush.bf16.msra.mxu2 %v3924_v15  ;;  %1604 = vmatpush.bf16.msra.mxu3 %v3919_v12 }
 0x1a0   : > { %1566 = vmatpush.bf16.msra.mxu0 %v3921_v13  ;;  %1579 = vmatpush.bf16.msra.mxu1 %v3929_v18 }
 0x1a1   : > { %1592 = vmatpush.bf16.msra.mxu2 %v3938_v25  ;;  %1605 = vmatpush.bf16.msra.mxu3 %v3942_v26 }
 0x1a4   : > { %1567 = vmatpush.bf16.msra.mxu0 %v3944_v27  ;;  %1580 = vmatpush.bf16.msra.mxu1 %v3947_v29 }
 0x1a5   : > { %1593 = vmatpush.bf16.msra.mxu2 %v3971_v42  ;;  %1606 = vmatpush.bf16.msra.mxu3 %v3955_v32 }
 0x1a8   : > { %1568 = vmatpush.bf16.msra.mxu0 %v3964_v36  ;;  %1581 = vmatpush.bf16.msra.mxu1 %v3969_v41 }
 0x1a9   : > { %1594 = vmatpush.bf16.msra.mxu2 %v3986_v54  ;;  %1607 = vmatpush.bf16.msra.mxu3 %v3977_v47 }
 0x1ac   : > { %1569 = vmatpush.bf16.msra.mxu0 %v3988_v56  ;;  %1582 = vmatpush.bf16.msra.mxu1 %v3994_v60 }
 0x1ad   : > { %1595 = vmatpush.bf16.msra.mxu2 %v4015_v14  ;;  %1608 = vmatpush.bf16.msra.mxu3 %v3999_v3 }
 0x1b0   : > { %1570 = vmatpush.bf16.msra.mxu0 %v4007_v10  ;;  %1583 = vmatpush.bf16.msra.mxu1 %v4017_v16 }
 0x1b1   : > { %1596 = vmatpush.bf16.msra.mxu2 %v4034_v24  ;;  %1609 = vmatpush.bf16.msra.mxu3 %v4025_v22 }
 0x20f   : > { %v1283_v19 = vpop.f32.mrf.mxu0  ;;  %v1296_v50 = vpop.f32.mrf.mxu1 }
 0x210   : > { %v1326_v58 = vadd.f32 %v1283_v19, %v1269_v43  ;;  %v1327_v59 = vadd.f32 %v1296_v50, %v1270_v57  ;;  %v1540_v19 = vsel %vm1539_vm0, 1, %v3499_v31  ;;  %v1682_v57 = vstv %s1551_s9  ;;  %s1695_s9 = sadd.s32 %s4029_s8, %s1694_s24  ;;  %s2479_s8 = scalar_lea.vmem %s3790_s22, %s3016_s16 [#allocation8] }
 0x211   : > { %1542 = vperm.xlu1 %3162, %v1540_v19   ;;  %vm1683_vm1 = vcmp.lt.s32.totalorder %v1682_v57, %v4045_v28 }
 0x212   : > { %v1330_v63 = vsub.f32 0.0, %v1326_v58  ;;  %v1349_v0 = vsub.f32 0.0, %v1327_v59 }
 0x214   : > { %v1331_v5 = vmul.f32 1.442695, %v1330_v63  ;;  %v1350_v7 = vmul.f32 1.442695, %v1349_v0 }
 0x216   : > { %3180 = vpow2.f32 %v1331_v5  ;;  %v1309_v8 = vpop.f32.mrf.mxu2  ;;  %v1322_v20 = vpop.f32.mrf.mxu3 }
 0x217   : > { %3182 = vpow2.f32 %v1350_v7  ;;  %v1329_v23 = vadd.f32 %v1322_v20, %v1272_v11  ;;  %v1285_v33 = vpop.f32.mrf.mxu0  ;;  %v1298_v34 = vpop.f32.mrf.mxu1  ;;  %v1328_v4 = vadd.f32 %v1309_v8, %v1271_v48 }
 0x218   : > { %v1684_v33 = vsel %vm1683_vm1, 1, %v3499_v31 }
 0x219   : > { %v1369_v35 = vsub.f32 0.0, %v1329_v23  ;;  %1686 = vperm.xlu1 %3162, %v1684_v33  }
 0x21b   : > { %v1370_v9 = vmul.f32 1.442695, %v1369_v35 }
 0x21c   : > { %v3181_v37 = vpop.eup %3180 }
 0x21d   : > { %v3183_v17 = vpop.eup %3182  ;;  %v1333_v38 = vadd.f32 1.0, %v3181_v37  ;;  %3184 = vpow2.f32 %v1370_v9  ;;  %v2261_v37 = vstv %s2130_s17  ;;  %s3027_s17 = sadd.s32 56, %s3034_s2 }
 0x21e   : > { %v1352_v30 = vadd.f32 1.0, %v3183_v17  ;;  %v1311_v39 = vpop.f32.mrf.mxu2  ;;  %v1324_v44 = vpop.f32.mrf.mxu3  ;;  %vm2262_vm10 = vcmp.lt.s32.totalorder %v2261_v37, %v4045_v28 }
 0x21f   : > { %3186 = vrcp.f32 %v1333_v38  ;;  %v1343_v8 = vand.u32 2147483647, %v1333_v38  ;;  %v1345_v11 = vand.u32 2147483648, %v1333_v38  ;;  %vm1339_vm4 = vweird.f32 %v1333_v38 }
 0x220   : > { %3188 = vrcp.f32 %v1352_v30  ;;  %v1364_v7 = vand.u32 2147483648, %v1352_v30  ;;  %v1362_v23 = vand.u32 2147483647, %v1352_v30  ;;  %vm1358_vm5 = vweird.f32 %v1352_v30 }
 0x221   : > { %v1346_v17 = vor.u32 1.1754944e-38, %v1345_v11  ;;  %vm1344_vm8 = vcmp.eq.f32.partialorder %v1343_v8, 8.507059e+37 }
 0x222   : > { %vm1363_vm9 = vcmp.eq.f32.partialorder %v1362_v23, 8.507059e+37 }
 0x223   : > { %v3185_v46 = vpop.eup %3184 }
 0x224   : > { %v4232_v43 = vadd.f32 1.0, %v3185_v46  ;;  %v1365_v46 = vor.u32 1.1754944e-38, %v1364_v7 }
 0x225   : > { %v3187_v50 = vpop.eup %3186 }
 0x226   : > { %v3189_v58 = vpop.eup %3188  ;;  %v1335_v59 = vmul.f32 %v3187_v50, %v1333_v38  ;;  %3190 = vrcp.f32 %v4232_v43  ;;  %vm1340_vm2 = vweird.f32 %v3187_v50  ;;  %vm1378_vm13 = vweird.f32 %v4232_v43 }
 0x227   : > { %v1354_v63 = vmul.f32 %v3189_v58, %v1352_v30  ;;  %3192 = vtanh.f32 %v1328_v4  ;;  %vm1359_vm3 = vweird.f32 %v3189_v58  ;;  %vm1341_vm6 = vmor %vm1339_vm4, %vm1340_vm2  ;;  %v1382_v7 = vand.u32 2147483647, %v4232_v43 }
 0x228   : > { %v1336_v0 = vsub.f32 1.0, %v1335_v59  ;;  %vm1360_vm7 = vmor %vm1358_vm5, %vm1359_vm3 }
 0x229   : > { %v1355_v5 = vsub.f32 1.0, %v1354_v63  ;;  %vm1383_vm15 = vcmp.eq.f32.partialorder %v1382_v7, 8.507059e+37 }
 0x22a   : > { %v1337_v20 = vmul.f32 %v3187_v50, %v1336_v0  ;;  %v2263_v0 = vsel %vm2262_vm10, 1, %v3499_v31 }
 0x22b   : > { %v1356_v34 = vmul.f32 %v3189_v58, %v1355_v5  ;;  %v1398_v5 = vpop.permute.xlu0 %1397  ;;  %2265 = vperm.xlu1 %3162, %v2263_v0  }
 0x22c   : > { %v3191_v35 = vpop.eup %3190  ;;  %v1338_v9 = vadd.f32 %v3187_v50, %v1337_v20  ;;  %vm1399_vm11 = vcmp.eq.s32.totalorder %v1398_v5, 1 }
 0x22d   : > { %v1357_v39 = vadd.f32 %v3189_v58, %v1356_v34  ;;  %v1374_v44 = vmul.f32 %v3191_v35, %v4232_v43  ;;  %v3193_v1 = vpop.eup %3192  ;;  %vm1379_vm12 = vweird.f32 %v3191_v35 }
 0x22e   : > { %v1342_v48 = vsel %vm1341_vm6, %v3187_v50, %v1338_v9  ;;  %vm1380_vm14 = vmor %vm1378_vm13, %vm1379_vm12 }
 0x22f   : > { %v1347_v4 = vsel %vm1344_vm8, %v1346_v17, %v1342_v48  ;;  %v1361_v19 = vsel %vm1360_vm7, %v3189_v58, %v1357_v39  ;;  %v1375_v57 = vsub.f32 1.0, %v1374_v44  ;;  %v1384_v58 = vand.u32 2147483648, %v4232_v43 }
 0x230   : > { %v1366_v38 = vsel %vm1363_vm9, %v1365_v46, %v1361_v19  ;;  %v1389_v59 = vmul.f32 %v3193_v1, %v1347_v4 }
 0x231   : > { %v1388_v30 = vmul.f32 %v1366_v38, %v4173_v21  ;;  %v1376_v63 = vmul.f32 %v3191_v35, %v1375_v57  ;;  %v1385_v20 = vor.u32 1.1754944e-38, %v1384_v58  ;;  %v1417_v57 = vld [vmem:[%s4295_s15 + $0x18] sm:$0xff] }
 0x233   : > { %v1390_v11 = vadd.f32 %v1389_v59, %v1388_v30  ;;  %v1377_v50 = vadd.f32 %v3191_v35, %v1376_v63 }
 0x235   : > { %3194 = vtanh.f32 %v1390_v11  ;;  %v4246_v28 = vsel %vm1399_vm11, %v1390_v11, %v4173_v21  ;;  %v1381_v8 = vsel %vm1380_vm14, %v3191_v35, %v1377_v50  ;;  %v1415_v35 = vld [vmem:[%s4295_s15 + $0x8] sm:$0xff] }
 0x236   : > { %v1386_v33 = vsel %vm1383_vm15, %v1385_v20, %v1381_v8 }
 0x23b   : > { %v3195_v23 = vpop.eup %3194 }
 0x23c   : > { %v1392_v34 = vmul.f32 %v3195_v23, %v1386_v33  ;;  %v1416_v33 = vld [vmem:[%s4295_s15 + $0x10] sm:$0xff] }
 0x23e   : > { %v1400_v9 = vsel %vm1399_vm11, %v1392_v34, 0.0  ;;  %v4256_v37 = vsel %vm1399_vm11, %v1392_v34, %v4181_v49  ;;  %v1414_v49 = vld [vmem:[%s4295_s15] sm:$0xff]  ;;  %s3032_s15 = smul.u32 4294967272, %s4672_s25 }
 0x23f   : > { %v1418_v21 = vpack.c.bf16 %v4256_v37, %v4256_v37  ;;  %2906 = vst [vmem:[%s2468_s5 + $0x8] sm:$0xff] %v1400_v9  ;;  %s4417_s5 = sshll.u32 %s1694_s24, 3 }
 0x240   : > { %s1697_s3 = sshra.s32 %s4417_s5, 3  ;;  %s1834_s7 = scalar_lea.vmem %s3790_s22, %s4417_s5 [#allocation8] }
 0x241   : > { %1427 = vmatmul.bf16.vlgmr.msrb.gmra.mxu0 %v1418_v21  ;;  %1440 = vmatmul.bf16.vlgmr.msrb.gmra.mxu1 %v1418_v21  ;;  %s3019_s11 = sshll.u32 %s1697_s3, 5  ;;  %s2489_s28 = scalar_lea.vmem %s3790_s22, %s3032_s15 [#allocation8] }
 0x242   : > { %1453 = vmatmul.bf16.vlgmr.msrb.gmra.mxu2 %v1418_v21  ;;  %1466 = vmatmul.bf16.vlgmr.msrb.gmra.mxu3 %v1418_v21  ;;  %s4420_s4 = scalar_lea.vmem [#allocation2], %s3019_s11  ;;  %s2501_s11 = scalar_lea.vmem %s3790_s22, %s3034_s2 [#allocation8] }
 0x243   : > { %1707 = vmatpush.bf16.msrb.mxu0 %v3865_v40  ;;  %1720 = vmatpush.bf16.msrb.mxu1 %v3870_v45 }
 0x244   : > { %1733 = vmatpush.bf16.msrb.mxu2 %v3877_v51  ;;  %1746 = vmatpush.bf16.msrb.mxu3 %v3880_v52 }
 0x247   : > { %1708 = vmatpush.bf16.msrb.mxu0 %v3882_v53  ;;  %1721 = vmatpush.bf16.msrb.mxu1 %v3886_v55 }
 0x248   : > { %1734 = vmatpush.bf16.msrb.mxu2 %v3909_v6  ;;  %1747 = vmatpush.bf16.msrb.mxu3 %v3896_v61 }
 0x24b   : > { %1709 = vmatpush.bf16.msrb.mxu0 %v3898_v62  ;;  %1722 = vmatpush.bf16.msrb.mxu1 %v3904_v2 }
 0x24c   : > { %1735 = vmatpush.bf16.msrb.mxu2 %v3924_v15  ;;  %1748 = vmatpush.bf16.msrb.mxu3 %v3919_v12 }
 0x24f   : > { %1710 = vmatpush.bf16.msrb.mxu0 %v3921_v13  ;;  %1723 = vmatpush.bf16.msrb.mxu1 %v3929_v18 }
 0x250   : > { %1736 = vmatpush.bf16.msrb.mxu2 %v3938_v25  ;;  %1749 = vmatpush.bf16.msrb.mxu3 %v3942_v26 }
 0x253   : > { %1711 = vmatpush.bf16.msrb.mxu0 %v3944_v27  ;;  %1724 = vmatpush.bf16.msrb.mxu1 %v3947_v29 }
 0x254   : > { %1737 = vmatpush.bf16.msrb.mxu2 %v3971_v42  ;;  %1750 = vmatpush.bf16.msrb.mxu3 %v3955_v32 }
 0x257   : > { %1712 = vmatpush.bf16.msrb.mxu0 %v3964_v36  ;;  %1725 = vmatpush.bf16.msrb.mxu1 %v3969_v41 }
 0x258   : > { %1738 = vmatpush.bf16.msrb.mxu2 %v3986_v54  ;;  %1751 = vmatpush.bf16.msrb.mxu3 %v3977_v47 }
 0x25b   : > { %1713 = vmatpush.bf16.msrb.mxu0 %v3988_v56  ;;  %1726 = vmatpush.bf16.msrb.mxu1 %v3994_v60 }
 0x25c   : > { %1739 = vmatpush.bf16.msrb.mxu2 %v4015_v14  ;;  %1752 = vmatpush.bf16.msrb.mxu3 %v3999_v3 }
 0x25f   : > { %1714 = vmatpush.bf16.msrb.mxu0 %v4007_v10  ;;  %1727 = vmatpush.bf16.msrb.mxu1 %v4017_v16 }
 0x260   : > { %1740 = vmatpush.bf16.msrb.mxu2 %v4034_v24  ;;  %1753 = vmatpush.bf16.msrb.mxu3 %v4025_v22 }
 0x2be   : > { %v1428_v43 = vpop.f32.mrf.mxu0  ;;  %v1441_v17 = vpop.f32.mrf.mxu1 }
 0x2bf   : > { %v1471_v39 = vadd.f32 %v1428_v43, %v1414_v49  ;;  %v1472_v44 = vadd.f32 %v1441_v17, %v1415_v35 }
 0x2c1   : > { %v1475_v1 = vsub.f32 0.0, %v1471_v39  ;;  %v1494_v46 = vsub.f32 0.0, %v1472_v44 }
 0x2c3   : > { %v1476_v48 = vmul.f32 1.442695, %v1475_v1  ;;  %v1495_v4 = vmul.f32 1.442695, %v1494_v46 }
 0x2c5   : > { %3196 = vpow2.f32 %v1476_v48  ;;  %v1454_v19 = vpop.f32.mrf.mxu2  ;;  %v1467_v38 = vpop.f32.mrf.mxu3 }
 0x2c6   : > { %3198 = vpow2.f32 %v1495_v4  ;;  %v1474_v59 = vadd.f32 %v1467_v38, %v1417_v57  ;;  %v1430_v30 = vpop.f32.mrf.mxu0  ;;  %v1443_v63 = vpop.f32.mrf.mxu1  ;;  %v1473_v21 = vadd.f32 %v1454_v19, %v1416_v33 }
 0x2c8   : > { %v1514_v0 = vsub.f32 0.0, %v1474_v59 }
 0x2ca   : > { %v1515_v5 = vmul.f32 1.442695, %v1514_v0 }
 0x2cb   : > { %v3197_v11 = vpop.eup %3196 }
 0x2cc   : > { %v3199_v50 = vpop.eup %3198  ;;  %v1478_v58 = vadd.f32 1.0, %v3197_v11  ;;  %3200 = vpow2.f32 %v1515_v5 }
 0x2cd   : > { %v1497_v7 = vadd.f32 1.0, %v3199_v50  ;;  %v1456_v8 = vpop.f32.mrf.mxu2  ;;  %v1469_v20 = vpop.f32.mrf.mxu3 }
 0x2ce   : > { %3202 = vrcp.f32 %v1478_v58  ;;  %v1490_v44 = vand.u32 2147483648, %v1478_v58  ;;  %v1488_v46 = vand.u32 2147483647, %v1478_v58  ;;  %vm1484_vm2 = vweird.f32 %v1478_v58 }
 0x2cf   : > { %3204 = vrcp.f32 %v1497_v7  ;;  %v1509_v48 = vand.u32 2147483648, %v1497_v7  ;;  %v1507_v57 = vand.u32 2147483647, %v1497_v7  ;;  %vm1503_vm4 = vweird.f32 %v1497_v7 }
 0x2d0   : > { %v1491_v19 = vor.u32 1.1754944e-38, %v1490_v44  ;;  %vm1489_vm5 = vcmp.eq.f32.partialorder %v1488_v46, 8.507059e+37 }
 0x2d1   : > { %v1510_v5 = vor.u32 1.1754944e-38, %v1509_v48  ;;  %vm1508_vm7 = vcmp.eq.f32.partialorder %v1507_v57, 8.507059e+37 }
 0x2d2   : > { %v3201_v23 = vpop.eup %3200 }
 0x2d3   : > { %v1517_v34 = vadd.f32 1.0, %v3201_v23 }
 0x2d4   : > { %v3203_v9 = vpop.eup %3202 }
 0x2d5   : > { %v3205_v49 = vpop.eup %3204  ;;  %v1480_v43 = vmul.f32 %v3203_v9, %v1478_v58  ;;  %3206 = vrcp.f32 %v1517_v34  ;;  %vm1485_vm0 = vweird.f32 %v3203_v9  ;;  %vm1523_vm10 = vweird.f32 %v1517_v34 }
 0x2d6   : > { %v1499_v35 = vmul.f32 %v3205_v49, %v1497_v7  ;;  %3208 = vtanh.f32 %v1473_v21  ;;  %vm1504_vm1 = vweird.f32 %v3205_v49  ;;  %vm1486_vm3 = vmor %vm1484_vm2, %vm1485_vm0  ;;  %v1543_v21 = vpop.permute.xlu1 %1542 }
 0x2d7   : > { %v1481_v17 = vsub.f32 1.0, %v1480_v43  ;;  %vm1505_vm6 = vmor %vm1503_vm4, %vm1504_vm1  ;;  %vm1544_vm8 = vcmp.eq.s32.totalorder %v1543_v21, 1 }
 0x2d8   : > { %v1500_v39 = vsub.f32 1.0, %v1499_v35 }
 0x2d9   : > { %v1482_v1 = vmul.f32 %v3203_v9, %v1481_v17 }
 0x2da   : > { %v1501_v4 = vmul.f32 %v3205_v49, %v1500_v39 }
 0x2db   : > { %v3207_v38 = vpop.eup %3206  ;;  %v1483_v59 = vadd.f32 %v3203_v9, %v1482_v1 }
 0x2dc   : > { %v1519_v30 = vmul.f32 %v3207_v38, %v1517_v34  ;;  %v1502_v63 = vadd.f32 %v3205_v49, %v1501_v4  ;;  %v3209_v11 = vpop.eup %3208  ;;  %vm1524_vm9 = vweird.f32 %v3207_v38 }
 0x2dd   : > { %v1487_v0 = vsel %vm1486_vm3, %v3203_v9, %v1483_v59  ;;  %v1529_v9 = vand.u32 2147483648, %v1517_v34  ;;  %vm1525_vm11 = vmor %vm1523_vm10, %vm1524_vm9 }
 0x2de   : > { %v1492_v50 = vsel %vm1489_vm5, %v1491_v19, %v1487_v0  ;;  %v1506_v8 = vsel %vm1505_vm6, %v3205_v49, %v1502_v63  ;;  %v1520_v20 = vsub.f32 1.0, %v1519_v30  ;;  %v1527_v49 = vand.u32 2147483647, %v1517_v34 }
 0x2df   : > { %v1534_v23 = vmul.f32 %v3209_v11, %v1492_v50  ;;  %v1511_v33 = vsel %vm1508_vm7, %v1510_v5, %v1506_v8  ;;  %v1530_v44 = vor.u32 1.1754944e-38, %v1529_v9  ;;  %v1561_v8 = vld [vmem:[%s4351_s14 + $0x18] sm:$0xff] }
 0x2e0   : > { %v1521_v43 = vmul.f32 %v3207_v38, %v1520_v20  ;;  %v1533_v58 = vmul.f32 %v1511_v33, %v4246_v28  ;;  %vm1528_vm12 = vcmp.eq.f32.partialorder %v1527_v49, 8.507059e+37 }
 0x2e2   : > { %v1535_v35 = vadd.f32 %v1534_v23, %v1533_v58  ;;  %v1522_v7 = vadd.f32 %v3207_v38, %v1521_v43 }
 0x2e4   : > { %3210 = vtanh.f32 %v1535_v35  ;;  %v4304_v17 = vsel %vm1544_vm8, %v1535_v35, %v4246_v28  ;;  %v1526_v39 = vsel %vm1525_vm11, %v3207_v38, %v1522_v7  ;;  %v1559_v38 = vld [vmem:[%s4351_s14 + $0x8] sm:$0xff] }
 0x2e5   : > { %v1531_v46 = vsel %vm1528_vm12, %v1530_v44, %v1526_v39 }
 0x2ea   : > { %v3211_v1 = vpop.eup %3210 }
 0x2eb   : > { %v1537_v48 = vmul.f32 %v3211_v1, %v1531_v46  ;;  %v1826_v1 = vstv %s1695_s9 }
 0x2ed   : > { %v1545_v4 = vsel %vm1544_vm8, %v1537_v48, 0.0  ;;  %v4312_v57 = vsel %vm1544_vm8, %v1537_v48, %v4256_v37  ;;  %v1558_v37 = vld [vmem:[%s4351_s14] sm:$0xff] }
 0x2ee   : > { %2911 = vst [vmem:[%s2474_s18 + $0x10] sm:$0xff] %v1545_v4  ;;  %v1562_v28 = vpack.c.bf16 %v4312_v57, %v4312_v57  ;;  %v3292_v48 = vld [vmem:[%s4674_s26] sm:$0xff]  ;;  %v1560_v4 = vld [vmem:[%s4351_s14 + $0x10] sm:$0xff]  ;;  %s3021_s18 = sadd.s32 40, %s3032_s15  ;;  %s3033_s14 = smul.u32 4294967256, %s4672_s25 }
 0x2ef   : > { %vm1827_vm13 = vcmp.lt.s32.totalorder %v1826_v1, %v3292_v48  ;;  %s1842_s16 = sshra.s32 %s3021_s18, 3  ;;  %s3029_s25 = sshll.u32 (%p3713_p1), %s4011_s19, 4 }
 0x2f0   : > { %1571 = vmatmul.bf16.vlgmr.msra.gmra.mxu0 %v1562_v28  ;;  %1584 = vmatmul.bf16.vlgmr.msra.gmra.mxu1 %v1562_v28  ;;  %s3022_s0 = sshll.u32 %s1842_s16, 5  ;;  %s3024_s29 = sadd.s32 48, %s3033_s14 }
 0x2f1   : > { %1597 = vmatmul.bf16.vlgmr.msra.gmra.mxu2 %v1562_v28  ;;  %1610 = vmatmul.bf16.vlgmr.msra.gmra.mxu3 %v1562_v28  ;;  %s4475_s23 = scalar_lea.vmem [#allocation2], %s3022_s0  ;;  %s1987_s24 = sshra.s32 %s3024_s29, 3 }
 0x2f2   : > { %1852 = vmatpush.bf16.msra.mxu0 %v3865_v40  ;;  %1865 = vmatpush.bf16.msra.mxu1 %v3870_v45  ;;  %s3025_s6 = sshll.u32 %s1987_s24, 5  ;;  %s4676_s18 = sld [smem:[#allocation31_spill]] (%p3713_p1) }
 0x2f3   : > { %1878 = vmatpush.bf16.msra.mxu2 %v3877_v51  ;;  %1891 = vmatpush.bf16.msra.mxu3 %v3880_v52  ;;  %s4499_s9 = scalar_lea.vmem [#allocation2], %s3025_s6 }
 0x2f6   : > { %1853 = vmatpush.bf16.msra.mxu0 %v3882_v53  ;;  %1866 = vmatpush.bf16.msra.mxu1 %v3886_v55 }
 0x2f7   : > { %1879 = vmatpush.bf16.msra.mxu2 %v3909_v6  ;;  %1892 = vmatpush.bf16.msra.mxu3 %v3896_v61 }
 0x2fa   : > { %1854 = vmatpush.bf16.msra.mxu0 %v3898_v62  ;;  %1867 = vmatpush.bf16.msra.mxu1 %v3904_v2 }
 0x2fb   : > { %1880 = vmatpush.bf16.msra.mxu2 %v3924_v15  ;;  %1893 = vmatpush.bf16.msra.mxu3 %v3919_v12 }
 0x2fe   : > { %1855 = vmatpush.bf16.msra.mxu0 %v3921_v13  ;;  %1868 = vmatpush.bf16.msra.mxu1 %v3929_v18 }
 0x2ff   : > { %1881 = vmatpush.bf16.msra.mxu2 %v3938_v25  ;;  %1894 = vmatpush.bf16.msra.mxu3 %v3942_v26 }
 0x302   : > { %1856 = vmatpush.bf16.msra.mxu0 %v3944_v27  ;;  %1869 = vmatpush.bf16.msra.mxu1 %v3947_v29 }
 0x303   : > { %1882 = vmatpush.bf16.msra.mxu2 %v3971_v42  ;;  %1895 = vmatpush.bf16.msra.mxu3 %v3955_v32 }
 0x306   : > { %1857 = vmatpush.bf16.msra.mxu0 %v3964_v36  ;;  %1870 = vmatpush.bf16.msra.mxu1 %v3969_v41 }
 0x307   : > { %1883 = vmatpush.bf16.msra.mxu2 %v3986_v54  ;;  %1896 = vmatpush.bf16.msra.mxu3 %v3977_v47 }
 0x30a   : > { %1858 = vmatpush.bf16.msra.mxu0 %v3988_v56  ;;  %1871 = vmatpush.bf16.msra.mxu1 %v3994_v60 }
 0x30b   : > { %1884 = vmatpush.bf16.msra.mxu2 %v4015_v14  ;;  %1897 = vmatpush.bf16.msra.mxu3 %v3999_v3 }
 0x30e   : > { %1859 = vmatpush.bf16.msra.mxu0 %v4007_v10  ;;  %1872 = vmatpush.bf16.msra.mxu1 %v4017_v16 }
 0x30f   : > { %1885 = vmatpush.bf16.msra.mxu2 %v4034_v24  ;;  %1898 = vmatpush.bf16.msra.mxu3 %v4025_v22 }
 0x36d   : > { %v1572_v34 = vpop.f32.mrf.mxu0  ;;  %v1585_v59 = vpop.f32.mrf.mxu1 }
 0x36e   : > { %v1615_v19 = vadd.f32 %v1572_v34, %v1558_v37  ;;  %v1616_v30 = vadd.f32 %v1585_v59, %v1559_v38  ;;  %v1828_v37 = vsel %vm1827_vm13, 1, %v3499_v31  ;;  %v1971_v34 = vstv %s1840_s30  ;;  %s2495_s30 = scalar_lea.vmem %s3790_s22, %s3033_s14 [#allocation8] }
 0x36f   : > { %1830 = vperm.xlu2 %3163, %v1828_v37   ;;  %vm1972_vm14 = vcmp.lt.s32.totalorder %v1971_v34, %v3292_v48 }
 0x370   : > { %v1619_v63 = vsub.f32 0.0, %v1615_v19  ;;  %v1638_v0 = vsub.f32 0.0, %v1616_v30 }
 0x372   : > { %v1620_v5 = vmul.f32 1.442695, %v1619_v63  ;;  %v1639_v11 = vmul.f32 1.442695, %v1638_v0 }
 0x374   : > { %3212 = vpow2.f32 %v1620_v5  ;;  %v1598_v50 = vpop.f32.mrf.mxu2  ;;  %v1611_v20 = vpop.f32.mrf.mxu3 }
 0x375   : > { %3214 = vpow2.f32 %v1639_v11  ;;  %v1618_v23 = vadd.f32 %v1611_v20, %v1561_v8  ;;  %v1574_v33 = vpop.f32.mrf.mxu0  ;;  %v1587_v21 = vpop.f32.mrf.mxu1  ;;  %v1617_v59 = vadd.f32 %v1598_v50, %v1560_v4 }
 0x376   : > { %v1973_v33 = vsel %vm1972_vm14, 1, %v3499_v31 }
 0x377   : > { %v1658_v43 = vsub.f32 0.0, %v1618_v23  ;;  %1975 = vperm.xlu2 %3163, %v1973_v33  }
 0x379   : > { %v1659_v58 = vmul.f32 1.442695, %v1658_v43 }
 0x37a   : > { %v3213_v35 = vpop.eup %3212 }
 0x37b   : > { %v3215_v7 = vpop.eup %3214  ;;  %v1622_v9 = vadd.f32 1.0, %v3213_v35  ;;  %3216 = vpow2.f32 %v1659_v58 }
 0x37c   : > { %v1641_v49 = vadd.f32 1.0, %v3215_v7  ;;  %v1600_v39 = vpop.f32.mrf.mxu2  ;;  %v1613_v44 = vpop.f32.mrf.mxu3 }
 0x37d   : > { %3218 = vrcp.f32 %v1622_v9  ;;  %v1632_v11 = vand.u32 2147483647, %v1622_v9  ;;  %v1634_v8 = vand.u32 2147483648, %v1622_v9  ;;  %vm1628_vm1 = vweird.f32 %v1622_v9 }
 0x37e   : > { %3220 = vrcp.f32 %v1641_v49  ;;  %v1653_v20 = vand.u32 2147483648, %v1641_v49  ;;  %v1651_v43 = vand.u32 2147483647, %v1641_v49  ;;  %vm1647_vm2 = vweird.f32 %v1641_v49 }
 0x37f   : > { %v1635_v35 = vor.u32 1.1754944e-38, %v1634_v8  ;;  %vm1633_vm5 = vcmp.eq.f32.partialorder %v1632_v11, 8.507059e+37 }
 0x380   : > { %v1654_v44 = vor.u32 1.1754944e-38, %v1653_v20  ;;  %vm1652_vm6 = vcmp.eq.f32.partialorder %v1651_v43, 8.507059e+37  ;;  %v1703_v43 = vld [vmem:[%s4420_s4 + $0x8] sm:$0xff] }
 0x381   : > { %v3217_v46 = vpop.eup %3216 }
 0x382   : > { %v1661_v28 = vadd.f32 1.0, %v3217_v46 }
 0x383   : > { %v3219_v38 = vpop.eup %3218 }
 0x384   : > { %v3221_v19 = vpop.eup %3220  ;;  %v1624_v30 = vmul.f32 %v3219_v38, %v1622_v9  ;;  %3222 = vrcp.f32 %v1661_v28  ;;  %vm1629_vm15 = vweird.f32 %v3219_v38  ;;  %vm1667_vm9 = vweird.f32 %v1661_v28 }
 0x385   : > { %v1643_v63 = vmul.f32 %v3221_v19, %v1641_v49  ;;  %3224 = vtanh.f32 %v1617_v59  ;;  %vm1648_vm0 = vweird.f32 %v3221_v19  ;;  %vm1630_vm3 = vmor %vm1628_vm1, %vm1629_vm15  ;;  %v1687_v49 = vpop.permute.xlu1 %1686 }
 0x386   : > { %v1625_v0 = vsub.f32 1.0, %v1624_v30  ;;  %vm1649_vm4 = vmor %vm1647_vm2, %vm1648_vm0  ;;  %vm1688_vm7 = vcmp.eq.s32.totalorder %v1687_v49, 1 }
 0x387   : > { %v1644_v5 = vsub.f32 1.0, %v1643_v63 }
 0x388   : > { %v1626_v23 = vmul.f32 %v3219_v38, %v1625_v0 }
 0x389   : > { %v1645_v21 = vmul.f32 %v3221_v19, %v1644_v5 }
 0x38a   : > { %v3223_v50 = vpop.eup %3222  ;;  %v1627_v58 = vadd.f32 %v3219_v38, %v1626_v23 }
 0x38b   : > { %v1646_v7 = vadd.f32 %v3221_v19, %v1645_v21  ;;  %v1663_v39 = vmul.f32 %v3223_v50, %v1661_v28  ;;  %v3225_v46 = vpop.eup %3224  ;;  %vm1668_vm8 = vweird.f32 %v3223_v50 }
 0x38c   : > { %v1631_v1 = vsel %vm1630_vm3, %v3219_v38, %v1627_v58  ;;  %v1673_v38 = vand.u32 2147483648, %v1661_v28  ;;  %vm1669_vm10 = vmor %vm1667_vm9, %vm1668_vm8 }
 0x38d   : > { %v1636_v48 = vsel %vm1633_vm5, %v1635_v35, %v1631_v1  ;;  %v1650_v4 = vsel %vm1649_vm4, %v3221_v19, %v1646_v7  ;;  %v1664_v31 = vsub.f32 1.0, %v1663_v39  ;;  %v1671_v19 = vand.u32 2147483647, %v1661_v28 }
 0x38e   : > { %v1655_v37 = vsel %vm1652_vm6, %v1654_v44, %v1650_v4  ;;  %v1678_v34 = vmul.f32 %v3225_v46, %v1636_v48  ;;  %v1674_v11 = vor.u32 1.1754944e-38, %v1673_v38  ;;  %v1705_v48 = vld [vmem:[%s4420_s4 + $0x18] sm:$0xff] }
 0x38f   : > { %v1677_v59 = vmul.f32 %v1655_v37, %v4304_v17  ;;  %v1665_v9 = vmul.f32 %v3223_v50, %v1664_v31  ;;  %vm1672_vm11 = vcmp.eq.f32.partialorder %v1671_v19, 8.507059e+37 }
 0x391   : > { %v1679_v30 = vadd.f32 %v1678_v34, %v1677_v59  ;;  %v1666_v63 = vadd.f32 %v3223_v50, %v1665_v9 }
 0x393   : > { %3226 = vtanh.f32 %v1679_v30  ;;  %v4371_v0 = vsel %vm1688_vm7, %v1679_v30, %v4304_v17  ;;  %v1670_v5 = vsel %vm1669_vm10, %v3223_v50, %v1666_v63 }
 0x394   : > { %v1675_v20 = vsel %vm1672_vm11, %v1674_v11, %v1670_v5 }
 0x399   : > { %v3227_v8 = vpop.eup %3226 }
 0x39a   : > { %v1681_v23 = vmul.f32 %v3227_v8, %v1675_v20  ;;  %v1704_v8 = vld [vmem:[%s4420_s4 + $0x10] sm:$0xff] }
 0x39c   : > { %v1689_v33 = vsel %vm1688_vm7, %v1681_v23, 0.0  ;;  %v4379_v21 = vsel %vm1688_vm7, %v1681_v23, %v4312_v57  ;;  %v1702_v57 = vld [vmem:[%s4420_s4] sm:$0xff] }
 0x39d   : > { %v1706_v17 = vpack.c.bf16 %v4379_v21, %v4379_v21  ;;  %2916 = vst [vmem:[%s2479_s8 + $0x18] sm:$0xff] %v1689_v33  ;;  %s2132_s8 = sshra.s32 %s3027_s17, 3 }
 0x39e   : > { %s3028_s5 = sshll.u32 %s2132_s8, 5 }
 0x39f   : > { %1715 = vmatmul.bf16.vlgmr.msrb.gmra.mxu0 %v1706_v17  ;;  %1728 = vmatmul.bf16.vlgmr.msrb.gmra.mxu1 %v1706_v17  ;;  %s4523_s3 = scalar_lea.vmem [#allocation2], %s3028_s5 }
 0x3a0   : > { %1741 = vmatmul.bf16.vlgmr.msrb.gmra.mxu2 %v1706_v17  ;;  %1754 = vmatmul.bf16.vlgmr.msrb.gmra.mxu3 %v1706_v17 }
 0x3a1   : > { %1997 = vmatpush.bf16.msrb.mxu0 %v3865_v40  ;;  %2010 = vmatpush.bf16.msrb.mxu1 %v3870_v45 }
 0x3a2   : > { %2023 = vmatpush.bf16.msrb.mxu2 %v3877_v51  ;;  %2036 = vmatpush.bf16.msrb.mxu3 %v3880_v52 }
 0x3a5   : > { %1998 = vmatpush.bf16.msrb.mxu0 %v3882_v53  ;;  %2011 = vmatpush.bf16.msrb.mxu1 %v3886_v55 }
 0x3a6   : > { %2024 = vmatpush.bf16.msrb.mxu2 %v3909_v6  ;;  %2037 = vmatpush.bf16.msrb.mxu3 %v3896_v61 }
 0x3a9   : > { %1999 = vmatpush.bf16.msrb.mxu0 %v3898_v62  ;;  %2012 = vmatpush.bf16.msrb.mxu1 %v3904_v2 }
 0x3aa   : > { %2025 = vmatpush.bf16.msrb.mxu2 %v3924_v15  ;;  %2038 = vmatpush.bf16.msrb.mxu3 %v3919_v12 }
 0x3ad   : > { %2000 = vmatpush.bf16.msrb.mxu0 %v3921_v13  ;;  %2013 = vmatpush.bf16.msrb.mxu1 %v3929_v18 }
 0x3ae   : > { %2026 = vmatpush.bf16.msrb.mxu2 %v3938_v25  ;;  %2039 = vmatpush.bf16.msrb.mxu3 %v3942_v26 }
 0x3b1   : > { %2001 = vmatpush.bf16.msrb.mxu0 %v3944_v27  ;;  %2014 = vmatpush.bf16.msrb.mxu1 %v3947_v29 }
 0x3b2   : > { %2027 = vmatpush.bf16.msrb.mxu2 %v3971_v42  ;;  %2040 = vmatpush.bf16.msrb.mxu3 %v3955_v32 }
 0x3b5   : > { %2002 = vmatpush.bf16.msrb.mxu0 %v3964_v36  ;;  %2015 = vmatpush.bf16.msrb.mxu1 %v3969_v41 }
 0x3b6   : > { %2028 = vmatpush.bf16.msrb.mxu2 %v3986_v54  ;;  %2041 = vmatpush.bf16.msrb.mxu3 %v3977_v47 }
 0x3b9   : > { %2003 = vmatpush.bf16.msrb.mxu0 %v3988_v56  ;;  %2016 = vmatpush.bf16.msrb.mxu1 %v3994_v60 }
 0x3ba   : > { %2029 = vmatpush.bf16.msrb.mxu2 %v4015_v14  ;;  %2042 = vmatpush.bf16.msrb.mxu3 %v3999_v3 }
 0x3bd   : > { %2004 = vmatpush.bf16.msrb.mxu0 %v4007_v10  ;;  %2017 = vmatpush.bf16.msrb.mxu1 %v4017_v16 }
 0x3be   : > { %2030 = vmatpush.bf16.msrb.mxu2 %v4034_v24  ;;  %2043 = vmatpush.bf16.msrb.mxu3 %v4025_v22 }
 0x41c   : > { %v1716_v28 = vpop.f32.mrf.mxu0  ;;  %v1729_v50 = vpop.f32.mrf.mxu1 }
 0x41d   : > { %v1759_v58 = vadd.f32 %v1716_v28, %v1702_v57  ;;  %v1760_v35 = vadd.f32 %v1729_v50, %v1703_v43 }
 0x41f   : > { %v1763_v7 = vsub.f32 0.0, %v1759_v58  ;;  %v1782_v39 = vsub.f32 0.0, %v1760_v35 }
 0x421   : > { %v1764_v44 = vmul.f32 1.442695, %v1763_v7  ;;  %v1783_v1 = vmul.f32 1.442695, %v1782_v39 }
 0x423   : > { %3228 = vpow2.f32 %v1764_v44  ;;  %v1742_v46 = vpop.f32.mrf.mxu2  ;;  %v1755_v4 = vpop.f32.mrf.mxu3 }
 0x424   : > { %3230 = vpow2.f32 %v1783_v1  ;;  %v1762_v31 = vadd.f32 %v1755_v4, %v1705_v48  ;;  %v1718_v37 = vpop.f32.mrf.mxu0  ;;  %v1731_v34 = vpop.f32.mrf.mxu1  ;;  %v1761_v33 = vadd.f32 %v1742_v46, %v1704_v8 }
 0x426   : > { %v1802_v59 = vsub.f32 0.0, %v1762_v31 }
 0x428   : > { %v1803_v9 = vmul.f32 1.442695, %v1802_v59 }
 0x429   : > { %v3229_v49 = vpop.eup %3228 }
 0x42a   : > { %v3231_v30 = vpop.eup %3230  ;;  %v1766_v63 = vadd.f32 1.0, %v3229_v49  ;;  %3232 = vpow2.f32 %v1803_v9 }
 0x42b   : > { %v1785_v38 = vadd.f32 1.0, %v3231_v30  ;;  %v1744_v19 = vpop.f32.mrf.mxu2  ;;  %v1757_v5 = vpop.f32.mrf.mxu3 }
 0x42c   : > { %3234 = vrcp.f32 %v1766_v63  ;;  %v1778_v58 = vand.u32 2147483648, %v1766_v63  ;;  %v1776_v7 = vand.u32 2147483647, %v1766_v63  ;;  %vm1772_vm14 = vweird.f32 %v1766_v63  ;;  %v1831_v30 = vpop.permute.xlu2 %1830 }
 0x42d   : > { %3236 = vrcp.f32 %v1785_v38  ;;  %v1797_v39 = vand.u32 2147483648, %v1785_v38  ;;  %v1795_v1 = vand.u32 2147483647, %v1785_v38  ;;  %vm1791_vm0 = vweird.f32 %v1785_v38 }
 0x42e   : > { %v1779_v46 = vor.u32 1.1754944e-38, %v1778_v58  ;;  %vm1777_vm1 = vcmp.eq.f32.partialorder %v1776_v7, 8.507059e+37  ;;  %vm1832_vm4 = vcmp.eq.s32.totalorder %v1831_v30, 1 }
 0x42f   : > { %v1798_v59 = vor.u32 1.1754944e-38, %v1797_v39  ;;  %vm1796_vm3 = vcmp.eq.f32.partialorder %v1795_v1, 8.507059e+37 }
 0x430   : > { %v3233_v11 = vpop.eup %3232 }
 0x431   : > { %v1805_v20 = vadd.f32 1.0, %v3233_v11 }
 0x432   : > { %v3235_v23 = vpop.eup %3234 }
 0x433   : > { %v3237_v17 = vpop.eup %3236  ;;  %v1768_v57 = vmul.f32 %v3235_v23, %v1766_v63  ;;  %3238 = vrcp.f32 %v1805_v20  ;;  %vm1773_vm12 = vweird.f32 %v3235_v23  ;;  %vm1811_vm6 = vweird.f32 %v1805_v20 }
 0x434   : > { %v1787_v28 = vmul.f32 %v3237_v17, %v1785_v38  ;;  %3240 = vtanh.f32 %v1761_v33  ;;  %vm1792_vm13 = vweird.f32 %v3237_v17  ;;  %vm1774_vm15 = vmor %vm1772_vm14, %vm1773_vm12 }
 0x435   : > { %v1769_v43 = vsub.f32 1.0, %v1768_v57  ;;  %vm1793_vm2 = vmor %vm1791_vm0, %vm1792_vm13 }
 0x436   : > { %v1788_v50 = vsub.f32 1.0, %v1787_v28 }
 0x437   : > { %v1770_v35 = vmul.f32 %v3235_v23, %v1769_v43 }
 0x438   : > { %v1789_v44 = vmul.f32 %v3237_v17, %v1788_v50 }
 0x439   : > { %v3239_v48 = vpop.eup %3238  ;;  %v1771_v4 = vadd.f32 %v3235_v23, %v1770_v35 }
 0x43a   : > { %v1807_v31 = vmul.f32 %v3239_v48, %v1805_v20  ;;  %v1790_v37 = vadd.f32 %v3237_v17, %v1789_v44  ;;  %v3241_v9 = vpop.eup %3240  ;;  %vm1812_vm5 = vweird.f32 %v3239_v48 }
 0x43b   : > { %v1775_v34 = vsel %vm1774_vm15, %v3235_v23, %v1771_v4  ;;  %v1817_v23 = vand.u32 2147483648, %v1805_v20  ;;  %vm1813_vm7 = vmor %vm1811_vm6, %vm1812_vm5 }
 0x43c   : > { %v1780_v49 = vsel %vm1777_vm1, %v1779_v46, %v1775_v34  ;;  %v1794_v19 = vsel %vm1793_vm2, %v3237_v17, %v1790_v37  ;;  %v1808_v5 = vsub.f32 1.0, %v1807_v31  ;;  %v1815_v17 = vand.u32 2147483647, %v1805_v20 }
 0x43d   : > { %v1822_v11 = vmul.f32 %v3241_v9, %v1780_v49  ;;  %v1799_v8 = vsel %vm1796_vm3, %v1798_v59, %v1794_v19  ;;  %v1818_v50 = vor.u32 1.1754944e-38, %v1817_v23  ;;  %v1976_v23 = vpop.permute.xlu2 %1975 }
 0x43e   : > { %v1809_v33 = vmul.f32 %v3239_v48, %v1808_v5  ;;  %v1821_v63 = vmul.f32 %v1799_v8, %v4371_v0  ;;  %vm1816_vm8 = vcmp.eq.f32.partialorder %v1815_v17, 8.507059e+37  ;;  %vm1977_vm1 = vcmp.eq.s32.totalorder %v1976_v23, 1 }
 0x440   : > { %v1823_v57 = vadd.f32 %v1822_v11, %v1821_v63  ;;  %v1810_v38 = vadd.f32 %v3239_v48, %v1809_v33 }
 0x442   : > { %3242 = vtanh.f32 %v1823_v57  ;;  %v4429_v28 = vsel %vm1832_vm4, %v1823_v57, %v4371_v0  ;;  %v1814_v43 = vsel %vm1813_vm7, %v3239_v48, %v1810_v38 }
 0x443   : > { %v1819_v35 = vsel %vm1816_vm8, %v1818_v50, %v1814_v43 }
 0x448   : > { %v3243_v58 = vpop.eup %3242 }
 0x449   : > { %v1825_v7 = vmul.f32 %v3243_v58, %v1819_v35 }
 0x44b   : > { %v1833_v39 = vsel %vm1832_vm4, %v1825_v7, 0.0  ;;  %v4436_v44 = vsel %vm1832_vm4, %v1825_v7, %v4379_v21 }
 0x44c   : > { %1835 = vst [vmem:[%s1834_s7] sm:$0xff] %v1833_v39  ;;  %v1851_v0 = vpack.c.bf16 %v4436_v44, %v4436_v44 }
 0x44e   : > { %1860 = vmatmul.bf16.vlgmr.msra.gmra.mxu0 %v1851_v0  ;;  %1873 = vmatmul.bf16.vlgmr.msra.gmra.mxu1 %v1851_v0 }
 0x44f   : > { %1886 = vmatmul.bf16.vlgmr.msra.gmra.mxu2 %v1851_v0  ;;  %1899 = vmatmul.bf16.vlgmr.msra.gmra.mxu3 %v1851_v0 }
 0x450   : > { %2142 = vmatpush.bf16.msra.mxu0 %v3865_v40  ;;  %2155 = vmatpush.bf16.msra.mxu1 %v3870_v45  ;;  %v1847_v40 = vld [vmem:[%s4475_s23] sm:$0xff] }
 0x451   : > { %2168 = vmatpush.bf16.msra.mxu2 %v3877_v51  ;;  %2181 = vmatpush.bf16.msra.mxu3 %v3880_v52  ;;  %v1848_v51 = vld [vmem:[%s4475_s23 + $0x8] sm:$0xff] }
 0x454   : > { %2143 = vmatpush.bf16.msra.mxu0 %v3882_v53  ;;  %2156 = vmatpush.bf16.msra.mxu1 %v3886_v55 }
 0x455   : > { %2169 = vmatpush.bf16.msra.mxu2 %v3909_v6  ;;  %2182 = vmatpush.bf16.msra.mxu3 %v3896_v61 }
 0x458   : > { %2144 = vmatpush.bf16.msra.mxu0 %v3898_v62  ;;  %2157 = vmatpush.bf16.msra.mxu1 %v3904_v2 }
 0x459   : > { %2170 = vmatpush.bf16.msra.mxu2 %v3924_v15  ;;  %2183 = vmatpush.bf16.msra.mxu3 %v3919_v12 }
 0x45c   : > { %2145 = vmatpush.bf16.msra.mxu0 %v3921_v13  ;;  %2158 = vmatpush.bf16.msra.mxu1 %v3929_v18  ;;  %v1850_v13 = vld [vmem:[%s4475_s23 + $0x18] sm:$0xff] }
 0x45d   : > { %2171 = vmatpush.bf16.msra.mxu2 %v3938_v25  ;;  %2184 = vmatpush.bf16.msra.mxu3 %v3942_v26 }
 0x460   : > { %2146 = vmatpush.bf16.msra.mxu0 %v3944_v27  ;;  %2159 = vmatpush.bf16.msra.mxu1 %v3947_v29 }
 0x461   : > { %2172 = vmatpush.bf16.msra.mxu2 %v3971_v42  ;;  %2185 = vmatpush.bf16.msra.mxu3 %v3955_v32 }
 0x464   : > { %2147 = vmatpush.bf16.msra.mxu0 %v3964_v36  ;;  %2160 = vmatpush.bf16.msra.mxu1 %v3969_v41 }
 0x465   : > { %2173 = vmatpush.bf16.msra.mxu2 %v3986_v54  ;;  %2186 = vmatpush.bf16.msra.mxu3 %v3977_v47 }
 0x468   : > { %2148 = vmatpush.bf16.msra.mxu0 %v3988_v56  ;;  %2161 = vmatpush.bf16.msra.mxu1 %v3994_v60  ;;  %v1849_v60 = vld [vmem:[%s4475_s23 + $0x10] sm:$0xff] }
 0x469   : > { %2174 = vmatpush.bf16.msra.mxu2 %v4015_v14  ;;  %2187 = vmatpush.bf16.msra.mxu3 %v3999_v3 }
 0x46c   : > { %2149 = vmatpush.bf16.msra.mxu0 %v4007_v10  ;;  %2162 = vmatpush.bf16.msra.mxu1 %v4017_v16 }
 0x46d   : > { %2175 = vmatpush.bf16.msra.mxu2 %v4034_v24  ;;  %2188 = vmatpush.bf16.msra.mxu3 %v4025_v22 }
 0x4cb   : > { %v1861_v45 = vpop.f32.mrf.mxu0  ;;  %v1874_v52 = vpop.f32.mrf.mxu1 }
 0x4cc   : > { %v1904_v53 = vadd.f32 %v1861_v45, %v1847_v40  ;;  %v1905_v55 = vadd.f32 %v1874_v52, %v1848_v51 }
 0x4ce   : > { %v1908_v61 = vsub.f32 0.0, %v1904_v53  ;;  %v1927_v62 = vsub.f32 0.0, %v1905_v55 }
 0x4d0   : > { %v1909_v2 = vmul.f32 1.442695, %v1908_v61  ;;  %v1928_v6 = vmul.f32 1.442695, %v1927_v62  ;;  %v1993_v62 = vld [vmem:[%s4499_s9 + $0x8] sm:$0xff] }
 0x4d2   : > { %3244 = vpow2.f32 %v1909_v2  ;;  %v1887_v12 = vpop.f32.mrf.mxu2  ;;  %v1900_v15 = vpop.f32.mrf.mxu3 }
 0x4d3   : > { %3246 = vpow2.f32 %v1928_v6  ;;  %v1907_v18 = vadd.f32 %v1900_v15, %v1850_v13  ;;  %v1863_v25 = vpop.f32.mrf.mxu0  ;;  %v1876_v26 = vpop.f32.mrf.mxu1  ;;  %v1906_v14 = vadd.f32 %v1887_v12, %v1849_v60 }
 0x4d5   : > { %v1947_v27 = vsub.f32 0.0, %v1907_v18 }
 0x4d7   : > { %v1948_v29 = vmul.f32 1.442695, %v1947_v27  ;;  %v1995_v27 = vld [vmem:[%s4499_s9 + $0x18] sm:$0xff] }
 0x4d8   : > { %v3245_v32 = vpop.eup %3244 }
 0x4d9   : > { %v3247_v36 = vpop.eup %3246  ;;  %v1911_v41 = vadd.f32 1.0, %v3245_v32  ;;  %3248 = vpow2.f32 %v1948_v29 }
 0x4da   : > { %v1930_v42 = vadd.f32 1.0, %v3247_v36  ;;  %v1889_v47 = vpop.f32.mrf.mxu2  ;;  %v1902_v54 = vpop.f32.mrf.mxu3 }
 0x4db   : > { %3250 = vrcp.f32 %v1911_v41  ;;  %v1923_v1 = vand.u32 2147483648, %v1911_v41  ;;  %v1921_v46 = vand.u32 2147483647, %v1911_v41  ;;  %vm1917_vm11 = vweird.f32 %v1911_v41 }
 0x4dc   : > { %3252 = vrcp.f32 %v1930_v42  ;;  %v1942_v48 = vand.u32 2147483648, %v1930_v42  ;;  %v1940_v37 = vand.u32 2147483647, %v1930_v42  ;;  %vm1936_vm12 = vweird.f32 %v1930_v42 }
 0x4dd   : > { %v1924_v9 = vor.u32 1.1754944e-38, %v1923_v1  ;;  %vm1922_vm15 = vcmp.eq.f32.partialorder %v1921_v46, 8.507059e+37 }
 0x4de   : > { %v1943_v19 = vor.u32 1.1754944e-38, %v1942_v48  ;;  %vm1941_vm0 = vcmp.eq.f32.partialorder %v1940_v37, 8.507059e+37 }
 0x4df   : > { %v3249_v56 = vpop.eup %3248 }
 0x4e0   : > { %v1950_v3 = vadd.f32 1.0, %v3249_v56 }
 0x4e1   : > { %v3251_v10 = vpop.eup %3250 }
 0x4e2   : > { %v3253_v16 = vpop.eup %3252  ;;  %v1913_v22 = vmul.f32 %v3251_v10, %v1911_v41  ;;  %3254 = vrcp.f32 %v1950_v3  ;;  %vm1918_vm9 = vweird.f32 %v3251_v10  ;;  %v1962_v35 = vand.u32 2147483648, %v1950_v3 }
 0x4e3   : > { %v1932_v24 = vmul.f32 %v3253_v16, %v1930_v42  ;;  %3256 = vtanh.f32 %v1906_v14  ;;  %vm1937_vm10 = vweird.f32 %v3253_v16  ;;  %vm1919_vm13 = vmor %vm1917_vm11, %vm1918_vm9  ;;  %vm1956_vm3 = vweird.f32 %v1950_v3 }
 0x4e4   : > { %v1914_v21 = vsub.f32 1.0, %v1913_v22  ;;  %vm1938_vm14 = vmor %vm1936_vm12, %vm1937_vm10  ;;  %v1960_v39 = vand.u32 2147483647, %v1950_v3  ;;  %v1963_v40 = vor.u32 1.1754944e-38, %v1962_v35  ;;  %v1994_v22 = vld [vmem:[%s4499_s9 + $0x10] sm:$0xff]  ;;  %v2121_v35 = vpop.permute.xlu0 %2120 }
 0x4e5   : > { %v1933_v20 = vsub.f32 1.0, %v1932_v24 }
 0x4e6   : > { %v1915_v4 = vmul.f32 %v3251_v10, %v1914_v21  ;;  %vm1961_vm5 = vcmp.eq.f32.partialorder %v1960_v39, 8.507059e+37 }
 0x4e7   : > { %v1934_v31 = vmul.f32 %v3253_v16, %v1933_v20 }
 0x4e8   : > { %v3255_v34 = vpop.eup %3254  ;;  %v1916_v59 = vadd.f32 %v3251_v10, %v1915_v4 }
 0x4e9   : > { %v1935_v49 = vadd.f32 %v3253_v16, %v1934_v31  ;;  %v1952_v30 = vmul.f32 %v3255_v34, %v1950_v3  ;;  %v3257_v11 = vpop.eup %3256  ;;  %vm1957_vm2 = vweird.f32 %v3255_v34 }
 0x4ea   : > { %v1920_v5 = vsel %vm1919_vm13, %v3251_v10, %v1916_v59  ;;  %vm1958_vm4 = vmor %vm1956_vm3, %vm1957_vm2 }
 0x4eb   : > { %v1925_v8 = vsel %vm1922_vm15, %v1924_v9, %v1920_v5  ;;  %v1939_v33 = vsel %vm1938_vm14, %v3253_v16, %v1935_v49  ;;  %v1953_v63 = vsub.f32 1.0, %v1952_v30  ;;  %vm2122_vm14 = vcmp.eq.s32.totalorder %v2121_v35, 1 }
 0x4ec   : > { %v1944_v57 = vsel %vm1941_vm0, %v1943_v19, %v1939_v33  ;;  %v1967_v38 = vmul.f32 %v3257_v11, %v1925_v8 }
 0x4ed   : > { %v1966_v17 = vmul.f32 %v1944_v57, %v4429_v28  ;;  %v1954_v43 = vmul.f32 %v3255_v34, %v1953_v63 }
 0x4ef   : > { %v1968_v50 = vadd.f32 %v1967_v38, %v1966_v17  ;;  %v1955_v58 = vadd.f32 %v3255_v34, %v1954_v43 }
 0x4f1   : > { %3258 = vtanh.f32 %v1968_v50  ;;  %v4484_v7 = vsel %vm1977_vm1, %v1968_v50, %v4429_v28  ;;  %v1959_v0 = vsel %vm1958_vm4, %v3255_v34, %v1955_v58 }
 0x4f2   : > { %v1964_v51 = vsel %vm1961_vm5, %v1963_v40, %v1959_v0 }
 0x4f7   : > { %v3259_v45 = vpop.eup %3258 }
 0x4f8   : > { %v1970_v52 = vmul.f32 %v3259_v45, %v1964_v51 }
 0x4fa   : > { %v1978_v53 = vsel %vm1977_vm1, %v1970_v52, 0.0  ;;  %v4492_v55 = vsel %vm1977_vm1, %v1970_v52, %v4436_v44  ;;  %v1992_v44 = vld [vmem:[%s4499_s9] sm:$0xff] }
 0x4fb   : > { %2924 = vst [vmem:[%s2489_s28 + $0x28] sm:$0xff] %v1978_v53  ;;  %v1996_v28 = vpack.c.bf16 %v4492_v55, %v4492_v55 }
 0x4fd   : > { %2005 = vmatmul.bf16.vlgmr.msrb.gmra.mxu0 %v1996_v28  ;;  %2018 = vmatmul.bf16.vlgmr.msrb.gmra.mxu1 %v1996_v28 }
 0x4fe   : > { %2031 = vmatmul.bf16.vlgmr.msrb.gmra.mxu2 %v1996_v28  ;;  %2044 = vmatmul.bf16.vlgmr.msrb.gmra.mxu3 %v1996_v28 }
 0x57a   : > { %v2006_v61 = vpop.f32.mrf.mxu0  ;;  %v2019_v2 = vpop.f32.mrf.mxu1 }
 0x57b   : > { %v2049_v6 = vadd.f32 %v2006_v61, %v1992_v44  ;;  %v2050_v12 = vadd.f32 %v2019_v2, %v1993_v62 }
 0x57d   : > { %v2053_v13 = vsub.f32 0.0, %v2049_v6  ;;  %v2072_v15 = vsub.f32 0.0, %v2050_v12 }
 0x57f   : > { %v2054_v18 = vmul.f32 1.442695, %v2053_v13  ;;  %v2073_v25 = vmul.f32 1.442695, %v2072_v15  ;;  %v2138_v15 = vld [vmem:[%s4523_s3 + $0x8] sm:$0xff] }
 0x581   : > { %3260 = vpow2.f32 %v2054_v18  ;;  %v2032_v26 = vpop.f32.mrf.mxu2  ;;  %v2045_v29 = vpop.f32.mrf.mxu3 }
 0x582   : > { %3262 = vpow2.f32 %v2073_v25  ;;  %v2052_v32 = vadd.f32 %v2045_v29, %v1995_v27  ;;  %v2008_v36 = vpop.f32.mrf.mxu0  ;;  %v2021_v41 = vpop.f32.mrf.mxu1  ;;  %v2051_v20 = vadd.f32 %v2032_v26, %v1994_v22 }
 0x584   : > { %v2092_v42 = vsub.f32 0.0, %v2052_v32 }
 0x586   : > { %v2093_v47 = vmul.f32 1.442695, %v2092_v42  ;;  %v2140_v42 = vld [vmem:[%s4523_s3 + $0x18] sm:$0xff] }
 0x587   : > { %v3261_v54 = vpop.eup %3260 }
 0x588   : > { %v3263_v56 = vpop.eup %3262  ;;  %v2056_v60 = vadd.f32 1.0, %v3261_v54  ;;  %3264 = vpow2.f32 %v2093_v47 }
 0x589   : > { %v2075_v3 = vadd.f32 1.0, %v3263_v56  ;;  %v2034_v10 = vpop.f32.mrf.mxu2  ;;  %v2047_v14 = vpop.f32.mrf.mxu3 }
 0x58a   : > { %3266 = vrcp.f32 %v2056_v60  ;;  %v2068_v37 = vand.u32 2147483648, %v2056_v60  ;;  %v2066_v9 = vand.u32 2147483647, %v2056_v60  ;;  %vm2062_vm8 = vweird.f32 %v2056_v60 }
 0x58b   : > { %3268 = vrcp.f32 %v2075_v3  ;;  %v2087_v34 = vand.u32 2147483648, %v2075_v3  ;;  %v2085_v30 = vand.u32 2147483647, %v2075_v3  ;;  %vm2081_vm9 = vweird.f32 %v2075_v3 }
 0x58c   : > { %v2069_v11 = vor.u32 1.1754944e-38, %v2068_v37  ;;  %vm2067_vm12 = vcmp.eq.f32.partialorder %v2066_v9, 8.507059e+37 }
 0x58d   : > { %v2088_v63 = vor.u32 1.1754944e-38, %v2087_v34  ;;  %vm2086_vm13 = vcmp.eq.f32.partialorder %v2085_v30, 8.507059e+37 }
 0x58e   : > { %v3265_v16 = vpop.eup %3264 }
 0x58f   : > { %v2095_v24 = vadd.f32 1.0, %v3265_v16 }
 0x590   : > { %v3267_v21 = vpop.eup %3266 }
 0x591   : > { %v3269_v1 = vpop.eup %3268  ;;  %v2058_v48 = vmul.f32 %v3267_v21, %v2056_v60  ;;  %3270 = vrcp.f32 %v2095_v24  ;;  %vm2063_vm6 = vweird.f32 %v3267_v21  ;;  %v2107_v51 = vand.u32 2147483648, %v2095_v24 }
 0x592   : > { %v2077_v4 = vmul.f32 %v3269_v1, %v2075_v3  ;;  %3272 = vtanh.f32 %v2051_v20  ;;  %vm2082_vm7 = vweird.f32 %v3269_v1  ;;  %vm2064_vm10 = vmor %vm2062_vm8, %vm2063_vm6  ;;  %vm2101_vm0 = vweird.f32 %v2095_v24 }
 0x593   : > { %v2059_v46 = vsub.f32 1.0, %v2058_v48  ;;  %vm2083_vm11 = vmor %vm2081_vm9, %vm2082_vm7  ;;  %v2105_v53 = vand.u32 2147483647, %v2095_v24  ;;  %v2108_v44 = vor.u32 1.1754944e-38, %v2107_v51  ;;  %v2139_v48 = vld [vmem:[%s4523_s3 + $0x10] sm:$0xff]  ;;  %v2266_v51 = vpop.permute.xlu1 %2265 }
 0x594   : > { %v2078_v31 = vsub.f32 1.0, %v2077_v4 }
 0x595   : > { %v2060_v59 = vmul.f32 %v3267_v21, %v2059_v46  ;;  %vm2106_vm2 = vcmp.eq.f32.partialorder %v2105_v53, 8.507059e+37 }
 0x596   : > { %v2079_v49 = vmul.f32 %v3269_v1, %v2078_v31 }
 0x597   : > { %v3271_v19 = vpop.eup %3270  ;;  %v2061_v5 = vadd.f32 %v3267_v21, %v2060_v59 }
 0x598   : > { %v2080_v8 = vadd.f32 %v3269_v1, %v2079_v49  ;;  %v2097_v33 = vmul.f32 %v3271_v19, %v2095_v24  ;;  %v3273_v38 = vpop.eup %3272  ;;  %vm2102_vm15 = vweird.f32 %v3271_v19 }
 0x599   : > { %v2065_v57 = vsel %vm2064_vm10, %v3267_v21, %v2061_v5  ;;  %vm2103_vm1 = vmor %vm2101_vm0, %vm2102_vm15 }
 0x59a   : > { %v2070_v23 = vsel %vm2067_vm12, %v2069_v11, %v2065_v57  ;;  %v2084_v17 = vsel %vm2083_vm11, %v3269_v1, %v2080_v8  ;;  %v2098_v43 = vsub.f32 1.0, %v2097_v33  ;;  %vm2267_vm11 = vcmp.eq.s32.totalorder %v2266_v51, 1 }
 0x59b   : > { %v2089_v50 = vsel %vm2086_vm13, %v2088_v63, %v2084_v17  ;;  %v2112_v58 = vmul.f32 %v3273_v38, %v2070_v23 }
 0x59c   : > { %v2111_v39 = vmul.f32 %v2089_v50, %v4484_v7  ;;  %v2099_v0 = vmul.f32 %v3271_v19, %v2098_v43 }
 0x59e   : > { %v2113_v40 = vadd.f32 %v2112_v58, %v2111_v39  ;;  %v2100_v45 = vadd.f32 %v3271_v19, %v2099_v0 }
 0x5a0   : > { %3274 = vtanh.f32 %v2113_v40  ;;  %v4508_v52 = vsel %vm2122_vm14, %v2113_v40, %v4484_v7  ;;  %v2104_v28 = vsel %vm2103_vm1, %v3271_v19, %v2100_v45 }
 0x5a1   : > { %v2109_v62 = vsel %vm2106_vm2, %v2108_v44, %v2104_v28 }
 0x5a6   : > { %v3275_v61 = vpop.eup %3274 }
 0x5a7   : > { %v2115_v2 = vmul.f32 %v3275_v61, %v2109_v62 }
 0x5a9   : > { %v2123_v6 = vsel %vm2122_vm14, %v2115_v2, 0.0  ;;  %v4516_v12 = vsel %vm2122_vm14, %v2115_v2, %v4492_v55  ;;  %v2137_v55 = vld [vmem:[%s4523_s3] sm:$0xff] }
 0x5aa   : > { %2929 = vst [vmem:[%s2495_s30 + $0x30] sm:$0xff] %v2123_v6  ;;  %v2141_v7 = vpack.c.bf16 %v4516_v12, %v4516_v12 }
 0x5ac   : > { %2150 = vmatmul.bf16.vlgmr.msra.gmra.mxu0 %v2141_v7  ;;  %2163 = vmatmul.bf16.vlgmr.msra.gmra.mxu1 %v2141_v7 }
 0x5ad   : > { %2176 = vmatmul.bf16.vlgmr.msra.gmra.mxu2 %v2141_v7  ;;  %2189 = vmatmul.bf16.vlgmr.msra.gmra.mxu3 %v2141_v7 }
 0x629   : > { %v2151_v13 = vpop.f32.mrf.mxu0  ;;  %v2164_v18 = vpop.f32.mrf.mxu1 }
 0x62a   : > { %v2194_v25 = vadd.f32 %v2151_v13, %v2137_v55  ;;  %v2195_v26 = vadd.f32 %v2164_v18, %v2138_v15 }
 0x62c   : > { %v2198_v27 = vsub.f32 0.0, %v2194_v25  ;;  %v2217_v29 = vsub.f32 0.0, %v2195_v26 }
 0x62e   : > { %v2199_v32 = vmul.f32 1.442695, %v2198_v27  ;;  %v2218_v36 = vmul.f32 1.442695, %v2217_v29 }
 0x630   : > { %3276 = vpow2.f32 %v2199_v32  ;;  %v2177_v41 = vpop.f32.mrf.mxu2  ;;  %v2190_v47 = vpop.f32.mrf.mxu3 }
 0x631   : > { %3278 = vpow2.f32 %v2218_v36  ;;  %v2197_v54 = vadd.f32 %v2190_v47, %v2140_v42  ;;  %v2153_v56 = vpop.f32.mrf.mxu0  ;;  %v2166_v60 = vpop.f32.mrf.mxu1  ;;  %v2196_v31 = vadd.f32 %v2177_v41, %v2139_v48 }
 0x633   : > { %v2237_v3 = vsub.f32 0.0, %v2197_v54 }
 0x635   : > { %v2238_v10 = vmul.f32 1.442695, %v2237_v3 }
 0x636   : > { %v3277_v14 = vpop.eup %3276 }
 0x637   : > { %v3279_v16 = vpop.eup %3278  ;;  %v2201_v22 = vadd.f32 1.0, %v3277_v14  ;;  %3280 = vpow2.f32 %v2238_v10 }
 0x638   : > { %v2220_v24 = vadd.f32 1.0, %v3279_v16  ;;  %v2179_v21 = vpop.f32.mrf.mxu2  ;;  %v2192_v20 = vpop.f32.mrf.mxu3 }
 0x639   : > { %3282 = vrcp.f32 %v2201_v22  ;;  %v2213_v30 = vand.u32 2147483648, %v2201_v22  ;;  %v2211_v11 = vand.u32 2147483647, %v2201_v22  ;;  %vm2207_vm5 = vweird.f32 %v2201_v22 }
 0x63a   : > { %3284 = vrcp.f32 %v2220_v24  ;;  %v2232_v19 = vand.u32 2147483648, %v2220_v24  ;;  %v2230_v33 = vand.u32 2147483647, %v2220_v24  ;;  %vm2226_vm6 = vweird.f32 %v2220_v24 }
 0x63b   : > { %v2214_v38 = vor.u32 1.1754944e-38, %v2213_v30  ;;  %vm2212_vm9 = vcmp.eq.f32.partialorder %v2211_v11, 8.507059e+37 }
 0x63c   : > { %v2233_v43 = vor.u32 1.1754944e-38, %v2232_v19  ;;  %vm2231_vm10 = vcmp.eq.f32.partialorder %v2230_v33, 8.507059e+37 }
 0x63d   : > { %v3281_v1 = vpop.eup %3280 }
 0x63e   : > { %v2240_v4 = vadd.f32 1.0, %v3281_v1 }
 0x63f   : > { %v3283_v46 = vpop.eup %3282 }
 0x640   : > { %v3285_v37 = vpop.eup %3284  ;;  %v2203_v34 = vmul.f32 %v3283_v46, %v2201_v22  ;;  %3286 = vrcp.f32 %v2240_v4  ;;  %vm2208_vm3 = vweird.f32 %v3283_v46  ;;  %v2252_v2 = vand.u32 2147483648, %v2240_v4 }
 0x641   : > { %v2222_v59 = vmul.f32 %v3285_v37, %v2220_v24  ;;  %3288 = vtanh.f32 %v2196_v31  ;;  %vm2227_vm4 = vweird.f32 %v3285_v37  ;;  %vm2209_vm7 = vmor %vm2207_vm5, %vm2208_vm3  ;;  %vm2246_vm13 = vweird.f32 %v2240_v4 }
 0x642   : > { %v2204_v9 = vsub.f32 1.0, %v2203_v34  ;;  %vm2228_vm8 = vmor %vm2226_vm6, %vm2227_vm4  ;;  %v2250_v6 = vand.u32 2147483647, %v2240_v4  ;;  %v2253_v55 = vor.u32 1.1754944e-38, %v2252_v2 }
 0x643   : > { %v2223_v49 = vsub.f32 1.0, %v2222_v59 }
 0x644   : > { %v2205_v5 = vmul.f32 %v3283_v46, %v2204_v9  ;;  %vm2251_vm15 = vcmp.eq.f32.partialorder %v2250_v6, 8.507059e+37 }
 0x645   : > { %v2224_v8 = vmul.f32 %v3285_v37, %v2223_v49 }
 0x646   : > { %v3287_v63 = vpop.eup %3286  ;;  %v2206_v57 = vadd.f32 %v3283_v46, %v2205_v5 }
 0x647   : > { %v2225_v23 = vadd.f32 %v3285_v37, %v2224_v8  ;;  %v2242_v17 = vmul.f32 %v3287_v63, %v2240_v4  ;;  %v3289_v58 = vpop.eup %3288  ;;  %vm2247_vm12 = vweird.f32 %v3287_v63 }
 0x648   : > { %v2210_v50 = vsel %vm2209_vm7, %v3283_v46, %v2206_v57  ;;  %vm2248_vm14 = vmor %vm2246_vm13, %vm2247_vm12 }
 0x649   : > { %v2215_v35 = vsel %vm2212_vm9, %v2214_v38, %v2210_v50  ;;  %v2229_v39 = vsel %vm2228_vm8, %v3285_v37, %v2225_v23  ;;  %v2243_v0 = vsub.f32 1.0, %v2242_v17 }
 0x64a   : > { %v2234_v40 = vsel %vm2231_vm10, %v2233_v43, %v2229_v39  ;;  %v2257_v45 = vmul.f32 %v3289_v58, %v2215_v35 }
 0x64b   : > { %v2256_v53 = vmul.f32 %v2234_v40, %v4508_v52  ;;  %v2244_v28 = vmul.f32 %v3287_v63, %v2243_v0 }
 0x64d   : > { %v2258_v44 = vadd.f32 %v2257_v45, %v2256_v53  ;;  %v2245_v61 = vadd.f32 %v3287_v63, %v2244_v28 }
 0x64f   : > { %3290 = vtanh.f32 %v2258_v44  ;;  %v2272_v62 = vsel %vm2267_vm11, %v2258_v44, %v4508_v52  ;;  %v2249_v7 = vsel %vm2248_vm14, %v3287_v63, %v2245_v61 }
 0x650   : > { %2274 = vst [vmem:[%s3786_s13] sm:$0xff] %v2272_v62  ;;  %v2254_v15 = vsel %vm2251_vm15, %v2253_v55, %v2249_v7  ;;  %s4675_s13 = sld [smem:[#allocation16_spill]] (%p3713_p1) }
 0x655   : > { %v3291_v13 = vpop.eup %3290 }
 0x656   : > { %v2260_v18 = vmul.f32 %v3291_v13, %v2254_v15  ;;  %2289 = sbr.rel (!%p3713_p1) target bundleno = 1641 (0x669), region = 68  ;;  %s2296_s4 = sadd.s32 (%p3713_p1), %s4675_s13, %s3029_s25 }
 0x657   : > { %s2939_s7 = sshll.u32 (%p3713_p1), %s2296_s4, 3 }
 0x658   : > { %v2268_v25 = vsel %vm2267_vm11, %v2260_v18, 0.0  ;;  %v2271_v26 = vsel %vm2267_vm11, %v2260_v18, %v4516_v12  ;;  %s2298_s27 = scalar_lea.vmem (%p3713_p1), %s4676_s18, %s2939_s7 }
 0x659   : > { %2934 = vst [vmem:[%s2501_s11 + $0x38] sm:$0xff] %v2268_v25 }
 0x65a   : > { %2273 = vst [vmem:[%s3781_s1] sm:$0xff] %v2271_v26 }
 0x660   : > { %v2341_v52 = vld [vmem:[%s3790_s22] sm:$0xff]  ;;  %v2343_v12 = vld [vmem:[%s3790_s22 + $0x8] sm:$0xff]  ;;  %v2345_v27 = vld [vmem:[%s3790_s22 + $0x10] sm:$0xff] }
 0x661   : > { %2342 = vst [vmem:[%s2298_s27] sm:$0xff] %v2341_v52  ;;  %v2347_v29 = vld [vmem:[%s3790_s22 + $0x18] sm:$0xff]  ;;  %v2349_v32 = vld [vmem:[%s3790_s22 + $0x20] sm:$0xff]  ;;  %v2351_v36 = vld [vmem:[%s3790_s22 + $0x28] sm:$0xff] }
 0x662   : > { %2344 = vst [vmem:[%s2298_s27 + $0x10] sm:$0xff] %v2343_v12  ;;  %v2353_v41 = vld [vmem:[%s3790_s22 + $0x30] sm:$0xff]  ;;  %v2355_v42 = vld [vmem:[%s3790_s22 + $0x38] sm:$0xff] }
 0x663   : > { %2346 = vst [vmem:[%s2298_s27 + $0x20] sm:$0xff] %v2345_v27 }
 0x664   : > { %2348 = vst [vmem:[%s2298_s27 + $0x30] sm:$0xff] %v2347_v29 }
 0x665   : > { %2350 = vst [vmem:[%s2298_s27 + $0x40] sm:$0xff] %v2349_v32 }
 0x666   : > { %2352 = vst [vmem:[%s2298_s27 + $0x50] sm:$0xff] %v2351_v36 }
 0x667   : > { %2354 = vst [vmem:[%s2298_s27 + $0x60] sm:$0xff] %v2353_v41 }
 0x668   : > { %2356 = vst [vmem:[%s2298_s27 + $0x70] sm:$0xff] %v2355_v42 }
 0x669 PF: > { %s26_s21 = sadd.s32 1, %s3493_s21   ;;  %s4678_s16 = sld [smem:[#allocation12_spill]] }
 0x66a   : > { %p4556_p10 = scmp.ge.s32.totalorder %s26_s21, 6   ;;  %s4679_s13 = sld [smem:[#allocation22_spill]] }
 0x66b   : > { %s4680_s14 = sld [smem:[#allocation13_spill]]  ;;  %s4688_s30 = smov %s3449_s10 }
 0x66c   : > { %s4681_s15 = sld [smem:[#allocation14_spill]]  ;;  %s4689_s10 = smov %s3711_s20 }
 0x66d   : > { %s4682_s0 = sld [smem:[#allocation23_spill]]  ;;  %s4690_s11 = smov %s3457_s12 }
 0x66e   : > { %s4683_s17 = sld [smem:[#allocation17_spill]] }
 0x66f   : > { %s4684_s18 = sld [smem:[#allocation18_spill]]  ;;  %s4691_s12 = smov %s4678_s16 }
 0x670   : > { %s4685_s22 = sld [smem:[#allocation20_spill]] }
 0x671   : > { %s4686_s23 = sld [smem:[#allocation21_spill]] }
 0x673   : > { %s4692_s16 = smov %s4682_s0  ;;  %25 = sbr.rel (!%p4556_p10) target bundleno = 21 (0x15), region = 203 }
 0x676   : > { %s4693_s19 = smov %s4685_s22 }
 0x677   : > { %s4694_s20 = smov %s4686_s23 }
 0x678   :  { %2392 = vsyncpa [#allocation4], 1 }
 0x679   :  { %2394 = vsyncpa [#allocation4 + $0x1], 1 }
 0x67a   :  { %2395 = vsyncpa [#allocation6], 1 }
 0x67b   :  { %2397 = vsyncpa [#allocation6 + $0x1], 1 }

// kernel: hbilstm_layer_forward.4
= control target key start
LH: loop header
LB: loop body
LE: loop exit
PB: predicated region body
PF: predicated region fallthrough
CT: control target
= control target key end

     0   :  { %s5010_s0 = inlined_call_operand.vmem [shape: s32[8,1], index: 0, kind: input, shape index: {}]   ;;  %s5011_s1 = inlined_call_operand.vmem [shape: f32[128,256], index: 1, kind: input, shape index: {}]   ;;  %s5012_s2 = inlined_call_operand.hbm [shape: bf16[2,256,512], index: 2, kind: input, shape index: {}]   ;;  %s5013_s3 = inlined_call_operand.vmem [shape: f32[2,1,512], index: 3, kind: input, shape index: {}]   ;;  %s5014_s4 = inlined_call_operand.hbm [shape: bf16[2,128,512], index: 4, kind: input, shape index: {}]   ;;  %s5015_s5 = inlined_call_operand.vmem [shape: f32[2,8,128], index: 5, kind: input, shape index: {}]   ;;  %s5016_s6 = inlined_call_operand.vmem [shape: f32[2,8,128], index: 6, kind: input, shape index: {}]   ;;  %s5017_s7 = inlined_call_operand.vmem [shape: f32[128,256], index: 7, kind: output, shape index: {0}]   ;;  %s5018_s8 = inlined_call_operand.vmem [shape: f32[2,8,128], index: 8, kind: output, shape index: {1}]   ;;  %s5019_s9 = inlined_call_operand.vmem [shape: f32[2,8,128], index: 9, kind: output, shape index: {2}]  }
   0x1   :  { %5029 = sst [smem:[#allocation20_spill]] %s5010_s0 }
   0x2   :  { %5030 = sst [smem:[#allocation21_spill]] %s5012_s2 }
   0x3   :  { %5031 = sst [smem:[#allocation22_spill]] %s5013_s3 }
   0x4   :  { %5032 = sst [smem:[#allocation23_spill]] %s5014_s4 }
   0x5   :  { %5033 = sst [smem:[#allocation24_spill]] %s5015_s5 }
   0x6   :  { %5034 = sst [smem:[#allocation25_spill]] %s5016_s6 }
   0x7   :  { %5035 = sst [smem:[#allocation26_spill]] %s5017_s7 }
   0x8   :  { %5036 = sst [smem:[#allocation27_spill]] %s5018_s8 }
   0x9   :  { %5037 = sst [smem:[#allocation28_spill]] %s5019_s9 }
   0xa   :  { %15 = vsyncpa [#allocation4], 0 }
   0xb   :  { %17 = vsyncpa [#allocation4 + $0x1], 0 }
   0xc   :  { %18 = vsyncpa [#allocation6], 0 }
   0xd   :  { %20 = vsyncpa [#allocation6 + $0x1], 0  ;;  %s3930_s30 = smov 0   ;;  %s3932_s10 = smov 0  }
   0xe   :  { %s3934_s11 = smov 0   ;;  %s3936_s12 = smov 0  }
   0xf   :  { %s3938_s13 = smov 0   ;;  %s3940_s14 = smov 0  }
  0x10   :  { %s3942_s15 = smov 0   ;;  %s3944_s16 = smov 0  }
  0x11   :  { %s3946_s17 = smov 0   ;;  %s3948_s18 = smov 0  }
  0x12 LB: > { %5038 = sst [smem:[#allocation10_spill]] %s3843_s10  ;;  %s2921_s19 = sadd.s32 4294967295, %s3875_s18   ;;  %s3875_s18 = sphi %s3948_s18, %s26_s18   ;;  %s3871_s17 = sphi %s3946_s17, %s5071_s17   ;;  %s3867_s16 = sphi %s3944_s16, %s5070_s16   ;;  %s3863_s15 = sphi %s3942_s15, %s5069_s15   ;;  %s3859_s14 = sphi %s3940_s14, %s5068_s14   ;;  %s3855_s13 = sphi %s3938_s13, %s5067_s13   ;;  %s3851_s12 = sphi %s3936_s12, %s5066_s12   ;;  %s3847_s11 = sphi %s3934_s11, %s5065_s11   ;;  %s3843_s10 = sphi %s3932_s10, %s5064_s10   ;;  %s3839_s30 = sphi %s3930_s30, %s5063_s30  }
  0x13   : > { %5039 = sst [smem:[#allocation11_spill]] %s3851_s12  ;;  %s35_s20 = sadd.s32 1, %s3867_s16 }
  0x14   : > { %5040 = sst [smem:[#allocation12_spill]] %s3855_s13  ;;  %p36_p0 = scmp.ge.s32.totalorder %s35_s20, 2 }
  0x15   : > { %5041 = sst [smem:[#allocation13_spill]] %s3867_s16  ;;  %s38_s21 = sadd.s32 1, %s3871_s17 }
  0x16   : > { %5042 = sst [smem:[#allocation14_spill]] %s3871_s17  ;;  %s100_s22 = sadd.s32 1, %s3855_s13 }
  0x17   : > { %5043 = sst [smem:[#allocation15_spill]] %s3875_s18  ;;  %p107_p1 = scmp.ne.s32.totalorder %s3855_s13, %s3851_s12 }
  0x18   : > { %s5073_s20 = smov (%p36_p0, %s35_s20), 0  ;;  %s5075_s21 = smov (!%p36_p0, %s38_s21), %s3871_s17 }
  0x19   : > { %5044 = sst [smem:[#allocation16_spill]] %s5073_s20  ;;  %p108_p2 = scmp.eq.s32.totalorder %s3875_s18, 0 }
  0x1a   : > { %p113_p3 = scmp.ne.s32.totalorder %s3851_s12, %s3847_s11  ;;  %p40_p4 = scmp.ge.s32.totalorder %s5075_s21, 2 }
  0x1b   : > { %p114_p5 = scmp.eq.s32.totalorder %s2921_s19, 0  ;;  %p3989_p6 = por %p108_p2, %p107_p1 }
  0x1c   : > { %s2925_s24 = sshll.u32 %s3867_s16, 1  ;;  %s5077_s21 = smov (%p40_p4, %s5075_s21), 0 }
  0x1d   : > { %5046 = sst [smem:[#allocation17_spill]] %s5077_s21  ;;  %p3996_p7 = por %p114_p5, %p113_p3 }
  0x1e   : > { %s228_s26 = ssub.s32 1, %s2925_s24  ;;  %s97_s27 = ssub.s32 %s3871_s17, %s5077_s21 }
  0x1f   : > { %s229_s28 = smul.u32 %s3871_s17, %s228_s26  ;;  %p98_p8 = scmp.eq.s32.totalorder %s97_s27, 0 }
  0x20   : > { %s2926_s29 = sshll.u32 %s5073_s20, 1  ;;  %s240_s8 = sadd.s32 1, %s3843_s10 }
  0x21   : > { %s230_s11 = sadd.s32 %s3867_s16, %s229_s28  ;;  %s232_s7 = ssub.s32 1, %s2926_s29 }
  0x22   : > { %s4006_s0 = scalar_select %p98_p8, %s3855_s13, %s100_s22  }
  0x23   : > { %s233_s9 = smul.u32 %s232_s7, %s5077_s21  ;;  %p250_p9 = scmp.ne.s32.totalorder %s3843_s10, %s3839_s30 }
  0x24   : > { %5048 = sst [smem:[#allocation18_spill]] %s4006_s0  ;;  %p251_p10 = scmp.eq.s32.totalorder %s2921_s19, 3 }
  0x25   : > { %s234_s6 = sadd.s32 %s233_s9, %s5073_s20  ;;  %p3513_p12 = scmp.lt.s32.totalorder %s3875_s18, 4 }
  0x26   : > { %s235_s5 = ssub.s32 %s230_s11, %s234_s6  ;;  %p4013_p11 = por %p251_p10, %p250_p9 }
  0x27   : > { %s237_s26 = sor.u32 %s235_s5, %s97_s27  ;;  %s4019_s28 = sand.u32 1, %s3855_s13  }
  0x28   : > { %p238_p13 = scmp.eq.s32.totalorder %s237_s26, 0  ;;  %s2929_s7 = sshll.u32 %s4019_s28, 9 }
  0x29   : > { %s3377_s9 = sshll.u32 %s3871_s17, 9  ;;  %s5051_s2 = sld [smem:[#allocation21_spill]] }
  0x2a   : > { %s4023_s22 = scalar_select %p238_p13, %s3843_s10, %s240_s8  }
  0x2b   : > { %s354_s11 = scalar_lea.vmem [#allocation3], %s2929_s7  ;;  %p4031_p0 = pnand %p3513_p12, %p3989_p6 }
  0x2c   : > { %5050 = sst [smem:[#allocation19_spill]] %s4023_s22  ;;  %s362_s21 = sshll.u32 %s354_s11, 4  ;;  %s363_s21 = int_to_ptr.vmem [resolvable:$true] %s362_s21 }
  0x2d   : > { %p2935_p1 = scmp.ge.s32.totalorder %s3875_s18, 1  ;;  %s351_s8 = scalar_lea.sflag [#allocation4], %s4019_s28 }
  0x2e   : > { %s3877_s26 = smov 256   ;;  %s3878_s20 = smov 16  }
  0x2f   : > { %s359_s29 = scalar_lea.hbm %s5051_s2, %s3377_s9  ;;  %p413_p2 = scmp.lt.s32.totalorder %s3875_s18, 5 }
  0x30   : > { %s360_s5 = sshll.u32 %s359_s29, 4  ;;  %s2932_s7 = sshll.u32 %s4019_s28, 8  ;;  %s361_s5 = int_to_ptr.hbm [resolvable:$true] %s360_s5 }
  0x31   : > { %3509 = dma.hbm_to_vmem [thread:$0]  (!%p4031_p0), %s361_s5, 8192, %s363_s21, %s351_s8, %s3877_s26, %s3877_s26, %s3878_s20  }
  0x32   : > { %s3378_s9 = sshll.u32 %s3871_s17, 8  ;;  %p414_p3 = pnand %p2935_p1, %p413_p2 }
  0x33   : > { %s5053_s4 = sld [smem:[#allocation23_spill]]  ;;  %s383_s29 = scalar_lea.vmem [#allocation5], %s2932_s7 }
  0x34   : > { %s391_s11 = sshll.u32 %s383_s29, 4  ;;  %s380_s16 = scalar_lea.sflag [#allocation6], %s4019_s28  ;;  %s392_s11 = int_to_ptr.vmem [resolvable:$true] %s391_s11 }
  0x35   : > { %s419_s21 = sand.u32 (!%p414_p3), 1, %s3851_s12  }
  0x36   : > { %s2936_s5 = sshll.u32 (!%p414_p3), %s419_s21, 9  ;;  %s420_s8 = scalar_lea.sflag (!%p414_p3), [#allocation4], %s419_s21 }
  0x37   : > { %417 = sbr.rel (%p414_p3) target bundleno = 1674 (0x68a), region = 48  ;;  %s4049_s17 = scalar_lea.vmem (!%p414_p3), [#allocation3], %s2936_s5 }
  0x39   : > { %s388_s23 = scalar_lea.hbm %s5053_s4, %s3378_s9 }
  0x3a   : > { %s389_s2 = sshll.u32 %s388_s23, 4  ;;  %s390_s2 = int_to_ptr.hbm [resolvable:$true] %s389_s2 }
  0x3b   : > { %3512 = dma.hbm_to_vmem [thread:$0]  (!%p4031_p0), %s390_s2, 4096, %s392_s11, %s380_s16, %s3877_s26, %s3877_s26, %s3878_s20  }
  0x3c   : > { %3830 = dma.done.wait (%p3996_p7), %s420_s8, 8192  }
  0x3d   : > { %3832 = vsyncadd (%p3996_p7), %s420_s8, 4294959104  ;;  %s2937_s7 = sshll.u32 %s419_s21, 8  ;;  %s430_s9 = scalar_lea.sflag [#allocation6], %s419_s21 }
  0x3e   : > { %s4055_s6 = scalar_lea.vmem [#allocation5], %s2937_s7 }
  0x3f   : > { %3834 = dma.done.wait (%p3996_p7), %s430_s9, 4096  }
  0x40   : > { %3836 = vsyncadd (%p3996_p7), %s430_s9, 4294963200  ;;  %s488_s2 = sand.u32 1, %s3839_s30   ;;  %s2939_s16 = sshll.u32 %s3859_s14, 1 }
  0x41   : > { %s2938_s20 = sshll.u32 %s488_s2, 6  ;;  %s504_s28 = ssub.s32 1, %s2939_s16 }
  0x42   : > { %s505_s27 = smul.u32 %s3863_s15, %s504_s28  ;;  %p518_p4 = scmp.lt.s32.totalorder %s3863_s15, 1 }
  0x43   : > { %s5054_s3 = sld [smem:[#allocation22_spill]]  ;;  %p2948_p6 = scmp.ne.s32.totalorder %s3859_s14, 0 }
  0x44   : > { %s4066_s26 = sadd.s32 %s3859_s14, %s505_s27  ;;  %s5055_s27 = sld [smem:[#allocation24_spill]] }
  0x45   : > { %s4069_s19 = sshll.u32 %s4066_s26, 3  ;;  %s5056_s12 = sld [smem:[#allocation25_spill]] }
  0x46   : > { %p508_p5 = scmp.lt.s32.totalorder %s4069_s19, 15  ;;  %s5057_s10 = sld [smem:[#allocation27_spill]] }
  0x47   : > { %s519_s25 = scalar_select %p518_p4, %s3863_s15, 1 }
  0x48   : > { %s509_s23 = scalar_select %p508_p5, %s4069_s19, 15 }
  0x49   : > { %s2943_s29 = sshll.u32 %s519_s25, 2  ;;  %s2944_s11 = sshll.u32 %s519_s25, 3 }
  0x4a   : > { %s3379_s21 = sshll.u32 %s509_s23, 4  ;;  %s4077_s8 = scalar_lea.vmem %s5054_s3, %s2943_s29 }
  0x4b   : > { %s4082_s2 = scalar_lea.vmem %s5011_s1, %s3379_s21  ;;  %s525_s4 = scalar_lea.vmem %s5055_s27, %s2944_s11 }
  0x4c   : > { %s529_s22 = scalar_lea.vmem %s5056_s12, %s2944_s11  ;;  %s4093_s18 = scalar_lea.vmem %s5057_s10, %s2944_s11 }
  0x4d   : > { %s5058_s30 = sld [smem:[#allocation28_spill]]  ;;  %s4100_s21 = scalar_lea.vmem [#allocation7], %s2938_s20 }
  0x4f   : > { %546 = sbr.rel (%p2948_p6) target bundleno = 87 (0x57), region = 60 }
  0x53   : > { %s4098_s3 = scalar_lea.vmem %s5058_s30, %s2944_s11 }
  0x54   : > { %v547_v0 = vld [vmem:[%s525_s4] sm:$0xff] }
  0x55   : > { %v549_v1 = vld [vmem:[%s529_s22] sm:$0xff]  ;;  %548 = vst [vmem:[%s4093_s18] sm:$0xff] %v547_v0 }
  0x56   : > { %550 = vst [vmem:[%s4098_s3] sm:$0xff] %v549_v1 }
  0x57 PF: > { %v3063_v2 = vld [vmem:[%s4049_s17 + $0xe0] sm:$0xf]  ;;  %v3410_v3 = vld [vmem:[%s4049_s17 + $0xec] sm:$0xf0]  ;;  %v3408_v7 = vld [vmem:[%s4049_s17 + $0xe4] sm:$0xf] }
  0x58   : > { %v3191_v4 = vld [vmem:[%s4049_s17 + $0x1e0] sm:$0xf]  ;;  %v3064_v5 = vor.u32 %v3410_v3, %v3063_v2  ;;  %v3442_v6 = vld [vmem:[%s4049_s17 + $0x1ec] sm:$0xf0]  ;;  %v3065_v8 = vld [vmem:[%s4049_s17 + $0xf0] sm:$0xf0] }
  0x59   : > { %v3192_v9 = vor.u32 %v3442_v6, %v3191_v4  ;;  %v3068_v10 = vor.u32 %v3408_v7, %v3065_v8  ;;  %v3440_v11 = vld [vmem:[%s4049_s17 + $0x1e4] sm:$0xf]  ;;  %v3193_v12 = vld [vmem:[%s4049_s17 + $0x1f0] sm:$0xf0]  ;;  %v3047_v13 = vld [vmem:[%s4049_s17 + $0xc0] sm:$0xf] }
  0x5a   : > { %1002 = vmatpush.bf16.msra.mxu0 %v3064_v5  ;;  %v3196_v14 = vor.u32 %v3440_v11, %v3193_v12  ;;  %v3406_v15 = vld [vmem:[%s4049_s17 + $0xcc] sm:$0xf0]  ;;  %v3175_v16 = vld [vmem:[%s4049_s17 + $0x1c0] sm:$0xf]  ;;  %v3404_v20 = vld [vmem:[%s4049_s17 + $0xc4] sm:$0xf] }
  0x5b   : > { %v3438_v17 = vld [vmem:[%s4049_s17 + $0x1cc] sm:$0xf0]  ;;  %1031 = vmatpush.bf16.msra.mxu1 %v3192_v9  ;;  %1060 = vmatpush.bf16.msra.mxu2 %v3068_v10  ;;  %v3048_v18 = vor.u32 %v3406_v15, %v3047_v13  ;;  %v3049_v21 = vld [vmem:[%s4049_s17 + $0xd0] sm:$0xf0]  ;;  %v3436_v22 = vld [vmem:[%s4049_s17 + $0x1c4] sm:$0xf] }
  0x5c   : > { %v3176_v19 = vor.u32 %v3438_v17, %v3175_v16  ;;  %1089 = vmatpush.bf16.msra.mxu3 %v3196_v14  ;;  %v3052_v23 = vor.u32 %v3404_v20, %v3049_v21  ;;  %v3177_v24 = vld [vmem:[%s4049_s17 + $0x1d0] sm:$0xf0]  ;;  %v3031_v25 = vld [vmem:[%s4049_s17 + $0xa0] sm:$0xf]  ;;  %v3402_v26 = vld [vmem:[%s4049_s17 + $0xac] sm:$0xf0] }
  0x5d   : > { %v3180_v27 = vor.u32 %v3436_v22, %v3177_v24  ;;  %v3159_v28 = vld [vmem:[%s4049_s17 + $0x1a0] sm:$0xf]  ;;  %v3434_v29 = vld [vmem:[%s4049_s17 + $0x1ac] sm:$0xf0]  ;;  %v3400_v30 = vld [vmem:[%s4049_s17 + $0xa4] sm:$0xf]  ;;  %v3032_v31 = vor.u32 %v3402_v26, %v3031_v25 }
  0x5e   : > { %1003 = vmatpush.bf16.msra.mxu0 %v3048_v18  ;;  %v3033_v32 = vld [vmem:[%s4049_s17 + $0xb0] sm:$0xf0]  ;;  %v3432_v33 = vld [vmem:[%s4049_s17 + $0x1a4] sm:$0xf]  ;;  %v3160_v35 = vor.u32 %v3434_v29, %v3159_v28  ;;  %v3015_v37 = vld [vmem:[%s4049_s17 + $0x80] sm:$0xf] }
  0x5f   : > { %v3161_v34 = vld [vmem:[%s4049_s17 + $0x1b0] sm:$0xf0]  ;;  %1032 = vmatpush.bf16.msra.mxu1 %v3176_v19  ;;  %1061 = vmatpush.bf16.msra.mxu2 %v3052_v23  ;;  %v3036_v36 = vor.u32 %v3400_v30, %v3033_v32  ;;  %v3398_v38 = vld [vmem:[%s4049_s17 + $0x8c] sm:$0xf0]  ;;  %v3143_v39 = vld [vmem:[%s4049_s17 + $0x180] sm:$0xf] }
  0x60   : > { %1090 = vmatpush.bf16.msra.mxu3 %v3180_v27  ;;  %v3164_v40 = vor.u32 %v3432_v33, %v3161_v34  ;;  %v3430_v41 = vld [vmem:[%s4049_s17 + $0x18c] sm:$0xf0]  ;;  %v3396_v42 = vld [vmem:[%s4049_s17 + $0x84] sm:$0xf]  ;;  %v3017_v43 = vld [vmem:[%s4049_s17 + $0x90] sm:$0xf0]  ;;  %v3016_v46 = vor.u32 %v3398_v38, %v3015_v37 }
  0x61   : > { %v3428_v44 = vld [vmem:[%s4049_s17 + $0x184] sm:$0xf]  ;;  %v3145_v45 = vld [vmem:[%s4049_s17 + $0x190] sm:$0xf0]  ;;  %v3144_v47 = vor.u32 %v3430_v41, %v3143_v39  ;;  %v3020_v48 = vor.u32 %v3396_v42, %v3017_v43  ;;  %v2999_v49 = vld [vmem:[%s4049_s17 + $0x60] sm:$0xf] }
  0x62   : > { %1004 = vmatpush.bf16.msra.mxu0 %v3032_v31  ;;  %v3394_v50 = vld [vmem:[%s4049_s17 + $0x6c] sm:$0xf0]  ;;  %v3127_v51 = vld [vmem:[%s4049_s17 + $0x160] sm:$0xf]  ;;  %v3148_v52 = vor.u32 %v3428_v44, %v3145_v45  ;;  %v3392_v54 = vld [vmem:[%s4049_s17 + $0x64] sm:$0xf] }
  0x63   : > { %1033 = vmatpush.bf16.msra.mxu1 %v3160_v35  ;;  %1062 = vmatpush.bf16.msra.mxu2 %v3036_v36  ;;  %v3426_v53 = vld [vmem:[%s4049_s17 + $0x16c] sm:$0xf0]  ;;  %v3001_v55 = vld [vmem:[%s4049_s17 + $0x70] sm:$0xf0]  ;;  %v3424_v56 = vld [vmem:[%s4049_s17 + $0x164] sm:$0xf]  ;;  %v3000_v58 = vor.u32 %v3394_v50, %v2999_v49 }
  0x64   : > { %1091 = vmatpush.bf16.msra.mxu3 %v3164_v40  ;;  %v3129_v57 = vld [vmem:[%s4049_s17 + $0x170] sm:$0xf0]  ;;  %v3128_v59 = vor.u32 %v3426_v53, %v3127_v51  ;;  %v3004_v60 = vor.u32 %v3392_v54, %v3001_v55  ;;  %v2983_v61 = vld [vmem:[%s4049_s17 + $0x40] sm:$0xf]  ;;  %v3390_v62 = vld [vmem:[%s4049_s17 + $0x4c] sm:$0xf0] }
  0x65   : > { %v3111_v63 = vld [vmem:[%s4049_s17 + $0x140] sm:$0xf]  ;;  %v3132_v0 = vor.u32 %v3424_v56, %v3129_v57  ;;  %v3422_v1 = vld [vmem:[%s4049_s17 + $0x14c] sm:$0xf0]  ;;  %v3388_v2 = vld [vmem:[%s4049_s17 + $0x44] sm:$0xf]  ;;  %v2984_v6 = vor.u32 %v3390_v62, %v2983_v61 }
  0x66   : > { %1005 = vmatpush.bf16.msra.mxu0 %v3016_v46  ;;  %v2985_v3 = vld [vmem:[%s4049_s17 + $0x50] sm:$0xf0]  ;;  %v3420_v4 = vld [vmem:[%s4049_s17 + $0x144] sm:$0xf]  ;;  %v3112_v7 = vor.u32 %v3422_v1, %v3111_v63  ;;  %v2967_v9 = vld [vmem:[%s4049_s17 + $0x20] sm:$0xf] }
  0x67   : > { %1034 = vmatpush.bf16.msra.mxu1 %v3144_v47  ;;  %1063 = vmatpush.bf16.msra.mxu2 %v3020_v48  ;;  %v3113_v5 = vld [vmem:[%s4049_s17 + $0x150] sm:$0xf0]  ;;  %v2988_v8 = vor.u32 %v3388_v2, %v2985_v3  ;;  %v3386_v10 = vld [vmem:[%s4049_s17 + $0x2c] sm:$0xf0]  ;;  %v3095_v11 = vld [vmem:[%s4049_s17 + $0x120] sm:$0xf] }
  0x68   : > { %1092 = vmatpush.bf16.msra.mxu3 %v3148_v52  ;;  %v3116_v12 = vor.u32 %v3420_v4, %v3113_v5  ;;  %v3418_v13 = vld [vmem:[%s4049_s17 + $0x12c] sm:$0xf0]  ;;  %v3384_v14 = vld [vmem:[%s4049_s17 + $0x24] sm:$0xf]  ;;  %v2969_v15 = vld [vmem:[%s4049_s17 + $0x30] sm:$0xf0]  ;;  %v2968_v18 = vor.u32 %v3386_v10, %v2967_v9 }
  0x69   : > { %v3416_v16 = vld [vmem:[%s4049_s17 + $0x124] sm:$0xf]  ;;  %v3097_v17 = vld [vmem:[%s4049_s17 + $0x130] sm:$0xf0]  ;;  %v2951_v19 = vld [vmem:[%s4049_s17] sm:$0xf]  ;;  %v3096_v21 = vor.u32 %v3418_v13, %v3095_v11  ;;  %v2972_v22 = vor.u32 %v3384_v14, %v2969_v15 }
  0x6a   : > { %1006 = vmatpush.bf16.msra.mxu0 %v3000_v58  ;;  %v3382_v20 = vld [vmem:[%s4049_s17 + $0xc] sm:$0xf0]  ;;  %v3079_v23 = vld [vmem:[%s4049_s17 + $0x100] sm:$0xf]  ;;  %v3380_v25 = vld [vmem:[%s4049_s17 + $0x4] sm:$0xf]  ;;  %v3100_v26 = vor.u32 %v3416_v16, %v3097_v17 }
  0x6b   : > { %1035 = vmatpush.bf16.msra.mxu1 %v3128_v59  ;;  %1064 = vmatpush.bf16.msra.mxu2 %v3004_v60  ;;  %v3414_v24 = vld [vmem:[%s4049_s17 + $0x10c] sm:$0xf0]  ;;  %v2953_v27 = vld [vmem:[%s4049_s17 + $0x10] sm:$0xf0]  ;;  %v3412_v28 = vld [vmem:[%s4049_s17 + $0x104] sm:$0xf]  ;;  %v2952_v33 = vor.u32 %v3382_v20, %v2951_v19 }
  0x6c   : > { %1093 = vmatpush.bf16.msra.mxu3 %v3132_v0  ;;  %v3081_v29 = vld [vmem:[%s4049_s17 + $0x110] sm:$0xf0]  ;;  %v648_v30 = vld [vmem:[%s4082_s2] sm:$0xff]  ;;  %v3409_v31 = vld [vmem:[%s4049_s17 + $0xec] sm:$0xf]  ;;  %v3080_v37 = vor.u32 %v3414_v24, %v3079_v23  ;;  %v2956_v38 = vor.u32 %v3380_v25, %v2953_v27  ;;  %s1273_s0 = smul.u32 7, %s3863_s15 }
  0x6d   : > { %v3073_v32 = vld [vmem:[%s4049_s17 + $0xf8] sm:$0xf0]  ;;  %v650_v34 = vld [vmem:[%s4082_s2 + $0x10] sm:$0xff]  ;;  %v3441_v35 = vld [vmem:[%s4049_s17 + $0x1ec] sm:$0xf]  ;;  %v3084_v41 = vor.u32 %v3412_v28, %v3081_v29  ;;  %s1577_s10 = smul.u32 5, %s3863_s15 }
  0x6e   : > { %1007 = vmatpush.bf16.msra.mxu0 %v2984_v6  ;;  %v3201_v36 = vld [vmem:[%s4049_s17 + $0x1f8] sm:$0xf0]  ;;  %v649_v39 = vld [vmem:[%s4082_s2 + $0x8] sm:$0xff]  ;;  %v3076_v42 = vor.u32 %v3409_v31, %v3073_v32  ;;  %v3411_v44 = vld [vmem:[%s4049_s17 + $0xf4] sm:$0xf0]  ;;  %v4180_v46 = vpack.c.bf16 %v650_v34, %v648_v30  ;;  %s1274_s4 = sadd.s32 %s4069_s19, %s1273_s0  ;;  %s5059_s14 = sld [smem:[#allocation20_spill]] }
  0x6f   : > { %1036 = vmatpush.bf16.msra.mxu1 %v3112_v7  ;;  %1065 = vmatpush.bf16.msra.mxu2 %v2988_v8  ;;  %v651_v40 = vld [vmem:[%s4082_s2 + $0x18] sm:$0xff]  ;;  %v3071_v43 = vld [vmem:[%s4049_s17 + $0xe8] sm:$0xf]  ;;  %v3204_v47 = vor.u32 %v3441_v35, %v3201_v36  ;;  %v3405_v49 = vld [vmem:[%s4049_s17 + $0xcc] sm:$0xf]  ;;  %s2300_s20 = smul.u32 4294967291, %s3863_s15 }
  0x70   : > { %1094 = vmatpush.bf16.msra.mxu3 %v3116_v12  ;;  %v3199_v45 = vld [vmem:[%s4049_s17 + $0x1e8] sm:$0xf]  ;;  %v3443_v48 = vld [vmem:[%s4049_s17 + $0x1f4] sm:$0xf0]  ;;  %v3057_v50 = vld [vmem:[%s4049_s17 + $0xd8] sm:$0xf0]  ;;  %v4185_v51 = vpack.c.bf16 %v651_v40, %v649_v39  ;;  %v3072_v54 = vor.u32 %v3411_v44, %v3071_v43 }
  0x71   : > { %v3437_v52 = vld [vmem:[%s4049_s17 + $0x1cc] sm:$0xf]  ;;  %v3185_v53 = vld [vmem:[%s4049_s17 + $0x1d8] sm:$0xf0]  ;;  %v3200_v55 = vor.u32 %v3443_v48, %v3199_v45  ;;  %v3060_v56 = vor.u32 %v3405_v49, %v3057_v50  ;;  %v3055_v57 = vld [vmem:[%s4049_s17 + $0xc8] sm:$0xf] }
  0x72   : > { %1008 = vmatpush.bf16.msra.mxu0 %v2968_v18  ;;  %v3407_v58 = vld [vmem:[%s4049_s17 + $0xd4] sm:$0xf0]  ;;  %v3183_v59 = vld [vmem:[%s4049_s17 + $0x1c8] sm:$0xf]  ;;  %v3188_v60 = vor.u32 %v3437_v52, %v3185_v53  ;;  %v3401_v62 = vld [vmem:[%s4049_s17 + $0xac] sm:$0xf] }
  0x73   : > { %1037 = vmatpush.bf16.msra.mxu1 %v3096_v21  ;;  %1066 = vmatpush.bf16.msra.mxu2 %v2972_v22  ;;  %v3439_v61 = vld [vmem:[%s4049_s17 + $0x1d4] sm:$0xf0]  ;;  %v3041_v63 = vld [vmem:[%s4049_s17 + $0xb8] sm:$0xf0]  ;;  %v3433_v0 = vld [vmem:[%s4049_s17 + $0x1ac] sm:$0xf]  ;;  %v3056_v2 = vor.u32 %v3407_v58, %v3055_v57 }
  0x74   : > { %1095 = vmatpush.bf16.msra.mxu3 %v3100_v26  ;;  %v3169_v1 = vld [vmem:[%s4049_s17 + $0x1b8] sm:$0xf0]  ;;  %v3184_v3 = vor.u32 %v3439_v61, %v3183_v59  ;;  %v3044_v4 = vor.u32 %v3401_v62, %v3041_v63  ;;  %v3039_v5 = vld [vmem:[%s4049_s17 + $0xa8] sm:$0xf]  ;;  %v3403_v6 = vld [vmem:[%s4049_s17 + $0xb4] sm:$0xf0]  ;;  %s5060_s22 = smov %s5059_s14 }
  0x75   : > { %v3167_v7 = vld [vmem:[%s4049_s17 + $0x1a8] sm:$0xf]  ;;  %v3172_v8 = vor.u32 %v3433_v0, %v3169_v1  ;;  %v3435_v9 = vld [vmem:[%s4049_s17 + $0x1b4] sm:$0xf0]  ;;  %v3397_v10 = vld [vmem:[%s4049_s17 + $0x8c] sm:$0xf]  ;;  %v3040_v14 = vor.u32 %v3403_v6, %v3039_v5 }
  0x76   : > { %1009 = vmatpush.bf16.msra.mxu0 %v2952_v33  ;;  %v3025_v11 = vld [vmem:[%s4049_s17 + $0x98] sm:$0xf0]  ;;  %v3429_v12 = vld [vmem:[%s4049_s17 + $0x18c] sm:$0xf]  ;;  %v652_v15 = vld [vmem:[%s4082_s2 + $0x20] sm:$0xff]  ;;  %v3168_v16 = vor.u32 %v3435_v9, %v3167_v7  ;;  %s2301_s11 = sadd.s32 6, %s2300_s20 }
  0x77   : > { %1038 = vmatpush.bf16.msra.mxu1 %v3080_v37  ;;  %1067 = vmatpush.bf16.msra.mxu2 %v2956_v38  ;;  %v3153_v13 = vld [vmem:[%s4049_s17 + $0x198] sm:$0xf0]  ;;  %v3028_v17 = vor.u32 %v3397_v10, %v3025_v11  ;;  %v3023_v18 = vld [vmem:[%s4049_s17 + $0x88] sm:$0xf]  ;;  %v3399_v19 = vld [vmem:[%s4049_s17 + $0x94] sm:$0xf0] }
  0x78   : > { %1096 = vmatpush.bf16.msra.mxu3 %v3084_v41  ;;  %v3151_v20 = vld [vmem:[%s4049_s17 + $0x188] sm:$0xf]  ;;  %v3156_v21 = vor.u32 %v3429_v12, %v3153_v13  ;;  %v3431_v22 = vld [vmem:[%s4049_s17 + $0x194] sm:$0xf0]  ;;  %v3393_v23 = vld [vmem:[%s4049_s17 + $0x6c] sm:$0xf]  ;;  %v3024_v30 = vor.u32 %v3399_v19, %v3023_v18 }
  0x79   : > { %1010 = vmatmul.bf16.vlgmr.msra.gmra.mxu0 %v4180_v46  ;;  %v3009_v24 = vld [vmem:[%s4049_s17 + $0x78] sm:$0xf0]  ;;  %v654_v25 = vld [vmem:[%s4082_s2 + $0x30] sm:$0xff]  ;;  %v3425_v26 = vld [vmem:[%s4049_s17 + $0x16c] sm:$0xf]  ;;  %v3152_v31 = vor.u32 %v3431_v22, %v3151_v20  ;;  %s1275_s7 = smul.u32 56, %s3863_s15 }
  0x7a   : > { %1039 = vmatmul.bf16.vlgmr.msra.gmra.mxu1 %v4185_v51  ;;  %1068 = vmatmul.bf16.vlgmr.msra.gmra.mxu2 %v4180_v46  ;;  %v3137_v27 = vld [vmem:[%s4049_s17 + $0x178] sm:$0xf0]  ;;  %v653_v28 = vld [vmem:[%s4082_s2 + $0x28] sm:$0xff]  ;;  %v3012_v32 = vor.u32 %v3393_v23, %v3009_v24  ;;  %v3395_v34 = vld [vmem:[%s4049_s17 + $0x74] sm:$0xf0]  ;;  %v4224_v36 = vpack.c.bf16 %v654_v25, %v652_v15  ;;  %s3497_s27 = smul.u32 40, %s3863_s15 }
  0x7b   : > { %1176 = vmatpush.bf16.msrb.mxu2 %v3076_v42  ;;  %1097 = vmatmul.bf16.vlgmr.msra.gmra.mxu3 %v4185_v51  ;;  %v655_v29 = vld [vmem:[%s4082_s2 + $0x38] sm:$0xff]  ;;  %v3007_v33 = vld [vmem:[%s4049_s17 + $0x68] sm:$0xf]  ;;  %v3140_v37 = vor.u32 %v3425_v26, %v3137_v27  ;;  %v3389_v39 = vld [vmem:[%s4049_s17 + $0x4c] sm:$0xf]  ;;  %s1276_s9 = sshra.s32 %s1275_s7, 3  ;;  %s1573_s28 = scalar_lea.vmem %s4100_s21, %s1275_s7 [#allocation7] }
  0x7c   : > { %1205 = vmatpush.bf16.msrb.mxu3 %v3204_v47  ;;  %1118 = vmatpush.bf16.msrb.mxu0 %v3072_v54  ;;  %v3135_v35 = vld [vmem:[%s4049_s17 + $0x168] sm:$0xf]  ;;  %v3427_v38 = vld [vmem:[%s4049_s17 + $0x174] sm:$0xf0]  ;;  %v2993_v40 = vld [vmem:[%s4049_s17 + $0x58] sm:$0xf0]  ;;  %v4229_v41 = vpack.c.bf16 %v655_v29, %v653_v28  ;;  %v3008_v44 = vor.u32 %v3395_v34, %v3007_v33 }
  0x7d   : > { %1147 = vmatpush.bf16.msrb.mxu1 %v3200_v55  ;;  %v3421_v42 = vld [vmem:[%s4049_s17 + $0x14c] sm:$0xf]  ;;  %v3121_v43 = vld [vmem:[%s4049_s17 + $0x158] sm:$0xf0]  ;;  %v3136_v45 = vor.u32 %v3427_v38, %v3135_v35  ;;  %v2996_v47 = vor.u32 %v3389_v39, %v2993_v40  ;;  %v2991_v48 = vld [vmem:[%s4049_s17 + $0x48] sm:$0xf] }
  0x7e   : > { %v3391_v49 = vld [vmem:[%s4049_s17 + $0x54] sm:$0xf0]  ;;  %v3124_v50 = vor.u32 %v3421_v42, %v3121_v43  ;;  %v3119_v53 = vld [vmem:[%s4049_s17 + $0x148] sm:$0xf]  ;;  %v3385_v55 = vld [vmem:[%s4049_s17 + $0x2c] sm:$0xf] }
  0x7f   : > { %1177 = vmatpush.bf16.msrb.mxu2 %v3060_v56  ;;  %v2992_v52 = vor.u32 %v3391_v49, %v2991_v48  ;;  %v3423_v54 = vld [vmem:[%s4049_s17 + $0x154] sm:$0xf0]  ;;  %v2977_v57 = vld [vmem:[%s4049_s17 + $0x38] sm:$0xf0]  ;;  %v3417_v58 = vld [vmem:[%s4049_s17 + $0x12c] sm:$0xf] }
  0x80   : > { %1206 = vmatpush.bf16.msrb.mxu3 %v3188_v60  ;;  %1119 = vmatpush.bf16.msrb.mxu0 %v3056_v2  ;;  %v3120_v56 = vor.u32 %v3423_v54, %v3119_v53  ;;  %v3105_v59 = vld [vmem:[%s4049_s17 + $0x138] sm:$0xf0]  ;;  %v2980_v60 = vor.u32 %v3385_v55, %v2977_v57  ;;  %v2975_v62 = vld [vmem:[%s4049_s17 + $0x28] sm:$0xf]  ;;  %v3387_v63 = vld [vmem:[%s4049_s17 + $0x34] sm:$0xf0] }
  0x81   : > { %1148 = vmatpush.bf16.msrb.mxu1 %v3184_v3  ;;  %v3108_v61 = vor.u32 %v3417_v58, %v3105_v59  ;;  %v3103_v0 = vld [vmem:[%s4049_s17 + $0x128] sm:$0xf]  ;;  %v3419_v1 = vld [vmem:[%s4049_s17 + $0x134] sm:$0xf0]  ;;  %v3381_v2 = vld [vmem:[%s4049_s17 + $0xc] sm:$0xf] }
  0x82   : > { %v2961_v3 = vld [vmem:[%s4049_s17 + $0x18] sm:$0xf0]  ;;  %v3413_v5 = vld [vmem:[%s4049_s17 + $0x10c] sm:$0xf]  ;;  %v3104_v7 = vor.u32 %v3419_v1, %v3103_v0  ;;  %v2959_v9 = vld [vmem:[%s4049_s17 + $0x8] sm:$0xf] }
  0x83   : > { %1178 = vmatpush.bf16.msrb.mxu2 %v3044_v4  ;;  %v2976_v4 = vor.u32 %v3387_v63, %v2975_v62  ;;  %v3089_v6 = vld [vmem:[%s4049_s17 + $0x118] sm:$0xf0]  ;;  %v3383_v10 = vld [vmem:[%s4049_s17 + $0x14] sm:$0xf0]  ;;  %v3087_v12 = vld [vmem:[%s4049_s17 + $0x108] sm:$0xf] }
  0x84   : > { %1207 = vmatpush.bf16.msrb.mxu3 %v3172_v8  ;;  %1120 = vmatpush.bf16.msrb.mxu0 %v3040_v14  ;;  %v2964_v8 = vor.u32 %v3381_v2, %v2961_v3  ;;  %v3092_v11 = vor.u32 %v3413_v5, %v3089_v6  ;;  %v3415_v13 = vld [vmem:[%s4049_s17 + $0x114] sm:$0xf0]  ;;  %v656_v14 = vld [vmem:[%s4082_s2 + $0x40] sm:$0xff]  ;;  %v658_v15 = vld [vmem:[%s4082_s2 + $0x50] sm:$0xff]  ;;  %v2960_v18 = vor.u32 %v3383_v10, %v2959_v9  ;;  %s1578_s17 = sadd.s32 1, %s1577_s10  ;;  %s3478_s25 = sadd.s32 8, %s3497_s27 }
  0x85   : > { %1149 = vmatpush.bf16.msrb.mxu1 %v3168_v16  ;;  %v657_v16 = vld [vmem:[%s4082_s2 + $0x48] sm:$0xff]  ;;  %v3088_v19 = vor.u32 %v3415_v13, %v3087_v12  ;;  %v4261_v20 = vpack.c.bf16 %v658_v15, %v656_v14  ;;  %v3323_v22 = vld [vmem:[%s4055_s6 + $0xe0] sm:$0xf]  ;;  %v3474_v23 = vld [vmem:[%s4055_s6 + $0xec] sm:$0xf0]  ;;  %s1581_s23 = sshra.s32 %s3478_s25, 3 }
  0x86   : > { %v3472_v24 = vld [vmem:[%s4055_s6 + $0xe4] sm:$0xf]  ;;  %v4272_v25 = vor.u32 %v3474_v23, %v3323_v22  ;;  %v3325_v26 = vld [vmem:[%s4055_s6 + $0xf0] sm:$0xf0]  ;;  %v3473_v27 = vld [vmem:[%s4055_s6 + $0xec] sm:$0xf] }
  0x87   : > { %1179 = vmatpush.bf16.msrb.mxu2 %v3028_v17  ;;  %v659_v17 = vld [vmem:[%s4082_s2 + $0x58] sm:$0xff]  ;;  %v4277_v29 = vor.u32 %v3472_v24, %v3325_v26  ;;  %v661_v33 = vld [vmem:[%s4082_s2 + $0x68] sm:$0xff]  ;;  %v3307_v38 = vld [vmem:[%s4055_s6 + $0xc0] sm:$0xf]  ;;  %s3479_s29 = sshll.u32 %s1581_s23, 5  ;;  %s1722_s30 = smul.u32 3, %s3863_s15 }
  0x88   : > { %1208 = vmatpush.bf16.msrb.mxu3 %v3156_v21  ;;  %1121 = vmatpush.bf16.msrb.mxu0 %v3024_v30  ;;  %v4263_v21 = vpack.c.bf16 %v659_v17, %v657_v16  ;;  %v3333_v28 = vld [vmem:[%s4055_s6 + $0xf8] sm:$0xf0]  ;;  %v3470_v39 = vld [vmem:[%s4055_s6 + $0xcc] sm:$0xf0]  ;;  %v3468_v40 = vld [vmem:[%s4055_s6 + $0xc4] sm:$0xf] }
  0x89   : > { %1150 = vmatpush.bf16.msrb.mxu1 %v3152_v31  ;;  %1015 = vmatmul.bf16.gmra.mxu0 %v4224_v36  ;;  %v4279_v30 = vor.u32 %v3473_v27, %v3333_v28  ;;  %v660_v31 = vld [vmem:[%s4082_s2 + $0x60] sm:$0xff]  ;;  %v663_v34 = vld [vmem:[%s4082_s2 + $0x78] sm:$0xff]  ;;  %v4299_v42 = vor.u32 %v3470_v39, %v3307_v38  ;;  %v3309_v43 = vld [vmem:[%s4055_s6 + $0xd0] sm:$0xf0]  ;;  %s4645_s5 = scalar_lea.vmem [#allocation2], %s3479_s29  ;;  %s1723_s0 = sadd.s32 2, %s1722_s30 }
  0x8a   : > { %1044 = vmatmul.bf16.gmra.mxu1 %v4229_v41  ;;  %1073 = vmatmul.bf16.gmra.mxu2 %v4224_v36  ;;  %v3291_v49 = vld [vmem:[%s4055_s6 + $0xa0] sm:$0xf]  ;;  %v3293_v54 = vld [vmem:[%s4055_s6 + $0xb0] sm:$0xf0]  ;;  %v3331_v55 = vld [vmem:[%s4055_s6 + $0xe8] sm:$0xf]  ;;  %s1724_s10 = sadd.s32 %s4069_s19, %s1723_s0 }
  0x8b   : > { %1180 = vmatpush.bf16.msrb.mxu2 %v3012_v32  ;;  %1102 = vmatmul.bf16.gmra.mxu3 %v4229_v41  ;;  %v662_v32 = vld [vmem:[%s4082_s2 + $0x70] sm:$0xff]  ;;  %v3465_v59 = vld [vmem:[%s4055_s6 + $0xac] sm:$0xf]  ;;  %v3275_v62 = vld [vmem:[%s4055_s6 + $0x80] sm:$0xf]  ;;  %s3476_s2 = sshll.u32 %s1276_s9, 5 }
  0x8c   : > { %1209 = vmatpush.bf16.msrb.mxu3 %v3140_v37  ;;  %1122 = vmatpush.bf16.msrb.mxu0 %v3008_v44  ;;  %v4288_v35 = vpack.c.bf16 %v662_v32, %v660_v31  ;;  %v4290_v37 = vpack.c.bf16 %v663_v34, %v661_v33  ;;  %v3469_v44 = vld [vmem:[%s4055_s6 + $0xcc] sm:$0xf]  ;;  %v3462_v63 = vld [vmem:[%s4055_s6 + $0x8c] sm:$0xf0]  ;;  %v3460_v0 = vld [vmem:[%s4055_s6 + $0x84] sm:$0xf] }
  0x8d   : > { %1151 = vmatpush.bf16.msrb.mxu1 %v3136_v45  ;;  %v3317_v45 = vld [vmem:[%s4055_s6 + $0xd8] sm:$0xf0]  ;;  %v4338_v1 = vor.u32 %v3462_v63, %v3275_v62  ;;  %v3277_v2 = vld [vmem:[%s4055_s6 + $0x90] sm:$0xf0]  ;;  %v3315_v3 = vld [vmem:[%s4055_s6 + $0xc8] sm:$0xf] }
  0x8e   : > { %v4306_v48 = vor.u32 %v3469_v44, %v3317_v45  ;;  %v4343_v5 = vor.u32 %v3460_v0, %v3277_v2  ;;  %v3458_v9 = vld [vmem:[%s4055_s6 + $0x6c] sm:$0xf0]  ;;  %v3456_v10 = vld [vmem:[%s4055_s6 + $0x64] sm:$0xf]  ;;  %v3299_v14 = vld [vmem:[%s4055_s6 + $0xa8] sm:$0xf] }
  0x8f   : > { %1181 = vmatpush.bf16.msrb.mxu2 %v2996_v47  ;;  %v4304_v47 = vor.u32 %v3468_v40, %v3309_v43  ;;  %v3467_v15 = vld [vmem:[%s4055_s6 + $0xb4] sm:$0xf0]  ;;  %v3457_v16 = vld [vmem:[%s4055_s6 + $0x6c] sm:$0xf]  ;;  %v3283_v22 = vld [vmem:[%s4055_s6 + $0x88] sm:$0xf] }
  0x90   : > { %1210 = vmatpush.bf16.msrb.mxu3 %v3124_v50  ;;  %1123 = vmatpush.bf16.msrb.mxu0 %v2992_v52  ;;  %v3466_v50 = vld [vmem:[%s4055_s6 + $0xac] sm:$0xf0]  ;;  %v3464_v52 = vld [vmem:[%s4055_s6 + $0xa4] sm:$0xf]  ;;  %v4366_v17 = vor.u32 %v3467_v15, %v3299_v14  ;;  %v3463_v23 = vld [vmem:[%s4055_s6 + $0x94] sm:$0xf0] }
  0x91   : > { %1152 = vmatpush.bf16.msrb.mxu1 %v3120_v56  ;;  %v4312_v53 = vor.u32 %v3466_v50, %v3291_v49  ;;  %v3475_v56 = vld [vmem:[%s4055_s6 + $0xf4] sm:$0xf0]  ;;  %v4319_v57 = vor.u32 %v3464_v52, %v3293_v54  ;;  %v4380_v24 = vor.u32 %v3463_v23, %v3283_v22  ;;  %v3243_v26 = vld [vmem:[%s4055_s6 + $0x40] sm:$0xf]  ;;  %v3454_v27 = vld [vmem:[%s4055_s6 + $0x4c] sm:$0xf0] }
  0x92   : > { %v4321_v58 = vor.u32 %v3475_v56, %v3331_v55  ;;  %v3452_v28 = vld [vmem:[%s4055_s6 + $0x44] sm:$0xf]  ;;  %v4387_v31 = vor.u32 %v3454_v27, %v3243_v26  ;;  %v3245_v32 = vld [vmem:[%s4055_s6 + $0x50] sm:$0xf0]  ;;  %v3267_v33 = vld [vmem:[%s4055_s6 + $0x68] sm:$0xf] }
  0x93   : > { %1182 = vmatpush.bf16.msrb.mxu2 %v2980_v60  ;;  %v3301_v60 = vld [vmem:[%s4055_s6 + $0xb8] sm:$0xf0]  ;;  %v3459_v34 = vld [vmem:[%s4055_s6 + $0x74] sm:$0xf0]  ;;  %v3251_v40 = vld [vmem:[%s4055_s6 + $0x48] sm:$0xf] }
  0x94   : > { %1211 = vmatpush.bf16.msrb.mxu3 %v3108_v61  ;;  %1124 = vmatpush.bf16.msrb.mxu0 %v2976_v4  ;;  %v4325_v61 = vor.u32 %v3465_v59, %v3301_v60  ;;  %v3471_v4 = vld [vmem:[%s4055_s6 + $0xd4] sm:$0xf0]  ;;  %v4394_v38 = vor.u32 %v3459_v34, %v3267_v33  ;;  %v3253_v39 = vld [vmem:[%s4055_s6 + $0x58] sm:$0xf0]  ;;  %v3227_v45 = vld [vmem:[%s4055_s6 + $0x20] sm:$0xf] }
  0x95   : > { %1153 = vmatpush.bf16.msrb.mxu1 %v3104_v7  ;;  %v4345_v6 = vor.u32 %v3471_v4, %v3315_v3  ;;  %v3285_v7 = vld [vmem:[%s4055_s6 + $0x98] sm:$0xf0]  ;;  %v3455_v44 = vld [vmem:[%s4055_s6 + $0x54] sm:$0xf0]  ;;  %v3450_v49 = vld [vmem:[%s4055_s6 + $0x2c] sm:$0xf0] }
  0x96   : > { %v4406_v50 = vor.u32 %v3450_v49, %v3227_v45  ;;  %v3448_v52 = vld [vmem:[%s4055_s6 + $0x24] sm:$0xf]  ;;  %v3229_v54 = vld [vmem:[%s4055_s6 + $0x30] sm:$0xf0]  ;;  %v4412_v55 = vor.u32 %v3455_v44, %v3251_v40  ;;  %v3235_v59 = vld [vmem:[%s4055_s6 + $0x28] sm:$0xf] }
  0x97   : > { %1183 = vmatpush.bf16.msrb.mxu2 %v2964_v8  ;;  %v4414_v56 = vor.u32 %v3448_v52, %v3229_v54  ;;  %v3451_v60 = vld [vmem:[%s4055_s6 + $0x34] sm:$0xf0]  ;;  %v3449_v62 = vld [vmem:[%s4055_s6 + $0x2c] sm:$0xf]  ;;  %v3237_v0 = vld [vmem:[%s4055_s6 + $0x38] sm:$0xf0] }
  0x98   : > { %1212 = vmatpush.bf16.msrb.mxu3 %v3092_v11  ;;  %1125 = vmatpush.bf16.msrb.mxu0 %v2960_v18  ;;  %v3261_v11 = vld [vmem:[%s4055_s6 + $0x70] sm:$0xf0]  ;;  %v3269_v18 = vld [vmem:[%s4055_s6 + $0x78] sm:$0xf0]  ;;  %v4422_v63 = vor.u32 %v3451_v60, %v3235_v59  ;;  %v4425_v2 = vor.u32 %v3449_v62, %v3237_v0  ;;  %v3211_v3 = vld [vmem:[%s4055_s6] sm:$0xf] }
  0x99   : > { %1154 = vmatpush.bf16.msrb.mxu1 %v3088_v19  ;;  %1020 = vmatmul.bf16.gmra.mxu0 %v4261_v20  ;;  %v4360_v13 = vor.u32 %v3456_v10, %v3261_v11  ;;  %v4369_v19 = vor.u32 %v3457_v16, %v3269_v18  ;;  %v3446_v4 = vld [vmem:[%s4055_s6 + $0xc] sm:$0xf0]  ;;  %v3219_v10 = vld [vmem:[%s4055_s6 + $0x8] sm:$0xf]  ;;  %v3447_v11 = vld [vmem:[%s4055_s6 + $0x14] sm:$0xf0] }
  0x9a   : > { %1049 = vmatmul.bf16.gmra.mxu1 %v4263_v21  ;;  %1078 = vmatmul.bf16.gmra.mxu2 %v4261_v20  ;;  %v3445_v14 = vld [vmem:[%s4055_s6 + $0xc] sm:$0xf]  ;;  %v4443_v15 = vor.u32 %v3447_v11, %v3219_v10  ;;  %v3221_v16 = vld [vmem:[%s4055_s6 + $0x18] sm:$0xf0]  ;;  %s1280_s16 = scalar_lea.vmem [#allocation2], %s3476_s2  ;;  %s2445_s13 = smul.u32 4294967289, %s3863_s15 }
  0x9b   : > { %1107 = vmatmul.bf16.gmra.mxu3 %v4263_v21  ;;  %1472 = vmatpush.bf16.msra.mxu2 %v4321_v58  ;;  %v4448_v18 = vor.u32 %v3445_v14, %v3221_v16  ;;  %s3498_s20 = smul.u32 24, %s3863_s15 }
  0x9c   : > { %1446 = vmatpush.bf16.msra.mxu0 %v4272_v25  ;;  %1485 = vmatpush.bf16.msra.mxu3 %v4279_v30  ;;  %s2155_s29 = smul.u32 4294967293, %s3863_s15 }
  0x9d   : > { %1459 = vmatpush.bf16.msra.mxu1 %v4277_v29  ;;  %s2785_s2 = scalar_lea.vmem %s4100_s21, %s3498_s20 [#allocation7] }
  0x9e   : > { %s2156_s30 = sadd.s32 5, %s2155_s29 }
  0x9f   : > { %1473 = vmatpush.bf16.msra.mxu2 %v4345_v6 }
  0xa0   : > { %1447 = vmatpush.bf16.msra.mxu0 %v4299_v42  ;;  %1486 = vmatpush.bf16.msra.mxu3 %v4306_v48 }
  0xa1   : > { %1460 = vmatpush.bf16.msra.mxu1 %v4304_v47 }
  0xa3   : > { %1474 = vmatpush.bf16.msra.mxu2 %v4366_v17 }
  0xa4   : > { %1448 = vmatpush.bf16.msra.mxu0 %v4312_v53  ;;  %1487 = vmatpush.bf16.msra.mxu3 %v4325_v61 }
  0xa5   : > { %1461 = vmatpush.bf16.msra.mxu1 %v4319_v57 }
  0xa7   : > { %1475 = vmatpush.bf16.msra.mxu2 %v4380_v24 }
  0xa8   : > { %1449 = vmatpush.bf16.msra.mxu0 %v4338_v1 }
  0xa9   : > { %1025 = vmatmul.bf16.gmra.mxu0 %v4288_v35  ;;  %1462 = vmatpush.bf16.msra.mxu1 %v4343_v5 }
  0xaa   : > { %1054 = vmatmul.bf16.gmra.mxu1 %v4290_v37  ;;  %1083 = vmatmul.bf16.gmra.mxu2 %v4288_v35 }
  0xab   : > { %1112 = vmatmul.bf16.gmra.mxu3 %v4290_v37  ;;  %1476 = vmatpush.bf16.msra.mxu2 %v4394_v38 }
  0xad   : > { %1463 = vmatpush.bf16.msra.mxu1 %v4360_v13 }
  0xaf   : > { %1477 = vmatpush.bf16.msra.mxu2 %v4412_v55 }
  0xb3   : > { %1478 = vmatpush.bf16.msra.mxu2 %v4422_v63 }
  0xb7   : > { %1479 = vmatpush.bf16.msra.mxu2 %v4443_v15 }
  0xb9   : > { %1126 = vmatmul.bf16.vlgmr.msrb.gmra.mxu0 %v4180_v46 }
  0xba   : > { %1155 = vmatmul.bf16.vlgmr.msrb.gmra.mxu1 %v4185_v51  ;;  %1184 = vmatmul.bf16.vlgmr.msrb.gmra.mxu2 %v4180_v46  ;;  %v3461_v46 = vld [vmem:[%s4055_s6 + $0x8c] sm:$0xf] }
  0xbb   : > { %1213 = vmatmul.bf16.vlgmr.msrb.gmra.mxu3 %v4185_v51  ;;  %v3259_v51 = vld [vmem:[%s4055_s6 + $0x60] sm:$0xf]  ;;  %v4351_v8 = vor.u32 %v3461_v46, %v3285_v7  ;;  %v3444_v46 = vld [vmem:[%s4055_s6 + $0x4] sm:$0xf]  ;;  %v4431_v7 = vor.u32 %v3446_v4, %v3211_v3  ;;  %1617 = vmatpush.bf16.msrb.mxu2 %v4321_v58 }
  0xbc   : > { %v4358_v12 = vor.u32 %v3458_v9, %v3259_v51  ;;  %v3213_v51 = vld [vmem:[%s4055_s6 + $0x10] sm:$0xf0]  ;;  %v4526_v4 = vld [vmem:[%s5059_s14] sm:$0xff]  ;;  %s2446_s14 = sadd.s32 7, %s2445_s13 }
  0xbd   : > { %1488 = vmatpush.bf16.msra.mxu3 %v4351_v8  ;;  %v4436_v9 = vor.u32 %v3444_v46, %v3213_v51  ;;  %v1565_v46 = vstv %s1274_s4  ;;  %v3879_v51 = vmov 0   ;;  %s1867_s4 = sadd.s32 3, %s3863_s15 }
  0xbe   : > { %1450 = vmatpush.bf16.msra.mxu0 %v4358_v12  ;;  %vm1566_vm0 = vcmp.lt.s32.totalorder %v1565_v46, %v4526_v4  ;;  %3597 = vset.pattern.permute.xlu0 %v3879_v51  ;;  %s1868_s12 = sadd.s32 %s4069_s19, %s1867_s4  ;;  %s2157_s4 = sadd.s32 %s4069_s19, %s2156_s30 }
  0xbf   : > { %1618 = vmatpush.bf16.msrb.mxu2 %v4345_v6  ;;  %v1567_v10 = vsel %vm1566_vm0, 1, %v3879_v51  ;;  %3598 = vset.pattern.permute.xlu1 %v3879_v51  ;;  %s3501_s30 = smul.u32 4294967240, %s3863_s15 }
  0xc0   : > { %1569 = vperm.xlu0 %3597, %v1567_v10   ;;  %3599 = vset.pattern.permute.xlu2 %v3879_v51 }
  0xc1   : > { %1489 = vmatpush.bf16.msra.mxu3 %v4369_v19 }
  0xc2   : > { %1451 = vmatpush.bf16.msra.mxu0 %v4387_v31 }
  0xc3   : > { %1619 = vmatpush.bf16.msrb.mxu2 %v4366_v17 }
  0xc6   : > { %1452 = vmatpush.bf16.msra.mxu0 %v4406_v50 }
  0xc7   : > { %1620 = vmatpush.bf16.msrb.mxu2 %v4380_v24 }
  0xc9   : > { %1131 = vmatmul.bf16.gmra.mxu0 %v4224_v36 }
  0xca   : > { %1160 = vmatmul.bf16.gmra.mxu1 %v4229_v41  ;;  %1189 = vmatmul.bf16.gmra.mxu2 %v4224_v36  ;;  %v4392_v36 = vor.u32 %v3452_v28, %v3245_v32 }
  0xcb   : > { %1218 = vmatmul.bf16.gmra.mxu3 %v4229_v41  ;;  %v3453_v41 = vld [vmem:[%s4055_s6 + $0x4c] sm:$0xf]  ;;  %1453 = vmatpush.bf16.msra.mxu0 %v4431_v7  ;;  %s1579_s6 = sadd.s32 %s4069_s19, %s1578_s17  ;;  %s2447_s17 = sadd.s32 %s4069_s19, %s2446_s14 }
  0xcc   : > { %v4400_v43 = vor.u32 %v3453_v41, %v3253_v39  ;;  %1464 = vmatpush.bf16.msra.mxu1 %v4392_v36  ;;  %1621 = vmatpush.bf16.msrb.mxu2 %v4394_v38 }
  0xce   : > { %1490 = vmatpush.bf16.msra.mxu3 %v4400_v43 }
  0xcf   : > { %1591 = vmatpush.bf16.msrb.mxu0 %v4272_v25 }
  0xd0   : > { %1465 = vmatpush.bf16.msra.mxu1 %v4414_v56  ;;  %1622 = vmatpush.bf16.msrb.mxu2 %v4412_v55 }
  0xd2   : > { %1491 = vmatpush.bf16.msra.mxu3 %v4425_v2 }
  0xd3   : > { %1592 = vmatpush.bf16.msrb.mxu0 %v4299_v42 }
  0xd4   : > { %1466 = vmatpush.bf16.msra.mxu1 %v4436_v9  ;;  %1623 = vmatpush.bf16.msrb.mxu2 %v4422_v63 }
  0xd6   : > { %1492 = vmatpush.bf16.msra.mxu3 %v4448_v18 }
  0xd7   : > { %1593 = vmatpush.bf16.msrb.mxu0 %v4312_v53 }
  0xd8   : > { %1604 = vmatpush.bf16.msrb.mxu1 %v4277_v29  ;;  %1624 = vmatpush.bf16.msrb.mxu2 %v4443_v15 }
  0xd9   : > { %1136 = vmatmul.bf16.gmra.mxu0 %v4261_v20 }
  0xda   : > { %1165 = vmatmul.bf16.gmra.mxu1 %v4263_v21  ;;  %1194 = vmatmul.bf16.gmra.mxu2 %v4261_v20  ;;  %v4475_v20 = vld [vmem:[%s4077_s8] sm:$0xf]  ;;  %s2302_s8 = sadd.s32 %s4069_s19, %s2301_s11  ;;  %s3481_s11 = sadd.s32 16, %s3498_s20 }
  0xdb   : > { %1223 = vmatmul.bf16.gmra.mxu3 %v4263_v21  ;;  %1594 = vmatpush.bf16.msrb.mxu0 %v4338_v1  ;;  %v4481_v21 = vld [vmem:[%s4093_s18] sm:$0xff]  ;;  %v4498_v28 = vperm.slane %v4475_v20, 1 }
  0xdc   : > { %1630 = vmatpush.bf16.msrb.mxu3 %v4279_v30  ;;  %1605 = vmatpush.bf16.msrb.mxu1 %v4304_v47 }
  0xdf   : > { %1595 = vmatpush.bf16.msrb.mxu0 %v4358_v12 }
  0xe0   : > { %1631 = vmatpush.bf16.msrb.mxu3 %v4306_v48  ;;  %1606 = vmatpush.bf16.msrb.mxu1 %v4319_v57 }
  0xe3   : > { %1596 = vmatpush.bf16.msrb.mxu0 %v4387_v31 }
  0xe4   : > { %1632 = vmatpush.bf16.msrb.mxu3 %v4325_v61  ;;  %1607 = vmatpush.bf16.msrb.mxu1 %v4343_v5 }
  0xe7   : > { %1597 = vmatpush.bf16.msrb.mxu0 %v4406_v50 }
  0xe8   : > { %1633 = vmatpush.bf16.msrb.mxu3 %v4351_v8  ;;  %1608 = vmatpush.bf16.msrb.mxu1 %v4360_v13 }
  0xe9   : > { %1141 = vmatmul.bf16.gmra.mxu0 %v4288_v35 }
  0xea   : > { %1170 = vmatmul.bf16.gmra.mxu1 %v4290_v37  ;;  %1199 = vmatmul.bf16.gmra.mxu2 %v4288_v35  ;;  %v4484_v35 = vperm.slane %v4475_v20, 0 }
  0xeb   : > { %1228 = vmatmul.bf16.gmra.mxu3 %v4290_v37  ;;  %v1285_v37 = vpack.c.bf16 %v4481_v21, %v4481_v21  ;;  %1598 = vmatpush.bf16.msrb.mxu0 %v4431_v7 }
  0xec   : > { %1634 = vmatpush.bf16.msrb.mxu3 %v4369_v19  ;;  %1609 = vmatpush.bf16.msrb.mxu1 %v4392_v36 }
  0xf0   : > { %1635 = vmatpush.bf16.msrb.mxu3 %v4400_v43  ;;  %1610 = vmatpush.bf16.msrb.mxu1 %v4414_v56 }
  0xf4   : > { %1636 = vmatpush.bf16.msrb.mxu3 %v4425_v2  ;;  %1611 = vmatpush.bf16.msrb.mxu1 %v4436_v9 }
  0xf6   : > { %v1011_v22 = vpop.f32.mrf.mxu0 }
  0xf7   : > { %v1012_v23 = vadd.f32 %v1011_v22, %v4484_v35  ;;  %v1040_v26 = vpop.f32.mrf.mxu1 }
  0xf8   : > { %1637 = vmatpush.bf16.msrb.mxu3 %v4448_v18 }
  0xf9   : > { %v1041_v27 = vadd.f32 %v1040_v26, %v1012_v23  ;;  %1454 = vmatmul.bf16.vlgmr.msra.gmra.mxu0 %v1285_v37 }
  0xfa   : > { %1467 = vmatmul.bf16.vlgmr.msra.gmra.mxu1 %v1285_v37  ;;  %1480 = vmatmul.bf16.vlgmr.msra.gmra.mxu2 %v1285_v37 }
  0xfb   : > { %1234 = vst [vmem:[#allocation2] sm:$0xff] %v1041_v27  ;;  %1493 = vmatmul.bf16.vlgmr.msra.gmra.mxu3 %v1285_v37  ;;  %1736 = vmatpush.bf16.msra.mxu0 %v4272_v25 }
  0xfc   : > { %1749 = vmatpush.bf16.msra.mxu1 %v4277_v29  ;;  %1762 = vmatpush.bf16.msra.mxu2 %v4321_v58 }
  0xfd   : > { %v1069_v32 = vpop.f32.mrf.mxu2  ;;  %1775 = vmatpush.bf16.msra.mxu3 %v4279_v30 }
  0xfe   : > { %v1070_v33 = vadd.f32 %v1069_v32, %v4498_v28  ;;  %v1098_v34 = vpop.f32.mrf.mxu3  ;;  %v1013_v41 = vpop.f32.mrf.mxu0  ;;  %v1710_v32 = vstv %s1579_s6  ;;  %s2779_s6 = scalar_lea.vmem %s4100_s21, %s3497_s27 [#allocation7] }
  0xff   : > { %v1014_v39 = vadd.f32 %v1013_v41, %v4484_v35  ;;  %v1042_v40 = vpop.f32.mrf.mxu1  ;;  %1737 = vmatpush.bf16.msra.mxu0 %v4299_v42  ;;  %vm1711_vm1 = vcmp.lt.s32.totalorder %v1710_v32, %v4526_v4 }
 0x100   : > { %v1099_v44 = vadd.f32 %v1098_v34, %v1070_v33  ;;  %1750 = vmatpush.bf16.msra.mxu1 %v4304_v47  ;;  %1763 = vmatpush.bf16.msra.mxu2 %v4345_v6  ;;  %v1712_v33 = vsel %vm1711_vm1, 1, %v3879_v51 }
 0x101   : > { %v1043_v45 = vadd.f32 %v1042_v40, %v1014_v39  ;;  %1776 = vmatpush.bf16.msra.mxu3 %v4306_v48  ;;  %1714 = vperm.xlu0 %3597, %v1712_v33  }
 0x102   : > { %1235 = vst [vmem:[#allocation2 + $0x8] sm:$0xff] %v1099_v44 }
 0x103   : > { %1238 = vst [vmem:[#allocation2 + $0x20] sm:$0xff] %v1043_v45  ;;  %1738 = vmatpush.bf16.msra.mxu0 %v4312_v53 }
 0x104   : > { %1751 = vmatpush.bf16.msra.mxu1 %v4319_v57  ;;  %1764 = vmatpush.bf16.msra.mxu2 %v4366_v17 }
 0x105   : > { %v1071_v49 = vpop.f32.mrf.mxu2  ;;  %1777 = vmatpush.bf16.msra.mxu3 %v4325_v61 }
 0x106   : > { %v1072_v52 = vadd.f32 %v1071_v49, %v4498_v28  ;;  %v1100_v54 = vpop.f32.mrf.mxu3  ;;  %v1016_v59 = vpop.f32.mrf.mxu0 }
 0x107   : > { %v1017_v60 = vadd.f32 %v1016_v59, %v4484_v35  ;;  %v1045_v62 = vpop.f32.mrf.mxu1  ;;  %1739 = vmatpush.bf16.msra.mxu0 %v4338_v1 }
 0x108   : > { %v1101_v0 = vadd.f32 %v1100_v54, %v1072_v52  ;;  %1752 = vmatpush.bf16.msra.mxu1 %v4343_v5  ;;  %1765 = vmatpush.bf16.msra.mxu2 %v4380_v24  ;;  %v2433_v54 = vstv %s2302_s8  ;;  %s1726_s8 = sshra.s32 %s3481_s11, 3  ;;  %s3499_s11 = smul.u32 4294967272, %s3863_s15 }
 0x109   : > { %v1046_v3 = vadd.f32 %v1045_v62, %v1017_v60  ;;  %1778 = vmatpush.bf16.msra.mxu3 %v4351_v8  ;;  %vm2434_vm2 = vcmp.lt.s32.totalorder %v2433_v54, %v4526_v4  ;;  %v4571_v54 = vperm.slane %v4475_v20, 2  ;;  %s3482_s7 = sshll.u32 %s1726_s8, 5 }
 0x10a   : > { %1239 = vst [vmem:[#allocation2 + $0x28] sm:$0xff] %v1101_v0  ;;  %v2435_v59 = vsel %vm2434_vm2, 1, %v3879_v51  ;;  %s4720_s9 = scalar_lea.vmem [#allocation2], %s3482_s7  ;;  %s3488_s8 = sadd.s32 40, %s3499_s11 }
 0x10b   : > { %1242 = vst [vmem:[#allocation2 + $0x40] sm:$0xff] %v1046_v3  ;;  %1740 = vmatpush.bf16.msra.mxu0 %v4358_v12  ;;  %2437 = vperm.xlu0 %3597, %v2435_v59   ;;  %s2159_s7 = sshra.s32 %s3488_s8, 3 }
 0x10c   : > { %1753 = vmatpush.bf16.msra.mxu1 %v4360_v13  ;;  %1766 = vmatpush.bf16.msra.mxu2 %v4394_v38 }
 0x10d   : > { %v1074_v11 = vpop.f32.mrf.mxu2  ;;  %1779 = vmatpush.bf16.msra.mxu3 %v4369_v19 }
 0x10e   : > { %v1075_v14 = vadd.f32 %v1074_v11, %v4498_v28  ;;  %v1103_v16 = vpop.f32.mrf.mxu3  ;;  %v1018_v37 = vpop.f32.mrf.mxu0 }
 0x10f   : > { %v1019_v22 = vadd.f32 %v1018_v37, %v4484_v35  ;;  %v1047_v23 = vpop.f32.mrf.mxu1  ;;  %1741 = vmatpush.bf16.msra.mxu0 %v4387_v31 }
 0x110   : > { %v1104_v26 = vadd.f32 %v1103_v16, %v1075_v14  ;;  %1754 = vmatpush.bf16.msra.mxu1 %v4392_v36  ;;  %1767 = vmatpush.bf16.msra.mxu2 %v4412_v55 }
 0x111   : > { %v1048_v27 = vadd.f32 %v1047_v23, %v1019_v22  ;;  %1780 = vmatpush.bf16.msra.mxu3 %v4400_v43 }
 0x112   : > { %1243 = vst [vmem:[#allocation2 + $0x48] sm:$0xff] %v1104_v26 }
 0x113   : > { %1246 = vst [vmem:[#allocation2 + $0x60] sm:$0xff] %v1048_v27  ;;  %1742 = vmatpush.bf16.msra.mxu0 %v4406_v50 }
 0x114   : > { %1755 = vmatpush.bf16.msra.mxu1 %v4414_v56  ;;  %1768 = vmatpush.bf16.msra.mxu2 %v4422_v63 }
 0x115   : > { %v1076_v34 = vpop.f32.mrf.mxu2  ;;  %1781 = vmatpush.bf16.msra.mxu3 %v4425_v2 }
 0x116   : > { %v1077_v41 = vadd.f32 %v1076_v34, %v4498_v28  ;;  %v1105_v39 = vpop.f32.mrf.mxu3  ;;  %v1021_v40 = vpop.f32.mrf.mxu0 }
 0x117   : > { %v1022_v44 = vadd.f32 %v1021_v40, %v4484_v35  ;;  %v1050_v45 = vpop.f32.mrf.mxu1  ;;  %1743 = vmatpush.bf16.msra.mxu0 %v4431_v7 }
 0x118   : > { %v1106_v49 = vadd.f32 %v1105_v39, %v1077_v41  ;;  %1756 = vmatpush.bf16.msra.mxu1 %v4436_v9  ;;  %1769 = vmatpush.bf16.msra.mxu2 %v4443_v15 }
 0x119   : > { %v1051_v52 = vadd.f32 %v1050_v45, %v1022_v44  ;;  %1782 = vmatpush.bf16.msra.mxu3 %v4448_v18 }
 0x11a   : > { %1247 = vst [vmem:[#allocation2 + $0x68] sm:$0xff] %v1106_v49 }
 0x11b   : > { %1250 = vst [vmem:[#allocation2 + $0x80] sm:$0xff] %v1051_v52 }
 0x11d   : > { %v1079_v60 = vpop.f32.mrf.mxu2 }
 0x11e   : > { %v1080_v62 = vadd.f32 %v1079_v60, %v4498_v28  ;;  %v1108_v0 = vpop.f32.mrf.mxu3  ;;  %v1023_v3 = vpop.f32.mrf.mxu0 }
 0x11f   : > { %v1024_v46 = vadd.f32 %v1023_v3, %v4484_v35  ;;  %v1052_v10 = vpop.f32.mrf.mxu1 }
 0x120   : > { %v1109_v11 = vadd.f32 %v1108_v0, %v1080_v62 }
 0x121   : > { %v1053_v14 = vadd.f32 %v1052_v10, %v1024_v46 }
 0x122   : > { %1251 = vst [vmem:[#allocation2 + $0x88] sm:$0xff] %v1109_v11 }
 0x123   : > { %1254 = vst [vmem:[#allocation2 + $0xa0] sm:$0xff] %v1053_v14 }
 0x125   : > { %v1081_v16 = vpop.f32.mrf.mxu2 }
 0x126   : > { %v1082_v37 = vadd.f32 %v1081_v16, %v4498_v28  ;;  %v1110_v22 = vpop.f32.mrf.mxu3  ;;  %v1026_v23 = vpop.f32.mrf.mxu0 }
 0x127   : > { %v1027_v26 = vadd.f32 %v1026_v23, %v4484_v35  ;;  %v1055_v27 = vpop.f32.mrf.mxu1 }
 0x128   : > { %v1111_v32 = vadd.f32 %v1110_v22, %v1082_v37 }
 0x129   : > { %v1056_v33 = vadd.f32 %v1055_v27, %v1027_v26 }
 0x12a   : > { %1255 = vst [vmem:[#allocation2 + $0xa8] sm:$0xff] %v1111_v32 }
 0x12b   : > { %1258 = vst [vmem:[#allocation2 + $0xc0] sm:$0xff] %v1056_v33 }
 0x12d   : > { %v1084_v34 = vpop.f32.mrf.mxu2 }
 0x12e   : > { %v1085_v41 = vadd.f32 %v1084_v34, %v4498_v28  ;;  %v1113_v39 = vpop.f32.mrf.mxu3  ;;  %v1028_v40 = vpop.f32.mrf.mxu0 }
 0x12f   : > { %v1029_v44 = vadd.f32 %v1028_v40, %v4484_v35  ;;  %v1057_v45 = vpop.f32.mrf.mxu1  ;;  %v4576_v35 = vperm.slane %v4475_v20, 3 }
 0x130   : > { %v1114_v49 = vadd.f32 %v1113_v39, %v1085_v41 }
 0x131   : > { %v1058_v52 = vadd.f32 %v1057_v45, %v1029_v44 }
 0x132   : > { %1259 = vst [vmem:[#allocation2 + $0xc8] sm:$0xff] %v1114_v49 }
 0x133   : > { %1262 = vst [vmem:[#allocation2 + $0xe0] sm:$0xff] %v1058_v52 }
 0x135   : > { %v1086_v59 = vpop.f32.mrf.mxu2 }
 0x136   : > { %v1087_v60 = vadd.f32 %v1086_v59, %v4498_v28  ;;  %v1115_v62 = vpop.f32.mrf.mxu3  ;;  %v1127_v0 = vpop.f32.mrf.mxu0 }
 0x137   : > { %v1128_v3 = vadd.f32 %v1127_v0, %v4571_v54  ;;  %v1156_v46 = vpop.f32.mrf.mxu1 }
 0x138   : > { %v1116_v10 = vadd.f32 %v1115_v62, %v1087_v60 }
 0x139   : > { %v1157_v11 = vadd.f32 %v1156_v46, %v1128_v3 }
 0x13a   : > { %1263 = vst [vmem:[#allocation2 + $0xe8] sm:$0xff] %v1116_v10 }
 0x13b   : > { %1236 = vst [vmem:[#allocation2 + $0x10] sm:$0xff] %v1157_v11 }
 0x13d   : > { %v1185_v14 = vpop.f32.mrf.mxu2 }
 0x13e   : > { %v1186_v16 = vadd.f32 %v1185_v14, %v4576_v35  ;;  %v1214_v37 = vpop.f32.mrf.mxu3  ;;  %v1129_v22 = vpop.f32.mrf.mxu0 }
 0x13f   : > { %v1130_v23 = vadd.f32 %v1129_v22, %v4571_v54  ;;  %v1158_v28 = vpop.f32.mrf.mxu1 }
 0x140   : > { %v1215_v26 = vadd.f32 %v1214_v37, %v1186_v16 }
 0x141   : > { %v1159_v27 = vadd.f32 %v1158_v28, %v1130_v23 }
 0x142   : > { %1237 = vst [vmem:[#allocation2 + $0x18] sm:$0xff] %v1215_v26 }
 0x143   : > { %1240 = vst [vmem:[#allocation2 + $0x30] sm:$0xff] %v1159_v27 }
 0x145   : > { %v1187_v32 = vpop.f32.mrf.mxu2 }
 0x146   : > { %v1188_v33 = vadd.f32 %v1187_v32, %v4576_v35  ;;  %v1216_v34 = vpop.f32.mrf.mxu3  ;;  %v1132_v41 = vpop.f32.mrf.mxu0 }
 0x147   : > { %v1133_v20 = vadd.f32 %v1132_v41, %v4571_v54  ;;  %v1161_v39 = vpop.f32.mrf.mxu1 }
 0x148   : > { %v1217_v40 = vadd.f32 %v1216_v34, %v1188_v33 }
 0x149   : > { %v1162_v44 = vadd.f32 %v1161_v39, %v1133_v20 }
 0x14a   : > { %1241 = vst [vmem:[#allocation2 + $0x38] sm:$0xff] %v1217_v40 }
 0x14b   : > { %1244 = vst [vmem:[#allocation2 + $0x50] sm:$0xff] %v1162_v44 }
 0x14d   : > { %v1190_v45 = vpop.f32.mrf.mxu2 }
 0x14e   : > { %v1191_v49 = vadd.f32 %v1190_v45, %v4576_v35  ;;  %v1219_v52 = vpop.f32.mrf.mxu3  ;;  %v1134_v59 = vpop.f32.mrf.mxu0 }
 0x14f   : > { %v1135_v60 = vadd.f32 %v1134_v59, %v4571_v54  ;;  %v1163_v62 = vpop.f32.mrf.mxu1 }
 0x150   : > { %v1220_v0 = vadd.f32 %v1219_v52, %v1191_v49 }
 0x151   : > { %v1164_v3 = vadd.f32 %v1163_v62, %v1135_v60 }
 0x152   : > { %1245 = vst [vmem:[#allocation2 + $0x58] sm:$0xff] %v1220_v0 }
 0x153   : > { %1248 = vst [vmem:[#allocation2 + $0x70] sm:$0xff] %v1164_v3 }
 0x155   : > { %v1192_v46 = vpop.f32.mrf.mxu2 }
 0x156   : > { %v1193_v10 = vadd.f32 %v1192_v46, %v4576_v35  ;;  %v1221_v11 = vpop.f32.mrf.mxu3  ;;  %v1137_v14 = vpop.f32.mrf.mxu0 }
 0x157   : > { %v1138_v16 = vadd.f32 %v1137_v14, %v4571_v54  ;;  %v1166_v37 = vpop.f32.mrf.mxu1 }
 0x158   : > { %v1222_v22 = vadd.f32 %v1221_v11, %v1193_v10 }
 0x159   : > { %v1167_v23 = vadd.f32 %v1166_v37, %v1138_v16 }
 0x15a   : > { %1249 = vst [vmem:[#allocation2 + $0x78] sm:$0xff] %v1222_v22 }
 0x15b   : > { %1252 = vst [vmem:[#allocation2 + $0x90] sm:$0xff] %v1167_v23 }
 0x15d   : > { %v1195_v28 = vpop.f32.mrf.mxu2 }
 0x15e   : > { %v1196_v26 = vadd.f32 %v1195_v28, %v4576_v35  ;;  %v1224_v27 = vpop.f32.mrf.mxu3  ;;  %v1139_v32 = vpop.f32.mrf.mxu0 }
 0x15f   : > { %v1140_v33 = vadd.f32 %v1139_v32, %v4571_v54  ;;  %v1168_v34 = vpop.f32.mrf.mxu1 }
 0x160   : > { %v1225_v41 = vadd.f32 %v1224_v27, %v1196_v26 }
 0x161   : > { %v1169_v20 = vadd.f32 %v1168_v34, %v1140_v33 }
 0x162   : > { %1253 = vst [vmem:[#allocation2 + $0x98] sm:$0xff] %v1225_v41 }
 0x163   : > { %1256 = vst [vmem:[#allocation2 + $0xb0] sm:$0xff] %v1169_v20 }
 0x165   : > { %v1197_v39 = vpop.f32.mrf.mxu2 }
 0x166   : > { %v1198_v40 = vadd.f32 %v1197_v39, %v4576_v35  ;;  %v1226_v44 = vpop.f32.mrf.mxu3  ;;  %v1142_v45 = vpop.f32.mrf.mxu0 }
 0x167   : > { %v1143_v49 = vadd.f32 %v1142_v45, %v4571_v54  ;;  %v1171_v52 = vpop.f32.mrf.mxu1 }
 0x168   : > { %v1227_v59 = vadd.f32 %v1226_v44, %v1198_v40 }
 0x169   : > { %v1172_v60 = vadd.f32 %v1171_v52, %v1143_v49 }
 0x16a   : > { %1257 = vst [vmem:[#allocation2 + $0xb8] sm:$0xff] %v1227_v59 }
 0x16b   : > { %1260 = vst [vmem:[#allocation2 + $0xd0] sm:$0xff] %v1172_v60 }
 0x16d   : > { %v1200_v62 = vpop.f32.mrf.mxu2 }
 0x16e   : > { %v1201_v0 = vadd.f32 %v1200_v62, %v4576_v35  ;;  %v1229_v3 = vpop.f32.mrf.mxu3  ;;  %v1144_v46 = vpop.f32.mrf.mxu0 }
 0x16f   : > { %v1145_v10 = vadd.f32 %v1144_v46, %v4571_v54  ;;  %v1173_v11 = vpop.f32.mrf.mxu1 }
 0x170   : > { %v1230_v14 = vadd.f32 %v1229_v3, %v1201_v0 }
 0x171   : > { %v1174_v16 = vadd.f32 %v1173_v11, %v1145_v10 }
 0x172   : > { %1261 = vst [vmem:[#allocation2 + $0xd8] sm:$0xff] %v1230_v14 }
 0x173   : > { %1264 = vst [vmem:[#allocation2 + $0xf0] sm:$0xff] %v1174_v16 }
 0x175   : > { %v1202_v37 = vpop.f32.mrf.mxu2 }
 0x176   : > { %v1203_v22 = vadd.f32 %v1202_v37, %v4576_v35  ;;  %v1231_v23 = vpop.f32.mrf.mxu3  ;;  %v1455_v28 = vpop.f32.mrf.mxu0 }
 0x177   : > { %v1468_v26 = vpop.f32.mrf.mxu1 }
 0x178   : > { %v1232_v27 = vadd.f32 %v1231_v23, %v1203_v22 }
 0x17a   : > { %1265 = vst [vmem:[#allocation2 + $0xf8] sm:$0xff] %v1232_v27 }
 0x17d   : > { %v1481_v32 = vpop.f32.mrf.mxu2 }
 0x17e   : > { %v1457_v33 = vpop.f32.mrf.mxu0  ;;  %v1494_v54 = vpop.f32.mrf.mxu3 }
 0x17f   : > { %v1470_v34 = vpop.f32.mrf.mxu1 }
 0x181   : > { %v1281_v41 = vld [vmem:[%s1280_s16] sm:$0xff]  ;;  %v1282_v20 = vld [vmem:[%s1280_s16 + $0x8] sm:$0xff]  ;;  %v1284_v44 = vld [vmem:[%s1280_s16 + $0x18] sm:$0xff] }
 0x182   : > { %v1498_v39 = vadd.f32 %v1455_v28, %v1281_v41  ;;  %v1499_v40 = vadd.f32 %v1468_v26, %v1282_v20  ;;  %v1501_v45 = vadd.f32 %v1494_v54, %v1284_v44  ;;  %v1283_v22 = vld [vmem:[%s1280_s16 + $0x10] sm:$0xff]  ;;  %s3483_s16 = sshll.u32 %s3863_s15, 3 }
 0x183   : > { %v1500_v28 = vadd.f32 %v1481_v32, %v1283_v22 }
 0x184   : > { %v1502_v35 = vsub.f32 0.0, %v1498_v39  ;;  %v1521_v49 = vsub.f32 0.0, %v1499_v40  ;;  %v1541_v52 = vsub.f32 0.0, %v1501_v45 }
 0x185   : > { %v1483_v59 = vpop.f32.mrf.mxu2 }
 0x186   : > { %v1503_v60 = vmul.f32 1.442695, %v1502_v35  ;;  %v1522_v62 = vmul.f32 1.442695, %v1521_v49  ;;  %v1496_v0 = vpop.f32.mrf.mxu3  ;;  %v1542_v3 = vmul.f32 1.442695, %v1541_v52 }
 0x187   : > { %v1272_v0 = vld [vmem:[%s4098_s3] sm:$0xff] }
 0x188   : > { %3600 = vpow2.f32 %v1503_v60 }
 0x189   : > { %3602 = vpow2.f32 %v1522_v62 }
 0x18a   : > { %3604 = vpow2.f32 %v1542_v3 }
 0x18e   : > { %v3601_v46 = vpop.eup %3600 }
 0x18f   : > { %v3603_v10 = vpop.eup %3602  ;;  %v1505_v11 = vadd.f32 1.0, %v3601_v46 }
 0x190   : > { %v3605_v14 = vpop.eup %3604  ;;  %v1524_v16 = vadd.f32 1.0, %v3603_v10 }
 0x191   : > { %3606 = vrcp.f32 %v1505_v11  ;;  %v1544_v37 = vadd.f32 1.0, %v3605_v14  ;;  %v1517_v20 = vand.u32 2147483648, %v1505_v11  ;;  %v1515_v44 = vand.u32 2147483647, %v1505_v11 }
 0x192   : > { %3608 = vrcp.f32 %v1524_v16  ;;  %v1536_v45 = vand.u32 2147483648, %v1524_v16  ;;  %v1534_v49 = vand.u32 2147483647, %v1524_v16  ;;  %vm1511_vm5 = vweird.f32 %v1505_v11 }
 0x193   : > { %3610 = vrcp.f32 %v1544_v37  ;;  %v1518_v59 = vor.u32 1.1754944e-38, %v1517_v20  ;;  %vm1530_vm7 = vweird.f32 %v1524_v16  ;;  %vm1516_vm8 = vcmp.eq.f32.partialorder %v1515_v44, 8.507059e+37 }
 0x194   : > { %3612 = vtanh.f32 %v1500_v28  ;;  %v1537_v3 = vor.u32 1.1754944e-38, %v1536_v45  ;;  %vm1535_vm10 = vcmp.eq.f32.partialorder %v1534_v49, 8.507059e+37  ;;  %vm1550_vm13 = vweird.f32 %v1544_v37 }
 0x195   : > { %v1554_v20 = vand.u32 2147483647, %v1544_v37 }
 0x197   : > { %v3607_v23 = vpop.eup %3606  ;;  %vm1555_vm15 = vcmp.eq.f32.partialorder %v1554_v20, 8.507059e+37 }
 0x198   : > { %v3609_v26 = vpop.eup %3608  ;;  %v1507_v27 = vmul.f32 %v3607_v23, %v1505_v11  ;;  %vm1512_vm3 = vweird.f32 %v3607_v23 }
 0x199   : > { %v1526_v33 = vmul.f32 %v3609_v26, %v1524_v16  ;;  %v3611_v54 = vpop.eup %3610  ;;  %vm1531_vm4 = vweird.f32 %v3609_v26  ;;  %vm1513_vm6 = vmor %vm1511_vm5, %vm1512_vm3  ;;  %v1556_v16 = vand.u32 2147483648, %v1544_v37 }
 0x19a   : > { %v1508_v34 = vsub.f32 1.0, %v1507_v27  ;;  %v1546_v39 = vmul.f32 %v3611_v54, %v1544_v37  ;;  %vm1532_vm9 = vmor %vm1530_vm7, %vm1531_vm4  ;;  %v3613_v46 = vpop.eup %3612  ;;  %vm1551_vm12 = vweird.f32 %v3611_v54 }
 0x19b   : > { %v1527_v41 = vsub.f32 1.0, %v1526_v33  ;;  %v1570_v33 = vpop.permute.xlu0 %1569  ;;  %vm1552_vm14 = vmor %vm1550_vm13, %vm1551_vm12 }
 0x19c   : > { %v1509_v40 = vmul.f32 %v3607_v23, %v1508_v34  ;;  %v1547_v32 = vsub.f32 1.0, %v1546_v39  ;;  %vm1571_vm11 = vcmp.eq.s32.totalorder %v1570_v33, 1  ;;  %v1557_v39 = vor.u32 1.1754944e-38, %v1556_v16 }
 0x19d   : > { %v1528_v35 = vmul.f32 %v3609_v26, %v1527_v41 }
 0x19e   : > { %v1510_v52 = vadd.f32 %v3607_v23, %v1509_v40  ;;  %v1548_v27 = vmul.f32 %v3611_v54, %v1547_v32 }
 0x19f   : > { %v1529_v60 = vadd.f32 %v3609_v26, %v1528_v35 }
 0x1a0   : > { %v1514_v62 = vsel %vm1513_vm6, %v3607_v23, %v1510_v52  ;;  %v1549_v41 = vadd.f32 %v3611_v54, %v1548_v27 }
 0x1a1   : > { %v1519_v10 = vsel %vm1516_vm8, %v1518_v59, %v1514_v62  ;;  %v1533_v14 = vsel %vm1532_vm9, %v3609_v26, %v1529_v60 }
 0x1a2   : > { %v1561_v22 = vmul.f32 %v3613_v46, %v1519_v10  ;;  %v1538_v28 = vsel %vm1535_vm10, %v1537_v3, %v1533_v14  ;;  %v1553_v26 = vsel %vm1552_vm14, %v3611_v54, %v1549_v41  ;;  %v1587_v54 = vld [vmem:[%s4645_s5 + $0x8] sm:$0xff]  ;;  %v1589_v14 = vld [vmem:[%s4645_s5 + $0x18] sm:$0xff] }
 0x1a3   : > { %v1560_v34 = vmul.f32 %v1538_v28, %v1272_v0  ;;  %v1558_v44 = vsel %vm1555_vm15, %v1557_v39, %v1553_v26 }
 0x1a5   : > { %v1562_v11 = vadd.f32 %v1561_v22, %v1560_v34 }
 0x1a7   : > { %3614 = vtanh.f32 %v1562_v11  ;;  %v4598_v23 = vsel %vm1571_vm11, %v1562_v11, %v1272_v0 }
 0x1ad   : > { %v3615_v40 = vpop.eup %3614 }
 0x1ae   : > { %v1564_v45 = vmul.f32 %v3615_v40, %v1558_v44  ;;  %v1855_v44 = vstv %s1724_s10 }
 0x1af   : > { %vm1856_vm0 = vcmp.lt.s32.totalorder %v1855_v44, %v4526_v4 }
 0x1b0   : > { %v1572_v35 = vsel %vm1571_vm11, %v1564_v45, 0.0  ;;  %v4606_v49 = vsel %vm1571_vm11, %v1564_v45, %v4481_v21  ;;  %v1586_v21 = vld [vmem:[%s4645_s5] sm:$0xff] }
 0x1b1   : > { %1574 = vst [vmem:[%s1573_s28] sm:$0xff] %v1572_v35  ;;  %v1590_v52 = vpack.c.bf16 %v4606_v49, %v4606_v49  ;;  %v1588_v35 = vld [vmem:[%s4645_s5 + $0x10] sm:$0xff]  ;;  %s3484_s28 = sadd.s32 24, %s3483_s16  ;;  %s2011_s5 = ssub.s32 4, %s3863_s15 }
 0x1b2   : > { %s1870_s27 = sshra.s32 %s3484_s28, 3  ;;  %s2012_s0 = sadd.s32 %s4069_s19, %s2011_s5 }
 0x1b3   : > { %1599 = vmatmul.bf16.vlgmr.msrb.gmra.mxu0 %v1590_v52  ;;  %1612 = vmatmul.bf16.vlgmr.msrb.gmra.mxu1 %v1590_v52  ;;  %s3485_s25 = sshll.u32 %s1870_s27, 5  ;;  %s2790_s19 = scalar_lea.vmem %s4100_s21, %s3483_s16 [#allocation7] }
 0x1b4   : > { %1625 = vmatmul.bf16.vlgmr.msrb.gmra.mxu2 %v1590_v52  ;;  %1638 = vmatmul.bf16.vlgmr.msrb.gmra.mxu3 %v1590_v52  ;;  %s4776_s23 = scalar_lea.vmem [#allocation2], %s3485_s25  ;;  %s4842_s13 = sshll.u32 %s2011_s5, 3 }
 0x1b5   : > { %1880 = vmatpush.bf16.msrb.mxu0 %v4272_v25  ;;  %1893 = vmatpush.bf16.msrb.mxu1 %v4277_v29  ;;  %s2014_s14 = sshra.s32 %s4842_s13, 3  ;;  %s2151_s20 = scalar_lea.vmem %s4100_s21, %s4842_s13 [#allocation7] }
 0x1b6   : > { %1906 = vmatpush.bf16.msrb.mxu2 %v4321_v58  ;;  %1919 = vmatpush.bf16.msrb.mxu3 %v4279_v30  ;;  %s2800_s16 = scalar_lea.vmem %s4100_s21, %s3499_s11 [#allocation7]  ;;  %s3500_s28 = smul.u32 4294967256, %s3863_s15 }
 0x1b8   : > { %s3491_s27 = sadd.s32 48, %s3500_s28  ;;  %s2806_s5 = scalar_lea.vmem %s4100_s21, %s3500_s28 [#allocation7] }
 0x1b9   : > { %1881 = vmatpush.bf16.msrb.mxu0 %v4299_v42  ;;  %1894 = vmatpush.bf16.msrb.mxu1 %v4304_v47  ;;  %s2304_s25 = sshra.s32 %s3491_s27, 3 }
 0x1ba   : > { %1907 = vmatpush.bf16.msrb.mxu2 %v4345_v6  ;;  %1920 = vmatpush.bf16.msrb.mxu3 %v4306_v48 }
 0x1bd   : > { %1882 = vmatpush.bf16.msrb.mxu0 %v4312_v53  ;;  %1895 = vmatpush.bf16.msrb.mxu1 %v4319_v57 }
 0x1be   : > { %1908 = vmatpush.bf16.msrb.mxu2 %v4366_v17  ;;  %1921 = vmatpush.bf16.msrb.mxu3 %v4325_v61 }
 0x1c1   : > { %1883 = vmatpush.bf16.msrb.mxu0 %v4338_v1  ;;  %1896 = vmatpush.bf16.msrb.mxu1 %v4343_v5 }
 0x1c2   : > { %1909 = vmatpush.bf16.msrb.mxu2 %v4380_v24  ;;  %1922 = vmatpush.bf16.msrb.mxu3 %v4351_v8 }
 0x1c5   : > { %1884 = vmatpush.bf16.msrb.mxu0 %v4358_v12  ;;  %1897 = vmatpush.bf16.msrb.mxu1 %v4360_v13 }
 0x1c6   : > { %1910 = vmatpush.bf16.msrb.mxu2 %v4394_v38  ;;  %1923 = vmatpush.bf16.msrb.mxu3 %v4369_v19 }
 0x1c9   : > { %1885 = vmatpush.bf16.msrb.mxu0 %v4387_v31  ;;  %1898 = vmatpush.bf16.msrb.mxu1 %v4392_v36 }
 0x1ca   : > { %1911 = vmatpush.bf16.msrb.mxu2 %v4412_v55  ;;  %1924 = vmatpush.bf16.msrb.mxu3 %v4400_v43 }
 0x1cd   : > { %1886 = vmatpush.bf16.msrb.mxu0 %v4406_v50  ;;  %1899 = vmatpush.bf16.msrb.mxu1 %v4414_v56 }
 0x1ce   : > { %1912 = vmatpush.bf16.msrb.mxu2 %v4422_v63  ;;  %1925 = vmatpush.bf16.msrb.mxu3 %v4425_v2 }
 0x1d1   : > { %1887 = vmatpush.bf16.msrb.mxu0 %v4431_v7  ;;  %1900 = vmatpush.bf16.msrb.mxu1 %v4436_v9 }
 0x1d2   : > { %1913 = vmatpush.bf16.msrb.mxu2 %v4443_v15  ;;  %1926 = vmatpush.bf16.msrb.mxu3 %v4448_v18 }
 0x230   : > { %v1600_v37 = vpop.f32.mrf.mxu0  ;;  %v1613_v32 = vpop.f32.mrf.mxu1 }
 0x231   : > { %v1643_v59 = vadd.f32 %v1600_v37, %v1586_v21  ;;  %v1644_v60 = vadd.f32 %v1613_v32, %v1587_v54  ;;  %v1857_v37 = vsel %vm1856_vm0, 1, %v3879_v51  ;;  %v1999_v54 = vstv %s1868_s12 }
 0x232   : > { %1859 = vperm.xlu1 %3598, %v1857_v37   ;;  %vm2000_vm1 = vcmp.lt.s32.totalorder %v1999_v54, %v4526_v4 }
 0x233   : > { %v1647_v62 = vsub.f32 0.0, %v1643_v59  ;;  %v1666_v0 = vsub.f32 0.0, %v1644_v60 }
 0x235   : > { %v1648_v3 = vmul.f32 1.442695, %v1647_v62  ;;  %v1667_v46 = vmul.f32 1.442695, %v1666_v0 }
 0x237   : > { %3616 = vpow2.f32 %v1648_v3  ;;  %v1626_v10 = vpop.f32.mrf.mxu2  ;;  %v1639_v22 = vpop.f32.mrf.mxu3 }
 0x238   : > { %3618 = vpow2.f32 %v1667_v46  ;;  %v1646_v28 = vadd.f32 %v1639_v22, %v1589_v14  ;;  %v1602_v27 = vpop.f32.mrf.mxu0  ;;  %v1615_v33 = vpop.f32.mrf.mxu1  ;;  %v1645_v52 = vadd.f32 %v1626_v10, %v1588_v35 }
 0x239   : > { %v2001_v27 = vsel %vm2000_vm1, 1, %v3879_v51 }
 0x23a   : > { %v1686_v34 = vsub.f32 0.0, %v1646_v28  ;;  %2003 = vperm.xlu1 %3598, %v2001_v27  }
 0x23c   : > { %v1687_v11 = vmul.f32 1.442695, %v1686_v34 }
 0x23d   : > { %v3617_v41 = vpop.eup %3616 }
 0x23e   : > { %v3619_v16 = vpop.eup %3618  ;;  %v1650_v20 = vadd.f32 1.0, %v3617_v41  ;;  %3620 = vpow2.f32 %v1687_v11  ;;  %v2578_v41 = vstv %s2447_s17  ;;  %s3486_s17 = sshll.u32 %s2014_s14, 5 }
 0x23f   : > { %v1669_v26 = vadd.f32 1.0, %v3619_v16  ;;  %v1628_v39 = vpop.f32.mrf.mxu2  ;;  %v1641_v40 = vpop.f32.mrf.mxu3  ;;  %vm2579_vm10 = vcmp.lt.s32.totalorder %v2578_v41, %v4526_v4 }
 0x240   : > { %3622 = vrcp.f32 %v1650_v20  ;;  %v1660_v10 = vand.u32 2147483647, %v1650_v20  ;;  %v1662_v14 = vand.u32 2147483648, %v1650_v20  ;;  %vm1656_vm4 = vweird.f32 %v1650_v20 }
 0x241   : > { %3624 = vrcp.f32 %v1669_v26  ;;  %v1681_v46 = vand.u32 2147483648, %v1669_v26  ;;  %v1679_v28 = vand.u32 2147483647, %v1669_v26  ;;  %vm1675_vm5 = vweird.f32 %v1669_v26 }
 0x242   : > { %v1663_v16 = vor.u32 1.1754944e-38, %v1662_v14  ;;  %vm1661_vm8 = vcmp.eq.f32.partialorder %v1660_v10, 8.507059e+37 }
 0x243   : > { %vm1680_vm9 = vcmp.eq.f32.partialorder %v1679_v28, 8.507059e+37 }
 0x244   : > { %v3621_v45 = vpop.eup %3620 }
 0x245   : > { %v4657_v21 = vadd.f32 1.0, %v3621_v45  ;;  %v1682_v45 = vor.u32 1.1754944e-38, %v1681_v46 }
 0x246   : > { %v3623_v32 = vpop.eup %3622 }
 0x247   : > { %v3625_v59 = vpop.eup %3624  ;;  %v1652_v60 = vmul.f32 %v3623_v32, %v1650_v20  ;;  %3626 = vrcp.f32 %v4657_v21  ;;  %vm1657_vm2 = vweird.f32 %v3623_v32  ;;  %vm1695_vm13 = vweird.f32 %v4657_v21 }
 0x248   : > { %v1671_v62 = vmul.f32 %v3625_v59, %v1669_v26  ;;  %3628 = vtanh.f32 %v1645_v52  ;;  %vm1676_vm3 = vweird.f32 %v3625_v59  ;;  %vm1658_vm6 = vmor %vm1656_vm4, %vm1657_vm2  ;;  %v1699_v46 = vand.u32 2147483647, %v4657_v21 }
 0x249   : > { %v1653_v0 = vsub.f32 1.0, %v1652_v60  ;;  %vm1677_vm7 = vmor %vm1675_vm5, %vm1676_vm3 }
 0x24a   : > { %v1672_v3 = vsub.f32 1.0, %v1671_v62  ;;  %vm1700_vm15 = vcmp.eq.f32.partialorder %v1699_v46, 8.507059e+37 }
 0x24b   : > { %v1654_v22 = vmul.f32 %v3623_v32, %v1653_v0  ;;  %v2580_v0 = vsel %vm2579_vm10, 1, %v3879_v51 }
 0x24c   : > { %v1673_v33 = vmul.f32 %v3625_v59, %v1672_v3  ;;  %v1715_v3 = vpop.permute.xlu0 %1714  ;;  %2582 = vperm.xlu1 %3598, %v2580_v0  }
 0x24d   : > { %v3627_v34 = vpop.eup %3626  ;;  %v1655_v11 = vadd.f32 %v3623_v32, %v1654_v22  ;;  %vm1716_vm11 = vcmp.eq.s32.totalorder %v1715_v3, 1 }
 0x24e   : > { %v1674_v39 = vadd.f32 %v3625_v59, %v1673_v33  ;;  %v1691_v40 = vmul.f32 %v3627_v34, %v4657_v21  ;;  %v3629_v44 = vpop.eup %3628  ;;  %vm1696_vm12 = vweird.f32 %v3627_v34 }
 0x24f   : > { %v1659_v35 = vsel %vm1658_vm6, %v3623_v32, %v1655_v11  ;;  %vm1697_vm14 = vmor %vm1695_vm13, %vm1696_vm12 }
 0x250   : > { %v1664_v52 = vsel %vm1661_vm8, %v1663_v16, %v1659_v35  ;;  %v1678_v37 = vsel %vm1677_vm7, %v3625_v59, %v1674_v39  ;;  %v1692_v54 = vsub.f32 1.0, %v1691_v40  ;;  %v1701_v59 = vand.u32 2147483648, %v4657_v21 }
 0x251   : > { %v1683_v20 = vsel %vm1680_vm9, %v1682_v45, %v1678_v37  ;;  %v1706_v60 = vmul.f32 %v3629_v44, %v1664_v52 }
 0x252   : > { %v1705_v26 = vmul.f32 %v1683_v20, %v4598_v23  ;;  %v1693_v62 = vmul.f32 %v3627_v34, %v1692_v54  ;;  %v1702_v22 = vor.u32 1.1754944e-38, %v1701_v59  ;;  %v1734_v54 = vld [vmem:[%s4720_s9 + $0x18] sm:$0xff] }
 0x254   : > { %v1707_v14 = vadd.f32 %v1706_v60, %v1705_v26  ;;  %v1694_v32 = vadd.f32 %v3627_v34, %v1693_v62 }
 0x256   : > { %3630 = vtanh.f32 %v1707_v14  ;;  %v4671_v4 = vsel %vm1716_vm11, %v1707_v14, %v4598_v23  ;;  %v1698_v10 = vsel %vm1697_vm14, %v3627_v34, %v1694_v32  ;;  %v1732_v34 = vld [vmem:[%s4720_s9 + $0x8] sm:$0xff] }
 0x257   : > { %v1703_v27 = vsel %vm1700_vm15, %v1702_v22, %v1698_v10 }
 0x25c   : > { %v3631_v28 = vpop.eup %3630 }
 0x25d   : > { %v1709_v33 = vmul.f32 %v3631_v28, %v1703_v27  ;;  %v1733_v27 = vld [vmem:[%s4720_s9 + $0x10] sm:$0xff] }
 0x25f   : > { %v1717_v11 = vsel %vm1716_vm11, %v1709_v33, 0.0  ;;  %v4681_v41 = vsel %vm1716_vm11, %v1709_v33, %v4606_v49  ;;  %v1731_v49 = vld [vmem:[%s4720_s9] sm:$0xff]  ;;  %s3489_s9 = sshll.u32 %s2159_s7, 5 }
 0x260   : > { %v1735_v23 = vpack.c.bf16 %v4681_v41, %v4681_v41  ;;  %3341 = vst [vmem:[%s2779_s6 + $0x8] sm:$0xff] %v1717_v11  ;;  %s4845_s6 = scalar_lea.vmem [#allocation2], %s3486_s17 }
 0x262   : > { %1744 = vmatmul.bf16.vlgmr.msra.gmra.mxu0 %v1735_v23  ;;  %1757 = vmatmul.bf16.vlgmr.msra.gmra.mxu1 %v1735_v23 }
 0x263   : > { %1770 = vmatmul.bf16.vlgmr.msra.gmra.mxu2 %v1735_v23  ;;  %1783 = vmatmul.bf16.vlgmr.msra.gmra.mxu3 %v1735_v23 }
 0x264   : > { %2024 = vmatpush.bf16.msra.mxu0 %v4272_v25  ;;  %2037 = vmatpush.bf16.msra.mxu1 %v4277_v29 }
 0x265   : > { %2050 = vmatpush.bf16.msra.mxu2 %v4321_v58  ;;  %2063 = vmatpush.bf16.msra.mxu3 %v4279_v30 }
 0x268   : > { %2025 = vmatpush.bf16.msra.mxu0 %v4299_v42  ;;  %2038 = vmatpush.bf16.msra.mxu1 %v4304_v47 }
 0x269   : > { %2051 = vmatpush.bf16.msra.mxu2 %v4345_v6  ;;  %2064 = vmatpush.bf16.msra.mxu3 %v4306_v48 }
 0x26c   : > { %2026 = vmatpush.bf16.msra.mxu0 %v4312_v53  ;;  %2039 = vmatpush.bf16.msra.mxu1 %v4319_v57 }
 0x26d   : > { %2052 = vmatpush.bf16.msra.mxu2 %v4366_v17  ;;  %2065 = vmatpush.bf16.msra.mxu3 %v4325_v61 }
 0x270   : > { %2027 = vmatpush.bf16.msra.mxu0 %v4338_v1  ;;  %2040 = vmatpush.bf16.msra.mxu1 %v4343_v5 }
 0x271   : > { %2053 = vmatpush.bf16.msra.mxu2 %v4380_v24  ;;  %2066 = vmatpush.bf16.msra.mxu3 %v4351_v8 }
 0x274   : > { %2028 = vmatpush.bf16.msra.mxu0 %v4358_v12  ;;  %2041 = vmatpush.bf16.msra.mxu1 %v4360_v13 }
 0x275   : > { %2054 = vmatpush.bf16.msra.mxu2 %v4394_v38  ;;  %2067 = vmatpush.bf16.msra.mxu3 %v4369_v19 }
 0x278   : > { %2029 = vmatpush.bf16.msra.mxu0 %v4387_v31  ;;  %2042 = vmatpush.bf16.msra.mxu1 %v4392_v36 }
 0x279   : > { %2055 = vmatpush.bf16.msra.mxu2 %v4412_v55  ;;  %2068 = vmatpush.bf16.msra.mxu3 %v4400_v43 }
 0x27c   : > { %2030 = vmatpush.bf16.msra.mxu0 %v4406_v50  ;;  %2043 = vmatpush.bf16.msra.mxu1 %v4414_v56 }
 0x27d   : > { %2056 = vmatpush.bf16.msra.mxu2 %v4422_v63  ;;  %2069 = vmatpush.bf16.msra.mxu3 %v4425_v2 }
 0x280   : > { %2031 = vmatpush.bf16.msra.mxu0 %v4431_v7  ;;  %2044 = vmatpush.bf16.msra.mxu1 %v4436_v9 }
 0x281   : > { %2057 = vmatpush.bf16.msra.mxu2 %v4443_v15  ;;  %2070 = vmatpush.bf16.msra.mxu3 %v4448_v18 }
 0x2df   : > { %v1745_v21 = vpop.f32.mrf.mxu0  ;;  %v1758_v16 = vpop.f32.mrf.mxu1 }
 0x2e0   : > { %v1788_v39 = vadd.f32 %v1745_v21, %v1731_v49  ;;  %v1789_v40 = vadd.f32 %v1758_v16, %v1732_v34 }
 0x2e2   : > { %v1792_v44 = vsub.f32 0.0, %v1788_v39  ;;  %v1811_v45 = vsub.f32 0.0, %v1789_v40 }
 0x2e4   : > { %v1793_v35 = vmul.f32 1.442695, %v1792_v44  ;;  %v1812_v52 = vmul.f32 1.442695, %v1811_v45 }
 0x2e6   : > { %3632 = vpow2.f32 %v1793_v35  ;;  %v1771_v37 = vpop.f32.mrf.mxu2  ;;  %v1784_v20 = vpop.f32.mrf.mxu3 }
 0x2e7   : > { %3634 = vpow2.f32 %v1812_v52  ;;  %v1791_v60 = vadd.f32 %v1784_v20, %v1734_v54  ;;  %v1747_v26 = vpop.f32.mrf.mxu0  ;;  %v1760_v62 = vpop.f32.mrf.mxu1  ;;  %v1790_v23 = vadd.f32 %v1771_v37, %v1733_v27 }
 0x2e9   : > { %v1831_v0 = vsub.f32 0.0, %v1791_v60 }
 0x2eb   : > { %v1832_v3 = vmul.f32 1.442695, %v1831_v0 }
 0x2ec   : > { %v3633_v14 = vpop.eup %3632 }
 0x2ed   : > { %v3635_v32 = vpop.eup %3634  ;;  %v1795_v59 = vadd.f32 1.0, %v3633_v14  ;;  %3636 = vpow2.f32 %v1832_v3 }
 0x2ee   : > { %v1814_v46 = vadd.f32 1.0, %v3635_v32  ;;  %v1773_v10 = vpop.f32.mrf.mxu2  ;;  %v1786_v22 = vpop.f32.mrf.mxu3 }
 0x2ef   : > { %3638 = vrcp.f32 %v1795_v59  ;;  %v1807_v40 = vand.u32 2147483648, %v1795_v59  ;;  %v1805_v45 = vand.u32 2147483647, %v1795_v59  ;;  %vm1801_vm2 = vweird.f32 %v1795_v59 }
 0x2f0   : > { %3640 = vrcp.f32 %v1814_v46  ;;  %v1826_v35 = vand.u32 2147483648, %v1814_v46  ;;  %v1824_v54 = vand.u32 2147483647, %v1814_v46  ;;  %vm1820_vm4 = vweird.f32 %v1814_v46 }
 0x2f1   : > { %v1808_v37 = vor.u32 1.1754944e-38, %v1807_v40  ;;  %vm1806_vm5 = vcmp.eq.f32.partialorder %v1805_v45, 8.507059e+37 }
 0x2f2   : > { %v1827_v3 = vor.u32 1.1754944e-38, %v1826_v35  ;;  %vm1825_vm7 = vcmp.eq.f32.partialorder %v1824_v54, 8.507059e+37 }
 0x2f3   : > { %v3637_v28 = vpop.eup %3636 }
 0x2f4   : > { %v1834_v33 = vadd.f32 1.0, %v3637_v28 }
 0x2f5   : > { %v3639_v11 = vpop.eup %3638 }
 0x2f6   : > { %v3641_v49 = vpop.eup %3640  ;;  %v1797_v21 = vmul.f32 %v3639_v11, %v1795_v59  ;;  %3642 = vrcp.f32 %v1834_v33  ;;  %vm1802_vm0 = vweird.f32 %v3639_v11  ;;  %vm1840_vm10 = vweird.f32 %v1834_v33 }
 0x2f7   : > { %v1816_v34 = vmul.f32 %v3641_v49, %v1814_v46  ;;  %3644 = vtanh.f32 %v1790_v23  ;;  %vm1821_vm1 = vweird.f32 %v3641_v49  ;;  %vm1803_vm3 = vmor %vm1801_vm2, %vm1802_vm0  ;;  %v1860_v23 = vpop.permute.xlu1 %1859 }
 0x2f8   : > { %v1798_v16 = vsub.f32 1.0, %v1797_v21  ;;  %vm1822_vm6 = vmor %vm1820_vm4, %vm1821_vm1  ;;  %vm1861_vm8 = vcmp.eq.s32.totalorder %v1860_v23, 1 }
 0x2f9   : > { %v1817_v39 = vsub.f32 1.0, %v1816_v34 }
 0x2fa   : > { %v1799_v44 = vmul.f32 %v3639_v11, %v1798_v16 }
 0x2fb   : > { %v1818_v52 = vmul.f32 %v3641_v49, %v1817_v39 }
 0x2fc   : > { %v3643_v20 = vpop.eup %3642  ;;  %v1800_v60 = vadd.f32 %v3639_v11, %v1799_v44 }
 0x2fd   : > { %v1836_v26 = vmul.f32 %v3643_v20, %v1834_v33  ;;  %v1819_v62 = vadd.f32 %v3641_v49, %v1818_v52  ;;  %v3645_v14 = vpop.eup %3644  ;;  %vm1841_vm9 = vweird.f32 %v3643_v20 }
 0x2fe   : > { %v1804_v0 = vsel %vm1803_vm3, %v3639_v11, %v1800_v60  ;;  %v1846_v11 = vand.u32 2147483648, %v1834_v33  ;;  %vm1842_vm11 = vmor %vm1840_vm10, %vm1841_vm9 }
 0x2ff   : > { %v1809_v32 = vsel %vm1806_vm5, %v1808_v37, %v1804_v0  ;;  %v1823_v10 = vsel %vm1822_vm6, %v3641_v49, %v1819_v62  ;;  %v1837_v22 = vsub.f32 1.0, %v1836_v26  ;;  %v1844_v49 = vand.u32 2147483647, %v1834_v33 }
 0x300   : > { %v1851_v28 = vmul.f32 %v3645_v14, %v1809_v32  ;;  %v1828_v27 = vsel %vm1825_vm7, %v1827_v3, %v1823_v10  ;;  %v1847_v40 = vor.u32 1.1754944e-38, %v1846_v11  ;;  %v1878_v10 = vld [vmem:[%s4776_s23 + $0x18] sm:$0xff] }
 0x301   : > { %v1838_v21 = vmul.f32 %v3643_v20, %v1837_v22  ;;  %v1850_v59 = vmul.f32 %v1828_v27, %v4671_v4  ;;  %vm1845_vm12 = vcmp.eq.f32.partialorder %v1844_v49, 8.507059e+37 }
 0x303   : > { %v1852_v34 = vadd.f32 %v1851_v28, %v1850_v59  ;;  %v1839_v46 = vadd.f32 %v3643_v20, %v1838_v21 }
 0x305   : > { %3646 = vtanh.f32 %v1852_v34  ;;  %v4729_v16 = vsel %vm1861_vm8, %v1852_v34, %v4671_v4  ;;  %v1843_v39 = vsel %vm1842_vm11, %v3643_v20, %v1839_v46  ;;  %v1876_v20 = vld [vmem:[%s4776_s23 + $0x8] sm:$0xff] }
 0x306   : > { %v1848_v45 = vsel %vm1845_vm12, %v1847_v40, %v1843_v39 }
 0x30b   : > { %v3647_v44 = vpop.eup %3646 }
 0x30c   : > { %v1854_v35 = vmul.f32 %v3647_v44, %v1848_v45  ;;  %v2143_v44 = vstv %s2012_s0  ;;  %s3494_s0 = sadd.s32 56, %s3501_s30 }
 0x30e   : > { %v1862_v52 = vsel %vm1861_vm8, %v1854_v35, 0.0  ;;  %v4737_v54 = vsel %vm1861_vm8, %v1854_v35, %v4681_v41  ;;  %v1875_v41 = vld [vmem:[%s4776_s23] sm:$0xff] }
 0x30f   : > { %3346 = vst [vmem:[%s2785_s2 + $0x10] sm:$0xff] %v1862_v52  ;;  %v1879_v4 = vpack.c.bf16 %v4737_v54, %v4737_v54  ;;  %v3728_v35 = vld [vmem:[%s5060_s22] sm:$0xff]  ;;  %v1877_v52 = vld [vmem:[%s4776_s23 + $0x10] sm:$0xff]  ;;  %s4900_s2 = scalar_lea.vmem [#allocation2], %s3489_s9  ;;  %s3492_s23 = sshll.u32 %s2304_s25, 5 }
 0x310   : > { %vm2144_vm13 = vcmp.lt.s32.totalorder %v2143_v44, %v3728_v35  ;;  %s4924_s29 = scalar_lea.vmem [#allocation2], %s3492_s23 }
 0x311   : > { %1888 = vmatmul.bf16.vlgmr.msrb.gmra.mxu0 %v1879_v4  ;;  %1901 = vmatmul.bf16.vlgmr.msrb.gmra.mxu1 %v1879_v4 }
 0x312   : > { %1914 = vmatmul.bf16.vlgmr.msrb.gmra.mxu2 %v1879_v4  ;;  %1927 = vmatmul.bf16.vlgmr.msrb.gmra.mxu3 %v1879_v4 }
 0x313   : > { %2169 = vmatpush.bf16.msrb.mxu0 %v4272_v25  ;;  %2182 = vmatpush.bf16.msrb.mxu1 %v4277_v29 }
 0x314   : > { %2195 = vmatpush.bf16.msrb.mxu2 %v4321_v58  ;;  %2208 = vmatpush.bf16.msrb.mxu3 %v4279_v30 }
 0x317   : > { %2170 = vmatpush.bf16.msrb.mxu0 %v4299_v42  ;;  %2183 = vmatpush.bf16.msrb.mxu1 %v4304_v47 }
 0x318   : > { %2196 = vmatpush.bf16.msrb.mxu2 %v4345_v6  ;;  %2209 = vmatpush.bf16.msrb.mxu3 %v4306_v48 }
 0x31b   : > { %2171 = vmatpush.bf16.msrb.mxu0 %v4312_v53  ;;  %2184 = vmatpush.bf16.msrb.mxu1 %v4319_v57 }
 0x31c   : > { %2197 = vmatpush.bf16.msrb.mxu2 %v4366_v17  ;;  %2210 = vmatpush.bf16.msrb.mxu3 %v4325_v61 }
 0x31f   : > { %2172 = vmatpush.bf16.msrb.mxu0 %v4338_v1  ;;  %2185 = vmatpush.bf16.msrb.mxu1 %v4343_v5 }
 0x320   : > { %2198 = vmatpush.bf16.msrb.mxu2 %v4380_v24  ;;  %2211 = vmatpush.bf16.msrb.mxu3 %v4351_v8 }
 0x323   : > { %2173 = vmatpush.bf16.msrb.mxu0 %v4358_v12  ;;  %2186 = vmatpush.bf16.msrb.mxu1 %v4360_v13 }
 0x324   : > { %2199 = vmatpush.bf16.msrb.mxu2 %v4394_v38  ;;  %2212 = vmatpush.bf16.msrb.mxu3 %v4369_v19 }
 0x327   : > { %2174 = vmatpush.bf16.msrb.mxu0 %v4387_v31  ;;  %2187 = vmatpush.bf16.msrb.mxu1 %v4392_v36 }
 0x328   : > { %2200 = vmatpush.bf16.msrb.mxu2 %v4412_v55  ;;  %2213 = vmatpush.bf16.msrb.mxu3 %v4400_v43 }
 0x32b   : > { %2175 = vmatpush.bf16.msrb.mxu0 %v4406_v50  ;;  %2188 = vmatpush.bf16.msrb.mxu1 %v4414_v56 }
 0x32c   : > { %2201 = vmatpush.bf16.msrb.mxu2 %v4422_v63  ;;  %2214 = vmatpush.bf16.msrb.mxu3 %v4425_v2 }
 0x32f   : > { %2176 = vmatpush.bf16.msrb.mxu0 %v4431_v7  ;;  %2189 = vmatpush.bf16.msrb.mxu1 %v4436_v9 }
 0x330   : > { %2202 = vmatpush.bf16.msrb.mxu2 %v4443_v15  ;;  %2215 = vmatpush.bf16.msrb.mxu3 %v4448_v18 }
 0x38e   : > { %v1889_v33 = vpop.f32.mrf.mxu0  ;;  %v1902_v60 = vpop.f32.mrf.mxu1 }
 0x38f   : > { %v1932_v37 = vadd.f32 %v1889_v33, %v1875_v41  ;;  %v1933_v26 = vadd.f32 %v1902_v60, %v1876_v20  ;;  %v2145_v41 = vsel %vm2144_vm13, 1, %v3879_v51  ;;  %v2288_v33 = vstv %s2157_s4  ;;  %s2449_s4 = sshra.s32 %s3494_s0, 3 }
 0x390   : > { %2147 = vperm.xlu2 %3599, %v2145_v41   ;;  %vm2289_vm14 = vcmp.lt.s32.totalorder %v2288_v33, %v3728_v35  ;;  %s3495_s10 = sshll.u32 %s2449_s4, 5 }
 0x391   : > { %v1936_v62 = vsub.f32 0.0, %v1932_v37  ;;  %v1955_v0 = vsub.f32 0.0, %v1933_v26  ;;  %s4948_s12 = scalar_lea.vmem [#allocation2], %s3495_s10 }
 0x393   : > { %v1937_v3 = vmul.f32 1.442695, %v1936_v62  ;;  %v1956_v14 = vmul.f32 1.442695, %v1955_v0 }
 0x395   : > { %3648 = vpow2.f32 %v1937_v3  ;;  %v1915_v32 = vpop.f32.mrf.mxu2  ;;  %v1928_v22 = vpop.f32.mrf.mxu3 }
 0x396   : > { %3650 = vpow2.f32 %v1956_v14  ;;  %v1935_v28 = vadd.f32 %v1928_v22, %v1878_v10  ;;  %v1891_v27 = vpop.f32.mrf.mxu0  ;;  %v1904_v23 = vpop.f32.mrf.mxu1  ;;  %v1934_v60 = vadd.f32 %v1915_v32, %v1877_v52 }
 0x397   : > { %v2290_v27 = vsel %vm2289_vm14, 1, %v3879_v51 }
 0x398   : > { %v1975_v21 = vsub.f32 0.0, %v1935_v28  ;;  %2292 = vperm.xlu2 %3599, %v2290_v27  }
 0x39a   : > { %v1976_v59 = vmul.f32 1.442695, %v1975_v21 }
 0x39b   : > { %v3649_v34 = vpop.eup %3648 }
 0x39c   : > { %v3651_v46 = vpop.eup %3650  ;;  %v1939_v11 = vadd.f32 1.0, %v3649_v34  ;;  %3652 = vpow2.f32 %v1976_v59 }
 0x39d   : > { %v1958_v49 = vadd.f32 1.0, %v3651_v46  ;;  %v1917_v39 = vpop.f32.mrf.mxu2  ;;  %v1930_v40 = vpop.f32.mrf.mxu3 }
 0x39e   : > { %3654 = vrcp.f32 %v1939_v11  ;;  %v1949_v14 = vand.u32 2147483647, %v1939_v11  ;;  %v1951_v10 = vand.u32 2147483648, %v1939_v11  ;;  %vm1945_vm1 = vweird.f32 %v1939_v11 }
 0x39f   : > { %3656 = vrcp.f32 %v1958_v49  ;;  %v1970_v22 = vand.u32 2147483648, %v1958_v49  ;;  %v1968_v21 = vand.u32 2147483647, %v1958_v49  ;;  %vm1964_vm2 = vweird.f32 %v1958_v49 }
 0x3a0   : > { %v1952_v34 = vor.u32 1.1754944e-38, %v1951_v10  ;;  %vm1950_vm5 = vcmp.eq.f32.partialorder %v1949_v14, 8.507059e+37 }
 0x3a1   : > { %v1971_v40 = vor.u32 1.1754944e-38, %v1970_v22  ;;  %vm1969_vm6 = vcmp.eq.f32.partialorder %v1968_v21, 8.507059e+37  ;;  %v2020_v21 = vld [vmem:[%s4845_s6 + $0x8] sm:$0xff] }
 0x3a2   : > { %v3653_v45 = vpop.eup %3652 }
 0x3a3   : > { %v1978_v4 = vadd.f32 1.0, %v3653_v45 }
 0x3a4   : > { %v3655_v20 = vpop.eup %3654 }
 0x3a5   : > { %v3657_v37 = vpop.eup %3656  ;;  %v1941_v26 = vmul.f32 %v3655_v20, %v1939_v11  ;;  %3658 = vrcp.f32 %v1978_v4  ;;  %vm1946_vm15 = vweird.f32 %v3655_v20  ;;  %vm1984_vm9 = vweird.f32 %v1978_v4 }
 0x3a6   : > { %v1960_v62 = vmul.f32 %v3657_v37, %v1958_v49  ;;  %3660 = vtanh.f32 %v1934_v60  ;;  %vm1965_vm0 = vweird.f32 %v3657_v37  ;;  %vm1947_vm3 = vmor %vm1945_vm1, %vm1946_vm15  ;;  %v2004_v49 = vpop.permute.xlu1 %2003 }
 0x3a7   : > { %v1942_v0 = vsub.f32 1.0, %v1941_v26  ;;  %vm1966_vm4 = vmor %vm1964_vm2, %vm1965_vm0  ;;  %vm2005_vm7 = vcmp.eq.s32.totalorder %v2004_v49, 1 }
 0x3a8   : > { %v1961_v3 = vsub.f32 1.0, %v1960_v62 }
 0x3a9   : > { %v1943_v28 = vmul.f32 %v3655_v20, %v1942_v0 }
 0x3aa   : > { %v1962_v23 = vmul.f32 %v3657_v37, %v1961_v3 }
 0x3ab   : > { %v3659_v32 = vpop.eup %3658  ;;  %v1944_v59 = vadd.f32 %v3655_v20, %v1943_v28 }
 0x3ac   : > { %v1963_v46 = vadd.f32 %v3657_v37, %v1962_v23  ;;  %v1980_v39 = vmul.f32 %v3659_v32, %v1978_v4  ;;  %v3661_v45 = vpop.eup %3660  ;;  %vm1985_vm8 = vweird.f32 %v3659_v32 }
 0x3ad   : > { %v1948_v44 = vsel %vm1947_vm3, %v3655_v20, %v1944_v59  ;;  %v1990_v20 = vand.u32 2147483648, %v1978_v4  ;;  %vm1986_vm10 = vmor %vm1984_vm9, %vm1985_vm8 }
 0x3ae   : > { %v1953_v35 = vsel %vm1950_vm5, %v1952_v34, %v1948_v44  ;;  %v1967_v52 = vsel %vm1966_vm4, %v3657_v37, %v1963_v46  ;;  %v1981_v51 = vsub.f32 1.0, %v1980_v39  ;;  %v1988_v37 = vand.u32 2147483647, %v1978_v4 }
 0x3af   : > { %v1972_v41 = vsel %vm1969_vm6, %v1971_v40, %v1967_v52  ;;  %v1995_v33 = vmul.f32 %v3661_v45, %v1953_v35  ;;  %v1991_v14 = vor.u32 1.1754944e-38, %v1990_v20  ;;  %v2022_v35 = vld [vmem:[%s4845_s6 + $0x18] sm:$0xff] }
 0x3b0   : > { %v1994_v60 = vmul.f32 %v1972_v41, %v4729_v16  ;;  %v1982_v11 = vmul.f32 %v3659_v32, %v1981_v51  ;;  %vm1989_vm11 = vcmp.eq.f32.partialorder %v1988_v37, 8.507059e+37 }
 0x3b2   : > { %v1996_v26 = vadd.f32 %v1995_v33, %v1994_v60  ;;  %v1983_v62 = vadd.f32 %v3659_v32, %v1982_v11 }
 0x3b4   : > { %3662 = vtanh.f32 %v1996_v26  ;;  %v4796_v0 = vsel %vm2005_vm7, %v1996_v26, %v4729_v16  ;;  %v1987_v3 = vsel %vm1986_vm10, %v3659_v32, %v1983_v62 }
 0x3b5   : > { %v1992_v22 = vsel %vm1989_vm11, %v1991_v14, %v1987_v3 }
 0x3ba   : > { %v3663_v10 = vpop.eup %3662 }
 0x3bb   : > { %v1998_v28 = vmul.f32 %v3663_v10, %v1992_v22  ;;  %v2021_v10 = vld [vmem:[%s4845_s6 + $0x10] sm:$0xff] }
 0x3bd   : > { %v2006_v27 = vsel %vm2005_vm7, %v1998_v28, 0.0  ;;  %v4804_v23 = vsel %vm2005_vm7, %v1998_v28, %v4737_v54  ;;  %v2019_v54 = vld [vmem:[%s4845_s6] sm:$0xff]  ;;  %s5061_s6 = sld [smem:[#allocation26_spill]] (%p4013_p11) }
 0x3be   : > { %v2023_v16 = vpack.c.bf16 %v4804_v23, %v4804_v23  ;;  %3351 = vst [vmem:[%s2790_s19 + $0x18] sm:$0xff] %v2006_v27  ;;  %s2812_s19 = scalar_lea.vmem %s4100_s21, %s3501_s30 [#allocation7] }
 0x3c0   : > { %2032 = vmatmul.bf16.vlgmr.msra.gmra.mxu0 %v2023_v16  ;;  %2045 = vmatmul.bf16.vlgmr.msra.gmra.mxu1 %v2023_v16 }
 0x3c1   : > { %2058 = vmatmul.bf16.vlgmr.msra.gmra.mxu2 %v2023_v16  ;;  %2071 = vmatmul.bf16.vlgmr.msra.gmra.mxu3 %v2023_v16 }
 0x3c2   : > { %2314 = vmatpush.bf16.msra.mxu0 %v4272_v25  ;;  %2327 = vmatpush.bf16.msra.mxu1 %v4277_v29 }
 0x3c3   : > { %2340 = vmatpush.bf16.msra.mxu2 %v4321_v58  ;;  %2353 = vmatpush.bf16.msra.mxu3 %v4279_v30 }
 0x3c6   : > { %2315 = vmatpush.bf16.msra.mxu0 %v4299_v42  ;;  %2328 = vmatpush.bf16.msra.mxu1 %v4304_v47 }
 0x3c7   : > { %2341 = vmatpush.bf16.msra.mxu2 %v4345_v6  ;;  %2354 = vmatpush.bf16.msra.mxu3 %v4306_v48 }
 0x3ca   : > { %2316 = vmatpush.bf16.msra.mxu0 %v4312_v53  ;;  %2329 = vmatpush.bf16.msra.mxu1 %v4319_v57 }
 0x3cb   : > { %2342 = vmatpush.bf16.msra.mxu2 %v4366_v17  ;;  %2355 = vmatpush.bf16.msra.mxu3 %v4325_v61 }
 0x3ce   : > { %2317 = vmatpush.bf16.msra.mxu0 %v4338_v1  ;;  %2330 = vmatpush.bf16.msra.mxu1 %v4343_v5 }
 0x3cf   : > { %2343 = vmatpush.bf16.msra.mxu2 %v4380_v24  ;;  %2356 = vmatpush.bf16.msra.mxu3 %v4351_v8 }
 0x3d2   : > { %2318 = vmatpush.bf16.msra.mxu0 %v4358_v12  ;;  %2331 = vmatpush.bf16.msra.mxu1 %v4360_v13 }
 0x3d3   : > { %2344 = vmatpush.bf16.msra.mxu2 %v4394_v38  ;;  %2357 = vmatpush.bf16.msra.mxu3 %v4369_v19 }
 0x3d6   : > { %2319 = vmatpush.bf16.msra.mxu0 %v4387_v31  ;;  %2332 = vmatpush.bf16.msra.mxu1 %v4392_v36 }
 0x3d7   : > { %2345 = vmatpush.bf16.msra.mxu2 %v4412_v55  ;;  %2358 = vmatpush.bf16.msra.mxu3 %v4400_v43 }
 0x3da   : > { %2320 = vmatpush.bf16.msra.mxu0 %v4406_v50  ;;  %2333 = vmatpush.bf16.msra.mxu1 %v4414_v56 }
 0x3db   : > { %2346 = vmatpush.bf16.msra.mxu2 %v4422_v63  ;;  %2359 = vmatpush.bf16.msra.mxu3 %v4425_v2 }
 0x3de   : > { %2321 = vmatpush.bf16.msra.mxu0 %v4431_v7  ;;  %2334 = vmatpush.bf16.msra.mxu1 %v4436_v9 }
 0x3df   : > { %2347 = vmatpush.bf16.msra.mxu2 %v4443_v15  ;;  %2360 = vmatpush.bf16.msra.mxu3 %v4448_v18 }
 0x43d   : > { %v2033_v4 = vpop.f32.mrf.mxu0  ;;  %v2046_v32 = vpop.f32.mrf.mxu1 }
 0x43e   : > { %v2076_v59 = vadd.f32 %v2033_v4, %v2019_v54  ;;  %v2077_v34 = vadd.f32 %v2046_v32, %v2020_v21 }
 0x440   : > { %v2080_v46 = vsub.f32 0.0, %v2076_v59  ;;  %v2099_v39 = vsub.f32 0.0, %v2077_v34 }
 0x442   : > { %v2081_v40 = vmul.f32 1.442695, %v2080_v46  ;;  %v2100_v44 = vmul.f32 1.442695, %v2099_v39 }
 0x444   : > { %3664 = vpow2.f32 %v2081_v40  ;;  %v2059_v45 = vpop.f32.mrf.mxu2  ;;  %v2072_v52 = vpop.f32.mrf.mxu3 }
 0x445   : > { %3666 = vpow2.f32 %v2100_v44  ;;  %v2079_v51 = vadd.f32 %v2072_v52, %v2022_v35  ;;  %v2035_v41 = vpop.f32.mrf.mxu0  ;;  %v2048_v33 = vpop.f32.mrf.mxu1  ;;  %v2078_v27 = vadd.f32 %v2059_v45, %v2021_v10 }
 0x447   : > { %v2119_v60 = vsub.f32 0.0, %v2079_v51 }
 0x449   : > { %v2120_v11 = vmul.f32 1.442695, %v2119_v60 }
 0x44a   : > { %v3665_v49 = vpop.eup %3664 }
 0x44b   : > { %v3667_v26 = vpop.eup %3666  ;;  %v2083_v62 = vadd.f32 1.0, %v3665_v49  ;;  %3668 = vpow2.f32 %v2120_v11 }
 0x44c   : > { %v2102_v20 = vadd.f32 1.0, %v3667_v26  ;;  %v2061_v37 = vpop.f32.mrf.mxu2  ;;  %v2074_v3 = vpop.f32.mrf.mxu3 }
 0x44d   : > { %3670 = vrcp.f32 %v2083_v62  ;;  %v2095_v59 = vand.u32 2147483648, %v2083_v62  ;;  %v2093_v46 = vand.u32 2147483647, %v2083_v62  ;;  %vm2089_vm14 = vweird.f32 %v2083_v62  ;;  %v2148_v26 = vpop.permute.xlu2 %2147 }
 0x44e   : > { %3672 = vrcp.f32 %v2102_v20  ;;  %v2114_v39 = vand.u32 2147483648, %v2102_v20  ;;  %v2112_v44 = vand.u32 2147483647, %v2102_v20  ;;  %vm2108_vm0 = vweird.f32 %v2102_v20 }
 0x44f   : > { %v2096_v45 = vor.u32 1.1754944e-38, %v2095_v59  ;;  %vm2094_vm1 = vcmp.eq.f32.partialorder %v2093_v46, 8.507059e+37  ;;  %vm2149_vm4 = vcmp.eq.s32.totalorder %v2148_v26, 1 }
 0x450   : > { %v2115_v60 = vor.u32 1.1754944e-38, %v2114_v39  ;;  %vm2113_vm3 = vcmp.eq.f32.partialorder %v2112_v44, 8.507059e+37 }
 0x451   : > { %v3669_v14 = vpop.eup %3668 }
 0x452   : > { %v2122_v22 = vadd.f32 1.0, %v3669_v14 }
 0x453   : > { %v3671_v28 = vpop.eup %3670 }
 0x454   : > { %v3673_v16 = vpop.eup %3672  ;;  %v2085_v54 = vmul.f32 %v3671_v28, %v2083_v62  ;;  %3674 = vrcp.f32 %v2122_v22  ;;  %vm2090_vm12 = vweird.f32 %v3671_v28  ;;  %vm2128_vm6 = vweird.f32 %v2122_v22 }
 0x455   : > { %v2104_v4 = vmul.f32 %v3673_v16, %v2102_v20  ;;  %3676 = vtanh.f32 %v2078_v27  ;;  %vm2109_vm13 = vweird.f32 %v3673_v16  ;;  %vm2091_vm15 = vmor %vm2089_vm14, %vm2090_vm12 }
 0x456   : > { %v2086_v21 = vsub.f32 1.0, %v2085_v54  ;;  %vm2110_vm2 = vmor %vm2108_vm0, %vm2109_vm13 }
 0x457   : > { %v2105_v32 = vsub.f32 1.0, %v2104_v4 }
 0x458   : > { %v2087_v34 = vmul.f32 %v3671_v28, %v2086_v21 }
 0x459   : > { %v2106_v40 = vmul.f32 %v3673_v16, %v2105_v32 }
 0x45a   : > { %v3675_v35 = vpop.eup %3674  ;;  %v2088_v52 = vadd.f32 %v3671_v28, %v2087_v34 }
 0x45b   : > { %v2124_v51 = vmul.f32 %v3675_v35, %v2122_v22  ;;  %v2107_v41 = vadd.f32 %v3673_v16, %v2106_v40  ;;  %v3677_v11 = vpop.eup %3676  ;;  %vm2129_vm5 = vweird.f32 %v3675_v35 }
 0x45c   : > { %v2092_v33 = vsel %vm2091_vm15, %v3671_v28, %v2088_v52  ;;  %v2134_v28 = vand.u32 2147483648, %v2122_v22  ;;  %vm2130_vm7 = vmor %vm2128_vm6, %vm2129_vm5 }
 0x45d   : > { %v2097_v49 = vsel %vm2094_vm1, %v2096_v45, %v2092_v33  ;;  %v2111_v37 = vsel %vm2110_vm2, %v3673_v16, %v2107_v41  ;;  %v2125_v3 = vsub.f32 1.0, %v2124_v51  ;;  %v2132_v16 = vand.u32 2147483647, %v2122_v22 }
 0x45e   : > { %v2139_v14 = vmul.f32 %v3677_v11, %v2097_v49  ;;  %v2116_v10 = vsel %vm2113_vm3, %v2115_v60, %v2111_v37  ;;  %v2135_v32 = vor.u32 1.1754944e-38, %v2134_v28  ;;  %v2293_v28 = vpop.permute.xlu2 %2292 }
 0x45f   : > { %v2126_v27 = vmul.f32 %v3675_v35, %v2125_v3  ;;  %v2138_v62 = vmul.f32 %v2116_v10, %v4796_v0  ;;  %vm2133_vm8 = vcmp.eq.f32.partialorder %v2132_v16, 8.507059e+37  ;;  %vm2294_vm1 = vcmp.eq.s32.totalorder %v2293_v28, 1 }
 0x461   : > { %v2140_v54 = vadd.f32 %v2139_v14, %v2138_v62  ;;  %v2127_v20 = vadd.f32 %v3675_v35, %v2126_v27 }
 0x463   : > { %3678 = vtanh.f32 %v2140_v54  ;;  %v4854_v4 = vsel %vm2149_vm4, %v2140_v54, %v4796_v0  ;;  %v2131_v21 = vsel %vm2130_vm7, %v3675_v35, %v2127_v20 }
 0x464   : > { %v2136_v34 = vsel %vm2133_vm8, %v2135_v32, %v2131_v21 }
 0x469   : > { %v3679_v59 = vpop.eup %3678 }
 0x46a   : > { %v2142_v46 = vmul.f32 %v3679_v59, %v2136_v34 }
 0x46c   : > { %v2150_v39 = vsel %vm2149_vm4, %v2142_v46, 0.0  ;;  %v4861_v40 = vsel %vm2149_vm4, %v2142_v46, %v4804_v23 }
 0x46d   : > { %2152 = vst [vmem:[%s2151_s20] sm:$0xff] %v2150_v39  ;;  %v2168_v0 = vpack.c.bf16 %v4861_v40, %v4861_v40 }
 0x46f   : > { %2177 = vmatmul.bf16.vlgmr.msrb.gmra.mxu0 %v2168_v0  ;;  %2190 = vmatmul.bf16.vlgmr.msrb.gmra.mxu1 %v2168_v0 }
 0x470   : > { %2203 = vmatmul.bf16.vlgmr.msrb.gmra.mxu2 %v2168_v0  ;;  %2216 = vmatmul.bf16.vlgmr.msrb.gmra.mxu3 %v2168_v0 }
 0x471   : > { %2459 = vmatpush.bf16.msrb.mxu0 %v4272_v25  ;;  %2472 = vmatpush.bf16.msrb.mxu1 %v4277_v29  ;;  %v2164_v25 = vld [vmem:[%s4900_s2] sm:$0xff] }
 0x472   : > { %2485 = vmatpush.bf16.msrb.mxu2 %v4321_v58  ;;  %2498 = vmatpush.bf16.msrb.mxu3 %v4279_v30  ;;  %v2165_v30 = vld [vmem:[%s4900_s2 + $0x8] sm:$0xff] }
 0x475   : > { %2460 = vmatpush.bf16.msrb.mxu0 %v4299_v42  ;;  %2473 = vmatpush.bf16.msrb.mxu1 %v4304_v47 }
 0x476   : > { %2486 = vmatpush.bf16.msrb.mxu2 %v4345_v6  ;;  %2499 = vmatpush.bf16.msrb.mxu3 %v4306_v48 }
 0x479   : > { %2461 = vmatpush.bf16.msrb.mxu0 %v4312_v53  ;;  %2474 = vmatpush.bf16.msrb.mxu1 %v4319_v57 }
 0x47a   : > { %2487 = vmatpush.bf16.msrb.mxu2 %v4366_v17  ;;  %2500 = vmatpush.bf16.msrb.mxu3 %v4325_v61 }
 0x47d   : > { %2462 = vmatpush.bf16.msrb.mxu0 %v4338_v1  ;;  %2475 = vmatpush.bf16.msrb.mxu1 %v4343_v5  ;;  %v2167_v5 = vld [vmem:[%s4900_s2 + $0x18] sm:$0xff] }
 0x47e   : > { %2488 = vmatpush.bf16.msrb.mxu2 %v4380_v24  ;;  %2501 = vmatpush.bf16.msrb.mxu3 %v4351_v8 }
 0x481   : > { %2463 = vmatpush.bf16.msrb.mxu0 %v4358_v12  ;;  %2476 = vmatpush.bf16.msrb.mxu1 %v4360_v13 }
 0x482   : > { %2489 = vmatpush.bf16.msrb.mxu2 %v4394_v38  ;;  %2502 = vmatpush.bf16.msrb.mxu3 %v4369_v19 }
 0x485   : > { %2464 = vmatpush.bf16.msrb.mxu0 %v4387_v31  ;;  %2477 = vmatpush.bf16.msrb.mxu1 %v4392_v36 }
 0x486   : > { %2490 = vmatpush.bf16.msrb.mxu2 %v4412_v55  ;;  %2503 = vmatpush.bf16.msrb.mxu3 %v4400_v43 }
 0x489   : > { %2465 = vmatpush.bf16.msrb.mxu0 %v4406_v50  ;;  %2478 = vmatpush.bf16.msrb.mxu1 %v4414_v56  ;;  %v2166_v56 = vld [vmem:[%s4900_s2 + $0x10] sm:$0xff] }
 0x48a   : > { %2491 = vmatpush.bf16.msrb.mxu2 %v4422_v63  ;;  %2504 = vmatpush.bf16.msrb.mxu3 %v4425_v2 }
 0x48d   : > { %2466 = vmatpush.bf16.msrb.mxu0 %v4431_v7  ;;  %2479 = vmatpush.bf16.msrb.mxu1 %v4436_v9 }
 0x48e   : > { %2492 = vmatpush.bf16.msrb.mxu2 %v4443_v15  ;;  %2505 = vmatpush.bf16.msrb.mxu3 %v4448_v18 }
 0x4ec   : > { %v2178_v29 = vpop.f32.mrf.mxu0  ;;  %v2191_v42 = vpop.f32.mrf.mxu1 }
 0x4ed   : > { %v2221_v47 = vadd.f32 %v2178_v29, %v2164_v25  ;;  %v2222_v48 = vadd.f32 %v2191_v42, %v2165_v30 }
 0x4ef   : > { %v2225_v53 = vsub.f32 0.0, %v2221_v47  ;;  %v2244_v57 = vsub.f32 0.0, %v2222_v48 }
 0x4f1   : > { %v2226_v58 = vmul.f32 1.442695, %v2225_v53  ;;  %v2245_v61 = vmul.f32 1.442695, %v2244_v57  ;;  %v2310_v57 = vld [vmem:[%s4924_s29 + $0x8] sm:$0xff] }
 0x4f3   : > { %3680 = vpow2.f32 %v2226_v58  ;;  %v2204_v1 = vpop.f32.mrf.mxu2  ;;  %v2217_v6 = vpop.f32.mrf.mxu3 }
 0x4f4   : > { %3682 = vpow2.f32 %v2245_v61  ;;  %v2224_v8 = vadd.f32 %v2217_v6, %v2167_v5  ;;  %v2180_v12 = vpop.f32.mrf.mxu0  ;;  %v2193_v13 = vpop.f32.mrf.mxu1  ;;  %v2223_v7 = vadd.f32 %v2204_v1, %v2166_v56 }
 0x4f6   : > { %v2264_v17 = vsub.f32 0.0, %v2224_v8 }
 0x4f8   : > { %v2265_v19 = vmul.f32 1.442695, %v2264_v17  ;;  %v2312_v17 = vld [vmem:[%s4924_s29 + $0x18] sm:$0xff] }
 0x4f9   : > { %v3681_v24 = vpop.eup %3680 }
 0x4fa   : > { %v3683_v31 = vpop.eup %3682  ;;  %v2228_v36 = vadd.f32 1.0, %v3681_v24  ;;  %3684 = vpow2.f32 %v2265_v19 }
 0x4fb   : > { %v2247_v38 = vadd.f32 1.0, %v3683_v31  ;;  %v2206_v43 = vpop.f32.mrf.mxu2  ;;  %v2219_v50 = vpop.f32.mrf.mxu3 }
 0x4fc   : > { %3686 = vrcp.f32 %v2228_v36  ;;  %v2240_v44 = vand.u32 2147483648, %v2228_v36  ;;  %v2238_v45 = vand.u32 2147483647, %v2228_v36  ;;  %vm2234_vm11 = vweird.f32 %v2228_v36 }
 0x4fd   : > { %3688 = vrcp.f32 %v2247_v38  ;;  %v2259_v35 = vand.u32 2147483648, %v2247_v38  ;;  %v2257_v41 = vand.u32 2147483647, %v2247_v38  ;;  %vm2253_vm12 = vweird.f32 %v2247_v38 }
 0x4fe   : > { %v2241_v11 = vor.u32 1.1754944e-38, %v2240_v44  ;;  %vm2239_vm15 = vcmp.eq.f32.partialorder %v2238_v45, 8.507059e+37 }
 0x4ff   : > { %v2260_v37 = vor.u32 1.1754944e-38, %v2259_v35  ;;  %vm2258_vm0 = vcmp.eq.f32.partialorder %v2257_v41, 8.507059e+37 }
 0x500   : > { %v3685_v55 = vpop.eup %3684 }
 0x501   : > { %v2267_v63 = vadd.f32 1.0, %v3685_v55 }
 0x502   : > { %v3687_v2 = vpop.eup %3686 }
 0x503   : > { %v3689_v9 = vpop.eup %3688  ;;  %v2230_v15 = vmul.f32 %v3687_v2, %v2228_v36  ;;  %3690 = vrcp.f32 %v2267_v63  ;;  %vm2235_vm9 = vweird.f32 %v3687_v2  ;;  %v2279_v34 = vand.u32 2147483648, %v2267_v63 }
 0x504   : > { %v2249_v18 = vmul.f32 %v3689_v9, %v2247_v38  ;;  %3692 = vtanh.f32 %v2223_v7  ;;  %vm2254_vm10 = vweird.f32 %v3689_v9  ;;  %vm2236_vm13 = vmor %vm2234_vm11, %vm2235_vm9  ;;  %vm2273_vm3 = vweird.f32 %v2267_v63 }
 0x505   : > { %v2231_v23 = vsub.f32 1.0, %v2230_v15  ;;  %vm2255_vm14 = vmor %vm2253_vm12, %vm2254_vm10  ;;  %v2277_v39 = vand.u32 2147483647, %v2267_v63  ;;  %v2280_v25 = vor.u32 1.1754944e-38, %v2279_v34  ;;  %v2311_v15 = vld [vmem:[%s4924_s29 + $0x10] sm:$0xff]  ;;  %v2438_v34 = vpop.permute.xlu0 %2437 }
 0x506   : > { %v2250_v22 = vsub.f32 1.0, %v2249_v18 }
 0x507   : > { %v2232_v52 = vmul.f32 %v3687_v2, %v2231_v23  ;;  %vm2278_vm5 = vcmp.eq.f32.partialorder %v2277_v39, 8.507059e+37 }
 0x508   : > { %v2251_v51 = vmul.f32 %v3689_v9, %v2250_v22 }
 0x509   : > { %v3691_v33 = vpop.eup %3690  ;;  %v2233_v60 = vadd.f32 %v3687_v2, %v2232_v52 }
 0x50a   : > { %v2252_v49 = vadd.f32 %v3689_v9, %v2251_v51  ;;  %v2269_v26 = vmul.f32 %v3691_v33, %v2267_v63  ;;  %v3693_v14 = vpop.eup %3692  ;;  %vm2274_vm2 = vweird.f32 %v3691_v33 }
 0x50b   : > { %v2237_v3 = vsel %vm2236_vm13, %v3687_v2, %v2233_v60  ;;  %vm2275_vm4 = vmor %vm2273_vm3, %vm2274_vm2 }
 0x50c   : > { %v2242_v10 = vsel %vm2239_vm15, %v2241_v11, %v2237_v3  ;;  %v2256_v27 = vsel %vm2255_vm14, %v3689_v9, %v2252_v49  ;;  %v2270_v62 = vsub.f32 1.0, %v2269_v26  ;;  %vm2439_vm14 = vcmp.eq.s32.totalorder %v2438_v34, 1 }
 0x50d   : > { %v2261_v54 = vsel %vm2258_vm0, %v2260_v37, %v2256_v27  ;;  %v2284_v20 = vmul.f32 %v3693_v14, %v2242_v10 }
 0x50e   : > { %v2283_v16 = vmul.f32 %v2261_v54, %v4854_v4  ;;  %v2271_v21 = vmul.f32 %v3691_v33, %v2270_v62 }
 0x510   : > { %v2285_v32 = vadd.f32 %v2284_v20, %v2283_v16  ;;  %v2272_v59 = vadd.f32 %v3691_v33, %v2271_v21 }
 0x512   : > { %3694 = vtanh.f32 %v2285_v32  ;;  %v4909_v46 = vsel %vm2294_vm1, %v2285_v32, %v4854_v4  ;;  %v2276_v0 = vsel %vm2275_vm4, %v3691_v33, %v2272_v59 }
 0x513   : > { %v2281_v30 = vsel %vm2278_vm5, %v2280_v25, %v2276_v0 }
 0x518   : > { %v3695_v29 = vpop.eup %3694 }
 0x519   : > { %v2287_v42 = vmul.f32 %v3695_v29, %v2281_v30 }
 0x51b   : > { %v2295_v47 = vsel %vm2294_vm1, %v2287_v42, 0.0  ;;  %v4917_v48 = vsel %vm2294_vm1, %v2287_v42, %v4861_v40  ;;  %v2309_v40 = vld [vmem:[%s4924_s29] sm:$0xff] }
 0x51c   : > { %3359 = vst [vmem:[%s2800_s16 + $0x28] sm:$0xff] %v2295_v47  ;;  %v2313_v4 = vpack.c.bf16 %v4917_v48, %v4917_v48 }
 0x51e   : > { %2322 = vmatmul.bf16.vlgmr.msra.gmra.mxu0 %v2313_v4  ;;  %2335 = vmatmul.bf16.vlgmr.msra.gmra.mxu1 %v2313_v4 }
 0x51f   : > { %2348 = vmatmul.bf16.vlgmr.msra.gmra.mxu2 %v2313_v4  ;;  %2361 = vmatmul.bf16.vlgmr.msra.gmra.mxu3 %v2313_v4 }
 0x59b   : > { %v2323_v53 = vpop.f32.mrf.mxu0  ;;  %v2336_v58 = vpop.f32.mrf.mxu1 }
 0x59c   : > { %v2366_v61 = vadd.f32 %v2323_v53, %v2309_v40  ;;  %v2367_v1 = vadd.f32 %v2336_v58, %v2310_v57 }
 0x59e   : > { %v2370_v5 = vsub.f32 0.0, %v2366_v61  ;;  %v2389_v6 = vsub.f32 0.0, %v2367_v1 }
 0x5a0   : > { %v2371_v8 = vmul.f32 1.442695, %v2370_v5  ;;  %v2390_v12 = vmul.f32 1.442695, %v2389_v6  ;;  %v2455_v6 = vld [vmem:[%s4948_s12 + $0x8] sm:$0xff] }
 0x5a2   : > { %3696 = vpow2.f32 %v2371_v8  ;;  %v2349_v13 = vpop.f32.mrf.mxu2  ;;  %v2362_v19 = vpop.f32.mrf.mxu3 }
 0x5a3   : > { %3698 = vpow2.f32 %v2390_v12  ;;  %v2369_v24 = vadd.f32 %v2362_v19, %v2312_v17  ;;  %v2325_v31 = vpop.f32.mrf.mxu0  ;;  %v2338_v36 = vpop.f32.mrf.mxu1  ;;  %v2368_v22 = vadd.f32 %v2349_v13, %v2311_v15 }
 0x5a5   : > { %v2409_v38 = vsub.f32 0.0, %v2369_v24 }
 0x5a7   : > { %v2410_v43 = vmul.f32 1.442695, %v2409_v38  ;;  %v2457_v38 = vld [vmem:[%s4948_s12 + $0x18] sm:$0xff] }
 0x5a8   : > { %v3697_v50 = vpop.eup %3696 }
 0x5a9   : > { %v3699_v55 = vpop.eup %3698  ;;  %v2373_v56 = vadd.f32 1.0, %v3697_v50  ;;  %3700 = vpow2.f32 %v2410_v43 }
 0x5aa   : > { %v2392_v63 = vadd.f32 1.0, %v3699_v55  ;;  %v2351_v2 = vpop.f32.mrf.mxu2  ;;  %v2364_v7 = vpop.f32.mrf.mxu3 }
 0x5ab   : > { %3702 = vrcp.f32 %v2373_v56  ;;  %v2385_v41 = vand.u32 2147483648, %v2373_v56  ;;  %v2383_v11 = vand.u32 2147483647, %v2373_v56  ;;  %vm2379_vm8 = vweird.f32 %v2373_v56 }
 0x5ac   : > { %3704 = vrcp.f32 %v2392_v63  ;;  %v2404_v33 = vand.u32 2147483648, %v2392_v63  ;;  %v2402_v26 = vand.u32 2147483647, %v2392_v63  ;;  %vm2398_vm9 = vweird.f32 %v2392_v63 }
 0x5ad   : > { %v2386_v14 = vor.u32 1.1754944e-38, %v2385_v41  ;;  %vm2384_vm12 = vcmp.eq.f32.partialorder %v2383_v11, 8.507059e+37 }
 0x5ae   : > { %v2405_v62 = vor.u32 1.1754944e-38, %v2404_v33  ;;  %vm2403_vm13 = vcmp.eq.f32.partialorder %v2402_v26, 8.507059e+37 }
 0x5af   : > { %v3701_v9 = vpop.eup %3700 }
 0x5b0   : > { %v2412_v18 = vadd.f32 1.0, %v3701_v9 }
 0x5b1   : > { %v3703_v23 = vpop.eup %3702 }
 0x5b2   : > { %v3705_v44 = vpop.eup %3704  ;;  %v2375_v35 = vmul.f32 %v3703_v23, %v2373_v56  ;;  %3706 = vrcp.f32 %v2412_v18  ;;  %vm2380_vm6 = vweird.f32 %v3703_v23  ;;  %v2424_v30 = vand.u32 2147483648, %v2412_v18 }
 0x5b3   : > { %v2394_v52 = vmul.f32 %v3705_v44, %v2392_v63  ;;  %3708 = vtanh.f32 %v2368_v22  ;;  %vm2399_vm7 = vweird.f32 %v3705_v44  ;;  %vm2381_vm10 = vmor %vm2379_vm8, %vm2380_vm6  ;;  %vm2418_vm0 = vweird.f32 %v2412_v18 }
 0x5b4   : > { %v2376_v45 = vsub.f32 1.0, %v2375_v35  ;;  %vm2400_vm11 = vmor %vm2398_vm9, %vm2399_vm7  ;;  %v2422_v47 = vand.u32 2147483647, %v2412_v18  ;;  %v2425_v40 = vor.u32 1.1754944e-38, %v2424_v30  ;;  %v2456_v35 = vld [vmem:[%s4948_s12 + $0x10] sm:$0xff]  ;;  %v2583_v30 = vpop.permute.xlu1 %2582 }
 0x5b5   : > { %v2395_v51 = vsub.f32 1.0, %v2394_v52 }
 0x5b6   : > { %v2377_v60 = vmul.f32 %v3703_v23, %v2376_v45  ;;  %vm2423_vm2 = vcmp.eq.f32.partialorder %v2422_v47, 8.507059e+37 }
 0x5b7   : > { %v2396_v49 = vmul.f32 %v3705_v44, %v2395_v51 }
 0x5b8   : > { %v3707_v37 = vpop.eup %3706  ;;  %v2378_v3 = vadd.f32 %v3703_v23, %v2377_v60 }
 0x5b9   : > { %v2397_v10 = vadd.f32 %v3705_v44, %v2396_v49  ;;  %v2414_v27 = vmul.f32 %v3707_v37, %v2412_v18  ;;  %v3709_v20 = vpop.eup %3708  ;;  %vm2419_vm15 = vweird.f32 %v3707_v37 }
 0x5ba   : > { %v2382_v54 = vsel %vm2381_vm10, %v3703_v23, %v2378_v3  ;;  %vm2420_vm1 = vmor %vm2418_vm0, %vm2419_vm15 }
 0x5bb   : > { %v2387_v28 = vsel %vm2384_vm12, %v2386_v14, %v2382_v54  ;;  %v2401_v16 = vsel %vm2400_vm11, %v3705_v44, %v2397_v10  ;;  %v2415_v21 = vsub.f32 1.0, %v2414_v27  ;;  %vm2584_vm11 = vcmp.eq.s32.totalorder %v2583_v30, 1 }
 0x5bc   : > { %v2406_v32 = vsel %vm2403_vm13, %v2405_v62, %v2401_v16  ;;  %v2429_v59 = vmul.f32 %v3709_v20, %v2387_v28 }
 0x5bd   : > { %v2428_v39 = vmul.f32 %v2406_v32, %v4909_v46  ;;  %v2416_v0 = vmul.f32 %v3707_v37, %v2415_v21 }
 0x5bf   : > { %v2430_v25 = vadd.f32 %v2429_v59, %v2428_v39  ;;  %v2417_v29 = vadd.f32 %v3707_v37, %v2416_v0 }
 0x5c1   : > { %3710 = vtanh.f32 %v2430_v25  ;;  %v4933_v42 = vsel %vm2439_vm14, %v2430_v25, %v4909_v46  ;;  %v2421_v4 = vsel %vm2420_vm1, %v3707_v37, %v2417_v29 }
 0x5c2   : > { %v2426_v57 = vsel %vm2423_vm2, %v2425_v40, %v2421_v4 }
 0x5c7   : > { %v3711_v53 = vpop.eup %3710 }
 0x5c8   : > { %v2432_v58 = vmul.f32 %v3711_v53, %v2426_v57 }
 0x5ca   : > { %v2440_v61 = vsel %vm2439_vm14, %v2432_v58, 0.0  ;;  %v4941_v1 = vsel %vm2439_vm14, %v2432_v58, %v4917_v48  ;;  %v2454_v48 = vld [vmem:[%s4948_s12] sm:$0xff] }
 0x5cb   : > { %3364 = vst [vmem:[%s2806_s5 + $0x30] sm:$0xff] %v2440_v61  ;;  %v2458_v46 = vpack.c.bf16 %v4941_v1, %v4941_v1 }
 0x5cd   : > { %2467 = vmatmul.bf16.vlgmr.msrb.gmra.mxu0 %v2458_v46  ;;  %2480 = vmatmul.bf16.vlgmr.msrb.gmra.mxu1 %v2458_v46 }
 0x5ce   : > { %2493 = vmatmul.bf16.vlgmr.msrb.gmra.mxu2 %v2458_v46  ;;  %2506 = vmatmul.bf16.vlgmr.msrb.gmra.mxu3 %v2458_v46 }
 0x64a   : > { %v2468_v5 = vpop.f32.mrf.mxu0  ;;  %v2481_v8 = vpop.f32.mrf.mxu1 }
 0x64b   : > { %v2511_v12 = vadd.f32 %v2468_v5, %v2454_v48  ;;  %v2512_v13 = vadd.f32 %v2481_v8, %v2455_v6 }
 0x64d   : > { %v2515_v17 = vsub.f32 0.0, %v2511_v12  ;;  %v2534_v19 = vsub.f32 0.0, %v2512_v13 }
 0x64f   : > { %v2516_v24 = vmul.f32 1.442695, %v2515_v17  ;;  %v2535_v31 = vmul.f32 1.442695, %v2534_v19 }
 0x651   : > { %3712 = vpow2.f32 %v2516_v24  ;;  %v2494_v36 = vpop.f32.mrf.mxu2  ;;  %v2507_v43 = vpop.f32.mrf.mxu3 }
 0x652   : > { %3714 = vpow2.f32 %v2535_v31  ;;  %v2514_v50 = vadd.f32 %v2507_v43, %v2457_v38  ;;  %v2470_v55 = vpop.f32.mrf.mxu0  ;;  %v2483_v56 = vpop.f32.mrf.mxu1  ;;  %v2513_v51 = vadd.f32 %v2494_v36, %v2456_v35 }
 0x654   : > { %v2554_v63 = vsub.f32 0.0, %v2514_v50 }
 0x656   : > { %v2555_v2 = vmul.f32 1.442695, %v2554_v63 }
 0x657   : > { %v3713_v7 = vpop.eup %3712 }
 0x658   : > { %v3715_v9 = vpop.eup %3714  ;;  %v2518_v15 = vadd.f32 1.0, %v3713_v7  ;;  %3716 = vpow2.f32 %v2555_v2 }
 0x659   : > { %v2537_v18 = vadd.f32 1.0, %v3715_v9  ;;  %v2496_v23 = vpop.f32.mrf.mxu2  ;;  %v2509_v22 = vpop.f32.mrf.mxu3 }
 0x65a   : > { %3718 = vrcp.f32 %v2518_v15  ;;  %v2530_v26 = vand.u32 2147483648, %v2518_v15  ;;  %v2528_v14 = vand.u32 2147483647, %v2518_v15  ;;  %vm2524_vm5 = vweird.f32 %v2518_v15 }
 0x65b   : > { %3720 = vrcp.f32 %v2537_v18  ;;  %v2549_v37 = vand.u32 2147483648, %v2537_v18  ;;  %v2547_v27 = vand.u32 2147483647, %v2537_v18  ;;  %vm2543_vm6 = vweird.f32 %v2537_v18 }
 0x65c   : > { %v2531_v20 = vor.u32 1.1754944e-38, %v2530_v26  ;;  %vm2529_vm9 = vcmp.eq.f32.partialorder %v2528_v14, 8.507059e+37 }
 0x65d   : > { %v2550_v21 = vor.u32 1.1754944e-38, %v2549_v37  ;;  %vm2548_vm10 = vcmp.eq.f32.partialorder %v2547_v27, 8.507059e+37 }
 0x65e   : > { %v3717_v44 = vpop.eup %3716 }
 0x65f   : > { %v2557_v52 = vadd.f32 1.0, %v3717_v44 }
 0x660   : > { %v3719_v45 = vpop.eup %3718 }
 0x661   : > { %v3721_v41 = vpop.eup %3720  ;;  %v2520_v33 = vmul.f32 %v3719_v45, %v2518_v15  ;;  %3722 = vrcp.f32 %v2557_v52  ;;  %vm2525_vm3 = vweird.f32 %v3719_v45  ;;  %v2569_v58 = vand.u32 2147483648, %v2557_v52 }
 0x662   : > { %v2539_v60 = vmul.f32 %v3721_v41, %v2537_v18  ;;  %3724 = vtanh.f32 %v2513_v51  ;;  %vm2544_vm4 = vweird.f32 %v3721_v41  ;;  %vm2526_vm7 = vmor %vm2524_vm5, %vm2525_vm3  ;;  %vm2563_vm13 = vweird.f32 %v2557_v52 }
 0x663   : > { %v2521_v11 = vsub.f32 1.0, %v2520_v33  ;;  %vm2545_vm8 = vmor %vm2543_vm6, %vm2544_vm4  ;;  %v2567_v61 = vand.u32 2147483647, %v2557_v52  ;;  %v2570_v48 = vor.u32 1.1754944e-38, %v2569_v58 }
 0x664   : > { %v2540_v49 = vsub.f32 1.0, %v2539_v60 }
 0x665   : > { %v2522_v3 = vmul.f32 %v3719_v45, %v2521_v11  ;;  %vm2568_vm15 = vcmp.eq.f32.partialorder %v2567_v61, 8.507059e+37 }
 0x666   : > { %v2541_v10 = vmul.f32 %v3721_v41, %v2540_v49 }
 0x667   : > { %v3723_v62 = vpop.eup %3722  ;;  %v2523_v54 = vadd.f32 %v3719_v45, %v2522_v3 }
 0x668   : > { %v2542_v28 = vadd.f32 %v3721_v41, %v2541_v10  ;;  %v2559_v16 = vmul.f32 %v3723_v62, %v2557_v52  ;;  %v3725_v59 = vpop.eup %3724  ;;  %vm2564_vm12 = vweird.f32 %v3723_v62 }
 0x669   : > { %v2527_v32 = vsel %vm2526_vm7, %v3719_v45, %v2523_v54  ;;  %vm2565_vm14 = vmor %vm2563_vm13, %vm2564_vm12 }
 0x66a   : > { %v2532_v34 = vsel %vm2529_vm9, %v2531_v20, %v2527_v32  ;;  %v2546_v39 = vsel %vm2545_vm8, %v3721_v41, %v2542_v28  ;;  %v2560_v0 = vsub.f32 1.0, %v2559_v16 }
 0x66b   : > { %v2551_v25 = vsel %vm2548_vm10, %v2550_v21, %v2546_v39  ;;  %v2574_v29 = vmul.f32 %v3725_v59, %v2532_v34 }
 0x66c   : > { %v2573_v47 = vmul.f32 %v2551_v25, %v4933_v42  ;;  %v2561_v4 = vmul.f32 %v3723_v62, %v2560_v0 }
 0x66e   : > { %v2575_v40 = vadd.f32 %v2574_v29, %v2573_v47  ;;  %v2562_v53 = vadd.f32 %v3723_v62, %v2561_v4 }
 0x670   : > { %3726 = vtanh.f32 %v2575_v40  ;;  %v2589_v57 = vsel %vm2584_vm11, %v2575_v40, %v4933_v42  ;;  %v2566_v46 = vsel %vm2565_vm14, %v3723_v62, %v2562_v53 }
 0x671   : > { %2591 = vst [vmem:[%s4098_s3] sm:$0xff] %v2589_v57  ;;  %v2571_v6 = vsel %vm2568_vm15, %v2570_v48, %v2566_v46  ;;  %s3496_s3 = sshll.u32 (%p4013_p11), %s4066_s26, 4 }
 0x672   : > { %s2613_s13 = sadd.s32 (%p4013_p11), %s3863_s15, %s3496_s3 }
 0x673   : > { %s3374_s14 = sshll.u32 (%p4013_p11), %s2613_s13, 3 }
 0x674   : > { %s2615_s24 = scalar_lea.vmem (%p4013_p11), %s5061_s6, %s3374_s14 }
 0x676   : > { %v3727_v5 = vpop.eup %3726 }
 0x677   : > { %v2577_v8 = vmul.f32 %v3727_v5, %v2571_v6  ;;  %2606 = sbr.rel (!%p4013_p11) target bundleno = 1674 (0x68a), region = 64 }
 0x679   : > { %v2585_v12 = vsel %vm2584_vm11, %v2577_v8, 0.0  ;;  %v2588_v13 = vsel %vm2584_vm11, %v2577_v8, %v4941_v1 }
 0x67a   : > { %3369 = vst [vmem:[%s2812_s19 + $0x38] sm:$0xff] %v2585_v12 }
 0x67b   : > { %2590 = vst [vmem:[%s4093_s18] sm:$0xff] %v2588_v13 }
 0x681   : > { %v2658_v42 = vld [vmem:[%s4100_s21] sm:$0xff]  ;;  %v2660_v1 = vld [vmem:[%s4100_s21 + $0x8] sm:$0xff]  ;;  %v2662_v17 = vld [vmem:[%s4100_s21 + $0x10] sm:$0xff] }
 0x682   : > { %2659 = vst [vmem:[%s2615_s24] sm:$0xff] %v2658_v42  ;;  %v2664_v19 = vld [vmem:[%s4100_s21 + $0x18] sm:$0xff]  ;;  %v2666_v24 = vld [vmem:[%s4100_s21 + $0x20] sm:$0xff]  ;;  %v2668_v31 = vld [vmem:[%s4100_s21 + $0x28] sm:$0xff] }
 0x683   : > { %2661 = vst [vmem:[%s2615_s24 + $0x10] sm:$0xff] %v2660_v1  ;;  %v2670_v36 = vld [vmem:[%s4100_s21 + $0x30] sm:$0xff]  ;;  %v2672_v38 = vld [vmem:[%s4100_s21 + $0x38] sm:$0xff] }
 0x684   : > { %2663 = vst [vmem:[%s2615_s24 + $0x20] sm:$0xff] %v2662_v17 }
 0x685   : > { %2665 = vst [vmem:[%s2615_s24 + $0x30] sm:$0xff] %v2664_v19 }
 0x686   : > { %2667 = vst [vmem:[%s2615_s24 + $0x40] sm:$0xff] %v2666_v24 }
 0x687   : > { %2669 = vst [vmem:[%s2615_s24 + $0x50] sm:$0xff] %v2668_v31 }
 0x688   : > { %2671 = vst [vmem:[%s2615_s24 + $0x60] sm:$0xff] %v2670_v36 }
 0x689   : > { %2673 = vst [vmem:[%s2615_s24 + $0x70] sm:$0xff] %v2672_v38 }
 0x68a PF: > { %s5062_s15 = sld [smem:[#allocation15_spill]] }
 0x68b   : > { %s5063_s30 = sld [smem:[#allocation10_spill]] }
 0x68c   : > { %s5064_s10 = sld [smem:[#allocation19_spill]] }
 0x68d   : > { %s5065_s11 = sld [smem:[#allocation11_spill]] }
 0x68e   : > { %s5066_s12 = sld [smem:[#allocation12_spill]] }
 0x68f   : > { %s5067_s13 = sld [smem:[#allocation18_spill]] }
 0x690   : > { %s26_s18 = sadd.s32 1, %s5062_s15   ;;  %s5068_s14 = sld [smem:[#allocation13_spill]] }
 0x691   : > { %p23_p7 = scmp.ge.s32.totalorder %s26_s18, 6   ;;  %s5069_s15 = sld [smem:[#allocation14_spill]] }
 0x692   : > { %s5070_s16 = sld [smem:[#allocation16_spill]] }
 0x693   : > { %s5071_s17 = sld [smem:[#allocation17_spill]]  ;;  %25 = sbr.rel (!%p23_p7) target bundleno = 18 (0x12), region = 195 }
 0x698   :  { %2709 = vsyncpa [#allocation4], 1 }
 0x699   :  { %2711 = vsyncpa [#allocation4 + $0x1], 1 }
 0x69a   :  { %2712 = vsyncpa [#allocation6], 1 }
 0x69b   :  { %2714 = vsyncpa [#allocation6 + $0x1], 1 }

</bundles_post_ra>
